<compile_context>
chip_gen: v6e
topology: v6e:2x2x1
jax: 0.10.0
libtpu: 0.0.40
codegen_flags: <defaults>
</compile_context>

<pallas_src>
import jax
import jax.numpy as jnp
from jax.experimental import pallas as pl
from jax.experimental.pallas import tpu as pltpu

IMAGENET_MEAN = jnp.array([0.485, 0.456, 0.406], dtype=jnp.float32)
IMAGENET_STD = jnp.array([0.229, 0.224, 0.225], dtype=jnp.float32)

LANE = 128  # all feature channels are padded to a full lane width


# ------------------------- conv (+fused BN / ReLU / stem preprocess) kernel -------------------------

def _make_conv_kernel(*, stride, dilation, ho, wo, cin, coutp, clip_input):
    s, d = stride, dilation

    def kernel(x_ref, w_ref, b_ref, o_ref):
        # x_ref: (1, s*s, Hq, Wq, cin)  phase-split, spatially padded input (f32 stem / bf16 else)
        # w_ref: (9, cin, coutp) bf16   tap-major weights (BN scale [+ ImageNet affine] folded in)
        # b_ref: (1, coutp)      f32    folded bias
        # o_ref: (1, ho*wo, coutp) bf16 flattened NHWC output tile (lane-dense, 128 wide)
        acc = jnp.zeros((ho * wo, coutp), jnp.float32)
        for t in range(9):                       # unrolled: 9 shifted-tap matmuls on the MXU
            i, j = divmod(t, 3)
            oi, oj = i * d, j * d
            p = (oi % s) * s + (oj % s)          # phase index
            hh, ww = oi // s, oj // s            # static offsets inside the phase
            xt = x_ref[0, p, hh:hh + ho, ww:ww + wo, :]
            if clip_input:
                # fused ImageNet preprocessing: only the clamp stays in-kernel, the affine
                # (x+1)/2, -mean, /std is folded into the weights / bias on the host.
                xt = jnp.clip(xt, -1.0, 1.0)
            xt = xt.astype(jnp.bfloat16).reshape(ho * wo, cin)
            acc = acc + jnp.dot(xt, w_ref[t], preferred_element_type=jnp.float32)
        y = acc + b_ref[...]
        o_ref[0] = jnp.maximum(y, 0.0).astype(o_ref.dtype)

    return kernel


def _phase_split(xp, stride):
    """(NB, Hp, Wp, C) -> (NB, stride*stride, Hq, Wq, C); phase index p = ph*stride + pw."""
    if stride == 1:
        return xp[:, None]
    nb, hp, wp, c = xp.shape
    assert hp % stride == 0 and wp % stride == 0
    phases = [xp[:, ph::stride, pw::stride, :]
              for ph in range(stride) for pw in range(stride)]
    return jnp.stack(phases, axis=1)


def conv_stage(x, w_taps, bias, *, stride, dilation, clip_input=False):
    """3x3 'same' (dilated) conv + folded-BN bias + ReLU on NHWC input.

    x: (NB, H, W, Cin); w_taps: (9, Cin, Coutp) bf16; bias: (1, Coutp) f32.
    Returns (NB, Ho, Wo, Coutp) bf16.
    """
    nb, h, w, cin = x.shape
    d, s = dilation, stride
    ho, wo = (h - 1) // s + 1, (w - 1) // s + 1
    coutp = w_taps.shape[-1]

    if clip_input:
        # stem: pad the raw (pre-clamp/normalize) image with the value whose normalized image
        # is exactly 0, so zero-padding semantics of the reference conv are preserved.
        pad_val = (2.0 * IMAGENET_MEAN - 1.0).astype(x.dtype)
        xp = jnp.broadcast_to(pad_val[None, None, None, :],
                              (nb, h + 2 * d, w + 2 * d, cin))
        xp = xp.at[:, d:d + h, d:d + w, :].set(x)
    else:
        xp = jnp.pad(x, ((0, 0), (d, d), (d, d), (0, 0)))

    xph = _phase_split(xp, s)                     # (nb, s*s, Hq, Wq, cin)
    _, nphase, hq, wq, _ = xph.shape

    kernel = _make_conv_kernel(stride=s, dilation=d, ho=ho, wo=wo,
                               cin=cin, coutp=coutp, clip_input=clip_input)
    out = pl.pallas_call(
        kernel,
        out_shape=jax.ShapeDtypeStruct((nb, ho * wo, coutp), jnp.bfloat16),
        grid=(nb,),
        in_specs=[
            pl.BlockSpec((1, nphase, hq, wq, cin), lambda b: (b, 0, 0, 0, 0)),
            pl.BlockSpec(w_taps.shape, lambda b: (0, 0, 0)),     # resident weights
            pl.BlockSpec((1, coutp), lambda b: (0, 0)),          # resident bias
        ],
        out_specs=pl.BlockSpec((1, ho * wo, coutp), lambda b: (b, 0, 0)),
        compiler_params=pltpu.CompilerParams(dimension_semantics=("parallel",)),
    )(xph, w_taps, bias)
    return out.reshape(nb, ho, wo, coutp)


# ------------------------- per-feature-map MSE kernel -------------------------

def _mse_partial_kernel(p_ref, t_ref, o_ref):
    # p_ref/t_ref: (1, M, C) bf16 feature tiles of one pred/target pair; o_ref: (1, 8, C) f32.
    d = p_ref[0].astype(jnp.float32) - t_ref[0].astype(jnp.float32)
    m, c = d.shape
    o_ref[0] = jnp.sum((d * d).reshape(m // 8, 8, c), axis=0)   # lane-wide partial sums


def feature_mse(feat, n_pairs, c_real):
    """F.mse_loss(pred_feat, target_feat) where feat = concat([pred, target], axis=0)."""
    nb, ho, wo, cp = feat.shape
    m = ho * wo
    assert m % 8 == 0
    f2 = feat.reshape(nb, m, cp)
    partials = pl.pallas_call(
        _mse_partial_kernel,
        out_shape=jax.ShapeDtypeStruct((n_pairs, 8, cp), jnp.float32),
        grid=(n_pairs,),
        in_specs=[
            pl.BlockSpec((1, m, cp), lambda i: (i, 0, 0)),            # pred half
            pl.BlockSpec((1, m, cp), lambda i: (i + n_pairs, 0, 0)),  # target half
        ],
        out_specs=pl.BlockSpec((1, 8, cp), lambda i: (i, 0, 0)),
        compiler_params=pltpu.CompilerParams(dimension_semantics=("parallel",)),
    )(f2, f2)
    # padded channels are identically zero in both branches, so they contribute nothing;
    # divide by the *real* element count to match F.mse_loss(reduction='mean').
    return jnp.sum(partials) / (n_pairs * c_real * ho * wo)


# ------------------------- synthetic encoder (proxy for resnet50dilated) -------------------------

# (cin, cout, stride, dilation) — scaled-down proxy of the resnet50dilated stages.
STAGES = [
    (3, 8, 2, 1),    # stem (proxy for conv1 + maxpool)
    (8, 16, 1, 1),   # layer1 -> feature map 1
    (16, 32, 2, 1),  # layer2 -> feature map 2
    (32, 48, 1, 2),  # layer3 (dilated) -> feature map 3
    (48, 64, 1, 4),  # layer4 (dilated) -> feature map 4
]


def init_params(key):
    params = []
    for (cin, cout, stride, dil) in STAGES:
        key, k1, k2, k3 = jax.random.split(key, 4)
        w = jax.random.normal(k1, (cout, cin, 3, 3), jnp.float32) / jnp.sqrt(cin * 9.0)
        scale = 1.0 + 0.1 * jax.random.normal(k2, (cout,), jnp.float32)
        bias = 0.1 * jax.random.normal(k3, (cout,), jnp.float32)
        params.append((w, scale, bias, stride, dil))
    return params


def prepare_params(raw_params):
    """Fold BN scale (and, for the stem, the ImageNet affine) into bf16 tap-major weights,
    pad channels to the 128-lane width, and pack a per-stage f32 bias."""
    a_pre = 0.5 / IMAGENET_STD                     # d(normalized)/d(clamped input)
    b_pre = (0.5 - IMAGENET_MEAN) / IMAGENET_STD   # normalized value of a clamped 0
    prepared = []
    for idx, (w, scale, bias, stride, dil) in enumerate(raw_params):
        cout, cin, kh, kw = w.shape
        wt = jnp.transpose(w, (2, 3, 1, 0)).reshape(kh * kw, cin, cout)  # (9, cin, cout)
        wt = wt * scale[None, None, :]                                   # fold BN scale
        b2 = bias
        if idx == 0:
            # fuse preprocessing: conv(a*x + b) == conv(a*x) + sum_taps(W @ b)
            b2 = bias + jnp.sum(wt * b_pre[None, :, None], axis=(0, 1))
            wt = wt * a_pre[None, :, None]
        cin_p = cin if idx == 0 else LANE          # later stages see 128 (padded) input channels
        wt = jnp.pad(wt, ((0, 0), (0, cin_p - cin), (0, LANE - cout)))
        b2 = jnp.pad(b2, (0, LANE - cout)).reshape(1, LANE)
        prepared.append(dict(w=wt.astype(jnp.bfloat16), b=b2.astype(jnp.float32),
                             stride=stride, dilation=dil, cout=cout))
    return prepared


def encode(x_nhwc, prepared):
    feats = []
    for idx, p in enumerate(prepared):
        x_nhwc = conv_stage(x_nhwc, p["w"], p["b"], stride=p["stride"],
                            dilation=p["dilation"], clip_input=(idx == 0))
        if idx > 0:   # return_feature_maps=True -> outputs of layer1..layer4
            feats.append((x_nhwc, p["cout"]))
    return feats


def resnet_pl_forward(pred, target, prepared, weight=30.0):
    """pred, target: (N, 3, H, W) in [-1, 1] (NCHW, PyTorch convention). Returns scalar loss."""
    n = pred.shape[0]
    x = jnp.concatenate([pred, target], axis=0)       # single 2N encoder pass
    x = jnp.transpose(x, (0, 2, 3, 1))                # NCHW -> NHWC (channels-last)
    feats = encode(x, prepared)
    losses = [feature_mse(f, n, c_real) for f, c_real in feats]
    return jnp.sum(jnp.stack(losses)) * weight


if __name__ == "__main__":
    key = jax.random.PRNGKey(0)
    kp, kt, kw = jax.random.split(key, 3)
    pred = jax.random.normal(kp, (2, 3, 32, 32), jnp.float32)
    target = jax.random.normal(kt, (2, 3, 32, 32), jnp.float32)
    prepared = prepare_params(init_params(kw))

    fwd = jax.jit(lambda p, t: resnet_pl_forward(p, t, prepared, weight=30.0))
    result = fwd(pred, target)
    jax.block_until_ready(result)
    assert result.shape == () and bool(jnp.isfinite(result))
    print("KERNEL_OK")
</pallas_src>

<mosaic_0001>
module attributes {stable_mosaic.version = 11 : i64} {
  func.func @kernel(%arg0: i32, %arg1: memref<1x4x17x17x3xf32, #tpu.memory_space<vmem>>, %arg2: memref<9x3x128xbf16, #tpu.memory_space<vmem>>, %arg3: memref<1x128xf32, #tpu.memory_space<vmem>>, %arg4: memref<1x256x128xbf16, #tpu.memory_space<vmem>>) attributes {dimension_semantics = [#tpu.dimension_semantics<parallel>], iteration_bounds = array<i64: 4>, scalar_prefetch = 0 : i64, scratch_operands = 0 : i64, tpu.core_type = #tpu.core_type<tc>, window_params = [{transform_indices = @transform_0, window_bounds = array<i64: 1, 4, 17, 17, 3>}, {pipeline_mode = #tpu.pipeline_mode<synchronous>, transform_indices = @transform_1, window_bounds = array<i64: 9, 3, 128>}, {pipeline_mode = #tpu.pipeline_mode<synchronous>, transform_indices = @transform_2, window_bounds = array<i64: 1, 128>}, {transform_indices = @transform_3, window_bounds = array<i64: 1, 256, 128>}]} {
    %cst = arith.constant 0.000000e+00 : f32
    %0 = vector.broadcast %cst : f32 to vector<256x128xf32>
    %c0 = arith.constant 0 : index
    %c0_0 = arith.constant 0 : index
    %c0_1 = arith.constant 0 : index
    %c0_2 = arith.constant 0 : index
    %c0_3 = arith.constant 0 : index
    %1 = vector.load %arg1[%c0, %c0_0, %c0_1, %c0_2, %c0_3] : memref<1x4x17x17x3xf32, #tpu.memory_space<vmem>>, vector<1x1x16x16x3xf32>
    %2 = vector.shape_cast %1 : vector<1x1x16x16x3xf32> to vector<16x16x3xf32>
    %cst_4 = arith.constant -1.000000e+00 : f32
    %cst_5 = arith.constant 1.000000e+00 : f32
    %3 = vector.broadcast %cst_4 : f32 to vector<16x16x3xf32>
    %4 = arith.maximumf %3, %2 : vector<16x16x3xf32>
    %5 = vector.broadcast %cst_5 : f32 to vector<16x16x3xf32>
    %6 = arith.minimumf %5, %4 : vector<16x16x3xf32>
    %7 = arith.truncf %6 : vector<16x16x3xf32> to vector<16x16x3xbf16>
    %8 = vector.shape_cast %7 : vector<16x16x3xbf16> to vector<256x3xbf16>
    %c0_6 = arith.constant 0 : index
    %c0_7 = arith.constant 0 : index
    %c0_8 = arith.constant 0 : index
    %9 = vector.load %arg2[%c0_6, %c0_7, %c0_8] : memref<9x3x128xbf16, #tpu.memory_space<vmem>>, vector<1x3x128xbf16>
    %10 = vector.shape_cast %9 : vector<1x3x128xbf16> to vector<3x128xbf16>
    %cst_9 = arith.constant dense<0.000000e+00> : vector<256x128xf32>
    %11 = tpu.matmul %8, %10, %cst_9 {dimension_numbers = #tpu.dot_dimension_numbers<[1], [0], [0], [1], [0, 0, 1, 1], [], []>} : vector<256x3xbf16>, vector<3x128xbf16>, vector<256x128xf32> -> vector<256x128xf32>
    %12 = arith.addf %0, %11 : vector<256x128xf32>
    %c0_10 = arith.constant 0 : index
    %c1 = arith.constant 1 : index
    %c0_11 = arith.constant 0 : index
    %c0_12 = arith.constant 0 : index
    %c0_13 = arith.constant 0 : index
    %13 = vector.load %arg1[%c0_10, %c1, %c0_11, %c0_12, %c0_13] : memref<1x4x17x17x3xf32, #tpu.memory_space<vmem>>, vector<1x1x16x16x3xf32>
    %14 = vector.shape_cast %13 : vector<1x1x16x16x3xf32> to vector<16x16x3xf32>
    %cst_14 = arith.constant -1.000000e+00 : f32
    %cst_15 = arith.constant 1.000000e+00 : f32
    %15 = vector.broadcast %cst_14 : f32 to vector<16x16x3xf32>
    %16 = arith.maximumf %15, %14 : vector<16x16x3xf32>
    %17 = vector.broadcast %cst_15 : f32 to vector<16x16x3xf32>
    %18 = arith.minimumf %17, %16 : vector<16x16x3xf32>
    %19 = arith.truncf %18 : vector<16x16x3xf32> to vector<16x16x3xbf16>
    %20 = vector.shape_cast %19 : vector<16x16x3xbf16> to vector<256x3xbf16>
    %c1_16 = arith.constant 1 : index
    %c0_17 = arith.constant 0 : index
    %c0_18 = arith.constant 0 : index
    %21 = vector.load %arg2[%c1_16, %c0_17, %c0_18] : memref<9x3x128xbf16, #tpu.memory_space<vmem>>, vector<1x3x128xbf16>
    %22 = vector.shape_cast %21 : vector<1x3x128xbf16> to vector<3x128xbf16>
    %cst_19 = arith.constant dense<0.000000e+00> : vector<256x128xf32>
    %23 = tpu.matmul %20, %22, %cst_19 {dimension_numbers = #tpu.dot_dimension_numbers<[1], [0], [0], [1], [0, 0, 1, 1], [], []>} : vector<256x3xbf16>, vector<3x128xbf16>, vector<256x128xf32> -> vector<256x128xf32>
    %24 = arith.addf %12, %23 : vector<256x128xf32>
    %c0_20 = arith.constant 0 : index
    %c0_21 = arith.constant 0 : index
    %c0_22 = arith.constant 0 : index
    %c1_23 = arith.constant 1 : index
    %c0_24 = arith.constant 0 : index
    %25 = vector.load %arg1[%c0_20, %c0_21, %c0_22, %c1_23, %c0_24] : memref<1x4x17x17x3xf32, #tpu.memory_space<vmem>>, vector<1x1x16x16x3xf32>
    %26 = vector.shape_cast %25 : vector<1x1x16x16x3xf32> to vector<16x16x3xf32>
    %cst_25 = arith.constant -1.000000e+00 : f32
    %cst_26 = arith.constant 1.000000e+00 : f32
    %27 = vector.broadcast %cst_25 : f32 to vector<16x16x3xf32>
    %28 = arith.maximumf %27, %26 : vector<16x16x3xf32>
    %29 = vector.broadcast %cst_26 : f32 to vector<16x16x3xf32>
    %30 = arith.minimumf %29, %28 : vector<16x16x3xf32>
    %31 = arith.truncf %30 : vector<16x16x3xf32> to vector<16x16x3xbf16>
    %32 = vector.shape_cast %31 : vector<16x16x3xbf16> to vector<256x3xbf16>
    %c2 = arith.constant 2 : index
    %c0_27 = arith.constant 0 : index
    %c0_28 = arith.constant 0 : index
    %33 = vector.load %arg2[%c2, %c0_27, %c0_28] : memref<9x3x128xbf16, #tpu.memory_space<vmem>>, vector<1x3x128xbf16>
    %34 = vector.shape_cast %33 : vector<1x3x128xbf16> to vector<3x128xbf16>
    %cst_29 = arith.constant dense<0.000000e+00> : vector<256x128xf32>
    %35 = tpu.matmul %32, %34, %cst_29 {dimension_numbers = #tpu.dot_dimension_numbers<[1], [0], [0], [1], [0, 0, 1, 1], [], []>} : vector<256x3xbf16>, vector<3x128xbf16>, vector<256x128xf32> -> vector<256x128xf32>
    %36 = arith.addf %24, %35 : vector<256x128xf32>
    %c0_30 = arith.constant 0 : index
    %c2_31 = arith.constant 2 : index
    %c0_32 = arith.constant 0 : index
    %c0_33 = arith.constant 0 : index
    %c0_34 = arith.constant 0 : index
    %37 = vector.load %arg1[%c0_30, %c2_31, %c0_32, %c0_33, %c0_34] : memref<1x4x17x17x3xf32, #tpu.memory_space<vmem>>, vector<1x1x16x16x3xf32>
    %38 = vector.shape_cast %37 : vector<1x1x16x16x3xf32> to vector<16x16x3xf32>
    %cst_35 = arith.constant -1.000000e+00 : f32
    %cst_36 = arith.constant 1.000000e+00 : f32
    %39 = vector.broadcast %cst_35 : f32 to vector<16x16x3xf32>
    %40 = arith.maximumf %39, %38 : vector<16x16x3xf32>
    %41 = vector.broadcast %cst_36 : f32 to vector<16x16x3xf32>
    %42 = arith.minimumf %41, %40 : vector<16x16x3xf32>
    %43 = arith.truncf %42 : vector<16x16x3xf32> to vector<16x16x3xbf16>
    %44 = vector.shape_cast %43 : vector<16x16x3xbf16> to vector<256x3xbf16>
    %c3 = arith.constant 3 : index
    %c0_37 = arith.constant 0 : index
    %c0_38 = arith.constant 0 : index
    %45 = vector.load %arg2[%c3, %c0_37, %c0_38] : memref<9x3x128xbf16, #tpu.memory_space<vmem>>, vector<1x3x128xbf16>
    %46 = vector.shape_cast %45 : vector<1x3x128xbf16> to vector<3x128xbf16>
    %cst_39 = arith.constant dense<0.000000e+00> : vector<256x128xf32>
    %47 = tpu.matmul %44, %46, %cst_39 {dimension_numbers = #tpu.dot_dimension_numbers<[1], [0], [0], [1], [0, 0, 1, 1], [], []>} : vector<256x3xbf16>, vector<3x128xbf16>, vector<256x128xf32> -> vector<256x128xf32>
    %48 = arith.addf %36, %47 : vector<256x128xf32>
    %c0_40 = arith.constant 0 : index
    %c3_41 = arith.constant 3 : index
    %c0_42 = arith.constant 0 : index
    %c0_43 = arith.constant 0 : index
    %c0_44 = arith.constant 0 : index
    %49 = vector.load %arg1[%c0_40, %c3_41, %c0_42, %c0_43, %c0_44] : memref<1x4x17x17x3xf32, #tpu.memory_space<vmem>>, vector<1x1x16x16x3xf32>
    %50 = vector.shape_cast %49 : vector<1x1x16x16x3xf32> to vector<16x16x3xf32>
    %cst_45 = arith.constant -1.000000e+00 : f32
    %cst_46 = arith.constant 1.000000e+00 : f32
    %51 = vector.broadcast %cst_45 : f32 to vector<16x16x3xf32>
    %52 = arith.maximumf %51, %50 : vector<16x16x3xf32>
    %53 = vector.broadcast %cst_46 : f32 to vector<16x16x3xf32>
    %54 = arith.minimumf %53, %52 : vector<16x16x3xf32>
    %55 = arith.truncf %54 : vector<16x16x3xf32> to vector<16x16x3xbf16>
    %56 = vector.shape_cast %55 : vector<16x16x3xbf16> to vector<256x3xbf16>
    %c4 = arith.constant 4 : index
    %c0_47 = arith.constant 0 : index
    %c0_48 = arith.constant 0 : index
    %57 = vector.load %arg2[%c4, %c0_47, %c0_48] : memref<9x3x128xbf16, #tpu.memory_space<vmem>>, vector<1x3x128xbf16>
    %58 = vector.shape_cast %57 : vector<1x3x128xbf16> to vector<3x128xbf16>
    %cst_49 = arith.constant dense<0.000000e+00> : vector<256x128xf32>
    %59 = tpu.matmul %56, %58, %cst_49 {dimension_numbers = #tpu.dot_dimension_numbers<[1], [0], [0], [1], [0, 0, 1, 1], [], []>} : vector<256x3xbf16>, vector<3x128xbf16>, vector<256x128xf32> -> vector<256x128xf32>
    %60 = arith.addf %48, %59 : vector<256x128xf32>
    %c0_50 = arith.constant 0 : index
    %c2_51 = arith.constant 2 : index
    %c0_52 = arith.constant 0 : index
    %c1_53 = arith.constant 1 : index
    %c0_54 = arith.constant 0 : index
    %61 = vector.load %arg1[%c0_50, %c2_51, %c0_52, %c1_53, %c0_54] : memref<1x4x17x17x3xf32, #tpu.memory_space<vmem>>, vector<1x1x16x16x3xf32>
    %62 = vector.shape_cast %61 : vector<1x1x16x16x3xf32> to vector<16x16x3xf32>
    %cst_55 = arith.constant -1.000000e+00 : f32
    %cst_56 = arith.constant 1.000000e+00 : f32
    %63 = vector.broadcast %cst_55 : f32 to vector<16x16x3xf32>
    %64 = arith.maximumf %63, %62 : vector<16x16x3xf32>
    %65 = vector.broadcast %cst_56 : f32 to vector<16x16x3xf32>
    %66 = arith.minimumf %65, %64 : vector<16x16x3xf32>
    %67 = arith.truncf %66 : vector<16x16x3xf32> to vector<16x16x3xbf16>
    %68 = vector.shape_cast %67 : vector<16x16x3xbf16> to vector<256x3xbf16>
    %c5 = arith.constant 5 : index
    %c0_57 = arith.constant 0 : index
    %c0_58 = arith.constant 0 : index
    %69 = vector.load %arg2[%c5, %c0_57, %c0_58] : memref<9x3x128xbf16, #tpu.memory_space<vmem>>, vector<1x3x128xbf16>
    %70 = vector.shape_cast %69 : vector<1x3x128xbf16> to vector<3x128xbf16>
    %cst_59 = arith.constant dense<0.000000e+00> : vector<256x128xf32>
    %71 = tpu.matmul %68, %70, %cst_59 {dimension_numbers = #tpu.dot_dimension_numbers<[1], [0], [0], [1], [0, 0, 1, 1], [], []>} : vector<256x3xbf16>, vector<3x128xbf16>, vector<256x128xf32> -> vector<256x128xf32>
    %72 = arith.addf %60, %71 : vector<256x128xf32>
    %c0_60 = arith.constant 0 : index
    %c0_61 = arith.constant 0 : index
    %c1_62 = arith.constant 1 : index
    %c0_63 = arith.constant 0 : index
    %c0_64 = arith.constant 0 : index
    %73 = vector.load %arg1[%c0_60, %c0_61, %c1_62, %c0_63, %c0_64] : memref<1x4x17x17x3xf32, #tpu.memory_space<vmem>>, vector<1x1x16x16x3xf32>
    %74 = vector.shape_cast %73 : vector<1x1x16x16x3xf32> to vector<16x16x3xf32>
    %cst_65 = arith.constant -1.000000e+00 : f32
    %cst_66 = arith.constant 1.000000e+00 : f32
    %75 = vector.broadcast %cst_65 : f32 to vector<16x16x3xf32>
    %76 = arith.maximumf %75, %74 : vector<16x16x3xf32>
    %77 = vector.broadcast %cst_66 : f32 to vector<16x16x3xf32>
    %78 = arith.minimumf %77, %76 : vector<16x16x3xf32>
    %79 = arith.truncf %78 : vector<16x16x3xf32> to vector<16x16x3xbf16>
    %80 = vector.shape_cast %79 : vector<16x16x3xbf16> to vector<256x3xbf16>
    %c6 = arith.constant 6 : index
    %c0_67 = arith.constant 0 : index
    %c0_68 = arith.constant 0 : index
    %81 = vector.load %arg2[%c6, %c0_67, %c0_68] : memref<9x3x128xbf16, #tpu.memory_space<vmem>>, vector<1x3x128xbf16>
    %82 = vector.shape_cast %81 : vector<1x3x128xbf16> to vector<3x128xbf16>
    %cst_69 = arith.constant dense<0.000000e+00> : vector<256x128xf32>
    %83 = tpu.matmul %80, %82, %cst_69 {dimension_numbers = #tpu.dot_dimension_numbers<[1], [0], [0], [1], [0, 0, 1, 1], [], []>} : vector<256x3xbf16>, vector<3x128xbf16>, vector<256x128xf32> -> vector<256x128xf32>
    %84 = arith.addf %72, %83 : vector<256x128xf32>
    %c0_70 = arith.constant 0 : index
    %c1_71 = arith.constant 1 : index
    %c1_72 = arith.constant 1 : index
    %c0_73 = arith.constant 0 : index
    %c0_74 = arith.constant 0 : index
    %85 = vector.load %arg1[%c0_70, %c1_71, %c1_72, %c0_73, %c0_74] : memref<1x4x17x17x3xf32, #tpu.memory_space<vmem>>, vector<1x1x16x16x3xf32>
    %86 = vector.shape_cast %85 : vector<1x1x16x16x3xf32> to vector<16x16x3xf32>
    %cst_75 = arith.constant -1.000000e+00 : f32
    %cst_76 = arith.constant 1.000000e+00 : f32
    %87 = vector.broadcast %cst_75 : f32 to vector<16x16x3xf32>
    %88 = arith.maximumf %87, %86 : vector<16x16x3xf32>
    %89 = vector.broadcast %cst_76 : f32 to vector<16x16x3xf32>
    %90 = arith.minimumf %89, %88 : vector<16x16x3xf32>
    %91 = arith.truncf %90 : vector<16x16x3xf32> to vector<16x16x3xbf16>
    %92 = vector.shape_cast %91 : vector<16x16x3xbf16> to vector<256x3xbf16>
    %c7 = arith.constant 7 : index
    %c0_77 = arith.constant 0 : index
    %c0_78 = arith.constant 0 : index
    %93 = vector.load %arg2[%c7, %c0_77, %c0_78] : memref<9x3x128xbf16, #tpu.memory_space<vmem>>, vector<1x3x128xbf16>
    %94 = vector.shape_cast %93 : vector<1x3x128xbf16> to vector<3x128xbf16>
    %cst_79 = arith.constant dense<0.000000e+00> : vector<256x128xf32>
    %95 = tpu.matmul %92, %94, %cst_79 {dimension_numbers = #tpu.dot_dimension_numbers<[1], [0], [0], [1], [0, 0, 1, 1], [], []>} : vector<256x3xbf16>, vector<3x128xbf16>, vector<256x128xf32> -> vector<256x128xf32>
    %96 = arith.addf %84, %95 : vector<256x128xf32>
    %c0_80 = arith.constant 0 : index
    %c0_81 = arith.constant 0 : index
    %c1_82 = arith.constant 1 : index
    %c1_83 = arith.constant 1 : index
    %c0_84 = arith.constant 0 : index
    %97 = vector.load %arg1[%c0_80, %c0_81, %c1_82, %c1_83, %c0_84] : memref<1x4x17x17x3xf32, #tpu.memory_space<vmem>>, vector<1x1x16x16x3xf32>
    %98 = vector.shape_cast %97 : vector<1x1x16x16x3xf32> to vector<16x16x3xf32>
    %cst_85 = arith.constant -1.000000e+00 : f32
    %cst_86 = arith.constant 1.000000e+00 : f32
    %99 = vector.broadcast %cst_85 : f32 to vector<16x16x3xf32>
    %100 = arith.maximumf %99, %98 : vector<16x16x3xf32>
    %101 = vector.broadcast %cst_86 : f32 to vector<16x16x3xf32>
    %102 = arith.minimumf %101, %100 : vector<16x16x3xf32>
    %103 = arith.truncf %102 : vector<16x16x3xf32> to vector<16x16x3xbf16>
    %104 = vector.shape_cast %103 : vector<16x16x3xbf16> to vector<256x3xbf16>
    %c8 = arith.constant 8 : index
    %c0_87 = arith.constant 0 : index
    %c0_88 = arith.constant 0 : index
    %105 = vector.load %arg2[%c8, %c0_87, %c0_88] : memref<9x3x128xbf16, #tpu.memory_space<vmem>>, vector<1x3x128xbf16>
    %106 = vector.shape_cast %105 : vector<1x3x128xbf16> to vector<3x128xbf16>
    %cst_89 = arith.constant dense<0.000000e+00> : vector<256x128xf32>
    %107 = tpu.matmul %104, %106, %cst_89 {dimension_numbers = #tpu.dot_dimension_numbers<[1], [0], [0], [1], [0, 0, 1, 1], [], []>} : vector<256x3xbf16>, vector<3x128xbf16>, vector<256x128xf32> -> vector<256x128xf32>
    %108 = arith.addf %96, %107 : vector<256x128xf32>
    %c0_90 = arith.constant 0 : index
    %c0_91 = arith.constant 0 : index
    %109 = vector.load %arg3[%c0_90, %c0_91] : memref<1x128xf32, #tpu.memory_space<vmem>>, vector<1x128xf32>
    %110 = vector.broadcast %109 : vector<1x128xf32> to vector<256x128xf32>
    %111 = arith.addf %108, %110 : vector<256x128xf32>
    %cst_92 = arith.constant 0.000000e+00 : f32
    %112 = vector.broadcast %cst_92 : f32 to vector<256x128xf32>
    %113 = arith.maximumf %111, %112 : vector<256x128xf32>
    %114 = arith.truncf %113 : vector<256x128xf32> to vector<256x128xbf16>
    %c0_93 = arith.constant 0 : index
    %c0_94 = arith.constant 0 : index
    %c0_95 = arith.constant 0 : index
    %115 = vector.load %arg4[%c0_93, %c0_94, %c0_95] : memref<1x256x128xbf16, #tpu.memory_space<vmem>>, vector<1x256x128xbf16>
    %116 = vector.shape_cast %115 : vector<1x256x128xbf16> to vector<256x128xbf16>
    %117 = vector.shape_cast %114 : vector<256x128xbf16> to vector<1x256x128xbf16>
    tpu.vector_store %arg4[%c0_93, %c0_94, %c0_95], %117 {strides = array<i32>} : memref<1x256x128xbf16, #tpu.memory_space<vmem>>, vector<1x256x128xbf16>,
    return
  }
  func.func @transform_0(%arg0: i32) -> (i32, i32, i32, i32, i32) {
    %c0_i32 = arith.constant 0 : i32
    %c0_i32_0 = arith.constant 0 : i32
    %c0_i32_1 = arith.constant 0 : i32
    %c0_i32_2 = arith.constant 0 : i32
    %c0_i32_3 = arith.constant 0 : i32
    return %arg0, %c0_i32, %c0_i32_0, %c0_i32_1, %c0_i32_2 : i32, i32, i32, i32, i32
  }
  func.func @transform_1(%arg0: i32) -> (i32, i32, i32) {
    %c0_i32 = arith.constant 0 : i32
    %c0_i32_0 = arith.constant 0 : i32
    %c0_i32_1 = arith.constant 0 : i32
    %c0_i32_2 = arith.constant 0 : i32
    return %c0_i32, %c0_i32_0, %c0_i32_1 : i32, i32, i32
  }
  func.func @transform_2(%arg0: i32) -> (i32, i32) {
    %c0_i32 = arith.constant 0 : i32
    %c0_i32_0 = arith.constant 0 : i32
    %c0_i32_1 = arith.constant 0 : i32
    return %c0_i32, %c0_i32_0 : i32, i32
  }
  func.func @transform_3(%arg0: i32) -> (i32, i32, i32) {
    %c0_i32 = arith.constant 0 : i32
    %c0_i32_0 = arith.constant 0 : i32
    %c0_i32_1 = arith.constant 0 : i32
    return %arg0, %c0_i32, %c0_i32_0 : i32, i32, i32
  }
}

module attributes {stable_mosaic.version = 11 : i64} {
  func.func @kernel(%arg0: i32, %arg1: memref<1x1x18x18x128xbf16, #tpu.memory_space<vmem>>, %arg2: memref<9x128x128xbf16, #tpu.memory_space<vmem>>, %arg3: memref<1x128xf32, #tpu.memory_space<vmem>>, %arg4: memref<1x256x128xbf16, #tpu.memory_space<vmem>>) attributes {dimension_semantics = [#tpu.dimension_semantics<parallel>], iteration_bounds = array<i64: 4>, scalar_prefetch = 0 : i64, scratch_operands = 0 : i64, tpu.core_type = #tpu.core_type<tc>, window_params = [{transform_indices = @transform_0, window_bounds = array<i64: 1, 1, 18, 18, 128>}, {pipeline_mode = #tpu.pipeline_mode<synchronous>, transform_indices = @transform_1, window_bounds = array<i64: 9, 128, 128>}, {pipeline_mode = #tpu.pipeline_mode<synchronous>, transform_indices = @transform_2, window_bounds = array<i64: 1, 128>}, {transform_indices = @transform_3, window_bounds = array<i64: 1, 256, 128>}]} {
    %cst = arith.constant 0.000000e+00 : f32
    %0 = vector.broadcast %cst : f32 to vector<256x128xf32>
    %c0 = arith.constant 0 : index
    %c0_0 = arith.constant 0 : index
    %c0_1 = arith.constant 0 : index
    %c0_2 = arith.constant 0 : index
    %c0_3 = arith.constant 0 : index
    %1 = vector.load %arg1[%c0, %c0_0, %c0_1, %c0_2, %c0_3] : memref<1x1x18x18x128xbf16, #tpu.memory_space<vmem>>, vector<1x1x16x16x128xbf16>
    %2 = vector.shape_cast %1 : vector<1x1x16x16x128xbf16> to vector<16x16x128xbf16>
    %3 = vector.shape_cast %2 : vector<16x16x128xbf16> to vector<256x128xbf16>
    %c0_4 = arith.constant 0 : index
    %c0_5 = arith.constant 0 : index
    %c0_6 = arith.constant 0 : index
    %4 = vector.load %arg2[%c0_4, %c0_5, %c0_6] : memref<9x128x128xbf16, #tpu.memory_space<vmem>>, vector<1x128x128xbf16>
    %5 = vector.shape_cast %4 : vector<1x128x128xbf16> to vector<128x128xbf16>
    %cst_7 = arith.constant dense<0.000000e+00> : vector<256x128xf32>
    %6 = tpu.matmul %3, %5, %cst_7 {dimension_numbers = #tpu.dot_dimension_numbers<[1], [0], [0], [1], [0, 0, 1, 1], [], []>} : vector<256x128xbf16>, vector<128x128xbf16>, vector<256x128xf32> -> vector<256x128xf32>
    %7 = arith.addf %0, %6 : vector<256x128xf32>
    %c0_8 = arith.constant 0 : index
    %c0_9 = arith.constant 0 : index
    %c0_10 = arith.constant 0 : index
    %c1 = arith.constant 1 : index
    %c0_11 = arith.constant 0 : index
    %8 = vector.load %arg1[%c0_8, %c0_9, %c0_10, %c1, %c0_11] : memref<1x1x18x18x128xbf16, #tpu.memory_space<vmem>>, vector<1x1x16x16x128xbf16>
    %9 = vector.shape_cast %8 : vector<1x1x16x16x128xbf16> to vector<16x16x128xbf16>
    %10 = vector.shape_cast %9 : vector<16x16x128xbf16> to vector<256x128xbf16>
    %c1_12 = arith.constant 1 : index
    %c0_13 = arith.constant 0 : index
    %c0_14 = arith.constant 0 : index
    %11 = vector.load %arg2[%c1_12, %c0_13, %c0_14] : memref<9x128x128xbf16, #tpu.memory_space<vmem>>, vector<1x128x128xbf16>
    %12 = vector.shape_cast %11 : vector<1x128x128xbf16> to vector<128x128xbf16>
    %cst_15 = arith.constant dense<0.000000e+00> : vector<256x128xf32>
    %13 = tpu.matmul %10, %12, %cst_15 {dimension_numbers = #tpu.dot_dimension_numbers<[1], [0], [0], [1], [0, 0, 1, 1], [], []>} : vector<256x128xbf16>, vector<128x128xbf16>, vector<256x128xf32> -> vector<256x128xf32>
    %14 = arith.addf %7, %13 : vector<256x128xf32>
    %c0_16 = arith.constant 0 : index
    %c0_17 = arith.constant 0 : index
    %c0_18 = arith.constant 0 : index
    %c2 = arith.constant 2 : index
    %c0_19 = arith.constant 0 : index
    %15 = vector.load %arg1[%c0_16, %c0_17, %c0_18, %c2, %c0_19] : memref<1x1x18x18x128xbf16, #tpu.memory_space<vmem>>, vector<1x1x16x16x128xbf16>
    %16 = vector.shape_cast %15 : vector<1x1x16x16x128xbf16> to vector<16x16x128xbf16>
    %17 = vector.shape_cast %16 : vector<16x16x128xbf16> to vector<256x128xbf16>
    %c2_20 = arith.constant 2 : index
    %c0_21 = arith.constant 0 : index
    %c0_22 = arith.constant 0 : index
    %18 = vector.load %arg2[%c2_20, %c0_21, %c0_22] : memref<9x128x128xbf16, #tpu.memory_space<vmem>>, vector<1x128x128xbf16>
    %19 = vector.shape_cast %18 : vector<1x128x128xbf16> to vector<128x128xbf16>
    %cst_23 = arith.constant dense<0.000000e+00> : vector<256x128xf32>
    %20 = tpu.matmul %17, %19, %cst_23 {dimension_numbers = #tpu.dot_dimension_numbers<[1], [0], [0], [1], [0, 0, 1, 1], [], []>} : vector<256x128xbf16>, vector<128x128xbf16>, vector<256x128xf32> -> vector<256x128xf32>
    %21 = arith.addf %14, %20 : vector<256x128xf32>
    %c0_24 = arith.constant 0 : index
    %c0_25 = arith.constant 0 : index
    %c1_26 = arith.constant 1 : index
    %c0_27 = arith.constant 0 : index
    %c0_28 = arith.constant 0 : index
    %22 = vector.load %arg1[%c0_24, %c0_25, %c1_26, %c0_27, %c0_28] : memref<1x1x18x18x128xbf16, #tpu.memory_space<vmem>>, vector<1x1x16x16x128xbf16>
    %23 = vector.shape_cast %22 : vector<1x1x16x16x128xbf16> to vector<16x16x128xbf16>
    %24 = vector.shape_cast %23 : vector<16x16x128xbf16> to vector<256x128xbf16>
    %c3 = arith.constant 3 : index
    %c0_29 = arith.constant 0 : index
    %c0_30 = arith.constant 0 : index
    %25 = vector.load %arg2[%c3, %c0_29, %c0_30] : memref<9x128x128xbf16, #tpu.memory_space<vmem>>, vector<1x128x128xbf16>
    %26 = vector.shape_cast %25 : vector<1x128x128xbf16> to vector<128x128xbf16>
    %cst_31 = arith.constant dense<0.000000e+00> : vector<256x128xf32>
    %27 = tpu.matmul %24, %26, %cst_31 {dimension_numbers = #tpu.dot_dimension_numbers<[1], [0], [0], [1], [0, 0, 1, 1], [], []>} : vector<256x128xbf16>, vector<128x128xbf16>, vector<256x128xf32> -> vector<256x128xf32>
    %28 = arith.addf %21, %27 : vector<256x128xf32>
    %c0_32 = arith.constant 0 : index
    %c0_33 = arith.constant 0 : index
    %c1_34 = arith.constant 1 : index
    %c1_35 = arith.constant 1 : index
    %c0_36 = arith.constant 0 : index
    %29 = vector.load %arg1[%c0_32, %c0_33, %c1_34, %c1_35, %c0_36] : memref<1x1x18x18x128xbf16, #tpu.memory_space<vmem>>, vector<1x1x16x16x128xbf16>
    %30 = vector.shape_cast %29 : vector<1x1x16x16x128xbf16> to vector<16x16x128xbf16>
    %31 = vector.shape_cast %30 : vector<16x16x128xbf16> to vector<256x128xbf16>
    %c4 = arith.constant 4 : index
    %c0_37 = arith.constant 0 : index
    %c0_38 = arith.constant 0 : index
    %32 = vector.load %arg2[%c4, %c0_37, %c0_38] : memref<9x128x128xbf16, #tpu.memory_space<vmem>>, vector<1x128x128xbf16>
    %33 = vector.shape_cast %32 : vector<1x128x128xbf16> to vector<128x128xbf16>
    %cst_39 = arith.constant dense<0.000000e+00> : vector<256x128xf32>
    %34 = tpu.matmul %31, %33, %cst_39 {dimension_numbers = #tpu.dot_dimension_numbers<[1], [0], [0], [1], [0, 0, 1, 1], [], []>} : vector<256x128xbf16>, vector<128x128xbf16>, vector<256x128xf32> -> vector<256x128xf32>
    %35 = arith.addf %28, %34 : vector<256x128xf32>
    %c0_40 = arith.constant 0 : index
    %c0_41 = arith.constant 0 : index
    %c1_42 = arith.constant 1 : index
    %c2_43 = arith.constant 2 : index
    %c0_44 = arith.constant 0 : index
    %36 = vector.load %arg1[%c0_40, %c0_41, %c1_42, %c2_43, %c0_44] : memref<1x1x18x18x128xbf16, #tpu.memory_space<vmem>>, vector<1x1x16x16x128xbf16>
    %37 = vector.shape_cast %36 : vector<1x1x16x16x128xbf16> to vector<16x16x128xbf16>
    %38 = vector.shape_cast %37 : vector<16x16x128xbf16> to vector<256x128xbf16>
    %c5 = arith.constant 5 : index
    %c0_45 = arith.constant 0 : index
    %c0_46 = arith.constant 0 : index
    %39 = vector.load %arg2[%c5, %c0_45, %c0_46] : memref<9x128x128xbf16, #tpu.memory_space<vmem>>, vector<1x128x128xbf16>
    %40 = vector.shape_cast %39 : vector<1x128x128xbf16> to vector<128x128xbf16>
    %cst_47 = arith.constant dense<0.000000e+00> : vector<256x128xf32>
    %41 = tpu.matmul %38, %40, %cst_47 {dimension_numbers = #tpu.dot_dimension_numbers<[1], [0], [0], [1], [0, 0, 1, 1], [], []>} : vector<256x128xbf16>, vector<128x128xbf16>, vector<256x128xf32> -> vector<256x128xf32>
    %42 = arith.addf %35, %41 : vector<256x128xf32>
    %c0_48 = arith.constant 0 : index
    %c0_49 = arith.constant 0 : index
    %c2_50 = arith.constant 2 : index
    %c0_51 = arith.constant 0 : index
    %c0_52 = arith.constant 0 : index
    %43 = vector.load %arg1[%c0_48, %c0_49, %c2_50, %c0_51, %c0_52] : memref<1x1x18x18x128xbf16, #tpu.memory_space<vmem>>, vector<1x1x16x16x128xbf16>
    %44 = vector.shape_cast %43 : vector<1x1x16x16x128xbf16> to vector<16x16x128xbf16>
    %45 = vector.shape_cast %44 : vector<16x16x128xbf16> to vector<256x128xbf16>
    %c6 = arith.constant 6 : index
    %c0_53 = arith.constant 0 : index
    %c0_54 = arith.constant 0 : index
    %46 = vector.load %arg2[%c6, %c0_53, %c0_54] : memref<9x128x128xbf16, #tpu.memory_space<vmem>>, vector<1x128x128xbf16>
    %47 = vector.shape_cast %46 : vector<1x128x128xbf16> to vector<128x128xbf16>
    %cst_55 = arith.constant dense<0.000000e+00> : vector<256x128xf32>
    %48 = tpu.matmul %45, %47, %cst_55 {dimension_numbers = #tpu.dot_dimension_numbers<[1], [0], [0], [1], [0, 0, 1, 1], [], []>} : vector<256x128xbf16>, vector<128x128xbf16>, vector<256x128xf32> -> vector<256x128xf32>
    %49 = arith.addf %42, %48 : vector<256x128xf32>
    %c0_56 = arith.constant 0 : index
    %c0_57 = arith.constant 0 : index
    %c2_58 = arith.constant 2 : index
    %c1_59 = arith.constant 1 : index
    %c0_60 = arith.constant 0 : index
    %50 = vector.load %arg1[%c0_56, %c0_57, %c2_58, %c1_59, %c0_60] : memref<1x1x18x18x128xbf16, #tpu.memory_space<vmem>>, vector<1x1x16x16x128xbf16>
    %51 = vector.shape_cast %50 : vector<1x1x16x16x128xbf16> to vector<16x16x128xbf16>
    %52 = vector.shape_cast %51 : vector<16x16x128xbf16> to vector<256x128xbf16>
    %c7 = arith.constant 7 : index
    %c0_61 = arith.constant 0 : index
    %c0_62 = arith.constant 0 : index
    %53 = vector.load %arg2[%c7, %c0_61, %c0_62] : memref<9x128x128xbf16, #tpu.memory_space<vmem>>, vector<1x128x128xbf16>
    %54 = vector.shape_cast %53 : vector<1x128x128xbf16> to vector<128x128xbf16>
    %cst_63 = arith.constant dense<0.000000e+00> : vector<256x128xf32>
    %55 = tpu.matmul %52, %54, %cst_63 {dimension_numbers = #tpu.dot_dimension_numbers<[1], [0], [0], [1], [0, 0, 1, 1], [], []>} : vector<256x128xbf16>, vector<128x128xbf16>, vector<256x128xf32> -> vector<256x128xf32>
    %56 = arith.addf %49, %55 : vector<256x128xf32>
    %c0_64 = arith.constant 0 : index
    %c0_65 = arith.constant 0 : index
    %c2_66 = arith.constant 2 : index
    %c2_67 = arith.constant 2 : index
    %c0_68 = arith.constant 0 : index
    %57 = vector.load %arg1[%c0_64, %c0_65, %c2_66, %c2_67, %c0_68] : memref<1x1x18x18x128xbf16, #tpu.memory_space<vmem>>, vector<1x1x16x16x128xbf16>
    %58 = vector.shape_cast %57 : vector<1x1x16x16x128xbf16> to vector<16x16x128xbf16>
    %59 = vector.shape_cast %58 : vector<16x16x128xbf16> to vector<256x128xbf16>
    %c8 = arith.constant 8 : index
    %c0_69 = arith.constant 0 : index
    %c0_70 = arith.constant 0 : index
    %60 = vector.load %arg2[%c8, %c0_69, %c0_70] : memref<9x128x128xbf16, #tpu.memory_space<vmem>>, vector<1x128x128xbf16>
    %61 = vector.shape_cast %60 : vector<1x128x128xbf16> to vector<128x128xbf16>
    %cst_71 = arith.constant dense<0.000000e+00> : vector<256x128xf32>
    %62 = tpu.matmul %59, %61, %cst_71 {dimension_numbers = #tpu.dot_dimension_numbers<[1], [0], [0], [1], [0, 0, 1, 1], [], []>} : vector<256x128xbf16>, vector<128x128xbf16>, vector<256x128xf32> -> vector<256x128xf32>
    %63 = arith.addf %56, %62 : vector<256x128xf32>
    %c0_72 = arith.constant 0 : index
    %c0_73 = arith.constant 0 : index
    %64 = vector.load %arg3[%c0_72, %c0_73] : memref<1x128xf32, #tpu.memory_space<vmem>>, vector<1x128xf32>
    %65 = vector.broadcast %64 : vector<1x128xf32> to vector<256x128xf32>
    %66 = arith.addf %63, %65 : vector<256x128xf32>
    %cst_74 = arith.constant 0.000000e+00 : f32
    %67 = vector.broadcast %cst_74 : f32 to vector<256x128xf32>
    %68 = arith.maximumf %66, %67 : vector<256x128xf32>
    %69 = arith.truncf %68 : vector<256x128xf32> to vector<256x128xbf16>
    %c0_75 = arith.constant 0 : index
    %c0_76 = arith.constant 0 : index
    %c0_77 = arith.constant 0 : index
    %70 = vector.load %arg4[%c0_75, %c0_76, %c0_77] : memref<1x256x128xbf16, #tpu.memory_space<vmem>>, vector<1x256x128xbf16>
    %71 = vector.shape_cast %70 : vector<1x256x128xbf16> to vector<256x128xbf16>
    %72 = vector.shape_cast %69 : vector<256x128xbf16> to vector<1x256x128xbf16>
    tpu.vector_store %arg4[%c0_75, %c0_76, %c0_77], %72 {strides = array<i32>} : memref<1x256x128xbf16, #tpu.memory_space<vmem>>, vector<1x256x128xbf16>,
    return
  }
  func.func @transform_0(%arg0: i32) -> (i32, i32, i32, i32, i32) {
    %c0_i32 = arith.constant 0 : i32
    %c0_i32_0 = arith.constant 0 : i32
    %c0_i32_1 = arith.constant 0 : i32
    %c0_i32_2 = arith.constant 0 : i32
    %c0_i32_3 = arith.constant 0 : i32
    return %arg0, %c0_i32, %c0_i32_0, %c0_i32_1, %c0_i32_2 : i32, i32, i32, i32, i32
  }
  func.func @transform_1(%arg0: i32) -> (i32, i32, i32) {
    %c0_i32 = arith.constant 0 : i32
    %c0_i32_0 = arith.constant 0 : i32
    %c0_i32_1 = arith.constant 0 : i32
    %c0_i32_2 = arith.constant 0 : i32
    return %c0_i32, %c0_i32_0, %c0_i32_1 : i32, i32, i32
  }
  func.func @transform_2(%arg0: i32) -> (i32, i32) {
    %c0_i32 = arith.constant 0 : i32
    %c0_i32_0 = arith.constant 0 : i32
    %c0_i32_1 = arith.constant 0 : i32
    return %c0_i32, %c0_i32_0 : i32, i32
  }
  func.func @transform_3(%arg0: i32) -> (i32, i32, i32) {
    %c0_i32 = arith.constant 0 : i32
    %c0_i32_0 = arith.constant 0 : i32
    %c0_i32_1 = arith.constant 0 : i32
    return %arg0, %c0_i32, %c0_i32_0 : i32, i32, i32
  }
}

module attributes {stable_mosaic.version = 11 : i64} {
  func.func @_mse_partial_kernel(%arg0: i32, %arg1: memref<1x256x128xbf16, #tpu.memory_space<vmem>>, %arg2: memref<1x256x128xbf16, #tpu.memory_space<vmem>>, %arg3: memref<1x8x128xf32, #tpu.memory_space<vmem>>) attributes {dimension_semantics = [#tpu.dimension_semantics<parallel>], iteration_bounds = array<i64: 2>, scalar_prefetch = 0 : i64, scratch_operands = 0 : i64, tpu.core_type = #tpu.core_type<tc>, window_params = [{transform_indices = @transform_0, window_bounds = array<i64: 1, 256, 128>}, {transform_indices = @transform_1, window_bounds = array<i64: 1, 256, 128>}, {transform_indices = @transform_2, window_bounds = array<i64: 1, 8, 128>}]} {
    %c0 = arith.constant 0 : index
    %c0_0 = arith.constant 0 : index
    %c0_1 = arith.constant 0 : index
    %0 = vector.load %arg1[%c0, %c0_0, %c0_1] : memref<1x256x128xbf16, #tpu.memory_space<vmem>>, vector<1x256x128xbf16>
    %1 = vector.shape_cast %0 : vector<1x256x128xbf16> to vector<256x128xbf16>
    %2 = arith.extf %1 : vector<256x128xbf16> to vector<256x128xf32>
    %c0_2 = arith.constant 0 : index
    %c0_3 = arith.constant 0 : index
    %c0_4 = arith.constant 0 : index
    %3 = vector.load %arg2[%c0_2, %c0_3, %c0_4] : memref<1x256x128xbf16, #tpu.memory_space<vmem>>, vector<1x256x128xbf16>
    %4 = vector.shape_cast %3 : vector<1x256x128xbf16> to vector<256x128xbf16>
    %5 = arith.extf %4 : vector<256x128xbf16> to vector<256x128xf32>
    %6 = arith.subf %2, %5 : vector<256x128xf32>
    %7 = arith.mulf %6, %6 : vector<256x128xf32>
    %8 = vector.shape_cast %7 : vector<256x128xf32> to vector<32x8x128xf32>
    %cst = arith.constant dense<0.000000e+00> : vector<8x128xf32>
    %9 = vector.multi_reduction <add>, %8, %cst [0] : vector<32x8x128xf32> to vector<8x128xf32>
    %c0_5 = arith.constant 0 : index
    %c0_6 = arith.constant 0 : index
    %c0_7 = arith.constant 0 : index
    %10 = vector.load %arg3[%c0_5, %c0_6, %c0_7] : memref<1x8x128xf32, #tpu.memory_space<vmem>>, vector<1x8x128xf32>
    %11 = vector.shape_cast %10 : vector<1x8x128xf32> to vector<8x128xf32>
    %12 = vector.shape_cast %9 : vector<8x128xf32> to vector<1x8x128xf32>
    tpu.vector_store %arg3[%c0_5, %c0_6, %c0_7], %12 {strides = array<i32>} : memref<1x8x128xf32, #tpu.memory_space<vmem>>, vector<1x8x128xf32>,
    return
  }
  func.func @transform_0(%arg0: i32) -> (i32, i32, i32) {
    %c0_i32 = arith.constant 0 : i32
    %c0_i32_0 = arith.constant 0 : i32
    %c0_i32_1 = arith.constant 0 : i32
    return %arg0, %c0_i32, %c0_i32_0 : i32, i32, i32
  }
  func.func @transform_1(%arg0: i32) -> (i32, i32, i32) {
    %c2_i32 = arith.constant 2 : i32
    %0 = arith.addi %arg0, %c2_i32 : i32
    %c0_i32 = arith.constant 0 : i32
    %c0_i32_0 = arith.constant 0 : i32
    %c0_i32_1 = arith.constant 0 : i32
    return %0, %c0_i32, %c0_i32_0 : i32, i32, i32
  }
  func.func @transform_2(%arg0: i32) -> (i32, i32, i32) {
    %c0_i32 = arith.constant 0 : i32
    %c0_i32_0 = arith.constant 0 : i32
    %c0_i32_1 = arith.constant 0 : i32
    return %arg0, %c0_i32, %c0_i32_0 : i32, i32, i32
  }
}

module attributes {stable_mosaic.version = 11 : i64} {
  func.func @kernel(%arg0: i32, %arg1: memref<1x4x9x9x128xbf16, #tpu.memory_space<vmem>>, %arg2: memref<9x128x128xbf16, #tpu.memory_space<vmem>>, %arg3: memref<1x128xf32, #tpu.memory_space<vmem>>, %arg4: memref<1x64x128xbf16, #tpu.memory_space<vmem>>) attributes {dimension_semantics = [#tpu.dimension_semantics<parallel>], iteration_bounds = array<i64: 4>, scalar_prefetch = 0 : i64, scratch_operands = 0 : i64, tpu.core_type = #tpu.core_type<tc>, window_params = [{transform_indices = @transform_0, window_bounds = array<i64: 1, 4, 9, 9, 128>}, {pipeline_mode = #tpu.pipeline_mode<synchronous>, transform_indices = @transform_1, window_bounds = array<i64: 9, 128, 128>}, {pipeline_mode = #tpu.pipeline_mode<synchronous>, transform_indices = @transform_2, window_bounds = array<i64: 1, 128>}, {transform_indices = @transform_3, window_bounds = array<i64: 1, 64, 128>}]} {
    %cst = arith.constant 0.000000e+00 : f32
    %0 = vector.broadcast %cst : f32 to vector<64x128xf32>
    %c0 = arith.constant 0 : index
    %c0_0 = arith.constant 0 : index
    %c0_1 = arith.constant 0 : index
    %c0_2 = arith.constant 0 : index
    %c0_3 = arith.constant 0 : index
    %1 = vector.load %arg1[%c0, %c0_0, %c0_1, %c0_2, %c0_3] : memref<1x4x9x9x128xbf16, #tpu.memory_space<vmem>>, vector<1x1x8x8x128xbf16>
    %2 = vector.shape_cast %1 : vector<1x1x8x8x128xbf16> to vector<8x8x128xbf16>
    %3 = vector.shape_cast %2 : vector<8x8x128xbf16> to vector<64x128xbf16>
    %c0_4 = arith.constant 0 : index
    %c0_5 = arith.constant 0 : index
    %c0_6 = arith.constant 0 : index
    %4 = vector.load %arg2[%c0_4, %c0_5, %c0_6] : memref<9x128x128xbf16, #tpu.memory_space<vmem>>, vector<1x128x128xbf16>
    %5 = vector.shape_cast %4 : vector<1x128x128xbf16> to vector<128x128xbf16>
    %cst_7 = arith.constant dense<0.000000e+00> : vector<64x128xf32>
    %6 = tpu.matmul %3, %5, %cst_7 {dimension_numbers = #tpu.dot_dimension_numbers<[1], [0], [0], [1], [0, 0, 1, 1], [], []>} : vector<64x128xbf16>, vector<128x128xbf16>, vector<64x128xf32> -> vector<64x128xf32>
    %7 = arith.addf %0, %6 : vector<64x128xf32>
    %c0_8 = arith.constant 0 : index
    %c1 = arith.constant 1 : index
    %c0_9 = arith.constant 0 : index
    %c0_10 = arith.constant 0 : index
    %c0_11 = arith.constant 0 : index
    %8 = vector.load %arg1[%c0_8, %c1, %c0_9, %c0_10, %c0_11] : memref<1x4x9x9x128xbf16, #tpu.memory_space<vmem>>, vector<1x1x8x8x128xbf16>
    %9 = vector.shape_cast %8 : vector<1x1x8x8x128xbf16> to vector<8x8x128xbf16>
    %10 = vector.shape_cast %9 : vector<8x8x128xbf16> to vector<64x128xbf16>
    %c1_12 = arith.constant 1 : index
    %c0_13 = arith.constant 0 : index
    %c0_14 = arith.constant 0 : index
    %11 = vector.load %arg2[%c1_12, %c0_13, %c0_14] : memref<9x128x128xbf16, #tpu.memory_space<vmem>>, vector<1x128x128xbf16>
    %12 = vector.shape_cast %11 : vector<1x128x128xbf16> to vector<128x128xbf16>
    %cst_15 = arith.constant dense<0.000000e+00> : vector<64x128xf32>
    %13 = tpu.matmul %10, %12, %cst_15 {dimension_numbers = #tpu.dot_dimension_numbers<[1], [0], [0], [1], [0, 0, 1, 1], [], []>} : vector<64x128xbf16>, vector<128x128xbf16>, vector<64x128xf32> -> vector<64x128xf32>
    %14 = arith.addf %7, %13 : vector<64x128xf32>
    %c0_16 = arith.constant 0 : index
    %c0_17 = arith.constant 0 : index
    %c0_18 = arith.constant 0 : index
    %c1_19 = arith.constant 1 : index
    %c0_20 = arith.constant 0 : index
    %15 = vector.load %arg1[%c0_16, %c0_17, %c0_18, %c1_19, %c0_20] : memref<1x4x9x9x128xbf16, #tpu.memory_space<vmem>>, vector<1x1x8x8x128xbf16>
    %16 = vector.shape_cast %15 : vector<1x1x8x8x128xbf16> to vector<8x8x128xbf16>
    %17 = vector.shape_cast %16 : vector<8x8x128xbf16> to vector<64x128xbf16>
    %c2 = arith.constant 2 : index
    %c0_21 = arith.constant 0 : index
    %c0_22 = arith.constant 0 : index
    %18 = vector.load %arg2[%c2, %c0_21, %c0_22] : memref<9x128x128xbf16, #tpu.memory_space<vmem>>, vector<1x128x128xbf16>
    %19 = vector.shape_cast %18 : vector<1x128x128xbf16> to vector<128x128xbf16>
    %cst_23 = arith.constant dense<0.000000e+00> : vector<64x128xf32>
    %20 = tpu.matmul %17, %19, %cst_23 {dimension_numbers = #tpu.dot_dimension_numbers<[1], [0], [0], [1], [0, 0, 1, 1], [], []>} : vector<64x128xbf16>, vector<128x128xbf16>, vector<64x128xf32> -> vector<64x128xf32>
    %21 = arith.addf %14, %20 : vector<64x128xf32>
    %c0_24 = arith.constant 0 : index
    %c2_25 = arith.constant 2 : index
    %c0_26 = arith.constant 0 : index
    %c0_27 = arith.constant 0 : index
    %c0_28 = arith.constant 0 : index
    %22 = vector.load %arg1[%c0_24, %c2_25, %c0_26, %c0_27, %c0_28] : memref<1x4x9x9x128xbf16, #tpu.memory_space<vmem>>, vector<1x1x8x8x128xbf16>
    %23 = vector.shape_cast %22 : vector<1x1x8x8x128xbf16> to vector<8x8x128xbf16>
    %24 = vector.shape_cast %23 : vector<8x8x128xbf16> to vector<64x128xbf16>
    %c3 = arith.constant 3 : index
    %c0_29 = arith.constant 0 : index
    %c0_30 = arith.constant 0 : index
    %25 = vector.load %arg2[%c3, %c0_29, %c0_30] : memref<9x128x128xbf16, #tpu.memory_space<vmem>>, vector<1x128x128xbf16>
    %26 = vector.shape_cast %25 : vector<1x128x128xbf16> to vector<128x128xbf16>
    %cst_31 = arith.constant dense<0.000000e+00> : vector<64x128xf32>
    %27 = tpu.matmul %24, %26, %cst_31 {dimension_numbers = #tpu.dot_dimension_numbers<[1], [0], [0], [1], [0, 0, 1, 1], [], []>} : vector<64x128xbf16>, vector<128x128xbf16>, vector<64x128xf32> -> vector<64x128xf32>
    %28 = arith.addf %21, %27 : vector<64x128xf32>
    %c0_32 = arith.constant 0 : index
    %c3_33 = arith.constant 3 : index
    %c0_34 = arith.constant 0 : index
    %c0_35 = arith.constant 0 : index
    %c0_36 = arith.constant 0 : index
    %29 = vector.load %arg1[%c0_32, %c3_33, %c0_34, %c0_35, %c0_36] : memref<1x4x9x9x128xbf16, #tpu.memory_space<vmem>>, vector<1x1x8x8x128xbf16>
    %30 = vector.shape_cast %29 : vector<1x1x8x8x128xbf16> to vector<8x8x128xbf16>
    %31 = vector.shape_cast %30 : vector<8x8x128xbf16> to vector<64x128xbf16>
    %c4 = arith.constant 4 : index
    %c0_37 = arith.constant 0 : index
    %c0_38 = arith.constant 0 : index
    %32 = vector.load %arg2[%c4, %c0_37, %c0_38] : memref<9x128x128xbf16, #tpu.memory_space<vmem>>, vector<1x128x128xbf16>
    %33 = vector.shape_cast %32 : vector<1x128x128xbf16> to vector<128x128xbf16>
    %cst_39 = arith.constant dense<0.000000e+00> : vector<64x128xf32>
    %34 = tpu.matmul %31, %33, %cst_39 {dimension_numbers = #tpu.dot_dimension_numbers<[1], [0], [0], [1], [0, 0, 1, 1], [], []>} : vector<64x128xbf16>, vector<128x128xbf16>, vector<64x128xf32> -> vector<64x128xf32>
    %35 = arith.addf %28, %34 : vector<64x128xf32>
    %c0_40 = arith.constant 0 : index
    %c2_41 = arith.constant 2 : index
    %c0_42 = arith.constant 0 : index
    %c1_43 = arith.constant 1 : index
    %c0_44 = arith.constant 0 : index
    %36 = vector.load %arg1[%c0_40, %c2_41, %c0_42, %c1_43, %c0_44] : memref<1x4x9x9x128xbf16, #tpu.memory_space<vmem>>, vector<1x1x8x8x128xbf16>
    %37 = vector.shape_cast %36 : vector<1x1x8x8x128xbf16> to vector<8x8x128xbf16>
    %38 = vector.shape_cast %37 : vector<8x8x128xbf16> to vector<64x128xbf16>
    %c5 = arith.constant 5 : index
    %c0_45 = arith.constant 0 : index
    %c0_46 = arith.constant 0 : index
    %39 = vector.load %arg2[%c5, %c0_45, %c0_46] : memref<9x128x128xbf16, #tpu.memory_space<vmem>>, vector<1x128x128xbf16>
    %40 = vector.shape_cast %39 : vector<1x128x128xbf16> to vector<128x128xbf16>
    %cst_47 = arith.constant dense<0.000000e+00> : vector<64x128xf32>
    %41 = tpu.matmul %38, %40, %cst_47 {dimension_numbers = #tpu.dot_dimension_numbers<[1], [0], [0], [1], [0, 0, 1, 1], [], []>} : vector<64x128xbf16>, vector<128x128xbf16>, vector<64x128xf32> -> vector<64x128xf32>
    %42 = arith.addf %35, %41 : vector<64x128xf32>
    %c0_48 = arith.constant 0 : index
    %c0_49 = arith.constant 0 : index
    %c1_50 = arith.constant 1 : index
    %c0_51 = arith.constant 0 : index
    %c0_52 = arith.constant 0 : index
    %43 = vector.load %arg1[%c0_48, %c0_49, %c1_50, %c0_51, %c0_52] : memref<1x4x9x9x128xbf16, #tpu.memory_space<vmem>>, vector<1x1x8x8x128xbf16>
    %44 = vector.shape_cast %43 : vector<1x1x8x8x128xbf16> to vector<8x8x128xbf16>
    %45 = vector.shape_cast %44 : vector<8x8x128xbf16> to vector<64x128xbf16>
    %c6 = arith.constant 6 : index
    %c0_53 = arith.constant 0 : index
    %c0_54 = arith.constant 0 : index
    %46 = vector.load %arg2[%c6, %c0_53, %c0_54] : memref<9x128x128xbf16, #tpu.memory_space<vmem>>, vector<1x128x128xbf16>
    %47 = vector.shape_cast %46 : vector<1x128x128xbf16> to vector<128x128xbf16>
    %cst_55 = arith.constant dense<0.000000e+00> : vector<64x128xf32>
    %48 = tpu.matmul %45, %47, %cst_55 {dimension_numbers = #tpu.dot_dimension_numbers<[1], [0], [0], [1], [0, 0, 1, 1], [], []>} : vector<64x128xbf16>, vector<128x128xbf16>, vector<64x128xf32> -> vector<64x128xf32>
    %49 = arith.addf %42, %48 : vector<64x128xf32>
    %c0_56 = arith.constant 0 : index
    %c1_57 = arith.constant 1 : index
    %c1_58 = arith.constant 1 : index
    %c0_59 = arith.constant 0 : index
    %c0_60 = arith.constant 0 : index
    %50 = vector.load %arg1[%c0_56, %c1_57, %c1_58, %c0_59, %c0_60] : memref<1x4x9x9x128xbf16, #tpu.memory_space<vmem>>, vector<1x1x8x8x128xbf16>
    %51 = vector.shape_cast %50 : vector<1x1x8x8x128xbf16> to vector<8x8x128xbf16>
    %52 = vector.shape_cast %51 : vector<8x8x128xbf16> to vector<64x128xbf16>
    %c7 = arith.constant 7 : index
    %c0_61 = arith.constant 0 : index
    %c0_62 = arith.constant 0 : index
    %53 = vector.load %arg2[%c7, %c0_61, %c0_62] : memref<9x128x128xbf16, #tpu.memory_space<vmem>>, vector<1x128x128xbf16>
    %54 = vector.shape_cast %53 : vector<1x128x128xbf16> to vector<128x128xbf16>
    %cst_63 = arith.constant dense<0.000000e+00> : vector<64x128xf32>
    %55 = tpu.matmul %52, %54, %cst_63 {dimension_numbers = #tpu.dot_dimension_numbers<[1], [0], [0], [1], [0, 0, 1, 1], [], []>} : vector<64x128xbf16>, vector<128x128xbf16>, vector<64x128xf32> -> vector<64x128xf32>
    %56 = arith.addf %49, %55 : vector<64x128xf32>
    %c0_64 = arith.constant 0 : index
    %c0_65 = arith.constant 0 : index
    %c1_66 = arith.constant 1 : index
    %c1_67 = arith.constant 1 : index
    %c0_68 = arith.constant 0 : index
    %57 = vector.load %arg1[%c0_64, %c0_65, %c1_66, %c1_67, %c0_68] : memref<1x4x9x9x128xbf16, #tpu.memory_space<vmem>>, vector<1x1x8x8x128xbf16>
    %58 = vector.shape_cast %57 : vector<1x1x8x8x128xbf16> to vector<8x8x128xbf16>
    %59 = vector.shape_cast %58 : vector<8x8x128xbf16> to vector<64x128xbf16>
    %c8 = arith.constant 8 : index
    %c0_69 = arith.constant 0 : index
    %c0_70 = arith.constant 0 : index
    %60 = vector.load %arg2[%c8, %c0_69, %c0_70] : memref<9x128x128xbf16, #tpu.memory_space<vmem>>, vector<1x128x128xbf16>
    %61 = vector.shape_cast %60 : vector<1x128x128xbf16> to vector<128x128xbf16>
    %cst_71 = arith.constant dense<0.000000e+00> : vector<64x128xf32>
    %62 = tpu.matmul %59, %61, %cst_71 {dimension_numbers = #tpu.dot_dimension_numbers<[1], [0], [0], [1], [0, 0, 1, 1], [], []>} : vector<64x128xbf16>, vector<128x128xbf16>, vector<64x128xf32> -> vector<64x128xf32>
    %63 = arith.addf %56, %62 : vector<64x128xf32>
    %c0_72 = arith.constant 0 : index
    %c0_73 = arith.constant 0 : index
    %64 = vector.load %arg3[%c0_72, %c0_73] : memref<1x128xf32, #tpu.memory_space<vmem>>, vector<1x128xf32>
    %65 = vector.broadcast %64 : vector<1x128xf32> to vector<64x128xf32>
    %66 = arith.addf %63, %65 : vector<64x128xf32>
    %cst_74 = arith.constant 0.000000e+00 : f32
    %67 = vector.broadcast %cst_74 : f32 to vector<64x128xf32>
    %68 = arith.maximumf %66, %67 : vector<64x128xf32>
    %69 = arith.truncf %68 : vector<64x128xf32> to vector<64x128xbf16>
    %c0_75 = arith.constant 0 : index
    %c0_76 = arith.constant 0 : index
    %c0_77 = arith.constant 0 : index
    %70 = vector.load %arg4[%c0_75, %c0_76, %c0_77] : memref<1x64x128xbf16, #tpu.memory_space<vmem>>, vector<1x64x128xbf16>
    %71 = vector.shape_cast %70 : vector<1x64x128xbf16> to vector<64x128xbf16>
    %72 = vector.shape_cast %69 : vector<64x128xbf16> to vector<1x64x128xbf16>
    tpu.vector_store %arg4[%c0_75, %c0_76, %c0_77], %72 {strides = array<i32>} : memref<1x64x128xbf16, #tpu.memory_space<vmem>>, vector<1x64x128xbf16>,
    return
  }
  func.func @transform_0(%arg0: i32) -> (i32, i32, i32, i32, i32) {
    %c0_i32 = arith.constant 0 : i32
    %c0_i32_0 = arith.constant 0 : i32
    %c0_i32_1 = arith.constant 0 : i32
    %c0_i32_2 = arith.constant 0 : i32
    %c0_i32_3 = arith.constant 0 : i32
    return %arg0, %c0_i32, %c0_i32_0, %c0_i32_1, %c0_i32_2 : i32, i32, i32, i32, i32
  }
  func.func @transform_1(%arg0: i32) -> (i32, i32, i32) {
    %c0_i32 = arith.constant 0 : i32
    %c0_i32_0 = arith.constant 0 : i32
    %c0_i32_1 = arith.constant 0 : i32
    %c0_i32_2 = arith.constant 0 : i32
    return %c0_i32, %c0_i32_0, %c0_i32_1 : i32, i32, i32
  }
  func.func @transform_2(%arg0: i32) -> (i32, i32) {
    %c0_i32 = arith.constant 0 : i32
    %c0_i32_0 = arith.constant 0 : i32
    %c0_i32_1 = arith.constant 0 : i32
    return %c0_i32, %c0_i32_0 : i32, i32
  }
  func.func @transform_3(%arg0: i32) -> (i32, i32, i32) {
    %c0_i32 = arith.constant 0 : i32
    %c0_i32_0 = arith.constant 0 : i32
    %c0_i32_1 = arith.constant 0 : i32
    return %arg0, %c0_i32, %c0_i32_0 : i32, i32, i32
  }
}

module attributes {stable_mosaic.version = 11 : i64} {
  func.func @_mse_partial_kernel(%arg0: i32, %arg1: memref<1x64x128xbf16, #tpu.memory_space<vmem>>, %arg2: memref<1x64x128xbf16, #tpu.memory_space<vmem>>, %arg3: memref<1x8x128xf32, #tpu.memory_space<vmem>>) attributes {dimension_semantics = [#tpu.dimension_semantics<parallel>], iteration_bounds = array<i64: 2>, scalar_prefetch = 0 : i64, scratch_operands = 0 : i64, tpu.core_type = #tpu.core_type<tc>, window_params = [{transform_indices = @transform_0, window_bounds = array<i64: 1, 64, 128>}, {transform_indices = @transform_1, window_bounds = array<i64: 1, 64, 128>}, {transform_indices = @transform_2, window_bounds = array<i64: 1, 8, 128>}]} {
    %c0 = arith.constant 0 : index
    %c0_0 = arith.constant 0 : index
    %c0_1 = arith.constant 0 : index
    %0 = vector.load %arg1[%c0, %c0_0, %c0_1] : memref<1x64x128xbf16, #tpu.memory_space<vmem>>, vector<1x64x128xbf16>
    %1 = vector.shape_cast %0 : vector<1x64x128xbf16> to vector<64x128xbf16>
    %2 = arith.extf %1 : vector<64x128xbf16> to vector<64x128xf32>
    %c0_2 = arith.constant 0 : index
    %c0_3 = arith.constant 0 : index
    %c0_4 = arith.constant 0 : index
    %3 = vector.load %arg2[%c0_2, %c0_3, %c0_4] : memref<1x64x128xbf16, #tpu.memory_space<vmem>>, vector<1x64x128xbf16>
    %4 = vector.shape_cast %3 : vector<1x64x128xbf16> to vector<64x128xbf16>
    %5 = arith.extf %4 : vector<64x128xbf16> to vector<64x128xf32>
    %6 = arith.subf %2, %5 : vector<64x128xf32>
    %7 = arith.mulf %6, %6 : vector<64x128xf32>
    %8 = vector.shape_cast %7 : vector<64x128xf32> to vector<8x8x128xf32>
    %cst = arith.constant dense<0.000000e+00> : vector<8x128xf32>
    %9 = vector.multi_reduction <add>, %8, %cst [0] : vector<8x8x128xf32> to vector<8x128xf32>
    %c0_5 = arith.constant 0 : index
    %c0_6 = arith.constant 0 : index
    %c0_7 = arith.constant 0 : index
    %10 = vector.load %arg3[%c0_5, %c0_6, %c0_7] : memref<1x8x128xf32, #tpu.memory_space<vmem>>, vector<1x8x128xf32>
    %11 = vector.shape_cast %10 : vector<1x8x128xf32> to vector<8x128xf32>
    %12 = vector.shape_cast %9 : vector<8x128xf32> to vector<1x8x128xf32>
    tpu.vector_store %arg3[%c0_5, %c0_6, %c0_7], %12 {strides = array<i32>} : memref<1x8x128xf32, #tpu.memory_space<vmem>>, vector<1x8x128xf32>,
    return
  }
  func.func @transform_0(%arg0: i32) -> (i32, i32, i32) {
    %c0_i32 = arith.constant 0 : i32
    %c0_i32_0 = arith.constant 0 : i32
    %c0_i32_1 = arith.constant 0 : i32
    return %arg0, %c0_i32, %c0_i32_0 : i32, i32, i32
  }
  func.func @transform_1(%arg0: i32) -> (i32, i32, i32) {
    %c2_i32 = arith.constant 2 : i32
    %0 = arith.addi %arg0, %c2_i32 : i32
    %c0_i32 = arith.constant 0 : i32
    %c0_i32_0 = arith.constant 0 : i32
    %c0_i32_1 = arith.constant 0 : i32
    return %0, %c0_i32, %c0_i32_0 : i32, i32, i32
  }
  func.func @transform_2(%arg0: i32) -> (i32, i32, i32) {
    %c0_i32 = arith.constant 0 : i32
    %c0_i32_0 = arith.constant 0 : i32
    %c0_i32_1 = arith.constant 0 : i32
    return %arg0, %c0_i32, %c0_i32_0 : i32, i32, i32
  }
}

module attributes {stable_mosaic.version = 11 : i64} {
  func.func @kernel(%arg0: i32, %arg1: memref<1x1x12x12x128xbf16, #tpu.memory_space<vmem>>, %arg2: memref<9x128x128xbf16, #tpu.memory_space<vmem>>, %arg3: memref<1x128xf32, #tpu.memory_space<vmem>>, %arg4: memref<1x64x128xbf16, #tpu.memory_space<vmem>>) attributes {dimension_semantics = [#tpu.dimension_semantics<parallel>], iteration_bounds = array<i64: 4>, scalar_prefetch = 0 : i64, scratch_operands = 0 : i64, tpu.core_type = #tpu.core_type<tc>, window_params = [{transform_indices = @transform_0, window_bounds = array<i64: 1, 1, 12, 12, 128>}, {pipeline_mode = #tpu.pipeline_mode<synchronous>, transform_indices = @transform_1, window_bounds = array<i64: 9, 128, 128>}, {pipeline_mode = #tpu.pipeline_mode<synchronous>, transform_indices = @transform_2, window_bounds = array<i64: 1, 128>}, {transform_indices = @transform_3, window_bounds = array<i64: 1, 64, 128>}]} {
    %cst = arith.constant 0.000000e+00 : f32
    %0 = vector.broadcast %cst : f32 to vector<64x128xf32>
    %c0 = arith.constant 0 : index
    %c0_0 = arith.constant 0 : index
    %c0_1 = arith.constant 0 : index
    %c0_2 = arith.constant 0 : index
    %c0_3 = arith.constant 0 : index
    %1 = vector.load %arg1[%c0, %c0_0, %c0_1, %c0_2, %c0_3] : memref<1x1x12x12x128xbf16, #tpu.memory_space<vmem>>, vector<1x1x8x8x128xbf16>
    %2 = vector.shape_cast %1 : vector<1x1x8x8x128xbf16> to vector<8x8x128xbf16>
    %3 = vector.shape_cast %2 : vector<8x8x128xbf16> to vector<64x128xbf16>
    %c0_4 = arith.constant 0 : index
    %c0_5 = arith.constant 0 : index
    %c0_6 = arith.constant 0 : index
    %4 = vector.load %arg2[%c0_4, %c0_5, %c0_6] : memref<9x128x128xbf16, #tpu.memory_space<vmem>>, vector<1x128x128xbf16>
    %5 = vector.shape_cast %4 : vector<1x128x128xbf16> to vector<128x128xbf16>
    %cst_7 = arith.constant dense<0.000000e+00> : vector<64x128xf32>
    %6 = tpu.matmul %3, %5, %cst_7 {dimension_numbers = #tpu.dot_dimension_numbers<[1], [0], [0], [1], [0, 0, 1, 1], [], []>} : vector<64x128xbf16>, vector<128x128xbf16>, vector<64x128xf32> -> vector<64x128xf32>
    %7 = arith.addf %0, %6 : vector<64x128xf32>
    %c0_8 = arith.constant 0 : index
    %c0_9 = arith.constant 0 : index
    %c0_10 = arith.constant 0 : index
    %c2 = arith.constant 2 : index
    %c0_11 = arith.constant 0 : index
    %8 = vector.load %arg1[%c0_8, %c0_9, %c0_10, %c2, %c0_11] : memref<1x1x12x12x128xbf16, #tpu.memory_space<vmem>>, vector<1x1x8x8x128xbf16>
    %9 = vector.shape_cast %8 : vector<1x1x8x8x128xbf16> to vector<8x8x128xbf16>
    %10 = vector.shape_cast %9 : vector<8x8x128xbf16> to vector<64x128xbf16>
    %c1 = arith.constant 1 : index
    %c0_12 = arith.constant 0 : index
    %c0_13 = arith.constant 0 : index
    %11 = vector.load %arg2[%c1, %c0_12, %c0_13] : memref<9x128x128xbf16, #tpu.memory_space<vmem>>, vector<1x128x128xbf16>
    %12 = vector.shape_cast %11 : vector<1x128x128xbf16> to vector<128x128xbf16>
    %cst_14 = arith.constant dense<0.000000e+00> : vector<64x128xf32>
    %13 = tpu.matmul %10, %12, %cst_14 {dimension_numbers = #tpu.dot_dimension_numbers<[1], [0], [0], [1], [0, 0, 1, 1], [], []>} : vector<64x128xbf16>, vector<128x128xbf16>, vector<64x128xf32> -> vector<64x128xf32>
    %14 = arith.addf %7, %13 : vector<64x128xf32>
    %c0_15 = arith.constant 0 : index
    %c0_16 = arith.constant 0 : index
    %c0_17 = arith.constant 0 : index
    %c4 = arith.constant 4 : index
    %c0_18 = arith.constant 0 : index
    %15 = vector.load %arg1[%c0_15, %c0_16, %c0_17, %c4, %c0_18] : memref<1x1x12x12x128xbf16, #tpu.memory_space<vmem>>, vector<1x1x8x8x128xbf16>
    %16 = vector.shape_cast %15 : vector<1x1x8x8x128xbf16> to vector<8x8x128xbf16>
    %17 = vector.shape_cast %16 : vector<8x8x128xbf16> to vector<64x128xbf16>
    %c2_19 = arith.constant 2 : index
    %c0_20 = arith.constant 0 : index
    %c0_21 = arith.constant 0 : index
    %18 = vector.load %arg2[%c2_19, %c0_20, %c0_21] : memref<9x128x128xbf16, #tpu.memory_space<vmem>>, vector<1x128x128xbf16>
    %19 = vector.shape_cast %18 : vector<1x128x128xbf16> to vector<128x128xbf16>
    %cst_22 = arith.constant dense<0.000000e+00> : vector<64x128xf32>
    %20 = tpu.matmul %17, %19, %cst_22 {dimension_numbers = #tpu.dot_dimension_numbers<[1], [0], [0], [1], [0, 0, 1, 1], [], []>} : vector<64x128xbf16>, vector<128x128xbf16>, vector<64x128xf32> -> vector<64x128xf32>
    %21 = arith.addf %14, %20 : vector<64x128xf32>
    %c0_23 = arith.constant 0 : index
    %c0_24 = arith.constant 0 : index
    %c2_25 = arith.constant 2 : index
    %c0_26 = arith.constant 0 : index
    %c0_27 = arith.constant 0 : index
    %22 = vector.load %arg1[%c0_23, %c0_24, %c2_25, %c0_26, %c0_27] : memref<1x1x12x12x128xbf16, #tpu.memory_space<vmem>>, vector<1x1x8x8x128xbf16>
    %23 = vector.shape_cast %22 : vector<1x1x8x8x128xbf16> to vector<8x8x128xbf16>
    %24 = vector.shape_cast %23 : vector<8x8x128xbf16> to vector<64x128xbf16>
    %c3 = arith.constant 3 : index
    %c0_28 = arith.constant 0 : index
    %c0_29 = arith.constant 0 : index
    %25 = vector.load %arg2[%c3, %c0_28, %c0_29] : memref<9x128x128xbf16, #tpu.memory_space<vmem>>, vector<1x128x128xbf16>
    %26 = vector.shape_cast %25 : vector<1x128x128xbf16> to vector<128x128xbf16>
    %cst_30 = arith.constant dense<0.000000e+00> : vector<64x128xf32>
    %27 = tpu.matmul %24, %26, %cst_30 {dimension_numbers = #tpu.dot_dimension_numbers<[1], [0], [0], [1], [0, 0, 1, 1], [], []>} : vector<64x128xbf16>, vector<128x128xbf16>, vector<64x128xf32> -> vector<64x128xf32>
    %28 = arith.addf %21, %27 : vector<64x128xf32>
    %c0_31 = arith.constant 0 : index
    %c0_32 = arith.constant 0 : index
    %c2_33 = arith.constant 2 : index
    %c2_34 = arith.constant 2 : index
    %c0_35 = arith.constant 0 : index
    %29 = vector.load %arg1[%c0_31, %c0_32, %c2_33, %c2_34, %c0_35] : memref<1x1x12x12x128xbf16, #tpu.memory_space<vmem>>, vector<1x1x8x8x128xbf16>
    %30 = vector.shape_cast %29 : vector<1x1x8x8x128xbf16> to vector<8x8x128xbf16>
    %31 = vector.shape_cast %30 : vector<8x8x128xbf16> to vector<64x128xbf16>
    %c4_36 = arith.constant 4 : index
    %c0_37 = arith.constant 0 : index
    %c0_38 = arith.constant 0 : index
    %32 = vector.load %arg2[%c4_36, %c0_37, %c0_38] : memref<9x128x128xbf16, #tpu.memory_space<vmem>>, vector<1x128x128xbf16>
    %33 = vector.shape_cast %32 : vector<1x128x128xbf16> to vector<128x128xbf16>
    %cst_39 = arith.constant dense<0.000000e+00> : vector<64x128xf32>
    %34 = tpu.matmul %31, %33, %cst_39 {dimension_numbers = #tpu.dot_dimension_numbers<[1], [0], [0], [1], [0, 0, 1, 1], [], []>} : vector<64x128xbf16>, vector<128x128xbf16>, vector<64x128xf32> -> vector<64x128xf32>
    %35 = arith.addf %28, %34 : vector<64x128xf32>
    %c0_40 = arith.constant 0 : index
    %c0_41 = arith.constant 0 : index
    %c2_42 = arith.constant 2 : index
    %c4_43 = arith.constant 4 : index
    %c0_44 = arith.constant 0 : index
    %36 = vector.load %arg1[%c0_40, %c0_41, %c2_42, %c4_43, %c0_44] : memref<1x1x12x12x128xbf16, #tpu.memory_space<vmem>>, vector<1x1x8x8x128xbf16>
    %37 = vector.shape_cast %36 : vector<1x1x8x8x128xbf16> to vector<8x8x128xbf16>
    %38 = vector.shape_cast %37 : vector<8x8x128xbf16> to vector<64x128xbf16>
    %c5 = arith.constant 5 : index
    %c0_45 = arith.constant 0 : index
    %c0_46 = arith.constant 0 : index
    %39 = vector.load %arg2[%c5, %c0_45, %c0_46] : memref<9x128x128xbf16, #tpu.memory_space<vmem>>, vector<1x128x128xbf16>
    %40 = vector.shape_cast %39 : vector<1x128x128xbf16> to vector<128x128xbf16>
    %cst_47 = arith.constant dense<0.000000e+00> : vector<64x128xf32>
    %41 = tpu.matmul %38, %40, %cst_47 {dimension_numbers = #tpu.dot_dimension_numbers<[1], [0], [0], [1], [0, 0, 1, 1], [], []>} : vector<64x128xbf16>, vector<128x128xbf16>, vector<64x128xf32> -> vector<64x128xf32>
    %42 = arith.addf %35, %41 : vector<64x128xf32>
    %c0_48 = arith.constant 0 : index
    %c0_49 = arith.constant 0 : index
    %c4_50 = arith.constant 4 : index
    %c0_51 = arith.constant 0 : index
    %c0_52 = arith.constant 0 : index
    %43 = vector.load %arg1[%c0_48, %c0_49, %c4_50, %c0_51, %c0_52] : memref<1x1x12x12x128xbf16, #tpu.memory_space<vmem>>, vector<1x1x8x8x128xbf16>
    %44 = vector.shape_cast %43 : vector<1x1x8x8x128xbf16> to vector<8x8x128xbf16>
    %45 = vector.shape_cast %44 : vector<8x8x128xbf16> to vector<64x128xbf16>
    %c6 = arith.constant 6 : index
    %c0_53 = arith.constant 0 : index
    %c0_54 = arith.constant 0 : index
    %46 = vector.load %arg2[%c6, %c0_53, %c0_54] : memref<9x128x128xbf16, #tpu.memory_space<vmem>>, vector<1x128x128xbf16>
    %47 = vector.shape_cast %46 : vector<1x128x128xbf16> to vector<128x128xbf16>
    %cst_55 = arith.constant dense<0.000000e+00> : vector<64x128xf32>
    %48 = tpu.matmul %45, %47, %cst_55 {dimension_numbers = #tpu.dot_dimension_numbers<[1], [0], [0], [1], [0, 0, 1, 1], [], []>} : vector<64x128xbf16>, vector<128x128xbf16>, vector<64x128xf32> -> vector<64x128xf32>
    %49 = arith.addf %42, %48 : vector<64x128xf32>
    %c0_56 = arith.constant 0 : index
    %c0_57 = arith.constant 0 : index
    %c4_58 = arith.constant 4 : index
    %c2_59 = arith.constant 2 : index
    %c0_60 = arith.constant 0 : index
    %50 = vector.load %arg1[%c0_56, %c0_57, %c4_58, %c2_59, %c0_60] : memref<1x1x12x12x128xbf16, #tpu.memory_space<vmem>>, vector<1x1x8x8x128xbf16>
    %51 = vector.shape_cast %50 : vector<1x1x8x8x128xbf16> to vector<8x8x128xbf16>
    %52 = vector.shape_cast %51 : vector<8x8x128xbf16> to vector<64x128xbf16>
    %c7 = arith.constant 7 : index
    %c0_61 = arith.constant 0 : index
    %c0_62 = arith.constant 0 : index
    %53 = vector.load %arg2[%c7, %c0_61, %c0_62] : memref<9x128x128xbf16, #tpu.memory_space<vmem>>, vector<1x128x128xbf16>
    %54 = vector.shape_cast %53 : vector<1x128x128xbf16> to vector<128x128xbf16>
    %cst_63 = arith.constant dense<0.000000e+00> : vector<64x128xf32>
    %55 = tpu.matmul %52, %54, %cst_63 {dimension_numbers = #tpu.dot_dimension_numbers<[1], [0], [0], [1], [0, 0, 1, 1], [], []>} : vector<64x128xbf16>, vector<128x128xbf16>, vector<64x128xf32> -> vector<64x128xf32>
    %56 = arith.addf %49, %55 : vector<64x128xf32>
    %c0_64 = arith.constant 0 : index
    %c0_65 = arith.constant 0 : index
    %c4_66 = arith.constant 4 : index
    %c4_67 = arith.constant 4 : index
    %c0_68 = arith.constant 0 : index
    %57 = vector.load %arg1[%c0_64, %c0_65, %c4_66, %c4_67, %c0_68] : memref<1x1x12x12x128xbf16, #tpu.memory_space<vmem>>, vector<1x1x8x8x128xbf16>
    %58 = vector.shape_cast %57 : vector<1x1x8x8x128xbf16> to vector<8x8x128xbf16>
    %59 = vector.shape_cast %58 : vector<8x8x128xbf16> to vector<64x128xbf16>
    %c8 = arith.constant 8 : index
    %c0_69 = arith.constant 0 : index
    %c0_70 = arith.constant 0 : index
    %60 = vector.load %arg2[%c8, %c0_69, %c0_70] : memref<9x128x128xbf16, #tpu.memory_space<vmem>>, vector<1x128x128xbf16>
    %61 = vector.shape_cast %60 : vector<1x128x128xbf16> to vector<128x128xbf16>
    %cst_71 = arith.constant dense<0.000000e+00> : vector<64x128xf32>
    %62 = tpu.matmul %59, %61, %cst_71 {dimension_numbers = #tpu.dot_dimension_numbers<[1], [0], [0], [1], [0, 0, 1, 1], [], []>} : vector<64x128xbf16>, vector<128x128xbf16>, vector<64x128xf32> -> vector<64x128xf32>
    %63 = arith.addf %56, %62 : vector<64x128xf32>
    %c0_72 = arith.constant 0 : index
    %c0_73 = arith.constant 0 : index
    %64 = vector.load %arg3[%c0_72, %c0_73] : memref<1x128xf32, #tpu.memory_space<vmem>>, vector<1x128xf32>
    %65 = vector.broadcast %64 : vector<1x128xf32> to vector<64x128xf32>
    %66 = arith.addf %63, %65 : vector<64x128xf32>
    %cst_74 = arith.constant 0.000000e+00 : f32
    %67 = vector.broadcast %cst_74 : f32 to vector<64x128xf32>
    %68 = arith.maximumf %66, %67 : vector<64x128xf32>
    %69 = arith.truncf %68 : vector<64x128xf32> to vector<64x128xbf16>
    %c0_75 = arith.constant 0 : index
    %c0_76 = arith.constant 0 : index
    %c0_77 = arith.constant 0 : index
    %70 = vector.load %arg4[%c0_75, %c0_76, %c0_77] : memref<1x64x128xbf16, #tpu.memory_space<vmem>>, vector<1x64x128xbf16>
    %71 = vector.shape_cast %70 : vector<1x64x128xbf16> to vector<64x128xbf16>
    %72 = vector.shape_cast %69 : vector<64x128xbf16> to vector<1x64x128xbf16>
    tpu.vector_store %arg4[%c0_75, %c0_76, %c0_77], %72 {strides = array<i32>} : memref<1x64x128xbf16, #tpu.memory_space<vmem>>, vector<1x64x128xbf16>,
    return
  }
  func.func @transform_0(%arg0: i32) -> (i32, i32, i32, i32, i32) {
    %c0_i32 = arith.constant 0 : i32
    %c0_i32_0 = arith.constant 0 : i32
    %c0_i32_1 = arith.constant 0 : i32
    %c0_i32_2 = arith.constant 0 : i32
    %c0_i32_3 = arith.constant 0 : i32
    return %arg0, %c0_i32, %c0_i32_0, %c0_i32_1, %c0_i32_2 : i32, i32, i32, i32, i32
  }
  func.func @transform_1(%arg0: i32) -> (i32, i32, i32) {
    %c0_i32 = arith.constant 0 : i32
    %c0_i32_0 = arith.constant 0 : i32
    %c0_i32_1 = arith.constant 0 : i32
    %c0_i32_2 = arith.constant 0 : i32
    return %c0_i32, %c0_i32_0, %c0_i32_1 : i32, i32, i32
  }
  func.func @transform_2(%arg0: i32) -> (i32, i32) {
    %c0_i32 = arith.constant 0 : i32
    %c0_i32_0 = arith.constant 0 : i32
    %c0_i32_1 = arith.constant 0 : i32
    return %c0_i32, %c0_i32_0 : i32, i32
  }
  func.func @transform_3(%arg0: i32) -> (i32, i32, i32) {
    %c0_i32 = arith.constant 0 : i32
    %c0_i32_0 = arith.constant 0 : i32
    %c0_i32_1 = arith.constant 0 : i32
    return %arg0, %c0_i32, %c0_i32_0 : i32, i32, i32
  }
}

module attributes {stable_mosaic.version = 11 : i64} {
  func.func @kernel(%arg0: i32, %arg1: memref<1x1x16x16x128xbf16, #tpu.memory_space<vmem>>, %arg2: memref<9x128x128xbf16, #tpu.memory_space<vmem>>, %arg3: memref<1x128xf32, #tpu.memory_space<vmem>>, %arg4: memref<1x64x128xbf16, #tpu.memory_space<vmem>>) attributes {dimension_semantics = [#tpu.dimension_semantics<parallel>], iteration_bounds = array<i64: 4>, scalar_prefetch = 0 : i64, scratch_operands = 0 : i64, tpu.core_type = #tpu.core_type<tc>, window_params = [{transform_indices = @transform_0, window_bounds = array<i64: 1, 1, 16, 16, 128>}, {pipeline_mode = #tpu.pipeline_mode<synchronous>, transform_indices = @transform_1, window_bounds = array<i64: 9, 128, 128>}, {pipeline_mode = #tpu.pipeline_mode<synchronous>, transform_indices = @transform_2, window_bounds = array<i64: 1, 128>}, {transform_indices = @transform_3, window_bounds = array<i64: 1, 64, 128>}]} {
    %cst = arith.constant 0.000000e+00 : f32
    %0 = vector.broadcast %cst : f32 to vector<64x128xf32>
    %c0 = arith.constant 0 : index
    %c0_0 = arith.constant 0 : index
    %c0_1 = arith.constant 0 : index
    %c0_2 = arith.constant 0 : index
    %c0_3 = arith.constant 0 : index
    %1 = vector.load %arg1[%c0, %c0_0, %c0_1, %c0_2, %c0_3] : memref<1x1x16x16x128xbf16, #tpu.memory_space<vmem>>, vector<1x1x8x8x128xbf16>
    %2 = vector.shape_cast %1 : vector<1x1x8x8x128xbf16> to vector<8x8x128xbf16>
    %3 = vector.shape_cast %2 : vector<8x8x128xbf16> to vector<64x128xbf16>
    %c0_4 = arith.constant 0 : index
    %c0_5 = arith.constant 0 : index
    %c0_6 = arith.constant 0 : index
    %4 = vector.load %arg2[%c0_4, %c0_5, %c0_6] : memref<9x128x128xbf16, #tpu.memory_space<vmem>>, vector<1x128x128xbf16>
    %5 = vector.shape_cast %4 : vector<1x128x128xbf16> to vector<128x128xbf16>
    %cst_7 = arith.constant dense<0.000000e+00> : vector<64x128xf32>
    %6 = tpu.matmul %3, %5, %cst_7 {dimension_numbers = #tpu.dot_dimension_numbers<[1], [0], [0], [1], [0, 0, 1, 1], [], []>} : vector<64x128xbf16>, vector<128x128xbf16>, vector<64x128xf32> -> vector<64x128xf32>
    %7 = arith.addf %0, %6 : vector<64x128xf32>
    %c0_8 = arith.constant 0 : index
    %c0_9 = arith.constant 0 : index
    %c0_10 = arith.constant 0 : index
    %c4 = arith.constant 4 : index
    %c0_11 = arith.constant 0 : index
    %8 = vector.load %arg1[%c0_8, %c0_9, %c0_10, %c4, %c0_11] : memref<1x1x16x16x128xbf16, #tpu.memory_space<vmem>>, vector<1x1x8x8x128xbf16>
    %9 = vector.shape_cast %8 : vector<1x1x8x8x128xbf16> to vector<8x8x128xbf16>
    %10 = vector.shape_cast %9 : vector<8x8x128xbf16> to vector<64x128xbf16>
    %c1 = arith.constant 1 : index
    %c0_12 = arith.constant 0 : index
    %c0_13 = arith.constant 0 : index
    %11 = vector.load %arg2[%c1, %c0_12, %c0_13] : memref<9x128x128xbf16, #tpu.memory_space<vmem>>, vector<1x128x128xbf16>
    %12 = vector.shape_cast %11 : vector<1x128x128xbf16> to vector<128x128xbf16>
    %cst_14 = arith.constant dense<0.000000e+00> : vector<64x128xf32>
    %13 = tpu.matmul %10, %12, %cst_14 {dimension_numbers = #tpu.dot_dimension_numbers<[1], [0], [0], [1], [0, 0, 1, 1], [], []>} : vector<64x128xbf16>, vector<128x128xbf16>, vector<64x128xf32> -> vector<64x128xf32>
    %14 = arith.addf %7, %13 : vector<64x128xf32>
    %c0_15 = arith.constant 0 : index
    %c0_16 = arith.constant 0 : index
    %c0_17 = arith.constant 0 : index
    %c8 = arith.constant 8 : index
    %c0_18 = arith.constant 0 : index
    %15 = vector.load %arg1[%c0_15, %c0_16, %c0_17, %c8, %c0_18] : memref<1x1x16x16x128xbf16, #tpu.memory_space<vmem>>, vector<1x1x8x8x128xbf16>
    %16 = vector.shape_cast %15 : vector<1x1x8x8x128xbf16> to vector<8x8x128xbf16>
    %17 = vector.shape_cast %16 : vector<8x8x128xbf16> to vector<64x128xbf16>
    %c2 = arith.constant 2 : index
    %c0_19 = arith.constant 0 : index
    %c0_20 = arith.constant 0 : index
    %18 = vector.load %arg2[%c2, %c0_19, %c0_20] : memref<9x128x128xbf16, #tpu.memory_space<vmem>>, vector<1x128x128xbf16>
    %19 = vector.shape_cast %18 : vector<1x128x128xbf16> to vector<128x128xbf16>
    %cst_21 = arith.constant dense<0.000000e+00> : vector<64x128xf32>
    %20 = tpu.matmul %17, %19, %cst_21 {dimension_numbers = #tpu.dot_dimension_numbers<[1], [0], [0], [1], [0, 0, 1, 1], [], []>} : vector<64x128xbf16>, vector<128x128xbf16>, vector<64x128xf32> -> vector<64x128xf32>
    %21 = arith.addf %14, %20 : vector<64x128xf32>
    %c0_22 = arith.constant 0 : index
    %c0_23 = arith.constant 0 : index
    %c4_24 = arith.constant 4 : index
    %c0_25 = arith.constant 0 : index
    %c0_26 = arith.constant 0 : index
    %22 = vector.load %arg1[%c0_22, %c0_23, %c4_24, %c0_25, %c0_26] : memref<1x1x16x16x128xbf16, #tpu.memory_space<vmem>>, vector<1x1x8x8x128xbf16>
    %23 = vector.shape_cast %22 : vector<1x1x8x8x128xbf16> to vector<8x8x128xbf16>
    %24 = vector.shape_cast %23 : vector<8x8x128xbf16> to vector<64x128xbf16>
    %c3 = arith.constant 3 : index
    %c0_27 = arith.constant 0 : index
    %c0_28 = arith.constant 0 : index
    %25 = vector.load %arg2[%c3, %c0_27, %c0_28] : memref<9x128x128xbf16, #tpu.memory_space<vmem>>, vector<1x128x128xbf16>
    %26 = vector.shape_cast %25 : vector<1x128x128xbf16> to vector<128x128xbf16>
    %cst_29 = arith.constant dense<0.000000e+00> : vector<64x128xf32>
    %27 = tpu.matmul %24, %26, %cst_29 {dimension_numbers = #tpu.dot_dimension_numbers<[1], [0], [0], [1], [0, 0, 1, 1], [], []>} : vector<64x128xbf16>, vector<128x128xbf16>, vector<64x128xf32> -> vector<64x128xf32>
    %28 = arith.addf %21, %27 : vector<64x128xf32>
    %c0_30 = arith.constant 0 : index
    %c0_31 = arith.constant 0 : index
    %c4_32 = arith.constant 4 : index
    %c4_33 = arith.constant 4 : index
    %c0_34 = arith.constant 0 : index
    %29 = vector.load %arg1[%c0_30, %c0_31, %c4_32, %c4_33, %c0_34] : memref<1x1x16x16x128xbf16, #tpu.memory_space<vmem>>, vector<1x1x8x8x128xbf16>
    %30 = vector.shape_cast %29 : vector<1x1x8x8x128xbf16> to vector<8x8x128xbf16>
    %31 = vector.shape_cast %30 : vector<8x8x128xbf16> to vector<64x128xbf16>
    %c4_35 = arith.constant 4 : index
    %c0_36 = arith.constant 0 : index
    %c0_37 = arith.constant 0 : index
    %32 = vector.load %arg2[%c4_35, %c0_36, %c0_37] : memref<9x128x128xbf16, #tpu.memory_space<vmem>>, vector<1x128x128xbf16>
    %33 = vector.shape_cast %32 : vector<1x128x128xbf16> to vector<128x128xbf16>
    %cst_38 = arith.constant dense<0.000000e+00> : vector<64x128xf32>
    %34 = tpu.matmul %31, %33, %cst_38 {dimension_numbers = #tpu.dot_dimension_numbers<[1], [0], [0], [1], [0, 0, 1, 1], [], []>} : vector<64x128xbf16>, vector<128x128xbf16>, vector<64x128xf32> -> vector<64x128xf32>
    %35 = arith.addf %28, %34 : vector<64x128xf32>
    %c0_39 = arith.constant 0 : index
    %c0_40 = arith.constant 0 : index
    %c4_41 = arith.constant 4 : index
    %c8_42 = arith.constant 8 : index
    %c0_43 = arith.constant 0 : index
    %36 = vector.load %arg1[%c0_39, %c0_40, %c4_41, %c8_42, %c0_43] : memref<1x1x16x16x128xbf16, #tpu.memory_space<vmem>>, vector<1x1x8x8x128xbf16>
    %37 = vector.shape_cast %36 : vector<1x1x8x8x128xbf16> to vector<8x8x128xbf16>
    %38 = vector.shape_cast %37 : vector<8x8x128xbf16> to vector<64x128xbf16>
    %c5 = arith.constant 5 : index
    %c0_44 = arith.constant 0 : index
    %c0_45 = arith.constant 0 : index
    %39 = vector.load %arg2[%c5, %c0_44, %c0_45] : memref<9x128x128xbf16, #tpu.memory_space<vmem>>, vector<1x128x128xbf16>
    %40 = vector.shape_cast %39 : vector<1x128x128xbf16> to vector<128x128xbf16>
    %cst_46 = arith.constant dense<0.000000e+00> : vector<64x128xf32>
    %41 = tpu.matmul %38, %40, %cst_46 {dimension_numbers = #tpu.dot_dimension_numbers<[1], [0], [0], [1], [0, 0, 1, 1], [], []>} : vector<64x128xbf16>, vector<128x128xbf16>, vector<64x128xf32> -> vector<64x128xf32>
    %42 = arith.addf %35, %41 : vector<64x128xf32>
    %c0_47 = arith.constant 0 : index
    %c0_48 = arith.constant 0 : index
    %c8_49 = arith.constant 8 : index
    %c0_50 = arith.constant 0 : index
    %c0_51 = arith.constant 0 : index
    %43 = vector.load %arg1[%c0_47, %c0_48, %c8_49, %c0_50, %c0_51] : memref<1x1x16x16x128xbf16, #tpu.memory_space<vmem>>, vector<1x1x8x8x128xbf16>
    %44 = vector.shape_cast %43 : vector<1x1x8x8x128xbf16> to vector<8x8x128xbf16>
    %45 = vector.shape_cast %44 : vector<8x8x128xbf16> to vector<64x128xbf16>
    %c6 = arith.constant 6 : index
    %c0_52 = arith.constant 0 : index
    %c0_53 = arith.constant 0 : index
    %46 = vector.load %arg2[%c6, %c0_52, %c0_53] : memref<9x128x128xbf16, #tpu.memory_space<vmem>>, vector<1x128x128xbf16>
    %47 = vector.shape_cast %46 : vector<1x128x128xbf16> to vector<128x128xbf16>
    %cst_54 = arith.constant dense<0.000000e+00> : vector<64x128xf32>
    %48 = tpu.matmul %45, %47, %cst_54 {dimension_numbers = #tpu.dot_dimension_numbers<[1], [0], [0], [1], [0, 0, 1, 1], [], []>} : vector<64x128xbf16>, vector<128x128xbf16>, vector<64x128xf32> -> vector<64x128xf32>
    %49 = arith.addf %42, %48 : vector<64x128xf32>
    %c0_55 = arith.constant 0 : index
    %c0_56 = arith.constant 0 : index
    %c8_57 = arith.constant 8 : index
    %c4_58 = arith.constant 4 : index
    %c0_59 = arith.constant 0 : index
    %50 = vector.load %arg1[%c0_55, %c0_56, %c8_57, %c4_58, %c0_59] : memref<1x1x16x16x128xbf16, #tpu.memory_space<vmem>>, vector<1x1x8x8x128xbf16>
    %51 = vector.shape_cast %50 : vector<1x1x8x8x128xbf16> to vector<8x8x128xbf16>
    %52 = vector.shape_cast %51 : vector<8x8x128xbf16> to vector<64x128xbf16>
    %c7 = arith.constant 7 : index
    %c0_60 = arith.constant 0 : index
    %c0_61 = arith.constant 0 : index
    %53 = vector.load %arg2[%c7, %c0_60, %c0_61] : memref<9x128x128xbf16, #tpu.memory_space<vmem>>, vector<1x128x128xbf16>
    %54 = vector.shape_cast %53 : vector<1x128x128xbf16> to vector<128x128xbf16>
    %cst_62 = arith.constant dense<0.000000e+00> : vector<64x128xf32>
    %55 = tpu.matmul %52, %54, %cst_62 {dimension_numbers = #tpu.dot_dimension_numbers<[1], [0], [0], [1], [0, 0, 1, 1], [], []>} : vector<64x128xbf16>, vector<128x128xbf16>, vector<64x128xf32> -> vector<64x128xf32>
    %56 = arith.addf %49, %55 : vector<64x128xf32>
    %c0_63 = arith.constant 0 : index
    %c0_64 = arith.constant 0 : index
    %c8_65 = arith.constant 8 : index
    %c8_66 = arith.constant 8 : index
    %c0_67 = arith.constant 0 : index
    %57 = vector.load %arg1[%c0_63, %c0_64, %c8_65, %c8_66, %c0_67] : memref<1x1x16x16x128xbf16, #tpu.memory_space<vmem>>, vector<1x1x8x8x128xbf16>
    %58 = vector.shape_cast %57 : vector<1x1x8x8x128xbf16> to vector<8x8x128xbf16>
    %59 = vector.shape_cast %58 : vector<8x8x128xbf16> to vector<64x128xbf16>
    %c8_68 = arith.constant 8 : index
    %c0_69 = arith.constant 0 : index
    %c0_70 = arith.constant 0 : index
    %60 = vector.load %arg2[%c8_68, %c0_69, %c0_70] : memref<9x128x128xbf16, #tpu.memory_space<vmem>>, vector<1x128x128xbf16>
    %61 = vector.shape_cast %60 : vector<1x128x128xbf16> to vector<128x128xbf16>
    %cst_71 = arith.constant dense<0.000000e+00> : vector<64x128xf32>
    %62 = tpu.matmul %59, %61, %cst_71 {dimension_numbers = #tpu.dot_dimension_numbers<[1], [0], [0], [1], [0, 0, 1, 1], [], []>} : vector<64x128xbf16>, vector<128x128xbf16>, vector<64x128xf32> -> vector<64x128xf32>
    %63 = arith.addf %56, %62 : vector<64x128xf32>
    %c0_72 = arith.constant 0 : index
    %c0_73 = arith.constant 0 : index
    %64 = vector.load %arg3[%c0_72, %c0_73] : memref<1x128xf32, #tpu.memory_space<vmem>>, vector<1x128xf32>
    %65 = vector.broadcast %64 : vector<1x128xf32> to vector<64x128xf32>
    %66 = arith.addf %63, %65 : vector<64x128xf32>
    %cst_74 = arith.constant 0.000000e+00 : f32
    %67 = vector.broadcast %cst_74 : f32 to vector<64x128xf32>
    %68 = arith.maximumf %66, %67 : vector<64x128xf32>
    %69 = arith.truncf %68 : vector<64x128xf32> to vector<64x128xbf16>
    %c0_75 = arith.constant 0 : index
    %c0_76 = arith.constant 0 : index
    %c0_77 = arith.constant 0 : index
    %70 = vector.load %arg4[%c0_75, %c0_76, %c0_77] : memref<1x64x128xbf16, #tpu.memory_space<vmem>>, vector<1x64x128xbf16>
    %71 = vector.shape_cast %70 : vector<1x64x128xbf16> to vector<64x128xbf16>
    %72 = vector.shape_cast %69 : vector<64x128xbf16> to vector<1x64x128xbf16>
    tpu.vector_store %arg4[%c0_75, %c0_76, %c0_77], %72 {strides = array<i32>} : memref<1x64x128xbf16, #tpu.memory_space<vmem>>, vector<1x64x128xbf16>,
    return
  }
  func.func @transform_0(%arg0: i32) -> (i32, i32, i32, i32, i32) {
    %c0_i32 = arith.constant 0 : i32
    %c0_i32_0 = arith.constant 0 : i32
    %c0_i32_1 = arith.constant 0 : i32
    %c0_i32_2 = arith.constant 0 : i32
    %c0_i32_3 = arith.constant 0 : i32
    return %arg0, %c0_i32, %c0_i32_0, %c0_i32_1, %c0_i32_2 : i32, i32, i32, i32, i32
  }
  func.func @transform_1(%arg0: i32) -> (i32, i32, i32) {
    %c0_i32 = arith.constant 0 : i32
    %c0_i32_0 = arith.constant 0 : i32
    %c0_i32_1 = arith.constant 0 : i32
    %c0_i32_2 = arith.constant 0 : i32
    return %c0_i32, %c0_i32_0, %c0_i32_1 : i32, i32, i32
  }
  func.func @transform_2(%arg0: i32) -> (i32, i32) {
    %c0_i32 = arith.constant 0 : i32
    %c0_i32_0 = arith.constant 0 : i32
    %c0_i32_1 = arith.constant 0 : i32
    return %c0_i32, %c0_i32_0 : i32, i32
  }
  func.func @transform_3(%arg0: i32) -> (i32, i32, i32) {
    %c0_i32 = arith.constant 0 : i32
    %c0_i32_0 = arith.constant 0 : i32
    %c0_i32_1 = arith.constant 0 : i32
    return %arg0, %c0_i32, %c0_i32_0 : i32, i32, i32
  }
}

</mosaic_0001>

<bundles_post_ra>
// kernel: _lambda_.9
= control target key start
LH: loop header
LB: loop body
LE: loop exit
PB: predicated region body
PF: predicated region fallthrough
CT: control target
= control target key end

     0   :  { %s4960_s12 = smov 0   ;;  %s5998_s0 = inlined_call_operand.vmem [shape: f32[4,4,17,17,3], index: 0, kind: input, shape index: {}]   ;;  %s5999_s1 = inlined_call_operand.vmem [shape: bf16[9,3,128], index: 1, kind: input, shape index: {}]   ;;  %s6000_s2 = inlined_call_operand.vmem [shape: f32[1,128], index: 2, kind: input, shape index: {}]   ;;  %s6001_s3 = inlined_call_operand.vmem [shape: bf16[4,256,128], index: 3, kind: output, shape index: {}]  }
   0x1 LB: > { %s3625_s13 = sadd.s32 4294967295, %s4937_s12   ;;  %p3629_p0 = scmp.ge.s32.totalorder %s4937_s12, 1  ;;  %s4937_s12 = sphi %s4960_s12, %s13_s12  }
   0x2   : > { %p137_p1 = scmp.lt.s32.totalorder %s4937_s12, 5 }
   0x4   : > { %p138_p2 = pnand %p3629_p0, %p137_p1 }
   0x6   : > { %141 = sbr.rel (%p138_p2) target bundleno = 515 (0x203), region = 32 }
   0xb   : > { %v3729_v0 = vld [vmem:[%s5999_s1 + $0x2] sm:$0x3]  ;;  %vm449_vm0 = vcmask 1040384   ;;  %vm450_vm1 = vcmask 1041408   ;;  %p161_p3 = scmp.lt.s32.totalorder %s3625_s13, 3  ;;  %v4939_v1 = vmov 65535  }
   0xc   : > { %v451_v2 = vsel %vm449_vm0, 4294967295, %v4939_v1  ;;  %v284_v3 = vld [vmem:[%s5999_s1] sm:$0x3]  ;;  %v3794_v4 = vld [vmem:[%s5999_s1 + $0x4] sm:$0x3]  ;;  %vm400_vm2 = vcmask 23552  }
   0xd   : > { %v4977_v5 = vsel %vm450_vm1, %v451_v2, 0  ;;  %s6031_s13 = smov (!%p161_p3, %s3625_s13), 3  ;;  %v3875_v12 = vld [vmem:[%s5999_s1 + $0x6] sm:$0x3]  ;;  %v3956_v13 = vld [vmem:[%s5999_s1 + $0x8] sm:$0x3] }
   0xe   : > { %v454_v6 = vand.u32 %v3729_v0, %v4977_v5  ;;  %v4983_v7 = vand.u32 %v4977_v5, %v284_v3  ;;  %v992_v8 = vand.u32 %v3794_v4, %v4977_v5  ;;  %s4921_s20 = smul.u32 1632, %s6031_s13  ;;  %v5019_v45 = vand.u32 %v3875_v12, %v4977_v5  ;;  %s4332_s11 = sshll.u32 %s6031_s13, 7 }
   0xf   : > { %v5022_v46 = vand.u32 %v3956_v13, %v4977_v5  ;;  %s5901_s15 = scalar_lea.vmem %s6001_s3, %s4332_s11 }
  0x10   : > { %4919 = vmatprep.subr.bf16.mxu1 %v454_v6  ;;  %4613 = vmatprep.subr.bf16.mxu0 %v454_v6  ;;  %s4990_s23 = scalar_lea.vmem %s5998_s0, %s4921_s20 }
  0x11   : > { %4920 = vmatpush3.bf16.msra.mxu1 %v454_v6  ;;  %4614 = vmatpush3.bf16.msra.mxu0 %v454_v6  ;;  %v3665_v9 = vld [vmem:[%s4990_s23 + $0x198] sm:$0xff]  ;;  %v3666_v10 = vld [vmem:[%s4990_s23 + $0x1a0] sm:$0xff]  ;;  %v3667_v18 = vld [vmem:[%s4990_s23 + $0x1b0] sm:$0xff] }
  0x12   : > { %v3681_v11 = vld [vmem:[%s4990_s23 + $0x258] sm:$0xff]  ;;  %4647 = vmatprep.subr.bf16.mxu1 %v4983_v7  ;;  %4681 = vmatprep.subr.bf16.mxu0 %v992_v8  ;;  %v3697_v14 = vclamps-f32 %v3665_v9, 1.0  ;;  %v3698_v15 = vclamps-f32 %v3666_v10, 1.0  ;;  %v3682_v16 = vld [vmem:[%s4990_s23 + $0x260] sm:$0xff]  ;;  %v3699_v21 = vclamps-f32 %v3667_v18, 1.0  ;;  %v3683_v23 = vld [vmem:[%s4990_s23 + $0x270] sm:$0xff] }
  0x13   : > { %v3713_v17 = vclamps-f32 %v3681_v11, 1.0  ;;  %v3668_v19 = vld [vmem:[%s4990_s23 + $0x1b8] sm:$0xff]  ;;  %v3714_v20 = vclamps-f32 %v3682_v16, 1.0  ;;  %v3669_v25 = vld [vmem:[%s4990_s23 + $0x1c8] sm:$0xff]  ;;  %v3715_v27 = vclamps-f32 %v3683_v23, 1.0  ;;  %v3670_v29 = vld [vmem:[%s4990_s23 + $0x1d0] sm:$0xff] }
  0x14   : > { %v3700_v22 = vclamps-f32 %v3668_v19, 1.0  ;;  %v3684_v24 = vld [vmem:[%s4990_s23 + $0x278] sm:$0xff]  ;;  %v382_v26 = vpack.c.bf16 %v3698_v15, %v3697_v14  ;;  %v3701_v30 = vclamps-f32 %v3669_v25, 1.0  ;;  %v3685_v31 = vld [vmem:[%s4990_s23 + $0x288] sm:$0xff]  ;;  %v3686_v32 = vld [vmem:[%s4990_s23 + $0x290] sm:$0xff]  ;;  %v3702_v35 = vclamps-f32 %v3670_v29, 1.0 }
  0x15   : > { %v3716_v28 = vclamps-f32 %v3684_v24, 1.0  ;;  %v390_v33 = vpack.c.bf16 %v3714_v20, %v3713_v17  ;;  %v3717_v36 = vclamps-f32 %v3685_v31, 1.0  ;;  %v3671_v37 = vld [vmem:[%s4990_s23 + $0x1e0] sm:$0xff]  ;;  %v3672_v38 = vld [vmem:[%s4990_s23 + $0x1e8] sm:$0xff]  ;;  %v3718_v41 = vclamps-f32 %v3686_v32, 1.0  ;;  %v3673_v43 = vld [vmem:[%s4990_s23 + $0x1f8] sm:$0xff] }
  0x16   : > { %v383_v34 = vpack.c.bf16 %v3700_v22, %v3699_v21  ;;  %v3687_v39 = vld [vmem:[%s4990_s23 + $0x2a0] sm:$0xff]  ;;  %4615 = vmatprep.mubr.msk.bf16.mxu0 %vm400_vm2, %v382_v26  ;;  %v3688_v42 = vld [vmem:[%s4990_s23 + $0x2a8] sm:$0xff]  ;;  %v384_v47 = vpack.c.bf16 %v3702_v35, %v3701_v30  ;;  %v3703_v48 = vclamps-f32 %v3671_v37, 1.0  ;;  %v3704_v49 = vclamps-f32 %v3672_v38, 1.0  ;;  %v3689_v51 = vld [vmem:[%s4990_s23 + $0x2b8] sm:$0xff] }
  0x17   : > { %v391_v40 = vpack.c.bf16 %v3716_v28, %v3715_v27  ;;  %v3674_v44 = vld [vmem:[%s4990_s23 + $0x200] sm:$0xff]  ;;  %4631 = vmatprep.mubr.msk.bf16.mxu1 %vm400_vm2, %v390_v33  ;;  %v3719_v50 = vclamps-f32 %v3687_v39, 1.0  ;;  %v392_v53 = vpack.c.bf16 %v3718_v41, %v3717_v36  ;;  %v3720_v54 = vclamps-f32 %v3688_v42, 1.0  ;;  %v3675_v62 = vld [vmem:[%s4990_s23 + $0x210] sm:$0xff]  ;;  %v3676_v63 = vld [vmem:[%s4990_s23 + $0x218] sm:$0xff] }
  0x18   : > { %4616 = vmatmul.mubr.msk.bf16.vlgmr.msra.gmra.mxu0 %vm400_vm2, %v383_v34  ;;  %v3690_v52 = vld [vmem:[%s4990_s23 + $0x2c0] sm:$0xff]  ;;  %v3705_v55 = vclamps-f32 %v3673_v43, 1.0  ;;  %v3706_v56 = vclamps-f32 %v3674_v44, 1.0  ;;  %v3721_v57 = vclamps-f32 %v3689_v51, 1.0  ;;  %v385_v59 = vpack.c.bf16 %v3704_v49, %v3703_v48  ;;  %v3691_v0 = vld [vmem:[%s4990_s23 + $0x2d0] sm:$0xff]  ;;  %v3692_v2 = vld [vmem:[%s4990_s23 + $0x2d8] sm:$0xff] }
  0x19   : > { %4632 = vmatmul.mubr.msk.bf16.vlgmr.msra.gmra.mxu1 %vm400_vm2, %v391_v40  ;;  %4682 = vmatpush3.bf16.msra.mxu0 %v992_v8  ;;  %v3722_v58 = vclamps-f32 %v3690_v52, 1.0  ;;  %v393_v60 = vpack.c.bf16 %v3720_v54, %v3719_v50  ;;  %v3677_v3 = vld [vmem:[%s4990_s23 + $0x228] sm:$0xff]  ;;  %v3678_v4 = vld [vmem:[%s4990_s23 + $0x230] sm:$0xff]  ;;  %v3707_v8 = vclamps-f32 %v3675_v62, 1.0  ;;  %v3708_v9 = vclamps-f32 %v3676_v63, 1.0  ;;  %v3679_v19 = vld [vmem:[%s4990_s23 + $0x240] sm:$0xff] }
  0x1a   : > { %4648 = vmatpush3.bf16.msra.mxu1 %v4983_v7  ;;  %4619 = vmatprep.mubr.msk.bf16.mxu0 %vm400_vm2, %v384_v47  ;;  %v386_v61 = vpack.c.bf16 %v3706_v56, %v3705_v55  ;;  %v3693_v6 = vld [vmem:[%s4990_s23 + $0x2e8] sm:$0xff]  ;;  %v3694_v7 = vld [vmem:[%s4990_s23 + $0x2f0] sm:$0xff]  ;;  %v3723_v10 = vclamps-f32 %v3691_v0, 1.0  ;;  %v3724_v11 = vclamps-f32 %v3692_v2, 1.0  ;;  %v3709_v12 = vclamps-f32 %v3677_v3, 1.0  ;;  %v3695_v21 = vld [vmem:[%s4990_s23 + $0x300] sm:$0xff] }
  0x1b   : > { %4635 = vmatprep.mubr.msk.bf16.mxu1 %vm400_vm2, %v392_v53  ;;  %4715 = vmatprep.subr.bf16.mxu1 %v5019_v45  ;;  %v394_v1 = vpack.c.bf16 %v3722_v58, %v3721_v57  ;;  %v3710_v13 = vclamps-f32 %v3678_v4, 1.0  ;;  %v3725_v14 = vclamps-f32 %v3693_v6, 1.0  ;;  %v3726_v15 = vclamps-f32 %v3694_v7, 1.0  ;;  %v3680_v20 = vld [vmem:[%s4990_s23 + $0x248] sm:$0xff]  ;;  %v172_v26 = vld [vmem:[%s4990_s23] sm:$0xff]  ;;  %v174_v42 = vld [vmem:[%s4990_s23 + $0x18] sm:$0xff] }
  0x1c   : > { %4749 = vmatprep.subr.bf16.mxu0 %v5022_v46  ;;  %v387_v16 = vpack.c.bf16 %v3708_v9, %v3707_v8  ;;  %v395_v17 = vpack.c.bf16 %v3724_v11, %v3723_v10  ;;  %v3696_v23 = vld [vmem:[%s4990_s23 + $0x308] sm:$0xff]  ;;  %v3711_v28 = vclamps-f32 %v3679_v19, 1.0  ;;  %v3712_v29 = vclamps-f32 %v3680_v20, 1.0  ;;  %v831_v39 = vld [vmem:[%s4990_s23 + $0x19] sm:$0xff]  ;;  %v176_v44 = vld [vmem:[%s4990_s23 + $0x30] sm:$0xff] }
  0x1d   : > { %v388_v18 = vpack.c.bf16 %v3710_v13, %v3709_v12  ;;  %v396_v22 = vpack.c.bf16 %v3726_v15, %v3725_v14  ;;  %v829_v24 = vld [vmem:[%s4990_s23 + $0x1] sm:$0xff]  ;;  %v830_v25 = vld [vmem:[%s4990_s23 + $0x9] sm:$0xff]  ;;  %v3727_v30 = vclamps-f32 %v3695_v21, 1.0  ;;  %v3728_v31 = vclamps-f32 %v3696_v23, 1.0  ;;  %v177_v47 = vld [vmem:[%s4990_s23 + $0x38] sm:$0xff] }
  0x1e   : > { %v173_v27 = vld [vmem:[%s4990_s23 + $0x8] sm:$0xff]  ;;  %v3762_v32 = vclamps-f32 %v829_v24, 1.0  ;;  %v3763_v33 = vclamps-f32 %v830_v25, 1.0  ;;  %v3633_v34 = vclamps-f32 %v172_v26, 1.0  ;;  %v389_v36 = vpack.c.bf16 %v3712_v29, %v3711_v28  ;;  %v175_v43 = vld [vmem:[%s4990_s23 + $0x20] sm:$0xff]  ;;  %v833_v50 = vld [vmem:[%s4990_s23 + $0x31] sm:$0xff] }
  0x1f   : > { %v3634_v35 = vclamps-f32 %v173_v27, 1.0  ;;  %v397_v37 = vpack.c.bf16 %v3728_v31, %v3727_v30  ;;  %v832_v40 = vld [vmem:[%s4990_s23 + $0x21] sm:$0xff]  ;;  %v3764_v48 = vclamps-f32 %v831_v39, 1.0  ;;  %v834_v51 = vld [vmem:[%s4990_s23 + $0x39] sm:$0xff]  ;;  %v3635_v52 = vclamps-f32 %v174_v42, 1.0  ;;  %v835_v63 = vld [vmem:[%s4990_s23 + $0x49] sm:$0xff] }
  0x20   : > { %4620 = vmatmul.mubr.msk.bf16.gmra.mxu0 %vm400_vm2, %v385_v59  ;;  %v925_v38 = vpack.c.bf16 %v3763_v33, %v3762_v32  ;;  %v3765_v49 = vclamps-f32 %v832_v40, 1.0  ;;  %v3636_v53 = vclamps-f32 %v175_v43, 1.0  ;;  %v3637_v54 = vclamps-f32 %v176_v44, 1.0  ;;  %v4037_v59 = vld [vmem:[%s5999_s1 + $0xa] sm:$0x3]  ;;  %v836_v0 = vld [vmem:[%s4990_s23 + $0x51] sm:$0xff] }
  0x21   : > { %4636 = vmatmul.mubr.msk.bf16.gmra.mxu1 %vm400_vm2, %v393_v60  ;;  %4623 = vmatprep.mubr.msk.bf16.mxu0 %vm400_vm2, %v386_v61  ;;  %v268_v41 = vpack.c.bf16 %v3634_v35, %v3633_v34  ;;  %v3638_v55 = vclamps-f32 %v177_v47, 1.0  ;;  %v3766_v56 = vclamps-f32 %v833_v50, 1.0  ;;  %v3767_v57 = vclamps-f32 %v834_v51, 1.0  ;;  %v4118_v60 = vld [vmem:[%s5999_s1 + $0xc] sm:$0x3]  ;;  %v179_v2 = vld [vmem:[%s4990_s23 + $0x50] sm:$0xff] }
  0x22   : > { %4639 = vmatprep.mubr.msk.bf16.mxu1 %vm400_vm2, %v394_v1  ;;  %v926_v58 = vpack.c.bf16 %v3765_v49, %v3764_v48  ;;  %v5076_v61 = vpack.c.bf16 %v3636_v53, %v3635_v52  ;;  %v178_v62 = vld [vmem:[%s4990_s23 + $0x48] sm:$0xff]  ;;  %v180_v7 = vld [vmem:[%s4990_s23 + $0x60] sm:$0xff]  ;;  %v5089_v9 = vand.u32 %v4037_v59, %v4977_v5  ;;  %v3768_v10 = vclamps-f32 %v835_v63, 1.0  ;;  %v182_v21 = vld [vmem:[%s4990_s23 + $0x78] sm:$0xff] }
  0x23   : > { %v5081_v1 = vpack.c.bf16 %v3638_v55, %v3637_v54  ;;  %v837_v3 = vld [vmem:[%s4990_s23 + $0x61] sm:$0xff]  ;;  %v838_v4 = vld [vmem:[%s4990_s23 + $0x69] sm:$0xff]  ;;  %v927_v6 = vpack.c.bf16 %v3767_v57, %v3766_v56  ;;  %v3769_v11 = vclamps-f32 %v836_v0, 1.0  ;;  %v5093_v12 = vand.u32 %v4118_v60, %v4977_v5  ;;  %v841_v25 = vld [vmem:[%s4990_s23 + $0x91] sm:$0xff] }
  0x24   : > { %v181_v8 = vld [vmem:[%s4990_s23 + $0x68] sm:$0xff]  ;;  %v3639_v13 = vclamps-f32 %v178_v62, 1.0  ;;  %v3640_v14 = vclamps-f32 %v179_v2, 1.0  ;;  %v3770_v15 = vclamps-f32 %v837_v3, 1.0  ;;  %v183_v24 = vld [vmem:[%s4990_s23 + $0x80] sm:$0xff]  ;;  %v184_v27 = vld [vmem:[%s4990_s23 + $0x90] sm:$0xff] }
  0x25   : > { %v842_v26 = vld [vmem:[%s4990_s23 + $0x99] sm:$0xff]  ;;  %v3643_v31 = vclamps-f32 %v182_v21, 1.0  ;;  %v3644_v32 = vclamps-f32 %v183_v24, 1.0  ;;  %v3774_v33 = vclamps-f32 %v841_v25, 1.0  ;;  %v3645_v35 = vclamps-f32 %v184_v27, 1.0  ;;  %v186_v40 = vld [vmem:[%s4990_s23 + $0xa8] sm:$0xff] }
  0x26   : > { %v5104_v19 = vpack.c.bf16 %v3640_v14, %v3639_v13  ;;  %v185_v28 = vld [vmem:[%s4990_s23 + $0x98] sm:$0xff]  ;;  %v3775_v34 = vclamps-f32 %v842_v26, 1.0  ;;  %v187_v44 = vld [vmem:[%s4990_s23 + $0xb0] sm:$0xff]  ;;  %v845_v47 = vld [vmem:[%s4990_s23 + $0xc1] sm:$0xff]  ;;  %v3647_v53 = vclamps-f32 %v186_v40, 1.0 }
  0x27   : > { %v844_v42 = vld [vmem:[%s4990_s23 + $0xb1] sm:$0xff]  ;;  %v846_v48 = vld [vmem:[%s4990_s23 + $0xc9] sm:$0xff]  ;;  %v188_v49 = vld [vmem:[%s4990_s23 + $0xc0] sm:$0xff]  ;;  %v3648_v54 = vclamps-f32 %v187_v44, 1.0  ;;  %v3778_v55 = vclamps-f32 %v845_v47, 1.0 }
  0x28   : > { %4624 = vmatmul.mubr.msk.bf16.gmra.mxu0 %vm400_vm2, %v387_v16  ;;  %v3771_v16 = vclamps-f32 %v838_v4, 1.0  ;;  %v931_v39 = vpack.c.bf16 %v3775_v34, %v3774_v33  ;;  %v189_v50 = vld [vmem:[%s4990_s23 + $0xc8] sm:$0xff]  ;;  %v3777_v52 = vclamps-f32 %v844_v42, 1.0  ;;  %v3779_v56 = vclamps-f32 %v846_v48, 1.0  ;;  %v190_v63 = vld [vmem:[%s4990_s23 + $0xd8] sm:$0xff]  ;;  %v191_v4 = vld [vmem:[%s4990_s23 + $0xe0] sm:$0xff] }
  0x29   : > { %4640 = vmatmul.mubr.msk.bf16.gmra.mxu1 %vm400_vm2, %v395_v17  ;;  %4627 = vmatprep.mubr.msk.bf16.mxu0 %vm400_vm2, %v388_v18  ;;  %v3641_v17 = vclamps-f32 %v180_v7, 1.0  ;;  %v3642_v18 = vclamps-f32 %v181_v8, 1.0  ;;  %v3649_v57 = vclamps-f32 %v188_v49, 1.0  ;;  %v5140_v60 = vpack.c.bf16 %v3648_v54, %v3647_v53  ;;  %v847_v0 = vld [vmem:[%s4990_s23 + $0xd9] sm:$0xff]  ;;  %v848_v2 = vld [vmem:[%s4990_s23 + $0xe1] sm:$0xff]  ;;  %v192_v8 = vld [vmem:[%s4990_s23 + $0xf0] sm:$0xff] }
  0x2a   : > { %4643 = vmatprep.mubr.msk.bf16.mxu1 %vm400_vm2, %v396_v22  ;;  %v929_v20 = vpack.c.bf16 %v3771_v16, %v3770_v15  ;;  %v840_v22 = vld [vmem:[%s4990_s23 + $0x81] sm:$0xff]  ;;  %v933_v62 = vpack.c.bf16 %v3779_v56, %v3778_v55  ;;  %v850_v7 = vld [vmem:[%s4990_s23 + $0xf9] sm:$0xff]  ;;  %v3781_v13 = vclamps-f32 %v848_v2, 1.0  ;;  %v3651_v14 = vclamps-f32 %v190_v63, 1.0  ;;  %v851_v24 = vld [vmem:[%s4990_s23 + $0x109] sm:$0xff] }
  0x2b   : > { %v5109_v23 = vpack.c.bf16 %v3642_v18, %v3641_v17  ;;  %v3773_v30 = vclamps-f32 %v840_v22, 1.0  ;;  %v3652_v15 = vclamps-f32 %v191_v4, 1.0  ;;  %v3783_v17 = vclamps-f32 %v850_v7, 1.0  ;;  %v194_v22 = vld [vmem:[%s4990_s23 + $0x108] sm:$0xff]  ;;  %v852_v25 = vld [vmem:[%s4990_s23 + $0x111] sm:$0xff]  ;;  %v855_v48 = vld [vmem:[%s4990_s23 + $0x139] sm:$0xff] }
  0x2c   : > { %v3653_v18 = vclamps-f32 %v192_v8, 1.0  ;;  %v195_v27 = vld [vmem:[%s4990_s23 + $0x110] sm:$0xff]  ;;  %v3785_v33 = vclamps-f32 %v852_v25, 1.0  ;;  %v3655_v34 = vclamps-f32 %v194_v22, 1.0  ;;  %v198_v47 = vld [vmem:[%s4990_s23 + $0x138] sm:$0xff]  ;;  %v856_v49 = vld [vmem:[%s4990_s23 + $0x141] sm:$0xff] }
  0x2d   : > { %v5158_v21 = vpack.c.bf16 %v3652_v15, %v3651_v14  ;;  %v858_v53 = vld [vmem:[%s4990_s23 + $0x159] sm:$0xff]  ;;  %v200_v54 = vld [vmem:[%s4990_s23 + $0x150] sm:$0xff]  ;;  %v3788_v56 = vclamps-f32 %v855_v48, 1.0  ;;  %v202_v8 = vld [vmem:[%s4990_s23 + $0x168] sm:$0xff] }
  0x2e   : > { %v201_v55 = vld [vmem:[%s4990_s23 + $0x158] sm:$0xff]  ;;  %v3791_v63 = vclamps-f32 %v858_v53, 1.0  ;;  %v203_v14 = vld [vmem:[%s4990_s23 + $0x170] sm:$0xff]  ;;  %v3892_v15 = vld [vmem:[%s4990_s23 + $0x4c8] sm:$0xff] }
  0x2f   : > { %v3662_v2 = vclamps-f32 %v201_v55, 1.0  ;;  %v3664_v22 = vclamps-f32 %v203_v14, 1.0 }
  0x30   : > { %4628 = vmatmul.mubr.msk.bf16.gmra.mxu0 %vm400_vm2, %v389_v36  ;;  %v3646_v36 = vclamps-f32 %v185_v28, 1.0  ;;  %v853_v28 = vld [vmem:[%s4990_s23 + $0x121] sm:$0xff] }
  0x31   : > { %4644 = vmatmul.mubr.msk.bf16.gmra.mxu1 %vm400_vm2, %v397_v37  ;;  %4683 = vmatprep.mubr.msk.bf16.mxu0 %vm400_vm2, %v925_v38  ;;  %v5122_v38 = vpack.c.bf16 %v3644_v32, %v3643_v31  ;;  %v197_v31 = vld [vmem:[%s4990_s23 + $0x128] sm:$0xff]  ;;  %v3784_v32 = vclamps-f32 %v851_v24, 1.0  ;;  %v3924_v24 = vclamps-f32 %v3892_v15, 1.0 }
  0x32   : > { %4649 = vmatprep.mubr.msk.bf16.mxu1 %vm400_vm2, %v268_v41  ;;  %v843_v41 = vld [vmem:[%s4990_s23 + $0xa9] sm:$0xff]  ;;  %v5127_v43 = vpack.c.bf16 %v3646_v36, %v3645_v35  ;;  %v3656_v35 = vclamps-f32 %v195_v27, 1.0  ;;  %v3786_v36 = vclamps-f32 %v853_v28, 1.0  ;;  %v3658_v40 = vclamps-f32 %v197_v31, 1.0 }
  0x33   : > { %v3776_v51 = vclamps-f32 %v843_v41, 1.0  ;;  %v936_v41 = vpack.c.bf16 %v3785_v33, %v3784_v32  ;;  %v3894_v32 = vld [vmem:[%s4990_s23 + $0x4e0] sm:$0xff]  ;;  %v3895_v33 = vld [vmem:[%s4990_s23 + $0x4e8] sm:$0xff] }
  0x34   : > { %v5176_v42 = vpack.c.bf16 %v3656_v35, %v3655_v34  ;;  %v3813_v35 = vld [vmem:[%s4990_s23 + $0x348] sm:$0xff] }
  0x35   : > { %v932_v59 = vpack.c.bf16 %v3777_v52, %v3776_v51  ;;  %v199_v51 = vld [vmem:[%s4990_s23 + $0x140] sm:$0xff]  ;;  %v857_v52 = vld [vmem:[%s4990_s23 + $0x151] sm:$0xff]  ;;  %v3845_v48 = vclamps-f32 %v3813_v35, 1.0  ;;  %v3824_v35 = vld [vmem:[%s4990_s23 + $0x3c8] sm:$0xff] }
  0x38   : > { %4684 = vmatmul.mubr.msk.bf16.vlgmr.msra.gmra.mxu0 %vm400_vm2, %v926_v58  ;;  %v3650_v58 = vclamps-f32 %v189_v50, 1.0 }
  0x39   : > { %4650 = vmatmul.mubr.msk.bf16.vlgmr.msra.gmra.mxu1 %vm400_vm2, %v5076_v61  ;;  %4750 = vmatpush3.bf16.msra.mxu0 %v5022_v46  ;;  %v928_v46 = vpack.c.bf16 %v3769_v11, %v3768_v10  ;;  %v193_v10 = vld [vmem:[%s4990_s23 + $0xf8] sm:$0xff]  ;;  %v3780_v11 = vclamps-f32 %v847_v0, 1.0  ;;  %v3661_v0 = vclamps-f32 %v200_v54, 1.0 }
  0x3a   : > { %4716 = vmatpush3.bf16.msra.mxu1 %v5019_v45  ;;  %4653 = vmatprep.mubr.msk.bf16.mxu1 %vm400_vm2, %v5081_v1  ;;  %v839_v45 = vld [vmem:[%s4990_s23 + $0x79] sm:$0xff]  ;;  %v5145_v3 = vpack.c.bf16 %v3650_v58, %v3649_v57  ;;  %v3789_v57 = vclamps-f32 %v856_v49, 1.0  ;;  %v3659_v58 = vclamps-f32 %v198_v47, 1.0 }
  0x3b   : > { %4687 = vmatprep.mubr.msk.bf16.mxu0 %vm400_vm2, %v927_v6  ;;  %4783 = vmatprep.subr.bf16.mxu1 %v5089_v9  ;;  %v3772_v29 = vclamps-f32 %v839_v45, 1.0  ;;  %v849_v6 = vld [vmem:[%s4990_s23 + $0xf1] sm:$0xff]  ;;  %v3897_v47 = vld [vmem:[%s4990_s23 + $0x500] sm:$0xff] }
  0x3c   : > { %4817 = vmatprep.subr.bf16.mxu0 %v5093_v12  ;;  %v3782_v16 = vclamps-f32 %v849_v6, 1.0  ;;  %v938_v4 = vpack.c.bf16 %v3789_v57, %v3788_v56  ;;  %v3929_v54 = vclamps-f32 %v3897_v47, 1.0  ;;  %v3817_v56 = vld [vmem:[%s4990_s23 + $0x378] sm:$0xff]  ;;  %v4199_v57 = vld [vmem:[%s5999_s1 + $0xe] sm:$0x3] }
  0x3d   : > { %v930_v37 = vpack.c.bf16 %v3773_v30, %v3772_v29  ;;  %v854_v29 = vld [vmem:[%s4990_s23 + $0x129] sm:$0xff]  ;;  %v196_v30 = vld [vmem:[%s4990_s23 + $0x120] sm:$0xff]  ;;  %v5242_v14 = vand.u32 %v4199_v57, %v4977_v5 }
  0x3e   : > { %v935_v45 = vpack.c.bf16 %v3783_v17, %v3782_v16  ;;  %v3893_v16 = vld [vmem:[%s4990_s23 + $0x4d0] sm:$0xff]  ;;  %v3826_v57 = vld [vmem:[%s4990_s23 + $0x3e0] sm:$0xff] }
  0x3f   : > { %v3811_v17 = vld [vmem:[%s4990_s23 + $0x330] sm:$0xff]  ;;  %v3925_v25 = vclamps-f32 %v3893_v16, 1.0 }
  0x40   : > { %4688 = vmatmul.mubr.msk.bf16.gmra.mxu0 %vm400_vm2, %v928_v46  ;;  %v3654_v46 = vclamps-f32 %v193_v10, 1.0  ;;  %v859_v10 = vld [vmem:[%s4990_s23 + $0x169] sm:$0xff]  ;;  %v3843_v27 = vclamps-f32 %v3811_v17, 1.0 }
  0x41   : > { %4654 = vmatmul.mubr.msk.bf16.gmra.mxu1 %vm400_vm2, %v5104_v19  ;;  %4691 = vmatprep.mubr.msk.bf16.mxu0 %vm400_vm2, %v929_v20  ;;  %v934_v20 = vpack.c.bf16 %v3781_v13, %v3780_v11  ;;  %v860_v11 = vld [vmem:[%s4990_s23 + $0x171] sm:$0xff]  ;;  %v5199_v13 = vpack.c.bf16 %v3662_v2, %v3661_v0  ;;  %v1643_v31 = vpack.c.bf16 %v3925_v25, %v3924_v24  ;;  %v3818_v2 = vld [vmem:[%s4990_s23 + $0x380] sm:$0xff] }
  0x42   : > { %4657 = vmatprep.mubr.msk.bf16.mxu1 %vm400_vm2, %v5109_v23  ;;  %v5163_v26 = vpack.c.bf16 %v3654_v46, %v3653_v18  ;;  %v3812_v18 = vld [vmem:[%s4990_s23 + $0x338] sm:$0xff]  ;;  %v3792_v46 = vclamps-f32 %v859_v10, 1.0  ;;  %v3819_v10 = vld [vmem:[%s4990_s23 + $0x390] sm:$0xff] }
  0x43   : > { %v3844_v28 = vclamps-f32 %v3812_v18, 1.0  ;;  %v3849_v18 = vclamps-f32 %v3817_v56, 1.0 }
  0x45   : > { %v1284_v34 = vpack.c.bf16 %v3844_v28, %v3843_v27  ;;  %v3821_v27 = vld [vmem:[%s4990_s23 + $0x3a8] sm:$0xff]  ;;  %v3902_v28 = vld [vmem:[%s4990_s23 + $0x540] sm:$0xff] }
  0x48   : > { %4692 = vmatmul.mubr.msk.bf16.gmra.mxu0 %vm400_vm2, %v930_v37  ;;  %v3787_v37 = vclamps-f32 %v854_v29, 1.0 }
  0x49   : > { %4658 = vmatmul.mubr.msk.bf16.gmra.mxu1 %vm400_vm2, %v5122_v38  ;;  %4695 = vmatprep.mubr.msk.bf16.mxu0 %vm400_vm2, %v931_v39  ;;  %v3657_v39 = vclamps-f32 %v196_v30, 1.0 }
  0x4a   : > { %4661 = vmatprep.mubr.msk.bf16.mxu1 %vm400_vm2, %v5127_v43  ;;  %v937_v44 = vpack.c.bf16 %v3787_v37, %v3786_v36  ;;  %v3814_v36 = vld [vmem:[%s4990_s23 + $0x350] sm:$0xff]  ;;  %v3815_v37 = vld [vmem:[%s4990_s23 + $0x360] sm:$0xff] }
  0x4b   : > { %v5181_v50 = vpack.c.bf16 %v3658_v40, %v3657_v39  ;;  %v3816_v39 = vld [vmem:[%s4990_s23 + $0x368] sm:$0xff]  ;;  %v3926_v40 = vclamps-f32 %v3894_v32, 1.0  ;;  %v3846_v49 = vclamps-f32 %v3814_v36, 1.0  ;;  %v3904_v32 = vld [vmem:[%s4990_s23 + $0x558] sm:$0xff]  ;;  %v3934_v36 = vclamps-f32 %v3902_v28, 1.0 }
  0x4c   : > { %v3832_v28 = vld [vmem:[%s4990_s23 + $0x428] sm:$0xff] }
  0x50   : > { %4696 = vmatmul.mubr.msk.bf16.gmra.mxu0 %vm400_vm2, %v932_v59  ;;  %v3660_v59 = vclamps-f32 %v199_v51, 1.0  ;;  %v3847_v51 = vclamps-f32 %v3815_v37, 1.0 }
  0x51   : > { %4662 = vmatmul.mubr.msk.bf16.gmra.mxu1 %vm400_vm2, %v5140_v60  ;;  %4699 = vmatprep.mubr.msk.bf16.mxu0 %vm400_vm2, %v933_v62  ;;  %v3790_v62 = vclamps-f32 %v857_v52, 1.0  ;;  %v3848_v52 = vclamps-f32 %v3816_v39, 1.0  ;;  %v3853_v39 = vclamps-f32 %v3821_v27, 1.0  ;;  %v3831_v27 = vld [vmem:[%s4990_s23 + $0x420] sm:$0xff] }
  0x52   : > { %4665 = vmatprep.mubr.msk.bf16.mxu1 %vm400_vm2, %v5145_v3  ;;  %v5194_v6 = vpack.c.bf16 %v3660_v59, %v3659_v58  ;;  %v1285_v58 = vpack.c.bf16 %v3846_v49, %v3845_v48  ;;  %v3898_v59 = vld [vmem:[%s4990_s23 + $0x510] sm:$0xff]  ;;  %v3856_v48 = vclamps-f32 %v3824_v35, 1.0  ;;  %v3863_v35 = vclamps-f32 %v3831_v27, 1.0 }
  0x53   : > { %v939_v7 = vpack.c.bf16 %v3791_v63, %v3790_v62  ;;  %v3899_v62 = vld [vmem:[%s4990_s23 + $0x518] sm:$0xff]  ;;  %v4280_v63 = vld [vmem:[%s5999_s1 + $0x10] sm:$0x3]  ;;  %v1286_v0 = vpack.c.bf16 %v3848_v52, %v3847_v51  ;;  %v3930_v15 = vclamps-f32 %v3898_v59, 1.0 }
  0x54   : > { %v3931_v16 = vclamps-f32 %v3899_v62, 1.0  ;;  %v5246_v17 = vand.u32 %v4280_v63, %v4977_v5  ;;  %v3851_v5 = vclamps-f32 %v3819_v10, 1.0  ;;  %v3909_v59 = vld [vmem:[%s4990_s23 + $0x590] sm:$0xff]  ;;  %v3828_v63 = vld [vmem:[%s4990_s23 + $0x3f8] sm:$0xff] }
  0x55   : > { %v3827_v62 = vld [vmem:[%s4990_s23 + $0x3f0] sm:$0xff]  ;;  %v3941_v10 = vclamps-f32 %v3909_v59, 1.0 }
  0x58   : > { %4700 = vmatmul.mubr.msk.bf16.gmra.mxu0 %vm400_vm2, %v934_v20  ;;  %v3793_v20 = vclamps-f32 %v860_v11, 1.0  ;;  %v3820_v11 = vld [vmem:[%s4990_s23 + $0x398] sm:$0xff] }
  0x59   : > { %4666 = vmatmul.mubr.msk.bf16.gmra.mxu1 %vm400_vm2, %v5158_v21  ;;  %4703 = vmatprep.mubr.msk.bf16.mxu0 %vm400_vm2, %v935_v45  ;;  %v3663_v45 = vclamps-f32 %v202_v8, 1.0 }
  0x5a   : > { %4669 = vmatprep.mubr.msk.bf16.mxu1 %vm400_vm2, %v5163_v26  ;;  %v940_v29 = vpack.c.bf16 %v3793_v20, %v3792_v46  ;;  %v3850_v46 = vclamps-f32 %v3818_v2, 1.0 }
  0x5b   : > { %v5212_v30 = vpack.c.bf16 %v3664_v22, %v3663_v45  ;;  %v3852_v22 = vclamps-f32 %v3820_v11, 1.0  ;;  %v3859_v11 = vclamps-f32 %v3827_v62, 1.0 }
  0x5c   : > { %v1287_v24 = vpack.c.bf16 %v3850_v46, %v3849_v18 }
  0x60   : > { %4704 = vmatmul.mubr.msk.bf16.gmra.mxu0 %vm400_vm2, %v936_v41  ;;  %v3927_v41 = vclamps-f32 %v3895_v33, 1.0  ;;  %v3905_v33 = vld [vmem:[%s4990_s23 + $0x560] sm:$0xff] }
  0x61   : > { %4670 = vmatmul.mubr.msk.bf16.gmra.mxu1 %vm400_vm2, %v5176_v42  ;;  %4707 = vmatprep.mubr.msk.bf16.mxu0 %vm400_vm2, %v937_v44  ;;  %v3896_v44 = vld [vmem:[%s4990_s23 + $0x4f8] sm:$0xff] }
  0x62   : > { %4673 = vmatprep.mubr.msk.bf16.mxu1 %vm400_vm2, %v5181_v50  ;;  %v3928_v53 = vclamps-f32 %v3896_v44, 1.0  ;;  %v1644_v55 = vpack.c.bf16 %v3927_v41, %v3926_v40  ;;  %v3936_v41 = vclamps-f32 %v3904_v32, 1.0  ;;  %v3937_v44 = vclamps-f32 %v3905_v33, 1.0 }
  0x64   : > { %v1645_v8 = vpack.c.bf16 %v3929_v54, %v3928_v53  ;;  %v1649_v52 = vpack.c.bf16 %v3937_v44, %v3936_v41  ;;  %v3825_v53 = vld [vmem:[%s4990_s23 + $0x3d8] sm:$0xff]  ;;  %v3906_v54 = vld [vmem:[%s4990_s23 + $0x570] sm:$0xff] }
  0x65   : > { %v3833_v41 = vld [vmem:[%s4990_s23 + $0x438] sm:$0xff]  ;;  %v3914_v44 = vld [vmem:[%s4990_s23 + $0x5d0] sm:$0xff] }
  0x68   : > { %4708 = vmatmul.mubr.msk.bf16.gmra.mxu0 %vm400_vm2, %v938_v4  ;;  %v3900_v4 = vld [vmem:[%s4990_s23 + $0x528] sm:$0xff] }
  0x69   : > { %4674 = vmatmul.mubr.msk.bf16.gmra.mxu1 %vm400_vm2, %v5194_v6  ;;  %4711 = vmatprep.mubr.msk.bf16.mxu0 %vm400_vm2, %v939_v7  ;;  %v3901_v7 = vld [vmem:[%s4990_s23 + $0x530] sm:$0xff]  ;;  %v3932_v20 = vclamps-f32 %v3900_v4, 1.0  ;;  %v3857_v4 = vclamps-f32 %v3825_v53, 1.0 }
  0x6a   : > { %4677 = vmatprep.mubr.msk.bf16.mxu1 %vm400_vm2, %v5199_v13  ;;  %v3933_v45 = vclamps-f32 %v3901_v7, 1.0  ;;  %v3858_v7 = vclamps-f32 %v3826_v57, 1.0  ;;  %v3835_v53 = vld [vmem:[%s4990_s23 + $0x450] sm:$0xff]  ;;  %v3865_v57 = vclamps-f32 %v3833_v41, 1.0 }
  0x6c   : > { %v1647_v25 = vpack.c.bf16 %v3933_v45, %v3932_v20  ;;  %v1291_v18 = vpack.c.bf16 %v3858_v7, %v3857_v4  ;;  %v3829_v20 = vld [vmem:[%s4990_s23 + $0x408] sm:$0xff]  ;;  %v3910_v45 = vld [vmem:[%s4990_s23 + $0x5a0] sm:$0xff] }
  0x70   : > { %4712 = vmatmul.mubr.msk.bf16.gmra.mxu0 %vm400_vm2, %v940_v29  ;;  %v3903_v29 = vld [vmem:[%s4990_s23 + $0x548] sm:$0xff] }
  0x71   : > { %4678 = vmatmul.mubr.msk.bf16.gmra.mxu1 %vm400_vm2, %v5212_v30  ;;  %4751 = vmatprep.mubr.msk.bf16.mxu0 %vm400_vm2, %v1643_v31  ;;  %v3822_v31 = vld [vmem:[%s4990_s23 + $0x3b0] sm:$0xff]  ;;  %v3935_v37 = vclamps-f32 %v3903_v29, 1.0  ;;  %v3942_v29 = vclamps-f32 %v3910_v45, 1.0  ;;  %v3840_v45 = vld [vmem:[%s4990_s23 + $0x488] sm:$0xff] }
  0x72   : > { %4717 = vmatprep.mubr.msk.bf16.mxu1 %vm400_vm2, %v1284_v34  ;;  %v3823_v34 = vld [vmem:[%s4990_s23 + $0x3c0] sm:$0xff]  ;;  %v3854_v40 = vclamps-f32 %v3822_v31, 1.0  ;;  %v3861_v31 = vclamps-f32 %v3829_v20, 1.0 }
  0x73   : > { %v3855_v47 = vclamps-f32 %v3823_v34, 1.0  ;;  %v1648_v49 = vpack.c.bf16 %v3935_v37, %v3934_v36  ;;  %v3864_v36 = vclamps-f32 %v3832_v28, 1.0  ;;  %v3839_v20 = vld [vmem:[%s4990_s23 + $0x480] sm:$0xff] }
  0x74   : > { %v1289_v51 = vpack.c.bf16 %v3854_v40, %v3853_v39  ;;  %v3871_v28 = vclamps-f32 %v3839_v20, 1.0 }
  0x75   : > { %v1290_v56 = vpack.c.bf16 %v3856_v48, %v3855_v47  ;;  %v3915_v47 = vld [vmem:[%s4990_s23 + $0x5d8] sm:$0xff]  ;;  %v1294_v48 = vpack.c.bf16 %v3864_v36, %v3863_v35 }
  0x76   : > { %v3841_v36 = vld [vmem:[%s4990_s23 + $0x498] sm:$0xff] }
  0x78   : > { %4752 = vmatmul.mubr.msk.bf16.vlgmr.msra.gmra.mxu0 %vm400_vm2, %v1644_v55  ;;  %v3907_v55 = vld [vmem:[%s4990_s23 + $0x578] sm:$0xff] }
  0x79   : > { %4718 = vmatmul.mubr.msk.bf16.vlgmr.msra.gmra.mxu1 %vm400_vm2, %v1285_v58  ;;  %4818 = vmatpush3.bf16.msra.mxu0 %v5093_v12  ;;  %v1646_v12 = vpack.c.bf16 %v3931_v16, %v3930_v15  ;;  %v3908_v58 = vld [vmem:[%s4990_s23 + $0x588] sm:$0xff]  ;;  %v3939_v2 = vclamps-f32 %v3907_v55, 1.0  ;;  %v3860_v15 = vclamps-f32 %v3828_v63, 1.0  ;;  %v3946_v55 = vclamps-f32 %v3914_v44, 1.0 }
  0x7a   : > { %4784 = vmatpush3.bf16.msra.mxu1 %v5089_v9  ;;  %4721 = vmatprep.mubr.msk.bf16.mxu1 %vm400_vm2, %v1286_v0  ;;  %v1288_v9 = vpack.c.bf16 %v3852_v22, %v3851_v5  ;;  %v3938_v0 = vclamps-f32 %v3906_v54, 1.0  ;;  %v3911_v5 = vld [vmem:[%s4990_s23 + $0x5a8] sm:$0xff]  ;;  %v3836_v54 = vld [vmem:[%s4990_s23 + $0x458] sm:$0xff]  ;;  %v3867_v63 = vclamps-f32 %v3835_v53, 1.0 }
  0x7b   : > { %4755 = vmatprep.mubr.msk.bf16.mxu0 %vm400_vm2, %v1645_v8  ;;  %4851 = vmatprep.subr.bf16.mxu1 %v5242_v14  ;;  %v3940_v8 = vclamps-f32 %v3908_v58, 1.0  ;;  %v1292_v22 = vpack.c.bf16 %v3860_v15, %v3859_v11  ;;  %v3919_v11 = vld [vmem:[%s4990_s23 + $0x608] sm:$0xff] }
  0x7c   : > { %4885 = vmatprep.subr.bf16.mxu0 %v5246_v17  ;;  %v1650_v16 = vpack.c.bf16 %v3939_v2, %v3938_v0  ;;  %v3868_v0 = vclamps-f32 %v3836_v54, 1.0 }
  0x7d   : > { %v1651_v46 = vpack.c.bf16 %v3941_v10, %v3940_v8  ;;  %v3837_v8 = vld [vmem:[%s4990_s23 + $0x468] sm:$0xff]  ;;  %v3918_v10 = vld [vmem:[%s4990_s23 + $0x600] sm:$0xff] }
  0x7e   : > { %v1296_v15 = vpack.c.bf16 %v3868_v0, %v3867_v63 }
  0x80   : > { %4756 = vmatmul.mubr.msk.bf16.gmra.mxu0 %vm400_vm2, %v1646_v12  ;;  %v3830_v12 = vld [vmem:[%s4990_s23 + $0x410] sm:$0xff] }
  0x81   : > { %4722 = vmatmul.mubr.msk.bf16.gmra.mxu1 %vm400_vm2, %v1287_v24  ;;  %4759 = vmatprep.mubr.msk.bf16.mxu0 %vm400_vm2, %v1647_v25  ;;  %v3912_v24 = vld [vmem:[%s4990_s23 + $0x5b8] sm:$0xff]  ;;  %v3913_v25 = vld [vmem:[%s4990_s23 + $0x5c0] sm:$0xff]  ;;  %v3862_v32 = vclamps-f32 %v3830_v12, 1.0  ;;  %v3869_v12 = vclamps-f32 %v3837_v8, 1.0 }
  0x82   : > { %4725 = vmatprep.mubr.msk.bf16.mxu1 %vm400_vm2, %v1288_v9  ;;  %v3943_v9 = vclamps-f32 %v3911_v5, 1.0  ;;  %v3944_v33 = vclamps-f32 %v3912_v24, 1.0  ;;  %v3945_v34 = vclamps-f32 %v3913_v25, 1.0  ;;  %v3950_v5 = vclamps-f32 %v3918_v10, 1.0  ;;  %v3980_v8 = vld [vmem:[%s4990_s23 + $0x381] sm:$0xff]  ;;  %v3981_v10 = vld [vmem:[%s4990_s23 + $0x391] sm:$0xff] }
  0x83   : > { %v1293_v39 = vpack.c.bf16 %v3862_v32, %v3861_v31 }
  0x84   : > { %v1652_v37 = vpack.c.bf16 %v3943_v9, %v3942_v29  ;;  %v1653_v40 = vpack.c.bf16 %v3945_v34, %v3944_v33  ;;  %v3872_v29 = vclamps-f32 %v3840_v45, 1.0  ;;  %v3922_v33 = vld [vmem:[%s4990_s23 + $0x630] sm:$0xff]  ;;  %v3923_v34 = vld [vmem:[%s4990_s23 + $0x638] sm:$0xff] }
  0x85   : > { %v3954_v41 = vclamps-f32 %v3922_v33, 1.0  ;;  %v3955_v44 = vclamps-f32 %v3923_v34, 1.0  ;;  %v3984_v45 = vld [vmem:[%s4990_s23 + $0x3b1] sm:$0xff] }
  0x86   : > { %v1298_v35 = vpack.c.bf16 %v3872_v29, %v3871_v28  ;;  %v3988_v28 = vld [vmem:[%s4990_s23 + $0x3e1] sm:$0xff]  ;;  %v3990_v29 = vld [vmem:[%s4990_s23 + $0x3f9] sm:$0xff] }
  0x88   : > { %4760 = vmatmul.mubr.msk.bf16.gmra.mxu0 %vm400_vm2, %v1648_v49  ;;  %v3834_v49 = vld [vmem:[%s4990_s23 + $0x440] sm:$0xff] }
  0x89   : > { %4726 = vmatmul.mubr.msk.bf16.gmra.mxu1 %vm400_vm2, %v1289_v51  ;;  %4763 = vmatprep.mubr.msk.bf16.mxu0 %vm400_vm2, %v1649_v52  ;;  %v3916_v51 = vld [vmem:[%s4990_s23 + $0x5e8] sm:$0xff]  ;;  %v3917_v52 = vld [vmem:[%s4990_s23 + $0x5f0] sm:$0xff]  ;;  %v3866_v58 = vclamps-f32 %v3834_v49, 1.0 }
  0x8a   : > { %4729 = vmatprep.mubr.msk.bf16.mxu1 %vm400_vm2, %v1290_v56  ;;  %v3947_v56 = vclamps-f32 %v3915_v47, 1.0  ;;  %v3948_v59 = vclamps-f32 %v3916_v51, 1.0  ;;  %v3949_v62 = vclamps-f32 %v3917_v52, 1.0  ;;  %v3873_v47 = vclamps-f32 %v3841_v36, 1.0  ;;  %v3992_v36 = vld [vmem:[%s4990_s23 + $0x411] sm:$0xff] }
  0x8b   : > { %v1295_v4 = vpack.c.bf16 %v3866_v58, %v3865_v57  ;;  %v1658_v52 = vpack.c.bf16 %v3955_v44, %v3954_v41  ;;  %v3977_v57 = vld [vmem:[%s4990_s23 + $0x361] sm:$0xff]  ;;  %v3978_v58 = vld [vmem:[%s4990_s23 + $0x369] sm:$0xff] }
  0x8c   : > { %v1654_v2 = vpack.c.bf16 %v3947_v56, %v3946_v55  ;;  %v1655_v7 = vpack.c.bf16 %v3949_v62, %v3948_v59  ;;  %v3975_v55 = vld [vmem:[%s4990_s23 + $0x349] sm:$0xff]  ;;  %v3976_v56 = vld [vmem:[%s4990_s23 + $0x351] sm:$0xff]  ;;  %v4009_v63 = vclamps-f32 %v3977_v57, 1.0  ;;  %v4010_v0 = vclamps-f32 %v3978_v58, 1.0 }
  0x8d   : > { %v4007_v59 = vclamps-f32 %v3975_v55, 1.0  ;;  %v4008_v62 = vclamps-f32 %v3976_v56, 1.0 }
  0x90   : > { %4764 = vmatmul.mubr.msk.bf16.gmra.mxu0 %vm400_vm2, %v1650_v16  ;;  %v3838_v16 = vld [vmem:[%s4990_s23 + $0x470] sm:$0xff] }
  0x91   : > { %4730 = vmatmul.mubr.msk.bf16.gmra.mxu1 %vm400_vm2, %v1291_v18  ;;  %4767 = vmatprep.mubr.msk.bf16.mxu0 %vm400_vm2, %v1651_v46  ;;  %v3920_v18 = vld [vmem:[%s4990_s23 + $0x618] sm:$0xff]  ;;  %v3921_v46 = vld [vmem:[%s4990_s23 + $0x620] sm:$0xff]  ;;  %v3870_v24 = vclamps-f32 %v3838_v16, 1.0  ;;  %v4013_v16 = vclamps-f32 %v3981_v10, 1.0 }
  0x92   : > { %4733 = vmatprep.mubr.msk.bf16.mxu1 %vm400_vm2, %v1292_v22  ;;  %v3951_v22 = vclamps-f32 %v3919_v11, 1.0  ;;  %v3952_v25 = vclamps-f32 %v3920_v18, 1.0  ;;  %v3953_v27 = vclamps-f32 %v3921_v46, 1.0  ;;  %v3982_v11 = vld [vmem:[%s4990_s23 + $0x399] sm:$0xff] }
  0x93   : > { %v1297_v31 = vpack.c.bf16 %v3870_v24, %v3869_v12  ;;  %v4014_v18 = vclamps-f32 %v3982_v11, 1.0 }
  0x94   : > { %v1656_v9 = vpack.c.bf16 %v3951_v22, %v3950_v5  ;;  %v1657_v32 = vpack.c.bf16 %v3953_v27, %v3952_v25  ;;  %v3986_v5 = vld [vmem:[%s4990_s23 + $0x3c9] sm:$0xff]  ;;  %v3987_v27 = vld [vmem:[%s4990_s23 + $0x3d9] sm:$0xff] }
  0x95   : > { %v2005_v20 = vpack.c.bf16 %v4014_v18, %v4013_v16  ;;  %v4018_v12 = vclamps-f32 %v3986_v5, 1.0  ;;  %v4085_v5 = vld [vmem:[%s4990_s23 + $0x188] sm:$0xff] }
  0x98   : > { %4768 = vmatmul.mubr.msk.bf16.gmra.mxu0 %vm400_vm2, %v1652_v37  ;;  %v3842_v37 = vld [vmem:[%s4990_s23 + $0x4a0] sm:$0xff] }
  0x99   : > { %4734 = vmatmul.mubr.msk.bf16.gmra.mxu1 %vm400_vm2, %v1293_v39  ;;  %4771 = vmatprep.mubr.msk.bf16.mxu0 %vm400_vm2, %v1653_v40  ;;  %v3973_v39 = vld [vmem:[%s4990_s23 + $0x331] sm:$0xff]  ;;  %v3974_v40 = vld [vmem:[%s4990_s23 + $0x339] sm:$0xff] }
  0x9a   : > { %4737 = vmatprep.mubr.msk.bf16.mxu1 %vm400_vm2, %v1294_v48  ;;  %v3874_v48 = vclamps-f32 %v3842_v37, 1.0  ;;  %v4005_v49 = vclamps-f32 %v3973_v39, 1.0  ;;  %v4006_v51 = vclamps-f32 %v3974_v40, 1.0  ;;  %v3994_v37 = vld [vmem:[%s4990_s23 + $0x429] sm:$0xff]  ;;  %v4024_v39 = vclamps-f32 %v3992_v36, 1.0 }
  0x9b   : > { %v4026_v41 = vclamps-f32 %v3994_v37, 1.0 }
  0x9c   : > { %v1299_v53 = vpack.c.bf16 %v3874_v48, %v3873_v47  ;;  %v2001_v54 = vpack.c.bf16 %v4006_v51, %v4005_v49  ;;  %v3995_v48 = vld [vmem:[%s4990_s23 + $0x439] sm:$0xff]  ;;  %v3996_v49 = vld [vmem:[%s4990_s23 + $0x441] sm:$0xff]  ;;  %v3997_v51 = vld [vmem:[%s4990_s23 + $0x451] sm:$0xff] }
  0x9d   : > { %v4029_v56 = vclamps-f32 %v3997_v51, 1.0  ;;  %v4138_v51 = vld [vmem:[%s4990_s23 + $0x1d0] sm:$0xff] }
  0xa0   : > { %4772 = vmatmul.mubr.msk.bf16.gmra.mxu0 %vm400_vm2, %v1654_v2  ;;  %v2002_v2 = vpack.c.bf16 %v4008_v62, %v4007_v59 }
  0xa1   : > { %4738 = vmatmul.mubr.msk.bf16.gmra.mxu1 %vm400_vm2, %v1295_v4  ;;  %4775 = vmatprep.mubr.msk.bf16.mxu0 %vm400_vm2, %v1655_v7  ;;  %v2003_v4 = vpack.c.bf16 %v4010_v0, %v4009_v63  ;;  %v3979_v7 = vld [vmem:[%s4990_s23 + $0x379] sm:$0xff]  ;;  %v3999_v0 = vld [vmem:[%s4990_s23 + $0x469] sm:$0xff] }
  0xa2   : > { %4741 = vmatprep.mubr.msk.bf16.mxu1 %vm400_vm2, %v1296_v15  ;;  %v4012_v15 = vclamps-f32 %v3980_v8, 1.0  ;;  %v4002_v8 = vld [vmem:[%s4990_s23 + $0x489] sm:$0xff] }
  0xa8   : > { %4776 = vmatmul.mubr.msk.bf16.gmra.mxu0 %vm400_vm2, %v1656_v9  ;;  %v4020_v9 = vclamps-f32 %v3988_v28, 1.0  ;;  %v4136_v28 = vld [vmem:[%s4990_s23 + $0x1b8] sm:$0xff] }
  0xa9   : > { %4742 = vmatmul.mubr.msk.bf16.gmra.mxu1 %vm400_vm2, %v1297_v31  ;;  %4779 = vmatprep.mubr.msk.bf16.mxu0 %vm400_vm2, %v1657_v32  ;;  %v4022_v32 = vclamps-f32 %v3990_v29, 1.0  ;;  %v4168_v36 = vclamps-f32 %v4136_v28, 1.0  ;;  %v4223_v28 = vld [vmem:[%s4990_s23 + $0x69] sm:$0xff] }
  0xaa   : > { %4745 = vmatprep.mubr.msk.bf16.mxu1 %vm400_vm2, %v1298_v35  ;;  %v3991_v35 = vld [vmem:[%s4990_s23 + $0x409] sm:$0xff] }
  0xb0   : > { %4780 = vmatmul.mubr.msk.bf16.gmra.mxu0 %vm400_vm2, %v1658_v52  ;;  %v3998_v52 = vld [vmem:[%s4990_s23 + $0x459] sm:$0xff] }
  0xb1   : > { %4746 = vmatmul.mubr.msk.bf16.gmra.mxu1 %vm400_vm2, %v1299_v53  ;;  %4819 = vmatprep.mubr.msk.bf16.mxu0 %vm400_vm2, %v5076_v61  ;;  %v4011_v61 = vclamps-f32 %v3979_v7, 1.0  ;;  %v4030_v57 = vclamps-f32 %v3998_v52, 1.0  ;;  %v4001_v7 = vld [vmem:[%s4990_s23 + $0x481] sm:$0xff]  ;;  %v4220_v52 = vld [vmem:[%s4990_s23 + $0x49] sm:$0xff] }
  0xb2   : > { %4785 = vmatprep.mubr.msk.bf16.mxu1 %vm400_vm2, %v2001_v54  ;;  %v4028_v54 = vclamps-f32 %v3996_v49, 1.0  ;;  %v4033_v18 = vclamps-f32 %v4001_v7, 1.0 }
  0xb3   : > { %v2004_v46 = vpack.c.bf16 %v4012_v15, %v4011_v61  ;;  %v4031_v61 = vclamps-f32 %v3999_v0, 1.0 }
  0xb8   : > { %4820 = vmatmul.mubr.msk.bf16.vlgmr.msra.gmra.mxu0 %vm400_vm2, %v5081_v1  ;;  %v3983_v1 = vld [vmem:[%s4990_s23 + $0x3a9] sm:$0xff] }
  0xb9   : > { %4786 = vmatmul.mubr.msk.bf16.vlgmr.msra.gmra.mxu1 %vm400_vm2, %v2002_v2  ;;  %4886 = vmatpush3.bf16.msra.mxu0 %v5246_v17  ;;  %v3985_v17 = vld [vmem:[%s4990_s23 + $0x3c1] sm:$0xff]  ;;  %v4000_v2 = vld [vmem:[%s4990_s23 + $0x471] sm:$0xff] }
  0xba   : > { %4852 = vmatpush3.bf16.msra.mxu1 %v5242_v14  ;;  %4789 = vmatprep.mubr.msk.bf16.mxu1 %vm400_vm2, %v2003_v4  ;;  %v4015_v14 = vclamps-f32 %v3983_v1, 1.0  ;;  %v4017_v22 = vclamps-f32 %v3985_v17, 1.0  ;;  %v4032_v15 = vclamps-f32 %v4000_v2, 1.0  ;;  %v4084_v17 = vld [vmem:[%s4990_s23 + $0x180] sm:$0xff] }
  0xbb   : > { %4823 = vmatprep.mubr.msk.bf16.mxu0 %vm400_vm2, %v5104_v19  ;;  %v4016_v19 = vclamps-f32 %v3984_v45, 1.0  ;;  %v4003_v45 = vld [vmem:[%s4990_s23 + $0x499] sm:$0xff]  ;;  %v4116_v29 = vclamps-f32 %v4084_v17, 1.0 }
  0xbc   : > { %v2007_v25 = vpack.c.bf16 %v4018_v12, %v4017_v22  ;;  %v4004_v22 = vld [vmem:[%s4990_s23 + $0x4a1] sm:$0xff]  ;;  %v4216_v12 = vld [vmem:[%s4990_s23 + $0x19] sm:$0xff] }
  0xbd   : > { %v2006_v24 = vpack.c.bf16 %v4016_v19, %v4015_v14 }
  0xc0   : > { %4824 = vmatmul.mubr.msk.bf16.gmra.mxu0 %vm400_vm2, %v5109_v23  ;;  %v3989_v23 = vld [vmem:[%s4990_s23 + $0x3f1] sm:$0xff] }
  0xc1   : > { %4790 = vmatmul.mubr.msk.bf16.gmra.mxu1 %vm400_vm2, %v2004_v46  ;;  %4827 = vmatprep.mubr.msk.bf16.mxu0 %vm400_vm2, %v5122_v38  ;;  %v4019_v38 = vclamps-f32 %v3987_v27, 1.0  ;;  %v4021_v31 = vclamps-f32 %v3989_v23, 1.0  ;;  %v4135_v27 = vld [vmem:[%s4990_s23 + $0x1b0] sm:$0xff] }
  0xc2   : > { %4793 = vmatprep.mubr.msk.bf16.mxu1 %vm400_vm2, %v2005_v20 }
  0xc3   : > { %v2008_v33 = vpack.c.bf16 %v4020_v9, %v4019_v38  ;;  %v2009_v34 = vpack.c.bf16 %v4022_v32, %v4021_v31  ;;  %v4117_v38 = vclamps-f32 %v4085_v5, 1.0  ;;  %v4035_v31 = vclamps-f32 %v4003_v45, 1.0 }
  0xc4   : > { %v4036_v32 = vclamps-f32 %v4004_v22, 1.0 }
  0xc5   : > { %v2375_v37 = vpack.c.bf16 %v4117_v38, %v4116_v29 }
  0xc8   : > { %4828 = vmatmul.mubr.msk.bf16.gmra.mxu0 %vm400_vm2, %v5127_v43  ;;  %v3993_v43 = vld [vmem:[%s4990_s23 + $0x421] sm:$0xff] }
  0xc9   : > { %4794 = vmatmul.mubr.msk.bf16.gmra.mxu1 %vm400_vm2, %v2006_v24  ;;  %4831 = vmatprep.mubr.msk.bf16.mxu0 %vm400_vm2, %v5140_v60  ;;  %v4023_v60 = vclamps-f32 %v3991_v35, 1.0  ;;  %v4025_v40 = vclamps-f32 %v3993_v43, 1.0  ;;  %v4217_v24 = vld [vmem:[%s4990_s23 + $0x21] sm:$0xff] }
  0xca   : > { %4797 = vmatprep.mubr.msk.bf16.mxu1 %vm400_vm2, %v2007_v25 }
  0xcb   : > { %v2010_v44 = vpack.c.bf16 %v4024_v39, %v4023_v60  ;;  %v2011_v47 = vpack.c.bf16 %v4026_v41, %v4025_v40  ;;  %v2016_v39 = vpack.c.bf16 %v4036_v32, %v4035_v31  ;;  %v4137_v41 = vld [vmem:[%s4990_s23 + $0x1c8] sm:$0xff]  ;;  %v4142_v31 = vld [vmem:[%s4990_s23 + $0x200] sm:$0xff] }
  0xcc   : > { %v4169_v7 = vclamps-f32 %v4137_v41, 1.0  ;;  %v4224_v32 = vld [vmem:[%s4990_s23 + $0x79] sm:$0xff] }
  0xd0   : > { %4832 = vmatmul.mubr.msk.bf16.gmra.mxu0 %vm400_vm2, %v5145_v3 }
  0xd1   : > { %4798 = vmatmul.mubr.msk.bf16.gmra.mxu1 %vm400_vm2, %v2008_v33  ;;  %4835 = vmatprep.mubr.msk.bf16.mxu0 %vm400_vm2, %v5158_v21  ;;  %v4027_v21 = vclamps-f32 %v3995_v48, 1.0  ;;  %v4248_v33 = vclamps-f32 %v4216_v12, 1.0 }
  0xd2   : > { %4801 = vmatprep.mubr.msk.bf16.mxu1 %vm400_vm2, %v2009_v34  ;;  %v4249_v34 = vclamps-f32 %v4217_v24, 1.0  ;;  %v4141_v24 = vld [vmem:[%s4990_s23 + $0x1f8] sm:$0xff] }
  0xd3   : > { %v2012_v62 = vpack.c.bf16 %v4028_v54, %v4027_v21  ;;  %v4221_v21 = vld [vmem:[%s4990_s23 + $0x51] sm:$0xff] }
  0xd4   : > { %v3077_v40 = vpack.c.bf16 %v4249_v34, %v4248_v33  ;;  %v4225_v33 = vld [vmem:[%s4990_s23 + $0x81] sm:$0xff] }
  0xd8   : > { %v5380_v53 = vpop.f32.mrf.mxu0  ;;  %4836 = vmatmul.mubr.msk.bf16.gmra.mxu0 %vm400_vm2, %v5163_v26 }
  0xd9   : > { %v5384_v3 = vpop.f32.mrf.mxu1  ;;  %4802 = vmatmul.mubr.msk.bf16.gmra.mxu1 %vm400_vm2, %v2010_v44  ;;  %4839 = vmatprep.mubr.msk.bf16.mxu0 %vm400_vm2, %v5176_v42  ;;  %v2013_v42 = vpack.c.bf16 %v4030_v57, %v4029_v56  ;;  %v4218_v44 = vld [vmem:[%s4990_s23 + $0x31] sm:$0xff]  ;;  %v4139_v56 = vld [vmem:[%s4990_s23 + $0x1e0] sm:$0xff]  ;;  %v4140_v57 = vld [vmem:[%s4990_s23 + $0x1e8] sm:$0xff] }
  0xda   : > { %v5389_v55 = vpop.f32.mrf.mxu0  ;;  %4805 = vmatprep.mubr.msk.bf16.mxu1 %vm400_vm2, %v2011_v47  ;;  %v4219_v47 = vld [vmem:[%s4990_s23 + $0x39] sm:$0xff] }
  0xdb   : > { %v5392_v26 = vpop.f32.mrf.mxu1  ;;  %v4251_v0 = vclamps-f32 %v4219_v47, 1.0  ;;  %v4174_v47 = vclamps-f32 %v4142_v31, 1.0  ;;  %v4228_v31 = vld [vmem:[%s4990_s23 + $0xa9] sm:$0xff] }
  0xdc   : > { %v5394_v58 = vpop.f32.mrf.mxu0 }
  0xdd   : > { %v5396_v59 = vpop.f32.mrf.mxu1 }
  0xde   : > { %v5398_v63 = vpop.f32.mrf.mxu0 }
  0xdf   : > { %v5402_v4 = vpop.f32.mrf.mxu1 }
  0xe0   : > { %v5406_v10 = vpop.f32.mrf.mxu0  ;;  %4840 = vmatmul.mubr.msk.bf16.gmra.mxu0 %vm400_vm2, %v5181_v50  ;;  %v4034_v50 = vclamps-f32 %v4002_v8, 1.0  ;;  %v4170_v8 = vclamps-f32 %v4138_v51, 1.0  ;;  %v4257_v51 = vclamps-f32 %v4225_v33, 1.0  ;;  %v4147_v33 = vld [vmem:[%s4990_s23 + $0x240] sm:$0xff] }
  0xe1   : > { %v5410_v11 = vpop.f32.mrf.mxu1  ;;  %4806 = vmatmul.mubr.msk.bf16.gmra.mxu1 %vm400_vm2, %v2012_v62  ;;  %4843 = vmatprep.mubr.msk.bf16.mxu0 %vm400_vm2, %v5194_v6  ;;  %v2014_v6 = vpack.c.bf16 %v4032_v15, %v4031_v61  ;;  %v4252_v61 = vclamps-f32 %v4220_v52, 1.0  ;;  %v4253_v15 = vclamps-f32 %v4221_v21, 1.0 }
  0xe2   : > { %v5415_v16 = vpop.f32.mrf.mxu0  ;;  %4809 = vmatprep.mubr.msk.bf16.mxu1 %vm400_vm2, %v2013_v42  ;;  %v2015_v19 = vpack.c.bf16 %v4034_v50, %v4033_v18  ;;  %v4250_v42 = vclamps-f32 %v4218_v44, 1.0  ;;  %v4171_v50 = vclamps-f32 %v4139_v56, 1.0  ;;  %v2720_v22 = vpack.c.bf16 %v4170_v8, %v4169_v7 }
  0xe3   : > { %v5418_v46 = vpop.f32.mrf.mxu1  ;;  %v3079_v12 = vpack.c.bf16 %v4253_v15, %v4252_v61  ;;  %v4173_v44 = vclamps-f32 %v4141_v24, 1.0 }
  0xe4   : > { %v5420_v20 = vpop.f32.mrf.mxu0  ;;  %v3078_v5 = vpack.c.bf16 %v4251_v0, %v4250_v42 }
  0xe5   : > { %v5422_v1 = vpop.f32.mrf.mxu1 }
  0xe6   : > { %v5427_v14 = vpop.f32.mrf.mxu0 }
  0xe7   : > { %v5432_v25 = vpop.f32.mrf.mxu1 }
  0xe8   : > { %v5436_v23 = vpop.f32.mrf.mxu0  ;;  %4844 = vmatmul.mubr.msk.bf16.gmra.mxu0 %vm400_vm2, %v5199_v13  ;;  %v4167_v13 = vclamps-f32 %v4135_v27, 1.0  ;;  %v4222_v27 = vld [vmem:[%s4990_s23 + $0x61] sm:$0xff] }
  0xe9   : > { %v5440_v9 = vpop.f32.mrf.mxu1  ;;  %4810 = vmatmul.mubr.msk.bf16.gmra.mxu1 %vm400_vm2, %v2014_v6  ;;  %4847 = vmatprep.mubr.msk.bf16.mxu0 %vm400_vm2, %v5212_v30  ;;  %v4172_v6 = vclamps-f32 %v4140_v57, 1.0 }
  0xea   : > { %v5445_v35 = vpop.f32.mrf.mxu0  ;;  %4813 = vmatprep.mubr.msk.bf16.mxu1 %vm400_vm2, %v2015_v19  ;;  %v2719_v49 = vpack.c.bf16 %v4168_v36, %v4167_v13  ;;  %v4143_v13 = vld [vmem:[%s4990_s23 + $0x210] sm:$0xff]  ;;  %v4144_v36 = vld [vmem:[%s4990_s23 + $0x218] sm:$0xff] }
  0xeb   : > { %v5448_v43 = vpop.f32.mrf.mxu1  ;;  %v2721_v38 = vpack.c.bf16 %v4172_v6, %v4171_v50  ;;  %v4175_v56 = vclamps-f32 %v4143_v13, 1.0  ;;  %v4176_v57 = vclamps-f32 %v4144_v36, 1.0  ;;  %v2722_v50 = vpack.c.bf16 %v4174_v47, %v4173_v44  ;;  %v4145_v6 = vld [vmem:[%s4990_s23 + $0x228] sm:$0xff] }
  0xec   : > { %v5450_v30 = vpop.f32.mrf.mxu0  ;;  %v4148_v13 = vld [vmem:[%s4990_s23 + $0x248] sm:$0xff] }
  0xed   : > { %v5452_v60 = vpop.f32.mrf.mxu1 }
  0xee   : > { %v5457_v48 = vpop.f32.mrf.mxu0 }
  0xef   : > { %v5462_v54 = vpop.f32.mrf.mxu1 }
  0xf0   : > { %v5466_v62 = vpop.f32.mrf.mxu0  ;;  %4848 = vmatmul.mubr.msk.bf16.gmra.mxu0 %vm400_vm2, %v2375_v37 }
  0xf1   : > { %v5469_v2 = vpop.f32.mrf.mxu1  ;;  %4814 = vmatmul.mubr.msk.bf16.gmra.mxu1 %vm400_vm2, %v2016_v39  ;;  %4887 = vmatprep.mubr.msk.bf16.mxu0 %vm400_vm2, %v3077_v40  ;;  %v4254_v39 = vclamps-f32 %v4222_v27, 1.0  ;;  %v4255_v40 = vclamps-f32 %v4223_v28, 1.0  ;;  %v2723_v28 = vpack.c.bf16 %v4176_v57, %v4175_v56  ;;  %v4179_v56 = vclamps-f32 %v4147_v33, 1.0  ;;  %v4151_v33 = vld [vmem:[%s4990_s23 + $0x270] sm:$0xff] }
  0xf2   : > { %v5473_v18 = vpop.f32.mrf.mxu0  ;;  %4853 = vmatprep.mubr.msk.bf16.mxu1 %vm400_vm2, %v2719_v49  ;;  %v4256_v49 = vclamps-f32 %v4224_v32, 1.0  ;;  %v4229_v32 = vld [vmem:[%s4990_s23 + $0xb1] sm:$0xff]  ;;  %v4180_v57 = vclamps-f32 %v4148_v13, 1.0 }
  0xf3   : > { %v5476_v45 = vpop.f32.mrf.mxu1  ;;  %v3080_v61 = vpack.c.bf16 %v4255_v40, %v4254_v39  ;;  %v4152_v13 = vld [vmem:[%s4990_s23 + $0x278] sm:$0xff] }
  0xf4   : > { %v5478_v17 = vpop.f32.mrf.mxu0 }
  0xf5   : > { %v5480_v19 = vpop.f32.mrf.mxu1 }
  0xf6   : > { %v5485_v29 = vpop.f32.mrf.mxu0 }
  0xf7   : > { %v5490_v34 = vpop.f32.mrf.mxu1 }
  0xf8   : > { %v4685_v37 = vpop.f32.mrf.mxu0  ;;  %4888 = vmatmul.mubr.msk.bf16.vlgmr.msra.gmra.mxu0 %vm400_vm2, %v3078_v5  ;;  %v4226_v5 = vld [vmem:[%s4990_s23 + $0x91] sm:$0xff] }
  0xf9   : > { %v4651_v41 = vpop.f32.mrf.mxu1  ;;  %4854 = vmatmul.mubr.msk.bf16.vlgmr.msra.gmra.mxu1 %vm400_vm2, %v2720_v22  ;;  %4891 = vmatprep.mubr.msk.bf16.mxu0 %vm400_vm2, %v3079_v12  ;;  %v4227_v22 = vld [vmem:[%s4990_s23 + $0x99] sm:$0xff]  ;;  %v4258_v40 = vclamps-f32 %v4226_v5, 1.0  ;;  %v4230_v5 = vld [vmem:[%s4990_s23 + $0xc1] sm:$0xff] }
  0xfa   : > { %v711_v52 = vadd.f32 %v4651_v41, %v5380_v53  ;;  %v1028_v21 = vpop.f32.mrf.mxu0  ;;  %4857 = vmatprep.mubr.msk.bf16.mxu1 %vm400_vm2, %v2721_v38  ;;  %v3081_v53 = vpack.c.bf16 %v4257_v51, %v4256_v49  ;;  %v4146_v38 = vld [vmem:[%s4990_s23 + $0x230] sm:$0xff]  ;;  %v4259_v41 = vclamps-f32 %v4227_v22, 1.0  ;;  %v4260_v49 = vclamps-f32 %v4228_v31, 1.0  ;;  %v4150_v31 = vld [vmem:[%s4990_s23 + $0x260] sm:$0xff] }
  0xfb   : > { %v702_v42 = vpop.f32.mrf.mxu1  ;;  %v4178_v47 = vclamps-f32 %v4146_v38, 1.0  ;;  %v4261_v51 = vclamps-f32 %v4229_v32, 1.0  ;;  %v4231_v22 = vld [vmem:[%s4990_s23 + $0xc9] sm:$0xff]  ;;  %v2725_v38 = vpack.c.bf16 %v4180_v57, %v4179_v56  ;;  %v4232_v32 = vld [vmem:[%s4990_s23 + $0xd9] sm:$0xff]  ;;  %v4183_v56 = vclamps-f32 %v4151_v33, 1.0 }
  0xfc   : > { %v5499_v0 = vadd.f32 %v4685_v37, %v711_v52  ;;  %v703_v7 = vadd.f32 %v702_v42, %v5389_v55  ;;  %v4686_v8 = vpop.f32.mrf.mxu0  ;;  %v4184_v57 = vclamps-f32 %v4152_v13, 1.0  ;;  %v4155_v33 = vld [vmem:[%s4990_s23 + $0x2a0] sm:$0xff]  ;;  %v4156_v13 = vld [vmem:[%s4990_s23 + $0x2a8] sm:$0xff] }
  0xfd   : > { %v4652_v15 = vpop.f32.mrf.mxu1 }
  0xfe   : > { %v5505_v12 = vadd.f32 %v1028_v21, %v703_v7  ;;  %v714_v24 = vadd.f32 %v4652_v15, %v5394_v58  ;;  %v1031_v27 = vpop.f32.mrf.mxu0  ;;  %v4177_v58 = vclamps-f32 %v4145_v6, 1.0  ;;  %v3082_v15 = vpack.c.bf16 %v4259_v41, %v4258_v40  ;;  %v4149_v6 = vld [vmem:[%s4990_s23 + $0x258] sm:$0xff] }
  0xff   : > { %v705_v55 = vpop.f32.mrf.mxu1  ;;  %v4262_v41 = vclamps-f32 %v4230_v5, 1.0  ;;  %v4234_v5 = vld [vmem:[%s4990_s23 + $0xf1] sm:$0xff] }
 0x100   : > { %v5513_v36 = vadd.f32 %v4686_v8, %v714_v24  ;;  %v706_v37 = vadd.f32 %v705_v55, %v5398_v63  ;;  %v4689_v39 = vpop.f32.mrf.mxu0  ;;  %4892 = vmatmul.mubr.msk.bf16.gmra.mxu0 %vm400_vm2, %v3080_v61  ;;  %v4233_v55 = vld [vmem:[%s4990_s23 + $0xe1] sm:$0xff] }
 0x101   : > { %v4655_v44 = vpop.f32.mrf.mxu1  ;;  %4858 = vmatmul.mubr.msk.bf16.gmra.mxu1 %vm400_vm2, %v2722_v50  ;;  %4895 = vmatprep.mubr.msk.bf16.mxu0 %vm400_vm2, %v3081_v53  ;;  %v2724_v53 = vpack.c.bf16 %v4178_v47, %v4177_v58  ;;  %v4182_v47 = vclamps-f32 %v4150_v31, 1.0  ;;  %v2727_v31 = vpack.c.bf16 %v4184_v57, %v4183_v56  ;;  %v4187_v56 = vclamps-f32 %v4155_v33, 1.0  ;;  %v4159_v33 = vld [vmem:[%s4990_s23 + $0x2d0] sm:$0xff] }
 0x102   : > { %v5519_v52 = vadd.f32 %v1031_v27, %v706_v37  ;;  %v727_v63 = vadd.f32 %v4655_v44, %v5406_v10  ;;  %v1044_v21 = vpop.f32.mrf.mxu0  ;;  %4861 = vmatprep.mubr.msk.bf16.mxu1 %vm400_vm2, %v2723_v28  ;;  %v3083_v10 = vpack.c.bf16 %v4261_v51, %v4260_v49  ;;  %v4263_v44 = vclamps-f32 %v4231_v22, 1.0  ;;  %v4235_v22 = vld [vmem:[%s4990_s23 + $0xf9] sm:$0xff] }
 0x103   : > { %v718_v42 = vpop.f32.mrf.mxu1  ;;  %v4264_v49 = vclamps-f32 %v4232_v32, 1.0  ;;  %v4265_v51 = vclamps-f32 %v4233_v55, 1.0  ;;  %v4154_v32 = vld [vmem:[%s4990_s23 + $0x290] sm:$0xff]  ;;  %v4188_v57 = vclamps-f32 %v4156_v13, 1.0  ;;  %v4160_v13 = vld [vmem:[%s4990_s23 + $0x2d8] sm:$0xff] }
 0x104   : > { %v5523_v7 = vadd.f32 %v4689_v39, %v727_v63  ;;  %v719_v8 = vadd.f32 %v718_v42, %v5415_v16  ;;  %v4690_v61 = vpop.f32.mrf.mxu0  ;;  %v4236_v55 = vld [vmem:[%s4990_s23 + $0x109] sm:$0xff] }
 0x105   : > { %v4656_v50 = vpop.f32.mrf.mxu1 }
 0x106   : > { %v5529_v24 = vadd.f32 %v1044_v21, %v719_v8  ;;  %v730_v27 = vadd.f32 %v4656_v50, %v5420_v20  ;;  %v1047_v28 = vpop.f32.mrf.mxu0  ;;  %v4181_v20 = vclamps-f32 %v4149_v6, 1.0  ;;  %v3084_v50 = vpack.c.bf16 %v4263_v44, %v4262_v41  ;;  %v4153_v6 = vld [vmem:[%s4990_s23 + $0x288] sm:$0xff] }
 0x107   : > { %v721_v16 = vpop.f32.mrf.mxu1  ;;  %v4266_v44 = vclamps-f32 %v4234_v5, 1.0  ;;  %v4238_v5 = vld [vmem:[%s4990_s23 + $0x121] sm:$0xff] }
 0x108   : > { %v5537_v37 = vadd.f32 %v4690_v61, %v730_v27  ;;  %v722_v39 = vadd.f32 %v721_v16, %v5427_v14  ;;  %v4693_v40 = vpop.f32.mrf.mxu0  ;;  %4896 = vmatmul.mubr.msk.bf16.gmra.mxu0 %vm400_vm2, %v3082_v15  ;;  %v4237_v16 = vld [vmem:[%s4990_s23 + $0x111] sm:$0xff] }
 0x109   : > { %v4659_v58 = vpop.f32.mrf.mxu1  ;;  %4862 = vmatmul.mubr.msk.bf16.gmra.mxu1 %vm400_vm2, %v2724_v53  ;;  %4899 = vmatprep.mubr.msk.bf16.mxu0 %vm400_vm2, %v3083_v10  ;;  %v2726_v10 = vpack.c.bf16 %v4182_v47, %v4181_v20  ;;  %v4186_v47 = vclamps-f32 %v4154_v32, 1.0  ;;  %v2729_v32 = vpack.c.bf16 %v4188_v57, %v4187_v56  ;;  %v4191_v56 = vclamps-f32 %v4159_v33, 1.0  ;;  %v4163_v33 = vld [vmem:[%s4990_s23 + $0x300] sm:$0xff] }
 0x10a   : > { %v5543_v63 = vadd.f32 %v1047_v28, %v722_v39  ;;  %v743_v14 = vadd.f32 %v4659_v58, %v5436_v23  ;;  %v1060_v21 = vpop.f32.mrf.mxu0  ;;  %4865 = vmatprep.mubr.msk.bf16.mxu1 %vm400_vm2, %v2725_v38  ;;  %v3085_v23 = vpack.c.bf16 %v4265_v51, %v4264_v49  ;;  %v4267_v58 = vclamps-f32 %v4235_v22, 1.0  ;;  %v4239_v22 = vld [vmem:[%s4990_s23 + $0x129] sm:$0xff] }
 0x10b   : > { %v734_v42 = vpop.f32.mrf.mxu1  ;;  %v4268_v49 = vclamps-f32 %v4236_v55, 1.0  ;;  %v4269_v51 = vclamps-f32 %v4237_v16, 1.0  ;;  %v4158_v55 = vld [vmem:[%s4990_s23 + $0x2c0] sm:$0xff]  ;;  %v4192_v57 = vclamps-f32 %v4160_v13, 1.0  ;;  %v4164_v13 = vld [vmem:[%s4990_s23 + $0x308] sm:$0xff] }
 0x10c   : > { %v5547_v8 = vadd.f32 %v4693_v40, %v743_v14  ;;  %v735_v61 = vadd.f32 %v734_v42, %v5445_v35  ;;  %v4694_v15 = vpop.f32.mrf.mxu0  ;;  %v4240_v16 = vld [vmem:[%s4990_s23 + $0x139] sm:$0xff] }
 0x10d   : > { %v4660_v53 = vpop.f32.mrf.mxu1 }
 0x10e   : > { %v5553_v27 = vadd.f32 %v1060_v21, %v735_v61  ;;  %v746_v28 = vadd.f32 %v4660_v53, %v5450_v30  ;;  %v1063_v38 = vpop.f32.mrf.mxu0  ;;  %v4185_v30 = vclamps-f32 %v4153_v6, 1.0  ;;  %v3086_v53 = vpack.c.bf16 %v4267_v58, %v4266_v44  ;;  %v4157_v6 = vld [vmem:[%s4990_s23 + $0x2b8] sm:$0xff] }
 0x10f   : > { %v737_v35 = vpop.f32.mrf.mxu1  ;;  %v4270_v58 = vclamps-f32 %v4238_v5, 1.0  ;;  %v4242_v5 = vld [vmem:[%s4990_s23 + $0x151] sm:$0xff] }
 0x110   : > { %v5561_v39 = vadd.f32 %v4694_v15, %v746_v28  ;;  %v738_v40 = vadd.f32 %v737_v35, %v5457_v48  ;;  %v4697_v41 = vpop.f32.mrf.mxu0  ;;  %4900 = vmatmul.mubr.msk.bf16.gmra.mxu0 %vm400_vm2, %v3084_v50  ;;  %v4241_v35 = vld [vmem:[%s4990_s23 + $0x141] sm:$0xff] }
 0x111   : > { %v4663_v20 = vpop.f32.mrf.mxu1  ;;  %4866 = vmatmul.mubr.msk.bf16.gmra.mxu1 %vm400_vm2, %v2726_v10  ;;  %4903 = vmatprep.mubr.msk.bf16.mxu0 %vm400_vm2, %v3085_v23  ;;  %v2728_v23 = vpack.c.bf16 %v4186_v47, %v4185_v30  ;;  %v4190_v47 = vclamps-f32 %v4158_v55, 1.0  ;;  %v2731_v55 = vpack.c.bf16 %v4192_v57, %v4191_v56  ;;  %v4195_v56 = vclamps-f32 %v4163_v33, 1.0 }
 0x112   : > { %v5567_v14 = vadd.f32 %v1063_v38, %v738_v40  ;;  %v759_v48 = vadd.f32 %v4663_v20, %v5466_v62  ;;  %v1076_v21 = vpop.f32.mrf.mxu0  ;;  %4869 = vmatprep.mubr.msk.bf16.mxu1 %vm400_vm2, %v2727_v31  ;;  %v3087_v62 = vpack.c.bf16 %v4269_v51, %v4268_v49  ;;  %v4271_v20 = vclamps-f32 %v4239_v22, 1.0  ;;  %v4243_v22 = vld [vmem:[%s4990_s23 + $0x159] sm:$0xff] }
 0x113   : > { %v750_v42 = vpop.f32.mrf.mxu1  ;;  %v4272_v49 = vclamps-f32 %v4240_v16, 1.0  ;;  %v4273_v51 = vclamps-f32 %v4241_v35, 1.0  ;;  %v4162_v16 = vld [vmem:[%s4990_s23 + $0x2f0] sm:$0xff]  ;;  %v4196_v57 = vclamps-f32 %v4164_v13, 1.0 }
 0x114   : > { %v5571_v61 = vadd.f32 %v4697_v41, %v759_v48  ;;  %v751_v15 = vadd.f32 %v750_v42, %v5473_v18  ;;  %v4698_v50 = vpop.f32.mrf.mxu0  ;;  %v4244_v35 = vld [vmem:[%s4990_s23 + $0x169] sm:$0xff] }
 0x115   : > { %v4664_v10 = vpop.f32.mrf.mxu1 }
 0x116   : > { %v5577_v28 = vadd.f32 %v1076_v21, %v751_v15  ;;  %v762_v38 = vadd.f32 %v4664_v10, %v5478_v17  ;;  %v1079_v31 = vpop.f32.mrf.mxu0  ;;  %v4189_v17 = vclamps-f32 %v4157_v6, 1.0  ;;  %v3088_v10 = vpack.c.bf16 %v4271_v20, %v4270_v58  ;;  %v4161_v6 = vld [vmem:[%s4990_s23 + $0x2e8] sm:$0xff] }
 0x117   : > { %v753_v18 = vpop.f32.mrf.mxu1  ;;  %v4274_v20 = vclamps-f32 %v4242_v5, 1.0  ;;  %v4246_v5 = vld [vmem:[%s4990_s23 + $0x181] sm:$0xff] }
 0x118   : > { %v5585_v40 = vadd.f32 %v4698_v50, %v762_v38  ;;  %v754_v41 = vadd.f32 %v753_v18, %v5485_v29  ;;  %v4701_v44 = vpop.f32.mrf.mxu0  ;;  %4904 = vmatmul.mubr.msk.bf16.gmra.mxu0 %vm400_vm2, %v3086_v53  ;;  %v4245_v18 = vld [vmem:[%s4990_s23 + $0x171] sm:$0xff]  ;;  %v4278_v13 = vclamps-f32 %v4246_v5, 1.0 }
 0x119   : > { %v4667_v30 = vpop.f32.mrf.mxu1  ;;  %4870 = vmatmul.mubr.msk.bf16.gmra.mxu1 %vm400_vm2, %v2728_v23  ;;  %4907 = vmatprep.mubr.msk.bf16.mxu0 %vm400_vm2, %v3087_v62  ;;  %v2730_v62 = vpack.c.bf16 %v4190_v47, %v4189_v17  ;;  %v4194_v47 = vclamps-f32 %v4162_v16, 1.0  ;;  %v4165_v16 = vld [vmem:[%s4990_s23 + $0x318] sm:$0xff] }
 0x11a   : > { %v5591_v48 = vadd.f32 %v1079_v31, %v754_v41  ;;  %v775_v29 = vadd.f32 %v4667_v30, %v5384_v3  ;;  %v1092_v21 = vpop.f32.mrf.mxu0  ;;  %4873 = vmatprep.mubr.msk.bf16.mxu1 %vm400_vm2, %v2729_v32  ;;  %v3089_v3 = vpack.c.bf16 %v4273_v51, %v4272_v49  ;;  %v4275_v30 = vclamps-f32 %v4243_v22, 1.0  ;;  %v4247_v22 = vld [vmem:[%s4990_s23 + $0x189] sm:$0xff] }
 0x11b   : > { %v766_v42 = vpop.f32.mrf.mxu1  ;;  %v4276_v49 = vclamps-f32 %v4244_v35, 1.0  ;;  %v4277_v51 = vclamps-f32 %v4245_v18, 1.0  ;;  %v4166_v35 = vld [vmem:[%s4990_s23 + $0x320] sm:$0xff] }
 0x11c   : > { %v5595_v15 = vadd.f32 %v4701_v44, %v775_v29  ;;  %v767_v50 = vadd.f32 %v766_v42, %v5392_v26  ;;  %v4702_v53 = vpop.f32.mrf.mxu0 }
 0x11d   : > { %v4668_v23 = vpop.f32.mrf.mxu1 }
 0x11e   : > { %v5601_v38 = vadd.f32 %v1092_v21, %v767_v50  ;;  %v778_v31 = vadd.f32 %v4668_v23, %v5396_v59  ;;  %v1095_v32 = vpop.f32.mrf.mxu0  ;;  %v4193_v59 = vclamps-f32 %v4161_v6, 1.0  ;;  %v3090_v23 = vpack.c.bf16 %v4275_v30, %v4274_v20 }
 0x11f   : > { %v769_v26 = vpop.f32.mrf.mxu1  ;;  %v3091_v6 = vpack.c.bf16 %v4277_v51, %v4276_v49  ;;  %v4198_v20 = vclamps-f32 %v4166_v35, 1.0 }
 0x120   : > { %v5609_v41 = vadd.f32 %v4702_v53, %v778_v31  ;;  %v770_v44 = vadd.f32 %v769_v26, %v5402_v4  ;;  %v4705_v58 = vpop.f32.mrf.mxu0  ;;  %4908 = vmatmul.mubr.msk.bf16.gmra.mxu0 %vm400_vm2, %v3088_v10 }
 0x121   : > { %v4671_v17 = vpop.f32.mrf.mxu1  ;;  %4874 = vmatmul.mubr.msk.bf16.gmra.mxu1 %vm400_vm2, %v2730_v62  ;;  %4911 = vmatprep.mubr.msk.bf16.mxu0 %vm400_vm2, %v3089_v3  ;;  %v2732_v3 = vpack.c.bf16 %v4194_v47, %v4193_v59 }
 0x122   : > { %v5615_v29 = vadd.f32 %v1095_v32, %v770_v44  ;;  %v791_v4 = vadd.f32 %v4671_v17, %v5410_v11  ;;  %v1108_v21 = vpop.f32.mrf.mxu0  ;;  %4877 = vmatprep.mubr.msk.bf16.mxu1 %vm400_vm2, %v2731_v55  ;;  %v2733_v55 = vpack.c.bf16 %v4196_v57, %v4195_v56  ;;  %v4279_v44 = vclamps-f32 %v4247_v22, 1.0 }
 0x123   : > { %v782_v42 = vpop.f32.mrf.mxu1 }
 0x124   : > { %v5619_v50 = vadd.f32 %v4705_v58, %v791_v4  ;;  %v783_v53 = vadd.f32 %v782_v42, %v5418_v46  ;;  %v4706_v10 = vpop.f32.mrf.mxu0  ;;  %v3092_v4 = vpack.c.bf16 %v4279_v44, %v4278_v13 }
 0x125   : > { %v4672_v62 = vpop.f32.mrf.mxu1 }
 0x126   : > { %v5624_v11 = vadd.f32 %v1108_v21, %v783_v53  ;;  %v794_v31 = vadd.f32 %v4672_v62, %v5422_v1  ;;  %v1111_v32 = vpop.f32.mrf.mxu0  ;;  %v4197_v1 = vclamps-f32 %v4165_v16, 1.0 }
 0x127   : > { %v785_v18 = vpop.f32.mrf.mxu1 }
 0x128   : > { %v5629_v26 = vadd.f32 %v4706_v10, %v794_v31  ;;  %v786_v46 = vadd.f32 %v785_v18, %v5432_v25  ;;  %v4709_v33 = vpop.f32.mrf.mxu0  ;;  %4912 = vmatmul.mubr.msk.bf16.gmra.mxu0 %vm400_vm2, %v3090_v23  ;;  %v2734_v56 = vpack.c.bf16 %v4198_v20, %v4197_v1 }
 0x129   : > { %v4675_v58 = vpop.f32.mrf.mxu1  ;;  %4878 = vmatmul.mubr.msk.bf16.gmra.mxu1 %vm400_vm2, %v2732_v3  ;;  %4915 = vmatprep.mubr.msk.bf16.mxu0 %vm400_vm2, %v3091_v6 }
 0x12a   : > { %v5635_v30 = vadd.f32 %v1111_v32, %v786_v46  ;;  %v807_v17 = vadd.f32 %v4675_v58, %v5440_v9  ;;  %v1124_v59 = vpop.f32.mrf.mxu0  ;;  %4881 = vmatprep.mubr.msk.bf16.mxu1 %vm400_vm2, %v2733_v55 }
 0x12b   : > { %v798_v25 = vpop.f32.mrf.mxu1 }
 0x12c   : > { %v5639_v47 = vadd.f32 %v4709_v33, %v807_v17  ;;  %v799_v49 = vadd.f32 %v798_v25, %v5448_v43  ;;  %v4710_v51 = vpop.f32.mrf.mxu0 }
 0x12d   : > { %v4676_v21 = vpop.f32.mrf.mxu1 }
 0x12e   : > { %v5642_v57 = vadd.f32 %v1124_v59, %v799_v49  ;;  %v810_v42 = vadd.f32 %v4676_v21, %v5452_v60  ;;  %v1127_v53 = vpop.f32.mrf.mxu0 }
 0x12f   : > { %v801_v10 = vpop.f32.mrf.mxu1 }
 0x130   : > { %v5645_v23 = vadd.f32 %v4710_v51, %v810_v42  ;;  %v802_v9 = vadd.f32 %v801_v10, %v5462_v54  ;;  %v4713_v62 = vpop.f32.mrf.mxu0  ;;  %4916 = vmatmul.mubr.msk.bf16.gmra.mxu0 %vm400_vm2, %v3092_v4 }
 0x131   : > { %v4679_v3 = vpop.f32.mrf.mxu1  ;;  %4882 = vmatmul.mubr.msk.bf16.gmra.mxu1 %vm400_vm2, %v2734_v56 }
 0x132   : > { %v5650_v43 = vadd.f32 %v1127_v53, %v802_v9  ;;  %v823_v6 = vadd.f32 %v4679_v3, %v5469_v2  ;;  %v1140_v5 = vpop.f32.mrf.mxu0 }
 0x133   : > { %v814_v22 = vpop.f32.mrf.mxu1 }
 0x134   : > { %v5653_v31 = vadd.f32 %v4713_v62, %v823_v6  ;;  %v815_v60 = vadd.f32 %v814_v22, %v5476_v45  ;;  %v4714_v32 = vpop.f32.mrf.mxu0 }
 0x135   : > { %v4680_v55 = vpop.f32.mrf.mxu1 }
 0x136   : > { %v5656_v16 = vadd.f32 %v1140_v5, %v815_v60  ;;  %v826_v54 = vadd.f32 %v4680_v55, %v5480_v19  ;;  %v1143_v35 = vpop.f32.mrf.mxu0 }
 0x137   : > { %v817_v18 = vpop.f32.mrf.mxu1 }
 0x138   : > { %v5659_v46 = vadd.f32 %v4714_v32, %v826_v54  ;;  %v818_v33 = vadd.f32 %v817_v18, %v5490_v34  ;;  %v4753_v13 = vpop.f32.mrf.mxu0 }
 0x139   : > { %v4719_v2 = vpop.f32.mrf.mxu1 }
 0x13a   : > { %v5662_v44 = vadd.f32 %v1143_v35, %v818_v33  ;;  %v1516_v58 = vadd.f32 %v4719_v2, %v5499_v0  ;;  %v1746_v1 = vpop.f32.mrf.mxu0 }
 0x13b   : > { %v1387_v45 = vpop.f32.mrf.mxu1 }
 0x13c   : > { %v5665_v20 = vadd.f32 %v4753_v13, %v1516_v58  ;;  %v1514_v17 = vadd.f32 %v1387_v45, %v5505_v12  ;;  %v4754_v59 = vpop.f32.mrf.mxu0 }
 0x13d   : > { %v4720_v19 = vpop.f32.mrf.mxu1 }
 0x13e   : > { %v5668_v25 = vadd.f32 %v1746_v1, %v1514_v17  ;;  %v1517_v49 = vadd.f32 %v4720_v19, %v5513_v36  ;;  %v1749_v51 = vpop.f32.mrf.mxu0 }
 0x13f   : > { %v1390_v34 = vpop.f32.mrf.mxu1 }
 0x140   : > { %v5671_v4 = vadd.f32 %v4754_v59, %v1517_v49  ;;  %v1515_v21 = vadd.f32 %v1390_v34, %v5519_v52  ;;  %v4757_v56 = vpop.f32.mrf.mxu0 }
 0x141   : > { %v4723_v0 = vpop.f32.mrf.mxu1 }
 0x142   : > { %v5674_v42 = vadd.f32 %v1749_v51, %v1515_v21  ;;  %v1520_v53 = vadd.f32 %v4723_v0, %v5523_v7  ;;  %v1762_v10 = vpop.f32.mrf.mxu0 }
 0x143   : > { %v1403_v12 = vpop.f32.mrf.mxu1 }
 0x144   : > { %v5677_v9 = vadd.f32 %v4757_v56, %v1520_v53  ;;  %v1518_v62 = vadd.f32 %v1403_v12, %v5529_v24  ;;  %v4758_v3 = vpop.f32.mrf.mxu0 }
 0x145   : > { %v4724_v36 = vpop.f32.mrf.mxu1 }
 0x146   : > { %v5680_v6 = vadd.f32 %v1762_v10, %v1518_v62  ;;  %v1521_v5 = vadd.f32 %v4724_v36, %v5537_v37  ;;  %v1765_v22 = vpop.f32.mrf.mxu0 }
 0x147   : > { %v1406_v52 = vpop.f32.mrf.mxu1 }
 0x148   : > { %v5683_v60 = vadd.f32 %v4758_v3, %v1521_v5  ;;  %v1519_v32 = vadd.f32 %v1406_v52, %v5543_v63  ;;  %v4761_v55 = vpop.f32.mrf.mxu0 }
 0x149   : > { %v4727_v7 = vpop.f32.mrf.mxu1 }
 0x14a   : > { %v5686_v54 = vadd.f32 %v1765_v22, %v1519_v32  ;;  %v1524_v35 = vadd.f32 %v4727_v7, %v5547_v8  ;;  %v1778_v18 = vpop.f32.mrf.mxu0 }
 0x14b   : > { %v1419_v24 = vpop.f32.mrf.mxu1 }
 0x14c   : > { %v5689_v33 = vadd.f32 %v4761_v55, %v1524_v35  ;;  %v1522_v13 = vadd.f32 %v1419_v24, %v5553_v27  ;;  %v4762_v2 = vpop.f32.mrf.mxu0 }
 0x14d   : > { %v4728_v37 = vpop.f32.mrf.mxu1 }
 0x14e   : > { %v5692_v58 = vadd.f32 %v1778_v18, %v1522_v13  ;;  %v1525_v1 = vadd.f32 %v4728_v37, %v5561_v39  ;;  %v1781_v45 = vpop.f32.mrf.mxu0 }
 0x14f   : > { %v1422_v63 = vpop.f32.mrf.mxu1 }
 0x150   : > { %v5695_v17 = vadd.f32 %v4762_v2, %v1525_v1  ;;  %v1523_v59 = vadd.f32 %v1422_v63, %v5567_v14  ;;  %v4765_v19 = vpop.f32.mrf.mxu0 }
 0x151   : > { %v4731_v8 = vpop.f32.mrf.mxu1 }
 0x152   : > { %v5698_v49 = vadd.f32 %v1781_v45, %v1523_v59  ;;  %v1528_v51 = vadd.f32 %v4731_v8, %v5571_v61  ;;  %v1794_v34 = vpop.f32.mrf.mxu0 }
 0x153   : > { %v1435_v27 = vpop.f32.mrf.mxu1 }
 0x154   : > { %v5701_v21 = vadd.f32 %v4765_v19, %v1528_v51  ;;  %v1526_v56 = vadd.f32 %v1435_v27, %v5577_v28  ;;  %v4766_v0 = vpop.f32.mrf.mxu0 }
 0x155   : > { %v4732_v39 = vpop.f32.mrf.mxu1 }
 0x156   : > { %v5704_v53 = vadd.f32 %v1794_v34, %v1526_v56  ;;  %v1529_v10 = vadd.f32 %v4732_v39, %v5585_v40  ;;  %v1797_v12 = vpop.f32.mrf.mxu0 }
 0x157   : > { %v1438_v14 = vpop.f32.mrf.mxu1 }
 0x158   : > { %v5707_v62 = vadd.f32 %v4766_v0, %v1529_v10  ;;  %v1527_v3 = vadd.f32 %v1438_v14, %v5591_v48  ;;  %v4769_v36 = vpop.f32.mrf.mxu0 }
 0x159   : > { %v4735_v61 = vpop.f32.mrf.mxu1 }
 0x15a   : > { %v5710_v5 = vadd.f32 %v1797_v12, %v1527_v3  ;;  %v1532_v22 = vadd.f32 %v4735_v61, %v5595_v15  ;;  %v1810_v52 = vpop.f32.mrf.mxu0 }
 0x15b   : > { %v1451_v28 = vpop.f32.mrf.mxu1 }
 0x15c   : > { %v5713_v32 = vadd.f32 %v4769_v36, %v1532_v22  ;;  %v1530_v55 = vadd.f32 %v1451_v28, %v5601_v38  ;;  %v4770_v7 = vpop.f32.mrf.mxu0 }
 0x15d   : > { %v4736_v40 = vpop.f32.mrf.mxu1 }
 0x15e   : > { %v5716_v35 = vadd.f32 %v1810_v52, %v1530_v55  ;;  %v1533_v18 = vadd.f32 %v4736_v40, %v5609_v41  ;;  %v1813_v24 = vpop.f32.mrf.mxu0 }
 0x15f   : > { %v1454_v48 = vpop.f32.mrf.mxu1 }
 0x160   : > { %v5719_v13 = vadd.f32 %v4770_v7, %v1533_v18  ;;  %v1531_v2 = vadd.f32 %v1454_v48, %v5615_v29  ;;  %v4773_v37 = vpop.f32.mrf.mxu0 }
 0x161   : > { %v4739_v15 = vpop.f32.mrf.mxu1 }
 0x162   : > { %v5722_v1 = vadd.f32 %v1813_v24, %v1531_v2  ;;  %v1536_v45 = vadd.f32 %v4739_v15, %v5619_v50  ;;  %v1826_v63 = vpop.f32.mrf.mxu0 }
 0x163   : > { %v1467_v38 = vpop.f32.mrf.mxu1 }
 0x164   : > { %v5725_v59 = vadd.f32 %v4773_v37, %v1536_v45  ;;  %v1534_v19 = vadd.f32 %v1467_v38, %v5624_v11  ;;  %v4774_v8 = vpop.f32.mrf.mxu0 }
 0x165   : > { %v4740_v41 = vpop.f32.mrf.mxu1 }
 0x166   : > { %v5728_v51 = vadd.f32 %v1826_v63, %v1534_v19  ;;  %v1537_v34 = vadd.f32 %v4740_v41, %v5629_v26  ;;  %v1829_v27 = vpop.f32.mrf.mxu0 }
 0x167   : > { %v1470_v29 = vpop.f32.mrf.mxu1 }
 0x168   : > { %v5731_v56 = vadd.f32 %v4774_v8, %v1537_v34  ;;  %v1535_v0 = vadd.f32 %v1470_v29, %v5635_v30  ;;  %v4777_v39 = vpop.f32.mrf.mxu0 }
 0x169   : > { %v4743_v50 = vpop.f32.mrf.mxu1 }
 0x16a   : > { %v5734_v10 = vadd.f32 %v1829_v27, %v1535_v0  ;;  %v1540_v12 = vadd.f32 %v4743_v50, %v5639_v47  ;;  %v1842_v14 = vpop.f32.mrf.mxu0 }
 0x16b   : > { %v1483_v11 = vpop.f32.mrf.mxu1 }
 0x16c   : > { %v5737_v3 = vadd.f32 %v4777_v39, %v1540_v12  ;;  %v1538_v36 = vadd.f32 %v1483_v11, %v5642_v57  ;;  %v4778_v61 = vpop.f32.mrf.mxu0 }
 0x16d   : > { %v4744_v26 = vpop.f32.mrf.mxu1 }
 0x16e   : > { %v5740_v22 = vadd.f32 %v1842_v14, %v1538_v36  ;;  %v1541_v52 = vadd.f32 %v4744_v26, %v5645_v23  ;;  %v1845_v28 = vpop.f32.mrf.mxu0 }
 0x16f   : > { %v1486_v30 = vpop.f32.mrf.mxu1 }
 0x170   : > { %v5743_v55 = vadd.f32 %v4778_v61, %v1541_v52  ;;  %v1539_v7 = vadd.f32 %v1486_v30, %v5650_v43  ;;  %v4781_v40 = vpop.f32.mrf.mxu0 }
 0x171   : > { %v4747_v47 = vpop.f32.mrf.mxu1 }
 0x172   : > { %6002 = vst [vmem:[#allocation2_spill] sm:$0xff] %v5743_v55  ;;  %v5746_v18 = vadd.f32 %v1845_v28, %v1539_v7  ;;  %v1544_v24 = vadd.f32 %v4747_v47, %v5653_v31  ;;  %v1858_v48 = vpop.f32.mrf.mxu0 }
 0x173   : > { %v1499_v57 = vpop.f32.mrf.mxu1 }
 0x174   : > { %6003 = vst [vmem:[#allocation3_spill] sm:$0xff] %v5746_v18  ;;  %v5749_v2 = vadd.f32 %v4781_v40, %v1544_v24  ;;  %v1542_v37 = vadd.f32 %v1499_v57, %v5656_v16  ;;  %v4782_v15 = vpop.f32.mrf.mxu0 }
 0x175   : > { %v4748_v23 = vpop.f32.mrf.mxu1 }
 0x176   : > { %v5752_v45 = vadd.f32 %v1858_v48, %v1542_v37  ;;  %v1545_v63 = vadd.f32 %v4748_v23, %v5659_v46  ;;  %v1861_v38 = vpop.f32.mrf.mxu0 }
 0x177   : > { %v1502_v43 = vpop.f32.mrf.mxu1 }
 0x178   : > { %v5755_v19 = vadd.f32 %v4782_v15, %v1545_v63  ;;  %v1543_v8 = vadd.f32 %v1502_v43, %v5662_v44  ;;  %v4821_v41 = vpop.f32.mrf.mxu0 }
 0x179   : > { %v4787_v31 = vpop.f32.mrf.mxu1 }
 0x17a   : > { %6004 = vst [vmem:[#allocation4_spill] sm:$0xff] %v5755_v19  ;;  %v5758_v34 = vadd.f32 %v1861_v38, %v1543_v8  ;;  %v2233_v27 = vadd.f32 %v4787_v31, %v5665_v20  ;;  %v2463_v29 = vpop.f32.mrf.mxu0 }
 0x17b   : > { %v2104_v16 = vpop.f32.mrf.mxu1 }
 0x17c   : > { %6005 = vst [vmem:[#allocation5_spill] sm:$0xff] %v5758_v34  ;;  %v5761_v0 = vadd.f32 %v4821_v41, %v2233_v27  ;;  %v2231_v39 = vadd.f32 %v2104_v16, %v5668_v25  ;;  %v5764_v50 = vpop.f32.mrf.mxu0 }
 0x17d   : > { %v5766_v46 = vpop.f32.mrf.mxu1 }
 0x17e   : > { %v5768_v12 = vadd.f32 %v2463_v29, %v2231_v39  ;;  %v5770_v14 = vpop.f32.mrf.mxu0 }
 0x17f   : > { %v5772_v44 = vpop.f32.mrf.mxu1 }
 0x180   : > { %v4825_v11 = vpop.f32.mrf.mxu0 }
 0x181   : > { %v4791_v36 = vpop.f32.mrf.mxu1 }
 0x182   : > { %v2237_v20 = vadd.f32 %v4791_v36, %v5677_v9  ;;  %v2479_v61 = vpop.f32.mrf.mxu0 }
 0x183   : > { %v2120_v26 = vpop.f32.mrf.mxu1 }
 0x184   : > { %v5775_v52 = vadd.f32 %v4825_v11, %v2237_v20  ;;  %v2235_v25 = vadd.f32 %v2120_v26, %v5680_v6  ;;  %v5778_v28 = vpop.f32.mrf.mxu0 }
 0x185   : > { %v5780_v30 = vpop.f32.mrf.mxu1 }
 0x186   : > { %v5782_v7 = vadd.f32 %v2479_v61, %v2235_v25  ;;  %v5784_v40 = vpop.f32.mrf.mxu0 }
 0x187   : > { %v5786_v47 = vpop.f32.mrf.mxu1 }
 0x188   : > { %v4829_v24 = vpop.f32.mrf.mxu0 }
 0x189   : > { %v4795_v48 = vpop.f32.mrf.mxu1 }
 0x18a   : > { %v2241_v9 = vadd.f32 %v4795_v48, %v5689_v33  ;;  %v2495_v57 = vpop.f32.mrf.mxu0 }
 0x18b   : > { %v2136_v37 = vpop.f32.mrf.mxu1 }
 0x18c   : > { %v5789_v15 = vadd.f32 %v4829_v24, %v2241_v9  ;;  %v2239_v6 = vadd.f32 %v2136_v37, %v5692_v58  ;;  %v5792_v23 = vpop.f32.mrf.mxu0 }
 0x18d   : > { %v5794_v63 = vpop.f32.mrf.mxu1 }
 0x18e   : > { %v5796_v38 = vadd.f32 %v2495_v57, %v2239_v6  ;;  %v5798_v43 = vpop.f32.mrf.mxu0 }
 0x18f   : > { %v5800_v8 = vpop.f32.mrf.mxu1 }
 0x190   : > { %v4833_v41 = vpop.f32.mrf.mxu0 }
 0x191   : > { %v4799_v31 = vpop.f32.mrf.mxu1 }
 0x192   : > { %v2245_v33 = vadd.f32 %v4799_v31, %v5701_v21  ;;  %v2511_v27 = vpop.f32.mrf.mxu0 }
 0x193   : > { %v2152_v29 = vpop.f32.mrf.mxu1 }
 0x194   : > { %v5803_v16 = vadd.f32 %v4833_v41, %v2245_v33  ;;  %v2243_v58 = vadd.f32 %v2152_v29, %v5704_v53  ;;  %v5806_v39 = vpop.f32.mrf.mxu0 }
 0x195   : > { %v5808_v11 = vpop.f32.mrf.mxu1 }
 0x196   : > { %v5810_v36 = vadd.f32 %v2511_v27, %v2243_v58  ;;  %v5812_v20 = vpop.f32.mrf.mxu0 }
 0x197   : > { %v5814_v61 = vpop.f32.mrf.mxu1 }
 0x198   : > { %v4837_v26 = vpop.f32.mrf.mxu0 }
 0x199   : > { %v4803_v25 = vpop.f32.mrf.mxu1 }
 0x19a   : > { %v2249_v21 = vadd.f32 %v4803_v25, %v5713_v32  ;;  %v2527_v24 = vpop.f32.mrf.mxu0 }
 0x19b   : > { %v2168_v48 = vpop.f32.mrf.mxu1 }
 0x19c   : > { %v5817_v9 = vadd.f32 %v4837_v26, %v2249_v21  ;;  %v2247_v53 = vadd.f32 %v2168_v48, %v5716_v35  ;;  %v5820_v57 = vpop.f32.mrf.mxu0 }
 0x19d   : > { %v5822_v37 = vpop.f32.mrf.mxu1 }
 0x19e   : > { %v5824_v6 = vadd.f32 %v2527_v24, %v2247_v53  ;;  %v5826_v41 = vpop.f32.mrf.mxu0 }
 0x19f   : > { %v5828_v31 = vpop.f32.mrf.mxu1 }
 0x1a0   : > { %v4841_v33 = vpop.f32.mrf.mxu0 }
 0x1a1   : > { %v4807_v27 = vpop.f32.mrf.mxu1 }
 0x1a2   : > { %v2253_v32 = vadd.f32 %v4807_v27, %v5725_v59  ;;  %v2543_v29 = vpop.f32.mrf.mxu0 }
 0x1a3   : > { %v2184_v58 = vpop.f32.mrf.mxu1 }
 0x1a4   : > { %v5831_v26 = vadd.f32 %v4841_v33, %v2253_v32  ;;  %v2251_v35 = vadd.f32 %v2184_v58, %v5728_v51  ;;  %v5834_v25 = vpop.f32.mrf.mxu0 }
 0x1a5   : > { %6006 = vst [vmem:[#allocation6_spill] sm:$0xff] %v5834_v25  ;;  %v5836_v21 = vpop.f32.mrf.mxu1 }
 0x1a6   : > { %v5838_v24 = vadd.f32 %v2543_v29, %v2251_v35  ;;  %v5840_v48 = vpop.f32.mrf.mxu0 }
 0x1a7   : > { %6008 = vst [vmem:[#allocation8_spill] sm:$0xff] %v5840_v48  ;;  %v5842_v53 = vpop.f32.mrf.mxu1 }
 0x1a8   : > { %6007 = vst [vmem:[#allocation7_spill] sm:$0xff] %v5838_v24  ;;  %v4845_v34 = vpop.f32.mrf.mxu0 }
 0x1a9   : > { %v4811_v19 = vpop.f32.mrf.mxu1 }
 0x1aa   : > { %v2257_v59 = vadd.f32 %v4811_v19, %v5737_v3  ;;  %v2559_v27 = vpop.f32.mrf.mxu0 }
 0x1ab   : > { %v2200_v18 = vpop.f32.mrf.mxu1 }
 0x1ac   : > { %v5845_v33 = vadd.f32 %v4845_v34, %v2257_v59  ;;  %v2255_v51 = vadd.f32 %v2200_v18, %v5740_v22  ;;  %v5848_v32 = vpop.f32.mrf.mxu0 }
 0x1ad   : > { %v5850_v58 = vpop.f32.mrf.mxu1 }
 0x1ae   : > { %v5852_v29 = vadd.f32 %v2559_v27, %v2255_v51  ;;  %v5854_v35 = vpop.f32.mrf.mxu0 }
 0x1af   : > { %6010 = vst [vmem:[#allocation10_spill] sm:$0xff] %v5854_v35  ;;  %v5856_v55 = vpop.f32.mrf.mxu1 }
 0x1b0   : > { %6009 = vst [vmem:[#allocation9_spill] sm:$0xff] %v5852_v29  ;;  %v4849_v48 = vpop.f32.mrf.mxu0  ;;  %v2234_v29 = vadd.f32 %v5766_v46, %v5671_v4  ;;  %v5882_v4 = vld [vmem:[%s6000_s2] ss:$0 sm:$0xff] }
 0x1b1   : > { %v4815_v24 = vpop.f32.mrf.mxu1 }
 0x1b2   : > { %v2261_v3 = vadd.f32 %v4815_v24, %v5749_v2  ;;  %v2575_v19 = vpop.f32.mrf.mxu0 }
 0x1b3   : > { %v2216_v25 = vpop.f32.mrf.mxu1 }
 0x1b4   : > { %v5859_v34 = vadd.f32 %v4849_v48, %v2261_v3  ;;  %v2259_v22 = vadd.f32 %v2216_v25, %v5752_v45  ;;  %v5862_v18 = vpop.f32.mrf.mxu0  ;;  %v2232_v48 = vadd.f32 %v5772_v44, %v5674_v42 }
 0x1b5   : > { %6012 = vst [vmem:[#allocation12_spill] sm:$0xff] %v5862_v18  ;;  %v5864_v59 = vpop.f32.mrf.mxu1  ;;  %v2593_v18 = vadd.f32 %v5764_v50, %v2234_v29 }
 0x1b6   : > { %6011 = vst [vmem:[#allocation11_spill] sm:$0xff] %v5859_v34  ;;  %v5866_v27 = vadd.f32 %v2575_v19, %v2259_v22  ;;  %v5868_v51 = vpop.f32.mrf.mxu0 }
 0x1b7   : > { %6014 = vst [vmem:[#allocation14_spill] sm:$0xff] %v5868_v51  ;;  %v5870_v35 = vpop.f32.mrf.mxu1 }
 0x1b8   : > { %6013 = vst [vmem:[#allocation13_spill] sm:$0xff] %v5866_v27  ;;  %6015 = vst [vmem:[#allocation15_spill] sm:$0xff] %v5870_v35  ;;  %v4889_v2 = vpop.f32.mrf.mxu0  ;;  %v2591_v27 = vadd.f32 %v5770_v14, %v2232_v48 }
 0x1b9   : > { %v4855_v24 = vpop.f32.mrf.mxu1 }
 0x1ba   : > { %v2951_v45 = vadd.f32 %v4855_v24, %v5761_v0  ;;  %v3180_v25 = vpop.f32.mrf.mxu0 }
 0x1bb   : > { %v2822_v3 = vpop.f32.mrf.mxu1 }
 0x1bc   : > { %v3309_v19 = vadd.f32 %v4889_v2, %v2951_v45  ;;  %v2949_v22 = vadd.f32 %v2822_v3, %v5768_v12  ;;  %v4890_v51 = vpop.f32.mrf.mxu0  ;;  %v2238_v12 = vadd.f32 %v5780_v30, %v5683_v60  ;;  %v2236_v45 = vadd.f32 %v5786_v47, %v5686_v54 }
 0x1bd   : > { %v4856_v46 = vpop.f32.mrf.mxu1 }
 0x1be   : > { %v3307_v42 = vadd.f32 %v3180_v25, %v2949_v22  ;;  %v2952_v44 = vadd.f32 %v4856_v46, %v2593_v18  ;;  %v3183_v0 = vpop.f32.mrf.mxu0  ;;  %v3348_v34 = vadd.f32 %v5882_v4, %v3309_v19  ;;  %v2597_v54 = vadd.f32 %v5778_v28, %v2238_v12 }
 0x1bf   : > { %v2825_v24 = vpop.f32.mrf.mxu1  ;;  %v2595_v47 = vadd.f32 %v5784_v40, %v2236_v45  ;;  %v2242_v28 = vadd.f32 %v5794_v63, %v5695_v17 }
 0x1c0   : > { %v3310_v50 = vadd.f32 %v4890_v51, %v2952_v44  ;;  %v2950_v29 = vadd.f32 %v2825_v24, %v2591_v27  ;;  %v4893_v2 = vpop.f32.mrf.mxu0  ;;  %v3346_v35 = vadd.f32 %v5882_v4, %v3307_v42  ;;  %v3380_v51 = vmax.f32 %v3348_v34, 0.0 }
 0x1c1   : > { %v4859_v3 = vpop.f32.mrf.mxu1 }
 0x1c2   : > { %v3349_v14 = vadd.f32 %v5882_v4, %v3310_v50  ;;  %v3308_v18 = vadd.f32 %v3183_v0, %v2950_v29  ;;  %v2955_v48 = vadd.f32 %v4859_v3, %v5775_v52  ;;  %v3196_v25 = vpop.f32.mrf.mxu0  ;;  %v3378_v34 = vmax.f32 %v3346_v35, 0.0 }
 0x1c3   : > { %v2838_v19 = vpop.f32.mrf.mxu1 }
 0x1c4   : > { %v3381_v27 = vmax.f32 %v3349_v14, 0.0  ;;  %v3347_v22 = vadd.f32 %v5882_v4, %v3308_v18  ;;  %v2953_v60 = vadd.f32 %v2838_v19, %v5782_v7  ;;  %v4894_v30 = vpop.f32.mrf.mxu0  ;;  %v3313_v52 = vadd.f32 %v4893_v2, %v2955_v48 }
 0x1c5   : > { %v4860_v46 = vpop.f32.mrf.mxu1  ;;  %v2601_v19 = vadd.f32 %v5792_v23, %v2242_v28  ;;  %v2246_v23 = vadd.f32 %v5808_v11, %v5707_v62 }
 0x1c6   : > { %v4373_v42 = vpack.c.bf16 %v3381_v27, %v3380_v51  ;;  %v3379_v44 = vmax.f32 %v3347_v22, 0.0  ;;  %v3311_v0 = vadd.f32 %v3196_v25, %v2953_v60  ;;  %v3199_v24 = vpop.f32.mrf.mxu0  ;;  %v2956_v7 = vadd.f32 %v4860_v46, %v2597_v54 }
 0x1c7   : > { %v2841_v50 = vpop.f32.mrf.mxu1  ;;  %v3352_v45 = vadd.f32 %v5882_v4, %v3313_v52  ;;  %v2240_v25 = vadd.f32 %v5800_v8, %v5698_v49  ;;  %v2605_v11 = vadd.f32 %v5806_v39, %v2246_v23 }
 0x1c8   : > { %4445 = vst [vmem:[%s5901_s15 + $0x8] sm:$0xff] %v4373_v42   ;;  %v4368_v40 = vpack.c.bf16 %v3379_v44, %v3378_v34  ;;  %v2954_v29 = vadd.f32 %v2841_v50, %v2595_v47  ;;  %v4897_v12 = vpop.f32.mrf.mxu0  ;;  %v3314_v3 = vadd.f32 %v4894_v30, %v2956_v7  ;;  %v3350_v35 = vadd.f32 %v5882_v4, %v3311_v0 }
 0x1c9   : > { %v4863_v2 = vpop.f32.mrf.mxu1  ;;  %v3384_v30 = vmax.f32 %v3352_v45, 0.0  ;;  %v2599_v8 = vadd.f32 %v5798_v43, %v2240_v25 }
 0x1ca   : > { %4369 = vst [vmem:[%s5901_s15] sm:$0xff] %v4368_v40   ;;  %v3312_v14 = vadd.f32 %v3199_v24, %v2954_v29  ;;  %v2959_v18 = vadd.f32 %v4863_v2, %v5789_v15  ;;  %v3212_v48 = vpop.f32.mrf.mxu0  ;;  %v3353_v17 = vadd.f32 %v5882_v4, %v3314_v3  ;;  %v3382_v15 = vmax.f32 %v3350_v35, 0.0 }
 0x1cb   : > { %v2854_v63 = vpop.f32.mrf.mxu1  ;;  %v2244_v40 = vadd.f32 %v5814_v61, %v5710_v5 }
 0x1cc   : > { %v3351_v51 = vadd.f32 %v5882_v4, %v3312_v14  ;;  %v3317_v27 = vadd.f32 %v4897_v12, %v2959_v18  ;;  %v2957_v22 = vadd.f32 %v2854_v63, %v5796_v38  ;;  %v4898_v60 = vpop.f32.mrf.mxu0  ;;  %v3385_v54 = vmax.f32 %v3353_v17, 0.0 }
 0x1cd   : > { %v4864_v47 = vpop.f32.mrf.mxu1  ;;  %v2603_v25 = vadd.f32 %v5812_v20, %v2244_v40  ;;  %v2248_v20 = vadd.f32 %v5828_v31, %v5722_v1 }
 0x1ce   : > { %v3383_v52 = vmax.f32 %v3351_v51, 0.0  ;;  %v2960_v46 = vadd.f32 %v4864_v47, %v2601_v19  ;;  %v3215_v49 = vpop.f32.mrf.mxu0  ;;  %v4383_v34 = vpack.c.bf16 %v3385_v54, %v3384_v30  ;;  %v3315_v42 = vadd.f32 %v3212_v48, %v2957_v22 }
 0x1cf   : > { %v2857_v44 = vpop.f32.mrf.mxu1  ;;  %v3356_v38 = vadd.f32 %v5882_v4, %v3317_v27  ;;  %v2250_v54 = vadd.f32 %v5822_v37, %v5719_v13 }
 0x1d0   : > { %v4378_v0 = vpack.c.bf16 %v3383_v52, %v3382_v15  ;;  %v3318_v24 = vadd.f32 %v4898_v60, %v2960_v46  ;;  %v4901_v7 = vpop.f32.mrf.mxu0  ;;  %4447 = vst [vmem:[%s5901_s15 + $0x18] sm:$0xff] %v4383_v34   ;;  %v2958_v50 = vadd.f32 %v2857_v44, %v2599_v8  ;;  %v3354_v12 = vadd.f32 %v5882_v4, %v3315_v42 }
 0x1d1   : > { %v4867_v28 = vpop.f32.mrf.mxu1  ;;  %v3388_v2 = vmax.f32 %v3356_v38, 0.0  ;;  %v2609_v31 = vadd.f32 %v5820_v57, %v2250_v54 }
 0x1d2   : > { %4446 = vst [vmem:[%s5901_s15 + $0x10] sm:$0xff] %v4378_v0   ;;  %v3357_v43 = vadd.f32 %v5882_v4, %v3318_v24  ;;  %v2963_v29 = vadd.f32 %v4867_v28, %v5803_v16  ;;  %v3228_v62 = vpop.f32.mrf.mxu0  ;;  %v3316_v45 = vadd.f32 %v3215_v49, %v2958_v50  ;;  %v3386_v19 = vmax.f32 %v3354_v12, 0.0 }
 0x1d3   : > { %v2870_v3 = vpop.f32.mrf.mxu1  ;;  %v2607_v0 = vadd.f32 %v5826_v41, %v2248_v20 }
 0x1d4   : > { %v3389_v35 = vmax.f32 %v3357_v43, 0.0  ;;  %v3321_v14 = vadd.f32 %v4901_v7, %v2963_v29  ;;  %v2961_v18 = vadd.f32 %v2870_v3, %v5810_v36  ;;  %v4902_v48 = vpop.f32.mrf.mxu0  ;;  %v3355_v5 = vadd.f32 %v5882_v4, %v3316_v45 }
 0x1d5   : > { %v4868_v61 = vpop.f32.mrf.mxu1 }
 0x1d6   : > { %v4393_v16 = vpack.c.bf16 %v3389_v35, %v3388_v2  ;;  %v3319_v17 = vadd.f32 %v3228_v62, %v2961_v18  ;;  %v2964_v63 = vadd.f32 %v4868_v61, %v2605_v11  ;;  %v3231_v39 = vpop.f32.mrf.mxu0  ;;  %v3387_v51 = vmax.f32 %v3355_v5, 0.0 }
 0x1d7   : > { %v2873_v27 = vpop.f32.mrf.mxu1  ;;  %v3360_v22 = vadd.f32 %v5882_v4, %v3321_v14  ;;  %v2254_v62 = vadd.f32 %v5836_v21, %v5731_v56  ;;  %v2252_v18 = vadd.f32 %v5842_v53, %v5734_v10  ;;  %v6018_v53 = vld [vmem:[#allocation8_spill] sm:$0xff] }
 0x1d8   : > { %4449 = vst [vmem:[%s5901_s15 + $0x28] sm:$0xff] %v4393_v16   ;;  %v3322_v60 = vadd.f32 %v4902_v48, %v2964_v63  ;;  %v2962_v30 = vadd.f32 %v2873_v27, %v2603_v25  ;;  %v4905_v36 = vpop.f32.mrf.mxu0  ;;  %v4388_v47 = vpack.c.bf16 %v3387_v51, %v3386_v19  ;;  %v3358_v52 = vadd.f32 %v5882_v4, %v3319_v17  ;;  %v6016_v48 = vld [vmem:[#allocation6_spill] sm:$0xff]  ;;  %v6017_v16 = vld [vmem:[#allocation7_spill] sm:$0xff] }
 0x1d9   : > { %v4871_v15 = vpop.f32.mrf.mxu1  ;;  %v3392_v42 = vmax.f32 %v3360_v22, 0.0  ;;  %v2613_v5 = vadd.f32 %v6016_v48, %v2254_v62 }
 0x1da   : > { %v3361_v46 = vadd.f32 %v5882_v4, %v3322_v60  ;;  %v3320_v49 = vadd.f32 %v3231_v39, %v2962_v30  ;;  %v2967_v8 = vadd.f32 %v4871_v15, %v5817_v9  ;;  %v3244_v23 = vpop.f32.mrf.mxu0  ;;  %4448 = vst [vmem:[%s5901_s15 + $0x20] sm:$0xff] %v4388_v47   ;;  %v3390_v7 = vmax.f32 %v3358_v52, 0.0  ;;  %v6019_v30 = vld [vmem:[#allocation2_spill] sm:$0xff] }
 0x1db   : > { %v2886_v34 = vpop.f32.mrf.mxu1  ;;  %v2611_v60 = vadd.f32 %v6018_v53, %v2252_v18  ;;  %v6024_v18 = vld [vmem:[#allocation5_spill] sm:$0xff] }
 0x1dc   : > { %v3393_v44 = vmax.f32 %v3361_v46, 0.0  ;;  %v3359_v13 = vadd.f32 %v5882_v4, %v3320_v49  ;;  %v2965_v37 = vadd.f32 %v2886_v34, %v5824_v6  ;;  %v4906_v1 = vpop.f32.mrf.mxu0  ;;  %v3325_v38 = vadd.f32 %v4905_v36, %v2967_v8  ;;  %v6020_v34 = vld [vmem:[#allocation3_spill] sm:$0xff] }
 0x1dd   : > { %v4872_v24 = vpop.f32.mrf.mxu1  ;;  %v2258_v36 = vadd.f32 %v5850_v58, %v6019_v30 }
 0x1de   : > { %v4403_v9 = vpack.c.bf16 %v3393_v44, %v3392_v42  ;;  %v3391_v50 = vmax.f32 %v3359_v13, 0.0  ;;  %v3323_v28 = vadd.f32 %v3244_v23, %v2965_v37  ;;  %v3247_v40 = vpop.f32.mrf.mxu0  ;;  %v2968_v43 = vadd.f32 %v4872_v24, %v2609_v31 }
 0x1df   : > { %v2889_v29 = vpop.f32.mrf.mxu1  ;;  %v3364_v57 = vadd.f32 %v5882_v4, %v3325_v38  ;;  %v2256_v42 = vadd.f32 %v5856_v55, %v6020_v34  ;;  %v2617_v37 = vadd.f32 %v5848_v32, %v2258_v36 }
 0x1e0   : > { %4451 = vst [vmem:[%s5901_s15 + $0x38] sm:$0xff] %v4403_v9   ;;  %v4398_v6 = vpack.c.bf16 %v3391_v50, %v3390_v7  ;;  %v2966_v11 = vadd.f32 %v2889_v29, %v2607_v0  ;;  %v4909_v12 = vpop.f32.mrf.mxu0  ;;  %v3326_v41 = vadd.f32 %v4906_v1, %v2968_v43  ;;  %v3362_v3 = vadd.f32 %v5882_v4, %v3323_v28  ;;  %v6021_v9 = vld [vmem:[#allocation9_spill] sm:$0xff]  ;;  %v6022_v43 = vld [vmem:[#allocation10_spill] sm:$0xff] }
 0x1e1   : > { %v4875_v45 = vpop.f32.mrf.mxu1  ;;  %v3396_v39 = vmax.f32 %v3364_v57, 0.0  ;;  %v2615_v29 = vadd.f32 %v6022_v43, %v2256_v42 }
 0x1e2   : > { %4450 = vst [vmem:[%s5901_s15 + $0x30] sm:$0xff] %v4398_v6   ;;  %v3324_v2 = vadd.f32 %v3247_v40, %v2966_v11  ;;  %v2971_v35 = vadd.f32 %v4875_v45, %v5831_v26  ;;  %v3260_v14 = vpop.f32.mrf.mxu0  ;;  %v3365_v56 = vadd.f32 %v5882_v4, %v3326_v41  ;;  %v3394_v26 = vmax.f32 %v3362_v3, 0.0 }
 0x1e3   : > { %v2902_v21 = vpop.f32.mrf.mxu1 }
 0x1e4   : > { %v3363_v61 = vadd.f32 %v5882_v4, %v3324_v2  ;;  %v3329_v25 = vadd.f32 %v4909_v12, %v2971_v35  ;;  %v2969_v17 = vadd.f32 %v2902_v21, %v6017_v16  ;;  %v4910_v63 = vpop.f32.mrf.mxu0  ;;  %v3397_v19 = vmax.f32 %v3365_v56, 0.0  ;;  %v6023_v35 = vld [vmem:[#allocation4_spill] sm:$0xff]  ;;  %v6025_v56 = vld [vmem:[#allocation15_spill] sm:$0xff] }
 0x1e5   : > { %v4876_v51 = vpop.f32.mrf.mxu1  ;;  %v2260_v21 = vadd.f32 %v6025_v56, %v6024_v18 }
 0x1e6   : > { %v3395_v27 = vmax.f32 %v3363_v61, 0.0  ;;  %v2972_v22 = vadd.f32 %v4876_v51, %v2613_v5  ;;  %v3263_v10 = vpop.f32.mrf.mxu0  ;;  %v4413_v54 = vpack.c.bf16 %v3397_v19, %v3396_v39  ;;  %v3327_v20 = vadd.f32 %v3260_v14, %v2969_v17  ;;  %v6026_v17 = vld [vmem:[#allocation11_spill] sm:$0xff] }
 0x1e7   : > { %v2905_v47 = vpop.f32.mrf.mxu1  ;;  %v3368_v52 = vadd.f32 %v5882_v4, %v3329_v25  ;;  %v2262_v14 = vadd.f32 %v5864_v59, %v6023_v35 }
 0x1e8   : > { %v4408_v15 = vpack.c.bf16 %v3395_v27, %v3394_v26  ;;  %v3330_v46 = vadd.f32 %v4910_v63, %v2972_v22  ;;  %v4913_v49 = vpop.f32.mrf.mxu0  ;;  %4453 = vst [vmem:[%s5901_s15 + $0x48] sm:$0xff] %v4413_v54   ;;  %v2970_v8 = vadd.f32 %v2905_v47, %v2611_v60  ;;  %v3366_v1 = vadd.f32 %v5882_v4, %v3327_v20  ;;  %v6027_v27 = vld [vmem:[#allocation13_spill] sm:$0xff]  ;;  %v6029_v60 = vld [vmem:[#allocation14_spill] sm:$0xff] }
 0x1e9   : > { %v4879_v23 = vpop.f32.mrf.mxu1  ;;  %v3400_v38 = vmax.f32 %v3368_v52, 0.0  ;;  %v2619_v30 = vadd.f32 %v6029_v60, %v2260_v21 }
 0x1ea   : > { %4452 = vst [vmem:[%s5901_s15 + $0x40] sm:$0xff] %v4408_v15   ;;  %v3369_v44 = vadd.f32 %v5882_v4, %v3330_v46  ;;  %v2975_v13 = vadd.f32 %v4879_v23, %v5845_v33  ;;  %v3276_v58 = vpop.f32.mrf.mxu0  ;;  %v3328_v31 = vadd.f32 %v3263_v10, %v2970_v8  ;;  %v3398_v11 = vmax.f32 %v3366_v1, 0.0  ;;  %v6028_v10 = vld [vmem:[#allocation12_spill] sm:$0xff] }
 0x1eb   : > { %v2918_v0 = vpop.f32.mrf.mxu1  ;;  %v2621_v53 = vadd.f32 %v6028_v10, %v2262_v14 }
 0x1ec   : > { %v3401_v24 = vmax.f32 %v3369_v44, 0.0  ;;  %v3333_v7 = vadd.f32 %v4913_v49, %v2975_v13  ;;  %v2973_v50 = vadd.f32 %v2918_v0, %v6021_v9  ;;  %v4914_v28 = vpop.f32.mrf.mxu0  ;;  %v3367_v55 = vadd.f32 %v5882_v4, %v3328_v31 }
 0x1ed   : > { %v4880_v40 = vpop.f32.mrf.mxu1 }
 0x1ee   : > { %v4423_v33 = vpack.c.bf16 %v3401_v24, %v3400_v38  ;;  %v3331_v62 = vadd.f32 %v3276_v58, %v2973_v50  ;;  %v2976_v6 = vadd.f32 %v4880_v40, %v2617_v37  ;;  %v3279_v32 = vpop.f32.mrf.mxu0  ;;  %v3399_v12 = vmax.f32 %v3367_v55, 0.0 }
 0x1ef   : > { %v2921_v57 = vpop.f32.mrf.mxu1  ;;  %v3372_v41 = vadd.f32 %v5882_v4, %v3333_v7 }
 0x1f0   : > { %4455 = vst [vmem:[%s5901_s15 + $0x58] sm:$0xff] %v4423_v33   ;;  %v3334_v45 = vadd.f32 %v4914_v28, %v2976_v6  ;;  %v2974_v3 = vadd.f32 %v2921_v57, %v2615_v29  ;;  %v4917_v2 = vpop.f32.mrf.mxu0  ;;  %v4418_v48 = vpack.c.bf16 %v3399_v12, %v3398_v11  ;;  %v3370_v61 = vadd.f32 %v5882_v4, %v3331_v62 }
 0x1f1   : > { %v4883_v5 = vpop.f32.mrf.mxu1  ;;  %v3404_v51 = vmax.f32 %v3372_v41, 0.0 }
 0x1f2   : > { %v3373_v25 = vadd.f32 %v5882_v4, %v3334_v45  ;;  %v3332_v16 = vadd.f32 %v3279_v32, %v2974_v3  ;;  %v2979_v63 = vadd.f32 %v4883_v5, %v6026_v17  ;;  %v3292_v39 = vpop.f32.mrf.mxu0  ;;  %4454 = vst [vmem:[%s5901_s15 + $0x50] sm:$0xff] %v4418_v48   ;;  %v3402_v47 = vmax.f32 %v3370_v61, 0.0 }
 0x1f3   : > { %v2934_v19 = vpop.f32.mrf.mxu1 }
 0x1f4   : > { %v3405_v26 = vmax.f32 %v3373_v25, 0.0  ;;  %v3371_v59 = vadd.f32 %v5882_v4, %v3332_v16  ;;  %v2977_v22 = vadd.f32 %v2934_v19, %v6027_v27  ;;  %v3337_v36 = vadd.f32 %v4917_v2, %v2979_v63  ;;  %v4918_v20 = vpop.f32.mrf.mxu0 }
 0x1f5   : > { %v4884_v54 = vpop.f32.mrf.mxu1 }
 0x1f6   : > { %v4433_v15 = vpack.c.bf16 %v3405_v26, %v3404_v51  ;;  %v3403_v52 = vmax.f32 %v3371_v59, 0.0  ;;  %v3335_v46 = vadd.f32 %v3292_v39, %v2977_v22  ;;  %v2980_v49 = vadd.f32 %v4884_v54, %v2621_v53  ;;  %v3295_v13 = vpop.f32.mrf.mxu0 }
 0x1f7   : > { %v2937_v8 = vpop.f32.mrf.mxu1  ;;  %v3376_v42 = vadd.f32 %v5882_v4, %v3337_v36 }
 0x1f8   : > { %4457 = vst [vmem:[%s5901_s15 + $0x68] sm:$0xff] %v4433_v15   ;;  %v4428_v23 = vpack.c.bf16 %v3403_v52, %v3402_v47  ;;  %v2978_v34 = vadd.f32 %v2937_v8, %v2619_v30  ;;  %v3338_v44 = vadd.f32 %v4918_v20, %v2980_v49  ;;  %v3374_v58 = vadd.f32 %v5882_v4, %v3335_v46 }
 0x1f9   : > { %v3408_v0 = vmax.f32 %v3376_v42, 0.0 }
 0x1fa   : > { %4456 = vst [vmem:[%s5901_s15 + $0x60] sm:$0xff] %v4428_v23   ;;  %v3336_v37 = vadd.f32 %v3295_v13, %v2978_v34  ;;  %v3377_v1 = vadd.f32 %v5882_v4, %v3338_v44  ;;  %v3406_v24 = vmax.f32 %v3374_v58, 0.0 }
 0x1fc   : > { %v3375_v31 = vadd.f32 %v5882_v4, %v3336_v37  ;;  %v3409_v38 = vmax.f32 %v3377_v1, 0.0 }
 0x1fe   : > { %v3407_v7 = vmax.f32 %v3375_v31, 0.0  ;;  %v4443_v9 = vpack.c.bf16 %v3409_v38, %v3408_v0 }
 0x200   : > { %v4438_v50 = vpack.c.bf16 %v3407_v7, %v3406_v24  ;;  %4459 = vst [vmem:[%s5901_s15 + $0x78] sm:$0xff] %v4443_v9  }
 0x202   : > { %4458 = vst [vmem:[%s5901_s15 + $0x70] sm:$0xff] %v4438_v50  }
 0x203 PF: > { %s13_s12 = sadd.s32 1, %s4937_s12  }
 0x204   : > { %p10_p4 = scmp.ge.s32.totalorder %s13_s12, 6  }
 0x206   :  { %12 = sbr.rel (!%p10_p4) target bundleno = 1 (0x1), region = 75 }

// kernel: _lambda_.14
= control target key start
LH: loop header
LB: loop body
LE: loop exit
PB: predicated region body
PF: predicated region fallthrough
CT: control target
= control target key end

     0   :  { %s661_s9 = smov 0   ;;  %s724_s0 = inlined_call_operand.vmem [shape: bf16[4,256,128], index: 0, kind: input, shape index: {}, may-alias: {0,1}]   ;;  %s725_s1 = inlined_call_operand.vmem [shape: bf16[4,256,128], index: 1, kind: input, shape index: {}, may-alias: {0,1}]   ;;  %s726_s2 = inlined_call_operand.vmem [shape: f32[2,8,128], index: 2, kind: output, shape index: {}]  }
   0x1 LB: > { %s667_s10 = sadd.s32 4294967295, %s644_s9   ;;  %p462_p0 = scmp.ge.s32.totalorder %s644_s9, 1  ;;  %s644_s9 = sphi %s661_s9, %s12_s9  }
   0x2   : > { %p126_p1 = scmp.lt.s32.totalorder %s644_s9, 3 }
   0x4   : > { %p127_p2 = pnand %p462_p0, %p126_p1 }
   0x5   : > { %s158_s11 = sadd.s32 (!%p127_p2), 2, %s667_s10  ;;  %p153_p3 = scmp.lt.s32.totalorder (!%p127_p2), %s667_s10, 3 }
   0x6   : > { %130 = sbr.rel (%p127_p2) target bundleno = 86 (0x56), region = 28  ;;  %p159_p4 = scmp.lt.s32.totalorder (!%p127_p2), %s158_s11, 3 }
   0x7   : > { %p165_p5 = scmp.lt.s32.totalorder (!%p127_p2), %s667_s10, 1 }
   0xb   : > { %s154_s12 = scalar_select %p153_p3, %s667_s10, 3 }
   0xc   : > { %s728_s11 = smov (!%p159_p4, %s158_s11), 3  ;;  %s730_s10 = smov (!%p165_p5, %s667_s10), 1 }
   0xd   : > { %s470_s13 = sshll.u32 %s154_s12, 7  ;;  %s471_s14 = sshll.u32 %s728_s11, 7 }
   0xe   : > { %s677_s17 = scalar_lea.vmem %s724_s0, %s470_s13  ;;  %s682_s20 = scalar_lea.vmem %s725_s1, %s471_s14 }
   0xf   : > { %v473_v0 = vld [vmem:[%s677_s17] sm:$0xff]   ;;  %v600_v2 = vld [vmem:[%s677_s17 + $0x8] sm:$0xff]   ;;  %v601_v10 = vld [vmem:[%s677_s17 + $0x10] sm:$0xff]   ;;  %s467_s21 = sshll.u32 %s730_s10, 3 }
  0x10   : > { %v537_v1 = vld [vmem:[%s682_s20] sm:$0xff]   ;;  %v615_v3 = vld [vmem:[%s682_s20 + $0x8] sm:$0xff]   ;;  %v474_v4 = vunpack.c.l.bf16 %v473_v0  ;;  %v475_v5 = vunpack.c.h.bf16 %v473_v0  ;;  %v478_v8 = vunpack.c.l.bf16 %v600_v2  ;;  %v616_v11 = vld [vmem:[%s682_s20 + $0x10] sm:$0xff]   ;;  %v479_v12 = vunpack.c.h.bf16 %v600_v2  ;;  %s168_s24 = scalar_lea.vmem %s726_s2, %s467_s21 }
  0x11   : > { %v538_v6 = vunpack.c.l.bf16 %v537_v1  ;;  %v539_v7 = vunpack.c.h.bf16 %v537_v1  ;;  %v542_v9 = vunpack.c.l.bf16 %v615_v3  ;;  %v543_v13 = vunpack.c.h.bf16 %v615_v3  ;;  %v602_v20 = vld [vmem:[%s677_s17 + $0x18] sm:$0xff]   ;;  %v603_v27 = vld [vmem:[%s677_s17 + $0x20] sm:$0xff]   ;;  %v604_v38 = vld [vmem:[%s677_s17 + $0x28] sm:$0xff]  }
  0x12   : > { %v482_v16 = vunpack.c.l.bf16 %v601_v10  ;;  %v546_v17 = vunpack.c.l.bf16 %v616_v11  ;;  %v483_v19 = vunpack.c.h.bf16 %v601_v10  ;;  %v617_v21 = vld [vmem:[%s682_s20 + $0x18] sm:$0xff]   ;;  %v547_v22 = vunpack.c.h.bf16 %v616_v11  ;;  %v618_v32 = vld [vmem:[%s682_s20 + $0x20] sm:$0xff]   ;;  %v619_v44 = vld [vmem:[%s682_s20 + $0x28] sm:$0xff]  }
  0x13   : > { %v297_v14 = vsub.f32 %v474_v4, %v538_v6  ;;  %v298_v15 = vsub.f32 %v475_v5, %v539_v7  ;;  %v299_v18 = vsub.f32 %v478_v8, %v542_v9  ;;  %v300_v23 = vsub.f32 %v479_v12, %v543_v13  ;;  %v605_v50 = vld [vmem:[%s677_s17 + $0x30] sm:$0xff]   ;;  %v606_v62 = vld [vmem:[%s677_s17 + $0x38] sm:$0xff]   ;;  %v607_v10 = vld [vmem:[%s677_s17 + $0x40] sm:$0xff]  }
  0x14   : > { %v486_v26 = vunpack.c.l.bf16 %v602_v20  ;;  %v550_v28 = vunpack.c.l.bf16 %v617_v21  ;;  %v301_v29 = vsub.f32 %v482_v16, %v546_v17  ;;  %v487_v31 = vunpack.c.h.bf16 %v602_v20  ;;  %v620_v56 = vld [vmem:[%s682_s20 + $0x30] sm:$0xff]   ;;  %v621_v4 = vld [vmem:[%s682_s20 + $0x38] sm:$0xff]   ;;  %v622_v16 = vld [vmem:[%s682_s20 + $0x40] sm:$0xff]  }
  0x15   : > { %v329_v24 = vmul.f32 %v297_v14, %v297_v14  ;;  %v330_v25 = vmul.f32 %v298_v15, %v298_v15  ;;  %v331_v30 = vmul.f32 %v299_v18, %v299_v18  ;;  %v551_v33 = vunpack.c.h.bf16 %v617_v21 }
  0x16   : > { %v302_v34 = vsub.f32 %v483_v19, %v547_v22  ;;  %v332_v35 = vmul.f32 %v300_v23, %v300_v23  ;;  %v490_v37 = vunpack.c.l.bf16 %v603_v27  ;;  %v554_v39 = vunpack.c.l.bf16 %v618_v32  ;;  %v608_v22 = vld [vmem:[%s677_s17 + $0x48] sm:$0xff]  }
  0x17   : > { %v361_v36 = vadd.f32 %v330_v25, %v329_v24  ;;  %v303_v40 = vsub.f32 %v486_v26, %v550_v28  ;;  %v333_v41 = vmul.f32 %v301_v29, %v301_v29  ;;  %v491_v43 = vunpack.c.h.bf16 %v603_v27  ;;  %v623_v28 = vld [vmem:[%s682_s20 + $0x48] sm:$0xff]  }
  0x18   : > { %v555_v45 = vunpack.c.h.bf16 %v618_v32  ;;  %v304_v46 = vsub.f32 %v487_v31, %v551_v33  ;;  %v334_v47 = vmul.f32 %v302_v34, %v302_v34  ;;  %v494_v49 = vunpack.c.l.bf16 %v604_v38  ;;  %v609_v34 = vld [vmem:[%s677_s17 + $0x50] sm:$0xff]  }
  0x19   : > { %v362_v42 = vadd.f32 %v361_v36, %v331_v30  ;;  %v558_v51 = vunpack.c.l.bf16 %v619_v44  ;;  %v305_v52 = vsub.f32 %v490_v37, %v554_v39  ;;  %v335_v53 = vmul.f32 %v303_v40, %v303_v40  ;;  %v624_v40 = vld [vmem:[%s682_s20 + $0x50] sm:$0xff]  }
  0x1a   : > { %v495_v55 = vunpack.c.h.bf16 %v604_v38  ;;  %v559_v57 = vunpack.c.h.bf16 %v619_v44  ;;  %v306_v58 = vsub.f32 %v491_v43, %v555_v45  ;;  %v336_v59 = vmul.f32 %v304_v46, %v304_v46  ;;  %v610_v46 = vld [vmem:[%s677_s17 + $0x58] sm:$0xff]  }
  0x1b   : > { %v363_v48 = vadd.f32 %v362_v42, %v332_v35  ;;  %v498_v61 = vunpack.c.l.bf16 %v605_v50  ;;  %v562_v63 = vunpack.c.l.bf16 %v620_v56  ;;  %v307_v0 = vsub.f32 %v494_v49, %v558_v51 }
  0x1c   : > { %v337_v1 = vmul.f32 %v305_v52, %v305_v52  ;;  %v499_v3 = vunpack.c.h.bf16 %v605_v50  ;;  %v563_v5 = vunpack.c.h.bf16 %v620_v56  ;;  %v308_v6 = vsub.f32 %v495_v55, %v559_v57  ;;  %v625_v52 = vld [vmem:[%s682_s20 + $0x58] sm:$0xff]  }
  0x1d   : > { %v364_v54 = vadd.f32 %v363_v48, %v333_v41  ;;  %v338_v7 = vmul.f32 %v306_v58, %v306_v58  ;;  %v502_v9 = vunpack.c.l.bf16 %v606_v62  ;;  %v566_v11 = vunpack.c.l.bf16 %v621_v4  ;;  %v611_v58 = vld [vmem:[%s677_s17 + $0x60] sm:$0xff]  }
  0x1e   : > { %v309_v12 = vsub.f32 %v498_v61, %v562_v63  ;;  %v339_v13 = vmul.f32 %v307_v0, %v307_v0  ;;  %v503_v15 = vunpack.c.h.bf16 %v606_v62  ;;  %v567_v17 = vunpack.c.h.bf16 %v621_v4  ;;  %v626_v0 = vld [vmem:[%s682_s20 + $0x60] sm:$0xff]  }
  0x1f   : > { %v365_v60 = vadd.f32 %v364_v54, %v334_v47  ;;  %v310_v18 = vsub.f32 %v499_v3, %v563_v5  ;;  %v340_v19 = vmul.f32 %v308_v6, %v308_v6  ;;  %v506_v21 = vunpack.c.l.bf16 %v607_v10  ;;  %v612_v6 = vld [vmem:[%s677_s17 + $0x68] sm:$0xff]  }
  0x20   : > { %v570_v23 = vunpack.c.l.bf16 %v622_v16  ;;  %v311_v24 = vsub.f32 %v502_v9, %v566_v11  ;;  %v341_v25 = vmul.f32 %v309_v12, %v309_v12  ;;  %v507_v27 = vunpack.c.h.bf16 %v607_v10  ;;  %v627_v12 = vld [vmem:[%s682_s20 + $0x68] sm:$0xff]  }
  0x21   : > { %v366_v2 = vadd.f32 %v365_v60, %v335_v53  ;;  %v571_v29 = vunpack.c.h.bf16 %v622_v16  ;;  %v312_v30 = vsub.f32 %v503_v15, %v567_v17  ;;  %v342_v31 = vmul.f32 %v310_v18, %v310_v18  ;;  %v613_v18 = vld [vmem:[%s677_s17 + $0x70] sm:$0xff]  }
  0x22   : > { %v510_v33 = vunpack.c.l.bf16 %v608_v22  ;;  %v574_v35 = vunpack.c.l.bf16 %v623_v28  ;;  %v313_v36 = vsub.f32 %v506_v21, %v570_v23  ;;  %v343_v37 = vmul.f32 %v311_v24, %v311_v24  ;;  %v628_v24 = vld [vmem:[%s682_s20 + $0x70] sm:$0xff]  }
  0x23   : > { %v367_v8 = vadd.f32 %v366_v2, %v336_v59  ;;  %v511_v39 = vunpack.c.h.bf16 %v608_v22  ;;  %v575_v41 = vunpack.c.h.bf16 %v623_v28  ;;  %v314_v42 = vsub.f32 %v507_v27, %v571_v29 }
  0x24   : > { %v344_v43 = vmul.f32 %v312_v30, %v312_v30  ;;  %v514_v45 = vunpack.c.l.bf16 %v609_v34  ;;  %v578_v47 = vunpack.c.l.bf16 %v624_v40  ;;  %v315_v48 = vsub.f32 %v510_v33, %v574_v35  ;;  %v614_v30 = vld [vmem:[%s677_s17 + $0x78] sm:$0xff]  }
  0x25   : > { %v368_v14 = vadd.f32 %v367_v8, %v337_v1  ;;  %v345_v49 = vmul.f32 %v313_v36, %v313_v36  ;;  %v515_v51 = vunpack.c.h.bf16 %v609_v34  ;;  %v579_v53 = vunpack.c.h.bf16 %v624_v40  ;;  %v629_v36 = vld [vmem:[%s682_s20 + $0x78] sm:$0xff]  }
  0x26   : > { %v316_v54 = vsub.f32 %v511_v39, %v575_v41  ;;  %v346_v55 = vmul.f32 %v314_v42, %v314_v42  ;;  %v518_v57 = vunpack.c.l.bf16 %v610_v46  ;;  %v582_v59 = vunpack.c.l.bf16 %v625_v52 }
  0x27   : > { %v369_v20 = vadd.f32 %v368_v14, %v338_v7  ;;  %v317_v60 = vsub.f32 %v514_v45, %v578_v47  ;;  %v347_v61 = vmul.f32 %v315_v48, %v315_v48  ;;  %v519_v63 = vunpack.c.h.bf16 %v610_v46 }
  0x28   : > { %v583_v1 = vunpack.c.h.bf16 %v625_v52  ;;  %v318_v2 = vsub.f32 %v515_v51, %v579_v53  ;;  %v348_v3 = vmul.f32 %v316_v54, %v316_v54  ;;  %v522_v5 = vunpack.c.l.bf16 %v611_v58 }
  0x29   : > { %v370_v26 = vadd.f32 %v369_v20, %v339_v13  ;;  %v586_v7 = vunpack.c.l.bf16 %v626_v0  ;;  %v319_v8 = vsub.f32 %v518_v57, %v582_v59  ;;  %v349_v9 = vmul.f32 %v317_v60, %v317_v60 }
  0x2a   : > { %v523_v11 = vunpack.c.h.bf16 %v611_v58  ;;  %v587_v13 = vunpack.c.h.bf16 %v626_v0  ;;  %v320_v14 = vsub.f32 %v519_v63, %v583_v1  ;;  %v350_v15 = vmul.f32 %v318_v2, %v318_v2 }
  0x2b   : > { %v371_v32 = vadd.f32 %v370_v26, %v340_v19  ;;  %v526_v17 = vunpack.c.l.bf16 %v612_v6  ;;  %v590_v19 = vunpack.c.l.bf16 %v627_v12  ;;  %v321_v20 = vsub.f32 %v522_v5, %v586_v7 }
  0x2c   : > { %v351_v21 = vmul.f32 %v319_v8, %v319_v8  ;;  %v527_v23 = vunpack.c.h.bf16 %v612_v6  ;;  %v322_v26 = vsub.f32 %v523_v11, %v587_v13  ;;  %v352_v27 = vmul.f32 %v320_v14, %v320_v14 }
  0x2d   : > { %v372_v38 = vadd.f32 %v371_v32, %v341_v25  ;;  %v591_v25 = vunpack.c.h.bf16 %v627_v12  ;;  %v530_v29 = vunpack.c.l.bf16 %v613_v18  ;;  %v323_v32 = vsub.f32 %v526_v17, %v590_v19 }
  0x2e   : > { %v353_v33 = vmul.f32 %v321_v20, %v321_v20  ;;  %v531_v35 = vunpack.c.h.bf16 %v613_v18  ;;  %v354_v39 = vmul.f32 %v322_v26, %v322_v26  ;;  %v534_v41 = vunpack.c.l.bf16 %v614_v30 }
  0x2f   : > { %v373_v44 = vadd.f32 %v372_v38, %v342_v31  ;;  %v594_v31 = vunpack.c.l.bf16 %v628_v24  ;;  %v324_v38 = vsub.f32 %v527_v23, %v591_v25  ;;  %v598_v42 = vunpack.c.l.bf16 %v629_v36 }
  0x30   : > { %v535_v46 = vunpack.c.h.bf16 %v614_v30  ;;  %v599_v47 = vunpack.c.h.bf16 %v629_v36 }
  0x31   : > { %v374_v50 = vadd.f32 %v373_v44, %v343_v37  ;;  %v595_v37 = vunpack.c.h.bf16 %v628_v24  ;;  %v355_v44 = vmul.f32 %v323_v32, %v323_v32  ;;  %v327_v51 = vsub.f32 %v534_v41, %v598_v42 }
  0x32   : > { %v328_v54 = vsub.f32 %v535_v46, %v599_v47 }
  0x33   : > { %v375_v56 = vadd.f32 %v374_v50, %v344_v43  ;;  %v325_v43 = vsub.f32 %v530_v29, %v594_v31  ;;  %v326_v48 = vsub.f32 %v531_v35, %v595_v37  ;;  %v359_v57 = vmul.f32 %v327_v51, %v327_v51 }
  0x34   : > { %v360_v59 = vmul.f32 %v328_v54, %v328_v54 }
  0x35   : > { %v376_v62 = vadd.f32 %v375_v56, %v345_v49  ;;  %v356_v49 = vmul.f32 %v324_v38, %v324_v38  ;;  %v357_v52 = vmul.f32 %v325_v43, %v325_v43 }
  0x37   : > { %v377_v4 = vadd.f32 %v376_v62, %v346_v55  ;;  %v358_v55 = vmul.f32 %v326_v48, %v326_v48 }
  0x39   : > { %v378_v10 = vadd.f32 %v377_v4, %v347_v61 }
  0x3b   : > { %v379_v16 = vadd.f32 %v378_v10, %v348_v3 }
  0x3d   : > { %v380_v22 = vadd.f32 %v379_v16, %v349_v9 }
  0x3f   : > { %v381_v28 = vadd.f32 %v380_v22, %v350_v15 }
  0x41   : > { %v382_v34 = vadd.f32 %v381_v28, %v351_v21 }
  0x43   : > { %v383_v40 = vadd.f32 %v382_v34, %v352_v27 }
  0x45   : > { %v384_v45 = vadd.f32 %v383_v40, %v353_v33 }
  0x47   : > { %v385_v50 = vadd.f32 %v384_v45, %v354_v39 }
  0x49   : > { %v386_v53 = vadd.f32 %v385_v50, %v355_v44 }
  0x4b   : > { %v387_v56 = vadd.f32 %v386_v53, %v356_v49 }
  0x4d   : > { %v388_v58 = vadd.f32 %v387_v56, %v357_v52 }
  0x4f   : > { %v389_v60 = vadd.f32 %v388_v58, %v358_v55 }
  0x51   : > { %v390_v61 = vadd.f32 %v389_v60, %v359_v57 }
  0x53   : > { %v391_v62 = vadd.f32 %v390_v61, %v360_v59 }
  0x55   : > { %392 = vst [vmem:[%s168_s24] sm:$0xff] %v391_v62 }
  0x56 PF: > { %s12_s9 = sadd.s32 1, %s644_s9  }
  0x57   : > { %p9_p6 = scmp.ge.s32.totalorder %s12_s9, 4  }
  0x59   :  { %11 = sbr.rel (!%p9_p6) target bundleno = 1 (0x1), region = 61 }

// kernel: _lambda_.10
= control target key start
LH: loop header
LB: loop body
LE: loop exit
PB: predicated region body
PF: predicated region fallthrough
CT: control target
= control target key end

     0   :  { %s6852_s12 = smov 0   ;;  %s9519_s0 = inlined_call_operand.vmem [shape: bf16[4,1,18,18,128], index: 0, kind: input, shape index: {}]   ;;  %s9520_s1 = inlined_call_operand.vmem [shape: bf16[9,128,128], index: 1, kind: input, shape index: {}]   ;;  %s9521_s2 = inlined_call_operand.vmem [shape: f32[1,128], index: 2, kind: input, shape index: {}]   ;;  %s9522_s3 = inlined_call_operand.vmem [shape: bf16[4,256,128], index: 3, kind: output, shape index: {}]  }
   0x1 LB: > { %s5267_s13 = sadd.s32 4294967295, %s6830_s12   ;;  %p5271_p0 = scmp.ge.s32.totalorder %s6830_s12, 1  ;;  %s6830_s12 = sphi %s6852_s12, %s13_s12  }
   0x2   : > { %p137_p1 = scmp.lt.s32.totalorder %s6830_s12, 5 }
   0x4   : > { %p138_p2 = pnand %p5271_p0, %p137_p1 }
   0x6   : > { %141 = sbr.rel (%p138_p2) target bundleno = 558 (0x22e), region = 32 }
   0xb   : > { %v6695_v0 = vld [vmem:[%s9520_s1 + $0x78] sm:$0xff]   ;;  %p161_p3 = scmp.lt.s32.totalorder %s5267_s13, 3  ;;  %v6696_v1 = vld [vmem:[%s9520_s1 + $0x70] sm:$0xff]   ;;  %v6697_v2 = vld [vmem:[%s9520_s1 + $0x68] sm:$0xff]   ;;  %vm236_vm0 = vsmask.f32 3328 }
   0xc   : > { %6238 = vmatprep.subr.bf16.mxu0 %v6695_v0  ;;  %6670 = vmatprep.subr.bf16.mxu1 %v6695_v0  ;;  %v6698_v3 = vld [vmem:[%s9520_s1 + $0x60] sm:$0xff]   ;;  %vm237_vm1 = vsmask.f32 7440  ;;  %v6699_v17 = vld [vmem:[%s9520_s1 + $0x58] sm:$0xff]   ;;  %v6700_v33 = vld [vmem:[%s9520_s1 + $0x50] sm:$0xff]   ;;  %vm1266_vm3 = vcmask 1042432  }
   0xd   : > { %s9715_s13 = smov (!%p161_p3, %s5267_s13), 3  ;;  %6239 = vmatpush3.bf16.msra.mxu0 %v6695_v0  ;;  %6678 = vmatpush3.bf16.msra.mxu1 %v6695_v0  ;;  %vm6906_vm2 = vmor %vm236_vm0, %vm237_vm1  ;;  %v6701_v58 = vld [vmem:[%s9520_s1 + $0x48] sm:$0xff]   ;;  %vm1267_vm4 = vcmask 1046532  }
   0xe   : > { %6240 = vmatprep.subr.bf16.mxu0 %v6696_v1  ;;  %6671 = vmatprep.subr.bf16.mxu1 %v6696_v1  ;;  %s6686_s20 = smul.u32 216, %s9715_s13  ;;  %vm7217_vm5 = vmor %vm1266_vm3, %vm1267_vm4  ;;  %s5894_s18 = sshll.u32 %s9715_s13, 7 }
  0x10   : > { %s6875_s23 = scalar_lea.vmem %s9519_s0, %s6686_s20  ;;  %s9422_s20 = scalar_lea.vmem %s9522_s3, %s5894_s18 }
  0x11   : > { %6241 = vmatpush3.bf16.msra.mxu0 %v6696_v1  ;;  %6679 = vmatpush3.bf16.msra.mxu1 %v6696_v1  ;;  %v6881_v4 = vld [vmem:[%s6875_s23] sm:$0xf]  ;;  %v6884_v5 = vld [vmem:[%s6875_s23 + $0x4] sm:$0xf]  ;;  %v6887_v6 = vld [vmem:[%s6875_s23 + $0x8] sm:$0x1] }
  0x12   : > { %6242 = vmatprep.subr.bf16.mxu0 %v6697_v2  ;;  %6672 = vmatprep.subr.bf16.mxu1 %v6697_v2  ;;  %v240_v7 = vshrl.u32 %v6881_v4, 16  ;;  %v243_v8 = vshll.u32 %v6881_v4, 16  ;;  %v249_v9 = vshll.u32 %v6884_v5, 16  ;;  %v253_v10 = vshrl.u32 %v6884_v5, 16  ;;  %v188_v12 = vld [vmem:[%s6875_s23 + $0x60] sm:$0xf] }
  0x13   : > { %v259_v11 = vshll.u32 %v6887_v6, 16  ;;  %v189_v15 = vld [vmem:[%s6875_s23 + $0x64] sm:$0xf]  ;;  %v228_v16 = vld [vmem:[%s6875_s23 + $0x68] sm:$0x1]  ;;  %v432_v21 = vshrl.u32 %v188_v12, 16 }
  0x14   : > { %v242_v13 = vrot.slane %v240_v7, 4  ;;  %v245_v14 = vrot.slane %v243_v8, 5  ;;  %v251_v18 = vrot.slane %v249_v9, 5  ;;  %v255_v19 = vrot.slane %v253_v10, 4  ;;  %v6902_v26 = vld [vmem:[%s6875_s23 + $0xc] sm:$0xf] }
  0x15   : > { %6243 = vmatpush3.bf16.msra.mxu0 %v6697_v2  ;;  %6680 = vmatpush3.bf16.msra.mxu1 %v6697_v2  ;;  %v435_v23 = vshll.u32 %v188_v12, 16  ;;  %v441_v24 = vshll.u32 %v189_v15, 16  ;;  %v445_v25 = vshrl.u32 %v189_v15, 16  ;;  %v261_v29 = vrot.slane %v259_v11, 5  ;;  %v6911_v32 = vld [vmem:[%s6875_s23 + $0x10] sm:$0xf] }
  0x16   : > { %6244 = vmatprep.subr.bf16.mxu0 %v6698_v3  ;;  %6673 = vmatprep.subr.bf16.mxu1 %v6698_v3  ;;  %v246_v22 = vor.u32 %v245_v14, %v242_v13  ;;  %v256_v28 = vor.u32 %v255_v19, %v251_v18  ;;  %v434_v30 = vrot.slane %v432_v21, 4  ;;  %v451_v31 = vshll.u32 %v228_v16, 16  ;;  %v6917_v40 = vld [vmem:[%s6875_s23 + $0x14] sm:$0x1]  ;;  %v190_v47 = vld [vmem:[%s6875_s23 + $0x6c] sm:$0xf] }
  0x17   : > { %v437_v35 = vrot.slane %v435_v23, 5  ;;  %v443_v36 = vrot.slane %v441_v24, 5  ;;  %v447_v37 = vrot.slane %v445_v25, 4  ;;  %v264_v41 = vshrl.u32 %v6902_v26, 16  ;;  %v191_v52 = vld [vmem:[%s6875_s23 + $0x70] sm:$0xf] }
  0x18   : > { %v247_v34 = vrot.slane %v246_v22, 4  ;;  %v257_v38 = vrot.slane %v256_v28, 4  ;;  %v453_v39 = vrot.slane %v451_v31, 5  ;;  %v267_v42 = vshll.u32 %v6902_v26, 16  ;;  %v229_v57 = vld [vmem:[%s6875_s23 + $0x74] sm:$0x1] }
  0x19   : > { %6245 = vmatpush3.bf16.msra.mxu0 %v6698_v3  ;;  %6681 = vmatpush3.bf16.msra.mxu1 %v6698_v3  ;;  %v438_v44 = vor.u32 %v437_v35, %v434_v30  ;;  %v448_v45 = vor.u32 %v447_v37, %v443_v36  ;;  %v273_v46 = vshll.u32 %v6911_v32, 16  ;;  %v266_v49 = vrot.slane %v264_v41, 4  ;;  %v6940_v14 = vld [vmem:[%s6875_s23 + $0x18] sm:$0xf]  ;;  %v6702_v15 = vld [vmem:[%s9520_s1 + $0x40] sm:$0xff]  }
  0x1a   : > { %6246 = vmatprep.subr.bf16.mxu0 %v6699_v17  ;;  %6674 = vmatprep.subr.bf16.mxu1 %v6699_v17  ;;  %v252_v43 = vsel %vm6906_vm2, %v247_v34, %v251_v18  ;;  %v262_v48 = vsel %vm6906_vm2, %v257_v38, %v261_v29  ;;  %v269_v50 = vrot.slane %v267_v42, 5  ;;  %v277_v51 = vshrl.u32 %v6911_v32, 16  ;;  %v6948_v19 = vld [vmem:[%s6875_s23 + $0x1c] sm:$0xf]  ;;  %v6953_v25 = vld [vmem:[%s6875_s23 + $0x20] sm:$0x1] }
  0x1b   : > { %v5291_v53 = vcombine.low %v252_v43, %v262_v48  ;;  %v439_v54 = vrot.slane %v438_v44, 4  ;;  %v449_v55 = vrot.slane %v448_v45, 4  ;;  %v275_v56 = vrot.slane %v273_v46, 5  ;;  %v192_v34 = vld [vmem:[%s6875_s23 + $0x78] sm:$0xf] }
  0x1c   : > { %v270_v59 = vor.u32 %v269_v50, %v266_v49  ;;  %v279_v60 = vrot.slane %v277_v51, 4  ;;  %v283_v61 = vshll.u32 %v6917_v40, 16  ;;  %v456_v1 = vshrl.u32 %v190_v47, 16  ;;  %v6703_v41 = vld [vmem:[%s9520_s1 + $0x38] sm:$0xff]   ;;  %v230_v49 = vld [vmem:[%s6875_s23 + $0x80] sm:$0x1] }
  0x1d   : > { %6247 = vmatpush3.bf16.msra.mxu0 %v6699_v17  ;;  %6682 = vmatpush3.bf16.msra.mxu1 %v6699_v17  ;;  %v444_v63 = vsel %vm6906_vm2, %v439_v54, %v443_v36  ;;  %v454_v0 = vsel %vm6906_vm2, %v449_v55, %v453_v39  ;;  %v459_v2 = vshll.u32 %v190_v47, 16  ;;  %v465_v12 = vshll.u32 %v191_v52, 16  ;;  %v6962_v39 = vld [vmem:[%s6875_s23 + $0x7c] sm:$0xf] }
  0x1e   : > { %6248 = vmatprep.subr.bf16.mxu0 %v6700_v33  ;;  %6675 = vmatprep.subr.bf16.mxu1 %v6700_v33  ;;  %v5299_v3 = vcombine.low %v444_v63, %v454_v0  ;;  %v271_v7 = vrot.slane %v270_v59, 4  ;;  %v280_v8 = vor.u32 %v279_v60, %v275_v56  ;;  %v285_v9 = vrot.slane %v283_v61, 5  ;;  %v6704_v42 = vld [vmem:[%s9520_s1 + $0xb8] sm:$0xff]   ;;  %v6706_v59 = vld [vmem:[%s9520_s1 + $0xb0] sm:$0xff]   ;;  %v6989_v0 = vld [vmem:[%s6875_s23 + $0x28] sm:$0xf] }
  0x1f   : > { %6254 = vmatprep.mubr.bf16.mxu0 %v5291_v53  ;;  %v458_v10 = vrot.slane %v456_v1, 4  ;;  %v461_v11 = vrot.slane %v459_v2, 5  ;;  %v469_v13 = vshrl.u32 %v191_v52, 16  ;;  %v475_v18 = vshll.u32 %v229_v57, 16  ;;  %v6705_v52 = vld [vmem:[%s9520_s1 + $0x30] sm:$0xff]  }
  0x20   : > { %v276_v16 = vsel %vm6906_vm2, %v271_v7, %v275_v56  ;;  %v281_v17 = vrot.slane %v280_v8, 4  ;;  %6270 = vmatprep.mubr.bf16.mxu1 %v5299_v3  ;;  %v467_v23 = vrot.slane %v465_v12, 5  ;;  %v288_v28 = vshrl.u32 %v6940_v14, 16  ;;  %v6980_v57 = vld [vmem:[%s6875_s23 + $0x24] sm:$0xf] }
  0x21   : > { %6249 = vmatpush3.bf16.msra.mxu0 %v6700_v33  ;;  %6683 = vmatpush3.bf16.msra.mxu1 %v6700_v33  ;;  %v462_v22 = vor.u32 %v461_v11, %v458_v10  ;;  %v471_v24 = vrot.slane %v469_v13, 4  ;;  %v477_v30 = vrot.slane %v475_v18, 5  ;;  %v291_v31 = vshll.u32 %v6940_v14, 16  ;;  %v6992_v8 = vld [vmem:[%s6875_s23 + $0x2c] sm:$0x1] }
  0x22   : > { %6250 = vmatprep.subr.bf16.mxu0 %v6701_v58  ;;  %6676 = vmatprep.subr.bf16.mxu1 %v6701_v58  ;;  %v286_v29 = vsel %vm6906_vm2, %v281_v17, %v285_v9  ;;  %v297_v33 = vshll.u32 %v6948_v19, 16  ;;  %v290_v38 = vrot.slane %v288_v28, 4  ;;  %v301_v45 = vshrl.u32 %v6948_v19, 16  ;;  %v6996_v13 = vld [vmem:[%s6875_s23 + $0x84] sm:$0xf] }
  0x23   : > { %v5292_v35 = vcombine.low %v276_v16, %v286_v29  ;;  %v463_v36 = vrot.slane %v462_v22, 4  ;;  %v472_v37 = vor.u32 %v471_v24, %v467_v23  ;;  %v293_v43 = vrot.slane %v291_v31, 5  ;;  %v7003_v22 = vld [vmem:[%s6875_s23 + $0x88] sm:$0xf] }
  0x24   : > { %v299_v44 = vrot.slane %v297_v33, 5  ;;  %v307_v46 = vshll.u32 %v6953_v25, 16  ;;  %v480_v50 = vshrl.u32 %v192_v34, 16  ;;  %v483_v51 = vshll.u32 %v192_v34, 16 }
  0x25   : > { %6251 = vmatpush3.bf16.msra.mxu0 %v6701_v58  ;;  %6684 = vmatpush3.bf16.msra.mxu1 %v6701_v58  ;;  %v468_v47 = vsel %vm6906_vm2, %v463_v36, %v467_v23  ;;  %v473_v48 = vrot.slane %v472_v37, 4  ;;  %v294_v53 = vor.u32 %v293_v43, %v290_v38  ;;  %v303_v54 = vrot.slane %v301_v45, 4  ;;  %v7012_v36 = vld [vmem:[%s6875_s23 + $0x8c] sm:$0x1] }
  0x26   : > { %6252 = vmatprep.subr.bf16.mxu0 %v6702_v15  ;;  %6677 = vmatprep.subr.bf16.mxu1 %v6702_v15  ;;  %v309_v55 = vrot.slane %v307_v46, 5  ;;  %v489_v56 = vshll.u32 %v6962_v39, 16  ;;  %v482_v60 = vrot.slane %v480_v50, 4  ;;  %v485_v61 = vrot.slane %v483_v51, 5  ;;  %v6708_v37 = vld [vmem:[%s9520_s1 + $0xa8] sm:$0xff]  }
  0x27   : > { %v478_v58 = vsel %vm6906_vm2, %v473_v48, %v477_v30  ;;  %v493_v63 = vshrl.u32 %v6962_v39, 16  ;;  %v295_v2 = vrot.slane %v294_v53, 4  ;;  %v304_v3 = vor.u32 %v303_v54, %v299_v44  ;;  %v6707_v30 = vld [vmem:[%s9520_s1 + $0x28] sm:$0xff]   ;;  %v7027_v53 = vld [vmem:[%s6875_s23 + $0x30] sm:$0xf] }
  0x28   : > { %v5300_v1 = vcombine.low %v468_v47, %v478_v58  ;;  %v491_v7 = vrot.slane %v489_v56, 5  ;;  %v486_v9 = vor.u32 %v485_v61, %v482_v60  ;;  %v499_v11 = vshll.u32 %v230_v49, 16  ;;  %v7036_v60 = vld [vmem:[%s6875_s23 + $0x34] sm:$0xf] }
  0x29   : > { %6253 = vmatpush3.bf16.msra.mxu0 %v6702_v15  ;;  %6685 = vmatpush3.bf16.msra.mxu1 %v6702_v15  ;;  %v495_v10 = vrot.slane %v493_v63, 4  ;;  %v312_v12 = vshrl.u32 %v6980_v57, 16  ;;  %v300_v15 = vsel %vm6906_vm2, %v295_v2, %v299_v44  ;;  %v305_v16 = vrot.slane %v304_v3, 4 }
  0x2a   : > { %6286 = vmatprep.subr.bf16.mxu1 %v6703_v41  ;;  %6334 = vmatprep.subr.bf16.mxu0 %v6704_v42  ;;  %v315_v17 = vshll.u32 %v6980_v57, 16  ;;  %v321_v18 = vshll.u32 %v6989_v0, 16  ;;  %v487_v23 = vrot.slane %v486_v9, 4  ;;  %v501_v28 = vrot.slane %v499_v11, 5 }
  0x2b   : > { %v496_v24 = vor.u32 %v495_v10, %v491_v7  ;;  %v314_v29 = vrot.slane %v312_v12, 4  ;;  %v310_v31 = vsel %vm6906_vm2, %v305_v16, %v309_v55  ;;  %v331_v43 = vshll.u32 %v6992_v8, 16  ;;  %v7044_v16 = vld [vmem:[%s6875_s23 + $0x38] sm:$0x1] }
  0x2c   : > { %6255 = vmatmul.mubr.bf16.vlgmr.msra.gmra.mxu0 %v5292_v35  ;;  %6271 = vmatmul.mubr.bf16.vlgmr.msra.gmra.mxu1 %v5300_v1  ;;  %v317_v33 = vrot.slane %v315_v17, 5  ;;  %v323_v34 = vrot.slane %v321_v18, 5  ;;  %v325_v35 = vshrl.u32 %v6989_v0, 16  ;;  %v5293_v38 = vcombine.low %v300_v15, %v310_v31  ;;  %v7048_v18 = vld [vmem:[%s6875_s23 + $0x90] sm:$0xf] }
  0x2d   : > { %6287 = vmatpush3.bf16.msra.mxu1 %v6703_v41  ;;  %6335 = vmatpush3.bf16.msra.mxu0 %v6704_v42  ;;  %v492_v41 = vsel %vm6906_vm2, %v487_v23, %v491_v7  ;;  %v497_v42 = vrot.slane %v496_v24, 4  ;;  %v504_v46 = vshrl.u32 %v6996_v13, 16  ;;  %v507_v47 = vshll.u32 %v6996_v13, 16  ;;  %v7054_v31 = vld [vmem:[%s6875_s23 + $0x94] sm:$0xf] }
  0x2e   : > { %6288 = vmatprep.subr.bf16.mxu1 %v6705_v52  ;;  %6336 = vmatprep.subr.bf16.mxu0 %v6706_v59  ;;  %v318_v44 = vor.u32 %v317_v33, %v314_v29  ;;  %v327_v45 = vrot.slane %v325_v35, 4  ;;  %v333_v49 = vrot.slane %v331_v43, 5  ;;  %v513_v50 = vshll.u32 %v7003_v22, 16 }
  0x2f   : > { %v502_v48 = vsel %vm6906_vm2, %v497_v42, %v501_v28  ;;  %v517_v51 = vshrl.u32 %v7003_v22, 16  ;;  %6258 = vmatprep.mubr.bf16.mxu0 %v5293_v38  ;;  %v506_v58 = vrot.slane %v504_v46, 4  ;;  %v509_v61 = vrot.slane %v507_v47, 5  ;;  %v6712_v38 = vld [vmem:[%s9520_s1 + $0x98] sm:$0xff]   ;;  %v6713_v46 = vld [vmem:[%s9520_s1 + $0x10] sm:$0xff]  }
  0x30   : > { %v5301_v54 = vcombine.low %v492_v41, %v502_v48  ;;  %v319_v55 = vrot.slane %v318_v44, 4  ;;  %v328_v56 = vor.u32 %v327_v45, %v323_v34  ;;  %v515_v63 = vrot.slane %v513_v50, 5  ;;  %v7064_v44 = vld [vmem:[%s6875_s23 + $0x98] sm:$0x1] }
  0x31   : > { %6289 = vmatpush3.bf16.msra.mxu1 %v6705_v52  ;;  %6337 = vmatpush3.bf16.msra.mxu0 %v6706_v59  ;;  %v6709_v52 = vld [vmem:[%s9520_s1 + $0x20] sm:$0xff]   ;;  %v519_v1 = vrot.slane %v517_v51, 4  ;;  %v523_v2 = vshll.u32 %v7012_v36, 16  ;;  %v336_v9 = vshrl.u32 %v7027_v53, 16  ;;  %v339_v10 = vshll.u32 %v7027_v53, 16 }
  0x32   : > { %6290 = vmatprep.subr.bf16.mxu1 %v6707_v30  ;;  %v6710_v59 = vld [vmem:[%s9520_s1 + $0xa0] sm:$0xff]   ;;  %6338 = vmatprep.subr.bf16.mxu0 %v6708_v37  ;;  %v324_v3 = vsel %vm6906_vm2, %v319_v55, %v323_v34  ;;  %v329_v7 = vrot.slane %v328_v56, 4  ;;  %v510_v11 = vor.u32 %v509_v61, %v506_v58  ;;  %v345_v17 = vshll.u32 %v7036_v60, 16  ;;  %v7077_v51 = vld [vmem:[%s6875_s23 + $0x3c] sm:$0xf]  ;;  %v6714_v55 = vld [vmem:[%s9520_s1 + $0x90] sm:$0xff]  }
  0x33   : > { %6274 = vmatprep.mubr.bf16.mxu1 %v5301_v54  ;;  %v520_v12 = vor.u32 %v519_v1, %v515_v63  ;;  %v525_v15 = vrot.slane %v523_v2, 5  ;;  %v338_v24 = vrot.slane %v336_v9, 4  ;;  %v341_v28 = vrot.slane %v339_v10, 5  ;;  %v7080_v54 = vld [vmem:[%s6875_s23 + $0x40] sm:$0xf] }
  0x34   : > { %v334_v23 = vsel %vm6906_vm2, %v329_v7, %v333_v49  ;;  %v349_v29 = vshrl.u32 %v7036_v60, 16  ;;  %v511_v34 = vrot.slane %v510_v11, 4  ;;  %v355_v43 = vshll.u32 %v7044_v16, 16  ;;  %v7087_v7 = vld [vmem:[%s6875_s23 + $0x44] sm:$0x1] }
  0x35   : > { %6291 = vmatpush3.bf16.msra.mxu1 %v6707_v30  ;;  %6339 = vmatpush3.bf16.msra.mxu0 %v6708_v37  ;;  %v6711_v30 = vld [vmem:[%s9520_s1 + $0x18] sm:$0xff]   ;;  %v5294_v33 = vcombine.low %v324_v3, %v334_v23  ;;  %v521_v35 = vrot.slane %v520_v12, 4  ;;  %v347_v37 = vrot.slane %v345_v17, 5  ;;  %v342_v41 = vor.u32 %v341_v28, %v338_v24  ;;  %v7099_v28 = vld [vmem:[%s6875_s23 + $0xa0] sm:$0xf] }
  0x36   : > { %6292 = vmatprep.subr.bf16.mxu1 %v6709_v52  ;;  %6340 = vmatprep.subr.bf16.mxu0 %v6710_v59  ;;  %v351_v42 = vrot.slane %v349_v29, 4  ;;  %v528_v45 = vshrl.u32 %v7048_v18, 16  ;;  %v516_v47 = vsel %vm6906_vm2, %v511_v34, %v515_v63  ;;  %v531_v49 = vshll.u32 %v7048_v18, 16  ;;  %v7090_v9 = vld [vmem:[%s6875_s23 + $0x9c] sm:$0xf]  ;;  %v6715_v29 = vld [vmem:[%s9520_s1 + $0x8] sm:$0xff]  }
  0x37   : > { %6259 = vmatmul.mubr.bf16.gmra.mxu0 %v5294_v33  ;;  %v526_v48 = vsel %vm6906_vm2, %v521_v35, %v525_v15  ;;  %v537_v50 = vshll.u32 %v7054_v31, 16  ;;  %v343_v58 = vrot.slane %v342_v41, 4  ;;  %v357_v63 = vrot.slane %v355_v43, 5  ;;  %v6716_v41 = vld [vmem:[%s9520_s1 + $0x88] sm:$0xff]  }
  0x38   : > { %v5302_v56 = vcombine.low %v516_v47, %v526_v48  ;;  %v352_v61 = vor.u32 %v351_v42, %v347_v37  ;;  %v533_v1 = vrot.slane %v531_v49, 5  ;;  %v541_v3 = vshrl.u32 %v7054_v31, 16 }
  0x39   : > { %6293 = vmatpush3.bf16.msra.mxu1 %v6709_v52  ;;  %6341 = vmatpush3.bf16.msra.mxu0 %v6710_v59  ;;  %v530_v52 = vrot.slane %v528_v45, 4  ;;  %v539_v2 = vrot.slane %v537_v50, 5  ;;  %v348_v10 = vsel %vm6906_vm2, %v343_v58, %v347_v37  ;;  %v547_v11 = vshll.u32 %v7064_v44, 16 }
  0x3a   : > { %6294 = vmatprep.subr.bf16.mxu1 %v6711_v30  ;;  %6342 = vmatprep.subr.bf16.mxu0 %v6712_v38  ;;  %v353_v59 = vrot.slane %v352_v61, 4  ;;  %v360_v12 = vshrl.u32 %v7077_v51, 16  ;;  %v543_v17 = vrot.slane %v541_v3, 4  ;;  %v363_v23 = vshll.u32 %v7077_v51, 16  ;;  %v7115_v61 = vld [vmem:[%s6875_s23 + $0xa4] sm:$0x1] }
  0x3b   : > { %6275 = vmatmul.mubr.bf16.gmra.mxu1 %v5302_v56  ;;  %v534_v15 = vor.u32 %v533_v1, %v530_v52  ;;  %v369_v24 = vshll.u32 %v7080_v54, 16  ;;  %v549_v34 = vrot.slane %v547_v11, 5  ;;  %v373_v37 = vshrl.u32 %v7080_v54, 16 }
  0x3c   : > { %v358_v33 = vsel %vm6906_vm2, %v353_v59, %v357_v63  ;;  %v362_v35 = vrot.slane %v360_v12, 4  ;;  %v544_v43 = vor.u32 %v543_v17, %v539_v2  ;;  %v365_v45 = vrot.slane %v363_v23, 5  ;;  %v7120_v59 = vld [vmem:[%s6875_s23 + $0x48] sm:$0xf]  ;;  %v7129_v17 = vld [vmem:[%s6875_s23 + $0x4c] sm:$0xf] }
  0x3d   : > { %6295 = vmatpush3.bf16.msra.mxu1 %v6711_v30  ;;  %6343 = vmatpush3.bf16.msra.mxu0 %v6712_v38  ;;  %v5295_v42 = vcombine.low %v348_v10, %v358_v33  ;;  %v535_v30 = vrot.slane %v534_v15, 4  ;;  %v371_v47 = vrot.slane %v369_v24, 5  ;;  %v375_v48 = vrot.slane %v373_v37, 4 }
  0x3e   : > { %6296 = vmatprep.subr.bf16.mxu1 %v6713_v46  ;;  %6344 = vmatprep.subr.bf16.mxu0 %v6714_v55  ;;  %v379_v49 = vshll.u32 %v7087_v7, 16  ;;  %v552_v50 = vshrl.u32 %v7090_v9, 16  ;;  %v545_v56 = vrot.slane %v544_v43, 4  ;;  %v366_v58 = vor.u32 %v365_v45, %v362_v35 }
  0x3f   : > { %6262 = vmatprep.mubr.bf16.mxu0 %v5295_v42  ;;  %v540_v38 = vsel %vm6906_vm2, %v535_v30, %v539_v2  ;;  %v555_v63 = vshll.u32 %v7090_v9, 16  ;;  %v376_v52 = vor.u32 %v375_v48, %v371_v47  ;;  %v561_v10 = vshll.u32 %v7099_v28, 16  ;;  %v6717_v2 = vld [vmem:[%s9520_s1] sm:$0xff]   ;;  %v7138_v30 = vld [vmem:[%s6875_s23 + $0x50] sm:$0x1] }
  0x40   : > { %v381_v1 = vrot.slane %v379_v49, 5  ;;  %v554_v3 = vrot.slane %v552_v50, 4  ;;  %v550_v11 = vsel %vm6906_vm2, %v545_v56, %v549_v34  ;;  %v367_v12 = vrot.slane %v366_v58, 4 }
  0x41   : > { %6297 = vmatpush3.bf16.msra.mxu1 %v6713_v46  ;;  %6345 = vmatpush3.bf16.msra.mxu0 %v6714_v55  ;;  %v557_v15 = vrot.slane %v555_v63, 5  ;;  %v565_v46 = vshrl.u32 %v7099_v28, 16  ;;  %v6718_v55 = vld [vmem:[%s9520_s1 + $0x80] sm:$0xff]   ;;  %v5303_v23 = vcombine.low %v540_v38, %v550_v11  ;;  %v377_v24 = vrot.slane %v376_v52, 4  ;;  %v7146_v38 = vld [vmem:[%s6875_s23 + $0xa8] sm:$0xf] }
  0x42   : > { %6298 = vmatprep.subr.bf16.mxu1 %v6715_v29  ;;  %6346 = vmatprep.subr.bf16.mxu0 %v6716_v41  ;;  %v563_v33 = vrot.slane %v561_v10, 5  ;;  %v571_v35 = vshll.u32 %v7115_v61, 16  ;;  %v372_v34 = vsel %vm6906_vm2, %v367_v12, %v371_v47  ;;  %v384_v43 = vshrl.u32 %v7120_v59, 16  ;;  %9549 = vst [vmem:[#allocation2_spill] sm:$0xff] %v7146_v38  ;;  %v7151_v47 = vld [vmem:[%s9520_s1 + $0xf8] sm:$0xff]  }
  0x43   : > { %v558_v37 = vor.u32 %v557_v15, %v554_v3  ;;  %v567_v42 = vrot.slane %v565_v46, 4  ;;  %6278 = vmatprep.mubr.bf16.mxu1 %v5303_v23  ;;  %v382_v45 = vsel %vm6906_vm2, %v377_v24, %v381_v1  ;;  %v387_v49 = vshll.u32 %v7120_v59, 16  ;;  %v7154_v52 = vld [vmem:[%s6875_s23 + $0xac] sm:$0xf]  ;;  %v7159_v1 = vld [vmem:[%s9520_s1 + $0x138] sm:$0xff]  }
  0x44   : > { %v573_v48 = vrot.slane %v571_v35, 5  ;;  %v393_v50 = vshll.u32 %v7129_v17, 16  ;;  %v386_v63 = vrot.slane %v384_v43, 4  ;;  %v397_v10 = vshrl.u32 %v7129_v17, 16  ;;  %v7164_v12 = vld [vmem:[%s6875_s23 + $0xb0] sm:$0x1] }
  0x45   : > { %6299 = vmatpush3.bf16.msra.mxu1 %v6715_v29  ;;  %6347 = vmatpush3.bf16.msra.mxu0 %v6716_v41  ;;  %v5296_v29 = vcombine.low %v372_v34, %v382_v45  ;;  %v559_v56 = vrot.slane %v558_v37, 4  ;;  %v568_v58 = vor.u32 %v567_v42, %v563_v33  ;;  %v389_v41 = vrot.slane %v387_v49, 5  ;;  %9550 = vst [vmem:[#allocation3_spill] sm:$0xff] %v7164_v12  ;;  %v7167_v15 = vld [vmem:[%s6875_s23 + $0x54] sm:$0xf] }
  0x46   : > { %6300 = vmatprep.subr.bf16.mxu1 %v6717_v2  ;;  %6348 = vmatprep.subr.bf16.mxu0 %v6718_v55  ;;  %v395_v3 = vrot.slane %v393_v50, 5  ;;  %v403_v11 = vshll.u32 %v7138_v30, 16  ;;  %v576_v24 = vshrl.u32 %v7146_v38, 16  ;;  %v579_v35 = vshll.u32 %v7146_v38, 16  ;;  %v7174_v34 = vld [vmem:[%s6875_s23 + $0x58] sm:$0xf] }
  0x47   : > { %6263 = vmatmul.mubr.bf16.gmra.mxu0 %v5296_v29  ;;  %v564_v46 = vsel %vm6906_vm2, %v559_v56, %v563_v33  ;;  %v569_v23 = vrot.slane %v568_v58, 4  ;;  %v390_v37 = vor.u32 %v389_v41, %v386_v63  ;;  %v399_v42 = vrot.slane %v397_v10, 4 }
  0x48   : > { %v405_v43 = vrot.slane %v403_v11, 5  ;;  %v585_v45 = vshll.u32 %v7154_v52, 16  ;;  %v578_v49 = vrot.slane %v576_v24, 4  ;;  %v581_v50 = vrot.slane %v579_v35, 5 }
  0x49   : > { %6301 = vmatpush3.bf16.msra.mxu1 %v6717_v2  ;;  %6349 = vmatpush3.bf16.msra.mxu0 %v6718_v55  ;;  %v574_v33 = vsel %vm6906_vm2, %v569_v23, %v573_v48  ;;  %v589_v29 = vshrl.u32 %v7154_v52, 16  ;;  %v391_v56 = vrot.slane %v390_v37, 4  ;;  %v400_v58 = vor.u32 %v399_v42, %v395_v3  ;;  %v7183_v55 = vld [vmem:[%s6875_s23 + $0x5c] sm:$0x1]  ;;  %v7188_v48 = vld [vmem:[%s6875_s23 + $0xb4] sm:$0xf] }
  0x4a   : > { %6382 = vmatprep.subr.bf16.mxu1 %v7151_v47  ;;  %6430 = vmatprep.subr.bf16.mxu0 %v7159_v1  ;;  %v5304_v2 = vcombine.low %v564_v46, %v574_v33  ;;  %v587_v63 = vrot.slane %v585_v45, 5  ;;  %v582_v41 = vor.u32 %v581_v50, %v578_v49  ;;  %v595_v11 = vshll.u32 %v7164_v12, 16  ;;  %9551 = vst [vmem:[#allocation4_spill] sm:$0xff] %v7188_v48  ;;  %v7195_v37 = vld [vmem:[%s6875_s23 + $0xb8] sm:$0xf] }
  0x4b   : > { %v591_v10 = vrot.slane %v589_v29, 4  ;;  %v408_v21 = vshrl.u32 %v7167_v15, 16  ;;  %v396_v23 = vsel %vm6906_vm2, %v391_v56, %v395_v3  ;;  %v401_v24 = vrot.slane %v400_v58, 4  ;;  %9552 = vst [vmem:[#allocation5_spill] sm:$0xff] %v7195_v37  ;;  %v7201_v3 = vld [vmem:[%s6875_s23 + $0xbc] sm:$0x1] }
  0x4c   : > { %6279 = vmatmul.mubr.bf16.gmra.mxu1 %v5304_v2  ;;  %v411_v46 = vshll.u32 %v7167_v15, 16  ;;  %v417_v35 = vshll.u32 %v7174_v34, 16  ;;  %v583_v42 = vrot.slane %v582_v41, 4  ;;  %v597_v33 = vrot.slane %v595_v11, 5  ;;  %9553 = vst [vmem:[#allocation6_spill] sm:$0xff] %v7201_v3 }
  0x4d   : > { %v592_v45 = vor.u32 %v591_v10, %v587_v63  ;;  %v410_v49 = vrot.slane %v408_v21, 4  ;;  %v406_v50 = vsel %vm6906_vm2, %v401_v24, %v405_v43  ;;  %v421_v62 = vshrl.u32 %v7174_v34, 16  ;;  %v1218_v10 = vld [vmem:[%s6875_s23] sm:$0xe] }
  0x4e   : > { %v413_v29 = vrot.slane %v411_v46, 5  ;;  %v419_v2 = vrot.slane %v417_v35, 5  ;;  %v5297_v56 = vcombine.low %v396_v23, %v406_v50  ;;  %v588_v58 = vsel %vm6906_vm2, %v583_v42, %v587_v63 }
  0x4f   : > { %v593_v20 = vrot.slane %v592_v45, 4  ;;  %v427_v41 = vshll.u32 %v7183_v55, 16  ;;  %v423_v21 = vrot.slane %v421_v62, 4  ;;  %v600_v12 = vshrl.u32 %v7188_v48, 16 }
  0x50   : > { %v414_v11 = vor.u32 %v413_v29, %v410_v49  ;;  %v603_v43 = vshll.u32 %v7188_v48, 16  ;;  %6266 = vmatprep.mubr.bf16.mxu0 %v5297_v56  ;;  %v609_v46 = vshll.u32 %v7195_v37, 16  ;;  %v613_v63 = vshrl.u32 %v7195_v37, 16  ;;  %v1219_v49 = vld [vmem:[%s6875_s23 + $0xc] sm:$0xe] }
  0x51   : > { %v598_v24 = vsel %vm6906_vm2, %v593_v20, %v597_v33  ;;  %v429_v23 = vrot.slane %v427_v41, 5  ;;  %v424_v45 = vor.u32 %v423_v21, %v419_v2  ;;  %v602_v50 = vrot.slane %v600_v12, 4  ;;  %v1220_v20 = vld [vmem:[%s6875_s23 + $0x18] sm:$0xe] }
  0x52   : > { %v5305_v35 = vcombine.low %v588_v58, %v598_v24  ;;  %v415_v42 = vrot.slane %v414_v11, 4  ;;  %v605_v62 = vrot.slane %v603_v43, 5  ;;  %v611_v29 = vrot.slane %v609_v46, 5 }
  0x53   : > { %v615_v38 = vrot.slane %v613_v63, 4  ;;  %v619_v48 = vshll.u32 %v7201_v3, 16  ;;  %v425_v58 = vrot.slane %v424_v45, 4  ;;  %v5339_v41 = vrot.slane %v1218_v10, 9 }
  0x54   : > { %6282 = vmatprep.mubr.bf16.mxu1 %v5305_v35  ;;  %v420_v33 = vsel %vm6906_vm2, %v415_v42, %v419_v2  ;;  %v1271_v12 = vrot.slane %v6884_v5, 5  ;;  %v606_v11 = vor.u32 %v605_v62, %v602_v50  ;;  %v5340_v24 = vrot.slane %v1219_v49, 9 }
  0x55   : > { %v616_v21 = vor.u32 %v615_v38, %v611_v29  ;;  %v621_v43 = vrot.slane %v619_v48, 5  ;;  %v430_v46 = vsel %vm6906_vm2, %v425_v58, %v429_v23  ;;  %v1278_v35 = vrot.slane %v6911_v32, 5 }
  0x56   : > { %v1272_v63 = vsel %vm7217_vm5, %v5339_v41, %v1271_v12  ;;  %v1273_v3 = vrot.slane %v1271_v12, 4  ;;  %v5298_v37 = vcombine.low %v420_v33, %v430_v46  ;;  %v607_v2 = vrot.slane %v606_v11, 4  ;;  %v1222_v12 = vld [vmem:[%s6875_s23 + $0x30] sm:$0xe]  ;;  %v1224_v46 = vld [vmem:[%s6875_s23 + $0x48] sm:$0xe] }
  0x57   : > { %v617_v42 = vrot.slane %v616_v21, 4  ;;  %v5315_v10 = vcombine.low %v6881_v4, %v6884_v5  ;;  %v9556_v38 = vrot.slane %v6887_v6, 5  ;;  %v1280_v45 = vrot.slane %v1278_v35, 4 }
  0x58   : > { %v5341_v23 = vrot.slane %v1220_v20, 9  ;;  %6267 = vmatmul.mubr.bf16.gmra.mxu0 %v5298_v37  ;;  %v612_v50 = vsel %vm6906_vm2, %v607_v2, %v611_v29  ;;  %v1285_v33 = vrot.slane %v6948_v19, 5  ;;  %v1279_v4 = vsel %vm7217_vm5, %v5340_v24, %v1278_v35  ;;  %v1223_v24 = vld [vmem:[%s6875_s23 + $0x3c] sm:$0xe] }
  0x59   : > { %v1275_v48 = vsel %vm7217_vm5, %v1273_v3, %v9556_v38  ;;  %v622_v49 = vsel %vm6906_vm2, %v617_v42, %v621_v43  ;;  %v9557_v5 = vrot.slane %v6917_v40, 5  ;;  %v1288_v37 = vrot.slane %v6953_v25, 5  ;;  %v1221_v3 = vld [vmem:[%s6875_s23 + $0x24] sm:$0xe]  ;;  %v6726_v25 = vld [vmem:[%s9520_s1 + $0x130] sm:$0xff]  }
  0x5a   : > { %v5371_v62 = vcombine.low %v1272_v63, %v1275_v48  ;;  %v5306_v58 = vcombine.low %v612_v50, %v622_v49  ;;  %v1286_v29 = vsel %vm7217_vm5, %v5341_v23, %v1285_v33  ;;  %v1287_v20 = vrot.slane %v1285_v33, 4  ;;  %v6725_v23 = vld [vmem:[%s9520_s1 + $0xf0] sm:$0xff]  }
  0x5b   : > { %v1282_v6 = vsel %vm7217_vm5, %v1280_v45, %v9557_v5  ;;  %v1292_v41 = vrot.slane %v6989_v0, 5  ;;  %v5342_v21 = vrot.slane %v1221_v3, 9  ;;  %v1299_v43 = vrot.slane %v7036_v60, 5  ;;  %v7292_v3 = vld [vmem:[%s6875_s23 + $0x68] sm:$0x1] }
  0x5c   : > { %6350 = vmatprep.mubr.bf16.mxu0 %v5371_v62  ;;  %6283 = vmatmul.mubr.bf16.gmra.mxu1 %v5306_v58  ;;  %v5372_v11 = vcombine.low %v1279_v4, %v1282_v6  ;;  %v1289_v40 = vsel %vm7217_vm5, %v1287_v20, %v1288_v37  ;;  %v1295_v2 = vrot.slane %v6992_v8, 5  ;;  %v5343_v42 = vrot.slane %v1222_v12, 9  ;;  %v1225_v37 = vld [vmem:[%s6875_s23 + $0x54] sm:$0xe]  ;;  %v7316_v12 = vld [vmem:[%s6875_s23 + $0x60] sm:$0xe] }
  0x5d   : > { %6302 = vmatprep.mubr.bf16.mxu1 %v5315_v10  ;;  %v5373_v63 = vcombine.low %v1286_v29, %v1289_v40  ;;  %v1294_v35 = vrot.slane %v1292_v41, 4  ;;  %v1301_v38 = vrot.slane %v1299_v43, 4  ;;  %v1302_v10 = vrot.slane %v7044_v16, 5 }
  0x5e   : > { %v1306_v48 = vrot.slane %v7080_v54, 5  ;;  %v5317_v45 = vcombine.low %v6940_v14, %v6948_v19  ;;  %v1313_v50 = vrot.slane %v7129_v17, 5  ;;  %v5344_v49 = vrot.slane %v1223_v24, 9  ;;  %v6734_v24 = vld [vmem:[%s9520_s1 + $0x120] sm:$0xff]  }
  0x5f   : > { %v1309_v8 = vrot.slane %v7087_v7, 5  ;;  %v5345_v33 = vrot.slane %v1224_v46, 9  ;;  %v1293_v14 = vsel %vm7217_vm5, %v5342_v21, %v1292_v41  ;;  %v1296_v19 = vsel %vm7217_vm5, %v1294_v35, %v1295_v2  ;;  %v7328_v46 = vld [vmem:[%s6875_s23 + $0x78] sm:$0xe]  ;;  %v6733_v2 = vld [vmem:[%s9520_s1 + $0xe0] sm:$0xff]  }
  0x60   : > { %6351 = vmatmul.mubr.bf16.vlgmr.msra.gmra.mxu0 %v5372_v11  ;;  %v1308_v62 = vrot.slane %v1306_v48, 4  ;;  %v1315_v16 = vrot.slane %v1313_v50, 4  ;;  %v1316_v58 = vrot.slane %v7138_v30, 5  ;;  %v1300_v4 = vsel %vm7217_vm5, %v5343_v42, %v1299_v43  ;;  %v7319_v11 = vld [vmem:[%s6875_s23 + $0x6c] sm:$0xe] }
  0x61   : > { %6431 = vmatpush3.bf16.msra.mxu0 %v7159_v1  ;;  %6354 = vmatprep.mubr.bf16.mxu0 %v5373_v63  ;;  %v1303_v7 = vsel %vm7217_vm5, %v1301_v38, %v1302_v10  ;;  %v6730_v1 = vld [vmem:[%s9520_s1 + $0x128] sm:$0xff]   ;;  %v1320_v5 = vrot.slane %v7174_v34, 5  ;;  %v9558_v6 = vcombine.low %v6902_v26, %v6911_v32  ;;  %v5318_v30 = vcombine.low %v6980_v57, %v6989_v0  ;;  %v1229_v63 = vld [vmem:[%s6875_s23 + $0x84] sm:$0xe]  ;;  %v1230_v42 = vld [vmem:[%s6875_s23 + $0x90] sm:$0xe] }
  0x62   : > { %6432 = vmatprep.subr.bf16.mxu0 %v6726_v25  ;;  %v1330_v29 = vrot.slane %v7292_v3, 5  ;;  %v5374_v20 = vcombine.low %v1293_v14, %v1296_v19  ;;  %v7298_v41 = vsel %vm7217_vm5, %v5344_v49, %v1306_v48  ;;  %v7302_v26 = vsel %vm7217_vm5, %v1308_v62, %v1309_v8  ;;  %v6729_v32 = vld [vmem:[%s9520_s1 + $0xe8] sm:$0xff]   ;;  %v7347_v48 = vld [vmem:[%s6875_s23 + $0x64] sm:$0xf]  ;;  %v1231_v49 = vld [vmem:[%s6875_s23 + $0x9c] sm:$0xe] }
  0x63   : > { %v5375_v57 = vcombine.low %v1300_v4, %v1303_v7  ;;  %v7309_v0 = vsel %vm7217_vm5, %v5345_v33, %v1313_v50  ;;  %v5319_v40 = vcombine.low %v7027_v53, %v7036_v60  ;;  %v5346_v21 = vrot.slane %v1225_v37, 9  ;;  %v7369_v4 = vld [vmem:[%s6875_s23 + $0x74] sm:$0x1] }
  0x64   : > { %6303 = vmatmul.mubr.bf16.vlgmr.msra.gmra.mxu1 %v9558_v6  ;;  %v1323_v43 = vrot.slane %v7183_v55, 5  ;;  %v5320_v35 = vcombine.low %v7077_v51, %v7080_v54  ;;  %v5376_v53 = vcombine.low %v7298_v41, %v7302_v26  ;;  %v5321_v60 = vcombine.low %v7120_v59, %v7129_v17  ;;  %v6819_v54 = vld [vmem:[%s6875_s23 + $0x80] sm:$0x1] }
  0x65   : > { %6383 = vmatpush3.bf16.msra.mxu1 %v7151_v47  ;;  %6306 = vmatprep.mubr.bf16.mxu1 %v5317_v45  ;;  %v7313_v47 = vsel %vm7217_vm5, %v1315_v16, %v1316_v58  ;;  %v5322_v55 = vcombine.low %v7167_v15, %v7174_v34  ;;  %v5347_v10 = vrot.slane %v7316_v12, 9  ;;  %v1327_v45 = vrot.slane %v7347_v48, 5  ;;  %v7365_v16 = vld [vmem:[%s6875_s23 + $0x70] sm:$0xf]  ;;  %v6820_v17 = vld [vmem:[%s6875_s23 + $0x60] sm:$0xf] }
  0x66   : > { %6384 = vmatprep.subr.bf16.mxu1 %v6725_v23  ;;  %6433 = vmatpush3.bf16.msra.mxu0 %v6726_v25  ;;  %v1322_v25 = vrot.slane %v1320_v5, 4  ;;  %v5377_v38 = vcombine.low %v7309_v0, %v7313_v47  ;;  %v5348_v62 = vrot.slane %v7319_v11, 9  ;;  %v1348_v8 = vrot.slane %v7003_v22, 5  ;;  %v1232_v0 = vld [vmem:[%s6875_s23 + $0xa8] sm:$0xe]  ;;  %v7549_v15 = vld [vmem:[%s9520_s1 + $0x1b8] sm:$0xff]  }
  0x67   : > { %6434 = vmatprep.subr.bf16.mxu0 %v6730_v1  ;;  %v1351_v33 = vrot.slane %v7012_v36, 5  ;;  %v7358_v14 = vsel %vm7217_vm5, %v5346_v21, %v1320_v5  ;;  %v1334_v58 = vrot.slane %v7365_v16, 5  ;;  %v1337_v7 = vrot.slane %v7369_v4, 5  ;;  %v6737_v36 = vld [vmem:[%s9520_s1 + $0xd8] sm:$0xff]  }
  0x68   : > { %6355 = vmatmul.mubr.bf16.gmra.mxu0 %v5374_v20  ;;  %v7362_v19 = vsel %vm7217_vm5, %v1322_v25, %v1323_v43  ;;  %v5349_v5 = vrot.slane %v7328_v46, 9  ;;  %v1350_v37 = vrot.slane %v1348_v8, 4  ;;  %v5351_v41 = vrot.slane %v1230_v42, 9  ;;  %v5467_v42 = vld [vmem:[%s6875_s23 + $0xc] sm:$0xf] }
  0x69   : > { %6385 = vmatpush3.bf16.msra.mxu1 %v6725_v23  ;;  %6358 = vmatprep.mubr.bf16.mxu0 %v5375_v57  ;;  %v5350_v23 = vrot.slane %v1229_v63, 9  ;;  %v1355_v26 = vrot.slane %v7054_v31, 5  ;;  %v1358_v57 = vrot.slane %v7064_v44, 5  ;;  %v1341_v47 = vrot.slane %v6962_v39, 5 }
  0x6a   : > { %6386 = vmatprep.subr.bf16.mxu1 %v6729_v32  ;;  %6435 = vmatpush3.bf16.msra.mxu0 %v6730_v1  ;;  %v6738_v1 = vld [vmem:[%s9520_s1 + $0x118] sm:$0xff]   ;;  %v7393_v21 = vsel %vm7217_vm5, %v1350_v37, %v1351_v33  ;;  %v1362_v63 = vrot.slane %v7099_v28, 5  ;;  %v5353_v33 = vrot.slane %v1232_v0, 9  ;;  %v1369_v37 = vrot.slane %v7154_v52, 5  ;;  %v6741_v0 = vld [vmem:[%s9520_s1 + $0xd0] sm:$0xff]  }
  0x6b   : > { %6436 = vmatprep.subr.bf16.mxu0 %v6734_v24  ;;  %v7381_v6 = vsel %vm7217_vm5, %v5350_v23, %v1348_v8  ;;  %v7401_v44 = vsel %vm7217_vm5, %v5351_v41, %v1355_v26  ;;  %v1357_v43 = vrot.slane %v1355_v26, 4  ;;  %v6742_v23 = vld [vmem:[%s9520_s1 + $0x110] sm:$0xff]   ;;  %v1365_v8 = vrot.slane %v7115_v61, 5  ;;  %v9560_v61 = vld [vmem:[#allocation3_spill] sm:$0xff] }
  0x6c   : > { %6307 = vmatmul.mubr.bf16.gmra.mxu1 %v5318_v30  ;;  %v1329_v30 = vrot.slane %v1327_v45, 4  ;;  %v1364_v20 = vrot.slane %v1362_v63, 4  ;;  %v1372_v50 = vrot.slane %v9560_v61, 5  ;;  %v1328_v61 = vsel %vm7217_vm5, %v5347_v10, %v1327_v45  ;;  %v5470_v45 = vld [vmem:[%s6875_s23 + $0x18] sm:$0xf] }
  0x6d   : > { %6310 = vmatprep.mubr.bf16.mxu1 %v5319_v40  ;;  %6387 = vmatpush3.bf16.msra.mxu1 %v6729_v32  ;;  %v5352_v40 = vrot.slane %v1231_v49, 9  ;;  %v7413_v32 = vld [vmem:[%s6875_s23 + $0x10] sm:$0xf]  ;;  %v7417_v41 = vsel %vm7217_vm5, %v1357_v43, %v1358_v57  ;;  %v1371_v57 = vrot.slane %v1369_v37, 4  ;;  %v2139_v12 = vshrl.u32 %v5467_v42, 16 }
  0x6e   : > { %6388 = vmatprep.subr.bf16.mxu1 %v6733_v2  ;;  %6437 = vmatpush3.bf16.msra.mxu0 %v6734_v24  ;;  %v9559_v24 = vld [vmem:[#allocation2_spill] sm:$0xff]  ;;  %v9562_v43 = vld [vmem:[#allocation4_spill] sm:$0xff]  ;;  %v2142_v10 = vshll.u32 %v5467_v42, 16  ;;  %v1336_v51 = vrot.slane %v1334_v58, 4  ;;  %v2148_v59 = vshll.u32 %v7413_v32, 16  ;;  %v1342_v4 = vsel %vm7217_vm5, %v5349_v5, %v1341_v47 }
  0x6f   : > { %6438 = vmatprep.subr.bf16.mxu0 %v6738_v1  ;;  %v7421_v26 = vsel %vm7217_vm5, %v5352_v40, %v1362_v63  ;;  %v9561_v40 = vld [vmem:[#allocation5_spill] sm:$0xff]  ;;  %v7487_v42 = vld [vmem:[%s6875_s23 + $0x14] sm:$0x1]  ;;  %v2141_v63 = vrot.slane %v2139_v12, 4  ;;  %v9564_v5 = vld [vmem:[#allocation6_spill] sm:$0xff] }
  0x70   : > { %6359 = vmatmul.mubr.bf16.gmra.mxu0 %v5376_v53  ;;  %v2144_v49 = vrot.slane %v2142_v10, 5  ;;  %v5473_v53 = vld [vmem:[%s6875_s23 + $0x24] sm:$0xf]  ;;  %v1338_v11 = vsel %vm7217_vm5, %v1336_v51, %v1337_v7 }
  0x71   : > { %6389 = vmatpush3.bf16.msra.mxu1 %v6733_v2  ;;  %6362 = vmatprep.mubr.bf16.mxu0 %v5377_v38  ;;  %v7431_v2 = vsel %vm7217_vm5, %v5353_v33, %v1369_v37  ;;  %v5378_v38 = vcombine.low %v7358_v14, %v7362_v19  ;;  %v1331_v33 = vsel %vm7217_vm5, %v1329_v30, %v1330_v29  ;;  %v6746_v14 = vld [vmem:[%s9520_s1 + $0x108] sm:$0xff]   ;;  %v6750_v30 = vld [vmem:[%s9520_s1 + $0x100] sm:$0xff]   ;;  %v7506_v19 = vrot.slane %v2148_v59, 5 }
  0x72   : > { %6390 = vmatprep.subr.bf16.mxu1 %v6737_v36  ;;  %6439 = vmatpush3.bf16.msra.mxu0 %v6738_v1  ;;  %v7449_v37 = vsel %vm7217_vm5, %v1364_v20, %v1365_v8  ;;  %v7461_v29 = vsel %vm7217_vm5, %v1371_v57, %v1372_v50  ;;  %v6745_v50 = vld [vmem:[%s9520_s1 + $0xc8] sm:$0xff]   ;;  %v7476_v1 = vld [vmem:[%s6875_s23 + $0xb4] sm:$0xe]  ;;  %v5379_v20 = vcombine.low %v1328_v61, %v1331_v33  ;;  %v2152_v8 = vshrl.u32 %v7413_v32, 16  ;;  %v7504_v61 = vld [vmem:[%s6875_s23 + $0x1c] sm:$0xf] }
  0x73   : > { %6440 = vmatprep.subr.bf16.mxu0 %v6742_v23  ;;  %v7491_v57 = vld [vmem:[%s6875_s23 + $0x6c] sm:$0xf]  ;;  %v2163_v33 = vshrl.u32 %v5470_v45, 16  ;;  %v2172_v51 = vshll.u32 %v7504_v61, 16  ;;  %v2176_v39 = vshrl.u32 %v7504_v61, 16  ;;  %v2187_v59 = vshrl.u32 %v5473_v53, 16 }
  0x74   : > { %6311 = vmatmul.mubr.bf16.gmra.mxu1 %v5320_v35  ;;  %v1344_v35 = vrot.slane %v6819_v54, 5  ;;  %v5324_v54 = vcombine.low %v7491_v57, %v7365_v16  ;;  %v2154_v3 = vrot.slane %v2152_v8, 4  ;;  %v2190_v46 = vshll.u32 %v5473_v53, 16  ;;  %v6823_v8 = vld [vmem:[%s6875_s23 + $0x7c] sm:$0xf] }
  0x75   : > { %6314 = vmatprep.mubr.bf16.mxu1 %v5321_v60  ;;  %6391 = vmatpush3.bf16.msra.mxu1 %v6737_v36  ;;  %v5323_v60 = vcombine.low %v6820_v17, %v7347_v48  ;;  %v1343_v36 = vrot.slane %v1341_v47, 4  ;;  %v7501_v48 = vsel %vm7217_vm5, %v5348_v62, %v1334_v58  ;;  %v2166_v17 = vshll.u32 %v5470_v45, 16  ;;  %v6749_v58 = vld [vmem:[%s9520_s1 + $0xc0] sm:$0xff]   ;;  %v7531_v45 = vld [vmem:[%s6875_s23 + $0x28] sm:$0xf] }
  0x76   : > { %6392 = vmatprep.subr.bf16.mxu1 %v6741_v0  ;;  %6441 = vmatpush3.bf16.msra.mxu0 %v6742_v23  ;;  %v9532_v62 = vrot.slane %v9561_v40, 5  ;;  %v7518_v23 = vld [vmem:[%s6875_s23 + $0x20] sm:$0x1]  ;;  %v2165_v12 = vrot.slane %v2163_v33, 4  ;;  %9563 = vst [vmem:[#allocation2_spill] sm:$0xff] %v7531_v45  ;;  %v5380_v34 = vcombine.low %v7501_v48, %v1338_v11  ;;  %v2196_v53 = vshll.u32 %v7531_v45, 16 }
  0x77   : > { %6442 = vmatprep.subr.bf16.mxu0 %v6746_v14  ;;  %v2168_v10 = vrot.slane %v2166_v17, 5  ;;  %v1345_v7 = vsel %vm7217_vm5, %v1343_v36, %v1344_v35  ;;  %v2145_v35 = vor.u32 %v2144_v49, %v2141_v63  ;;  %v7544_v36 = vld [vmem:[%s9520_s1 + $0x178] sm:$0xff]   ;;  %v5476_v63 = vld [vmem:[%s6875_s23 + $0x30] sm:$0xf]  ;;  %v7565_v48 = vld [vmem:[%s6875_s23 + $0x34] sm:$0xf] }
  0x78   : > { %6363 = vmatmul.mubr.bf16.gmra.mxu0 %v5378_v38  ;;  %v2158_v38 = vshll.u32 %v7487_v42, 16  ;;  %v5381_v17 = vcombine.low %v1342_v4, %v1345_v7  ;;  %9566 = vst [vmem:[#allocation5_spill] sm:$0xff] %v7565_v48  ;;  %v7567_v11 = vrot.slane %v2172_v51, 5  ;;  %v2192_v47 = vrot.slane %v2190_v46, 5  ;;  %v7586_v46 = vld [vmem:[%s6875_s23 + $0x40] sm:$0xf] }
  0x79   : > { %6393 = vmatpush3.bf16.msra.mxu1 %v6741_v0  ;;  %6366 = vmatprep.mubr.bf16.mxu0 %v5379_v20  ;;  %v2155_v20 = vor.u32 %v2154_v3, %v7506_v19  ;;  %v2169_v49 = vor.u32 %v2168_v10, %v2165_v12  ;;  %v6822_v3 = vld [vmem:[%s6875_s23 + $0x78] sm:$0xf]  ;;  %v2178_v12 = vrot.slane %v2176_v39, 4  ;;  %v2189_v10 = vrot.slane %v2187_v59, 4  ;;  %9567 = vst [vmem:[#allocation4_spill] sm:$0xff] %v7586_v46 }
  0x7a   : > { %6394 = vmatprep.subr.bf16.mxu1 %v6745_v50  ;;  %6443 = vmatpush3.bf16.msra.mxu0 %v6746_v14  ;;  %v2182_v14 = vshll.u32 %v7518_v23, 16  ;;  %v5325_v33 = vcombine.low %v6822_v3, %v6823_v8  ;;  %v7558_v25 = vrot.slane %v2158_v38, 5  ;;  %v7570_v0 = vld [vmem:[%s6875_s23 + $0x38] sm:$0x1]  ;;  %v7572_v4 = vrot.slane %v2145_v35, 4 }
  0x7b   : > { %6444 = vmatprep.subr.bf16.mxu0 %v6750_v30  ;;  %v7574_v7 = vrot.slane %v2155_v20, 4  ;;  %v2211_v3 = vshrl.u32 %v5476_v63, 16  ;;  %v5479_v8 = vld [vmem:[%s6875_s23 + $0x3c] sm:$0xf]  ;;  %v7582_v51 = vrot.slane %v2196_v53, 5  ;;  %v2214_v39 = vshll.u32 %v5476_v63, 16 }
  0x7c   : > { %6315 = vmatmul.mubr.bf16.gmra.mxu1 %v5322_v55  ;;  %v1378_v55 = vrot.slane %v9532_v62, 4  ;;  %v7576_v38 = vrot.slane %v2182_v14, 5  ;;  %v2220_v59 = vshll.u32 %v7565_v48, 16  ;;  %v2224_v20 = vshrl.u32 %v7565_v48, 16 }
  0x7d   : > { %6318 = vmatprep.mubr.bf16.mxu1 %v5323_v60  ;;  %6395 = vmatpush3.bf16.msra.mxu1 %v6745_v50  ;;  %v7561_v60 = vld [vmem:[%s6875_s23 + $0x2c] sm:$0x1]  ;;  %v2200_v50 = vshrl.u32 %v7531_v45, 16  ;;  %v2179_v14 = vor.u32 %v2178_v12, %v7567_v11  ;;  %v2213_v53 = vrot.slane %v2211_v3, 4  ;;  %v2216_v63 = vrot.slane %v2214_v39, 5 }
  0x7e   : > { %6396 = vmatprep.subr.bf16.mxu1 %v6749_v58  ;;  %9565 = vst [vmem:[#allocation3_spill] sm:$0xff] %v7561_v60  ;;  %6445 = vmatpush3.bf16.msra.mxu0 %v6750_v30  ;;  %v7580_v30 = vrot.slane %v2169_v49, 4  ;;  %v2235_v49 = vshrl.u32 %v5479_v8, 16  ;;  %v2238_v62 = vshll.u32 %v5479_v8, 16  ;;  %v2226_v48 = vrot.slane %v2224_v20, 4 }
  0x7f   : > { %6526 = vmatprep.subr.bf16.mxu0 %v7549_v15  ;;  %v2202_v35 = vrot.slane %v2200_v50, 4  ;;  %v7596_v50 = vrot.slane %v2220_v59, 5  ;;  %v7599_v45 = vld [vmem:[%s6875_s23 + $0x44] sm:$0x1]  ;;  %v2248_v12 = vshrl.u32 %v7586_v46, 16  ;;  %v9568_v16 = vrot.slane %v9561_v40, 5 }
  0x80   : > { %6367 = vmatmul.mubr.bf16.gmra.mxu0 %v5380_v34  ;;  %v2206_v34 = vshll.u32 %v7561_v60, 16  ;;  %v9569_v57 = vrot.slane %v7476_v1, 9  ;;  %v7620_v39 = vld [vmem:[%s6875_s23 + $0x4c] sm:$0xf]  ;;  %v2237_v59 = vrot.slane %v2235_v49, 4  ;;  %v2240_v20 = vrot.slane %v2238_v62, 5 }
  0x81   : > { %6397 = vmatpush3.bf16.msra.mxu1 %v6749_v58  ;;  %6370 = vmatprep.mubr.bf16.mxu0 %v5381_v17  ;;  %v2193_v58 = vor.u32 %v2192_v47, %v2189_v10  ;;  %v2230_v17 = vshll.u32 %v7570_v0, 16  ;;  %v2244_v47 = vshll.u32 %v7586_v46, 16  ;;  %v5482_v10 = vld [vmem:[%s6875_s23 + $0x48] sm:$0xf]  ;;  %v2203_v8 = vor.u32 %v2202_v35, %v7582_v51 }
  0x82   : > { %6478 = vmatprep.subr.bf16.mxu1 %v7544_v36  ;;  %v2250_v1 = vrot.slane %v2248_v12, 4  ;;  %v7624_v46 = vrot.slane %v2179_v14, 4  ;;  %v2151_v62 = vsel %vm6906_vm2, %v7572_v4, %v7506_v19  ;;  %v2161_v35 = vsel %vm6906_vm2, %v7574_v7, %v7558_v25  ;;  %v5485_v4 = vld [vmem:[%s6875_s23 + $0x54] sm:$0xf] }
  0x83   : > { %v7622_v60 = vrot.slane %v2244_v47, 5  ;;  %v2262_v14 = vshll.u32 %v5482_v10, 16  ;;  %v2254_v49 = vshll.u32 %v7599_v45, 16  ;;  %v2272_v19 = vshrl.u32 %v7620_v39, 16 }
  0x84   : > { %6319 = vmatmul.mubr.bf16.gmra.mxu1 %v5324_v54  ;;  %v7610_v54 = vsel %vm7217_vm5, %v9569_v57, %v9568_v16  ;;  %v7626_v16 = vrot.slane %v2193_v58, 4  ;;  %v7628_v57 = vrot.slane %v2206_v34, 5  ;;  %v2268_v58 = vshll.u32 %v7620_v39, 16 }
  0x85   : > { %6322 = vmatprep.mubr.bf16.mxu1 %v5325_v33  ;;  %v9570_v33 = vrot.slane %v9564_v5, 5  ;;  %v2259_v5 = vshrl.u32 %v5482_v10, 16  ;;  %v9572_v34 = vcombine.low %v7401_v44, %v7417_v41  ;;  %v7649_v47 = vrot.slane %v2203_v8, 4  ;;  %v7655_v10 = vld [vmem:[%s6875_s23 + $0x58] sm:$0xf] }
  0x86   : > { %v7651_v12 = vrot.slane %v2230_v17, 5  ;;  %v2241_v25 = vor.u32 %v2240_v20, %v2237_v59  ;;  %v2251_v7 = vor.u32 %v2250_v1, %v7622_v60  ;;  %v9573_v44 = vcombine.low %v6996_v13, %v7003_v22  ;;  %v7661_v41 = vld [vmem:[%s6875_s23 + $0x50] sm:$0x1] }
  0x87   : > { %v7616_v3 = vsel %vm7217_vm5, %v1378_v55, %v9570_v33  ;;  %v9571_v55 = vcombine.low %v7381_v6, %v7393_v21  ;;  %v2217_v6 = vor.u32 %v2216_v63, %v2213_v53  ;;  %v2227_v21 = vor.u32 %v2226_v48, %v7596_v50 }
  0x88   : > { %v2261_v48 = vrot.slane %v2259_v5, 4  ;;  %v2264_v53 = vrot.slane %v2262_v14, 5  ;;  %v7663_v63 = vrot.slane %v2268_v58, 5  ;;  %v2274_v17 = vrot.slane %v2272_v19, 4  ;;  %v5488_v5 = vld [vmem:[%s6875_s23 + $0x60] sm:$0xf] }
  0x89   : > { %6371 = vmatmul.mubr.bf16.gmra.mxu0 %v9571_v55  ;;  %v9574_v33 = vcombine.low %v7048_v18, %v7054_v31  ;;  %v2283_v8 = vshrl.u32 %v5485_v4, 16  ;;  %v2286_v59 = vshll.u32 %v5485_v4, 16  ;;  %v7668_v20 = vrot.slane %v2217_v6, 4  ;;  %v7685_v31 = vld [vmem:[%s6875_s23 + $0x64] sm:$0xf] }
  0x8a   : > { %6374 = vmatprep.mubr.bf16.mxu0 %v9572_v34  ;;  %v7670_v1 = vrot.slane %v2227_v21, 4  ;;  %v7672_v13 = vrot.slane %v2254_v49, 5  ;;  %v2292_v22 = vshll.u32 %v7655_v10, 16  ;;  %v5386_v55 = vcombine.low %v7610_v54, %v7616_v3  ;;  %v7681_v34 = vld [vmem:[%s6875_s23 + $0x5c] sm:$0x1] }
  0x8b   : > { %v5531_v14 = vcombine.low %v2151_v62, %v2161_v35  ;;  %v7678_v58 = vrot.slane %v2241_v25, 4  ;;  %v2296_v18 = vshrl.u32 %v7655_v10, 16  ;;  %v7687_v6 = vrot.slane %v2251_v7, 4 }
  0x8c   : > { %6323 = vmatmul.mubr.bf16.gmra.mxu1 %v9573_v44  ;;  %v2278_v21 = vshll.u32 %v7661_v41, 16  ;;  %v2307_v49 = vshrl.u32 %v5488_v5, 16  ;;  %v2310_v19 = vshll.u32 %v5488_v5, 16  ;;  %v9575_v4 = vcombine.low %v7421_v26, %v7449_v37 }
  0x8d   : > { %6326 = vmatprep.mubr.bf16.mxu1 %v9574_v33  ;;  %v2265_v54 = vor.u32 %v2264_v53, %v2261_v48  ;;  %v2275_v3 = vor.u32 %v2274_v17, %v7663_v63  ;;  %v2285_v62 = vrot.slane %v2283_v8, 4  ;;  %v2288_v35 = vrot.slane %v2286_v59, 5  ;;  %v7725_v8 = vld [vmem:[%s6875_s23 + $0x70] sm:$0xf] }
  0x8e   : > { %v9576_v25 = vcombine.low %v7431_v2, %v7461_v29  ;;  %v7697_v7 = vrot.slane %v2292_v22, 5  ;;  %v2298_v44 = vrot.slane %v2296_v18, 4  ;;  %v2302_v33 = vshll.u32 %v7681_v34, 16 }
  0x8f   : > { %v2316_v26 = vshll.u32 %v7685_v31, 16  ;;  %v2175_v37 = vsel %vm6906_vm2, %v7580_v30, %v7567_v11  ;;  %v2185_v2 = vsel %vm6906_vm2, %v7624_v46, %v7576_v38  ;;  %v2309_v29 = vrot.slane %v2307_v49, 4  ;;  %v5491_v46 = vld [vmem:[%s6875_s23 + $0x6c] sm:$0xf] }
  0x90   : > { %v2312_v48 = vrot.slane %v2310_v19, 5  ;;  %v9577_v53 = vcombine.low %v7090_v9, %v7099_v28  ;;  %v2199_v17 = vsel %vm6906_vm2, %v7626_v16, %v7582_v51  ;;  %v2209_v11 = vsel %vm6906_vm2, %v7649_v47, %v7628_v57  ;;  %v7733_v16 = vld [vmem:[%s6875_s23 + $0x68] sm:$0x1] }
  0x91   : > { %6375 = vmatmul.mubr.bf16.gmra.mxu0 %v9575_v4  ;;  %v7720_v30 = vrot.slane %v2278_v21, 5  ;;  %v2320_v38 = vshrl.u32 %v7685_v31, 16  ;;  %v9578_v9 = vcombine.low %v9559_v24, %v7154_v52  ;;  %v7730_v28 = vrot.slane %v2265_v54, 4  ;;  %v6751_v52 = vld [vmem:[%s6875_s23 + $0xc] sm:$0xff]  }
  0x92   : > { %6378 = vmatprep.mubr.bf16.mxu0 %v9576_v25  ;;  %v2289_v51 = vor.u32 %v2288_v35, %v2285_v62  ;;  %v2331_v59 = vshrl.u32 %v5491_v46, 16  ;;  %v2334_v57 = vshll.u32 %v5491_v46, 16  ;;  %v7735_v47 = vrot.slane %v2275_v3, 4  ;;  %v7746_v62 = vld [vmem:[%s6875_s23 + $0x74] sm:$0x1] }
  0x93   : > { %v2299_v22 = vor.u32 %v2298_v44, %v7697_v7  ;;  %v7738_v5 = vrot.slane %v2302_v33, 5  ;;  %v2340_v18 = vshll.u32 %v7725_v8, 16  ;;  %v2313_v24 = vor.u32 %v2312_v48, %v2309_v29  ;;  %v5494_v25 = vld [vmem:[%s6875_s23 + $0x78] sm:$0xf]  ;;  %v7750_v44 = vld [vmem:[%s6875_s23 + $0x7c] sm:$0xf] }
  0x94   : > { %6327 = vmatmul.mubr.bf16.gmra.mxu1 %v9577_v53  ;;  %v7742_v21 = vrot.slane %v2316_v26, 5  ;;  %v2322_v49 = vrot.slane %v2320_v38, 4  ;;  %v2344_v19 = vshrl.u32 %v7725_v8, 16  ;;  %v5532_v4 = vcombine.low %v2175_v37, %v2185_v2  ;;  %v7757_v26 = vld [vmem:[%s6875_s23 + $0x80] sm:$0x1] }
  0x95   : > { %6330 = vmatprep.mubr.bf16.mxu1 %v9578_v9  ;;  %v5533_v54 = vcombine.low %v2199_v17, %v2209_v11  ;;  %v2333_v3 = vrot.slane %v2331_v59, 4  ;;  %v2336_v35 = vrot.slane %v2334_v57, 5  ;;  %v7752_v33 = vrot.slane %v2289_v51, 4 }
  0x96   : > { %v7754_v53 = vrot.slane %v2340_v18, 5  ;;  %v2346_v29 = vrot.slane %v2344_v19, 4  ;;  %v2355_v48 = vshrl.u32 %v5494_v25, 16  ;;  %v2326_v37 = vshll.u32 %v7733_v16, 16  ;;  %v5497_v19 = vld [vmem:[%s6875_s23 + $0x84] sm:$0xf] }
  0x97   : > { %v2358_v2 = vshll.u32 %v5494_v25, 16  ;;  %v2364_v17 = vshll.u32 %v7750_v44, 16  ;;  %v2368_v11 = vshrl.u32 %v7750_v44, 16  ;;  %v7762_v38 = vrot.slane %v2299_v22, 4  ;;  %v6755_v25 = vld [vmem:[%s6875_s23 + $0x24] sm:$0xff]  }
  0x98   : > { %v7764_v46 = vrot.slane %v2313_v24, 4  ;;  %v2357_v9 = vrot.slane %v2355_v48, 4  ;;  %v9579_v51 = vcombine.low %v9562_v43, %v9561_v40  ;;  %v2223_v22 = vsel %vm6906_vm2, %v7668_v20, %v7596_v50 }
  0x99   : > { %6379 = vmatmul.mubr.bf16.gmra.mxu0 %v5386_v55  ;;  %v2323_v55 = vor.u32 %v2322_v49, %v7742_v21  ;;  %v2360_v59 = vrot.slane %v2358_v2, 5  ;;  %v7770_v57 = vrot.slane %v2364_v17, 5  ;;  %v2370_v18 = vrot.slane %v2368_v11, 4  ;;  %v7819_v17 = vld [vmem:[%s6875_s23 + $0x8c] sm:$0x1] }
  0x9a   : > { %6446 = vmatprep.mubr.bf16.mxu0 %v5531_v14  ;;  %v2337_v14 = vor.u32 %v2336_v35, %v2333_v3  ;;  %v2347_v24 = vor.u32 %v2346_v29, %v7754_v53  ;;  %v2350_v49 = vshll.u32 %v7746_v62, 16  ;;  %v2374_v40 = vshll.u32 %v7757_v26, 16  ;;  %v7793_v3 = vld [vmem:[%s6875_s23 + $0x88] sm:$0xf]  ;;  %v6752_v35 = vld [vmem:[%s6875_s23 + $0x18] sm:$0xff]  }
  0x9b   : > { %v2233_v43 = vsel %vm6906_vm2, %v7670_v1, %v7651_v12  ;;  %v2257_v50 = vsel %vm6906_vm2, %v7687_v6, %v7672_v13  ;;  %v2361_v20 = vor.u32 %v2360_v59, %v2357_v9  ;;  %v6758_v12 = vld [vmem:[%s9520_s1 + $0x1b0] sm:$0xff]   ;;  %v7800_v1 = vrot.slane %v2326_v37, 5  ;;  %v7824_v11 = vld [vmem:[%s9520_s1 + $0x1a8] sm:$0xff]  }
  0x9c   : > { %6331 = vmatmul.mubr.bf16.gmra.mxu1 %v9579_v51  ;;  %v2382_v29 = vshll.u32 %v5497_v19, 16  ;;  %v6757_v13 = vld [vmem:[%s9520_s1 + $0x170] sm:$0xff]   ;;  %v2271_v6 = vsel %vm6906_vm2, %v7730_v28, %v7663_v63  ;;  %v2281_v48 = vsel %vm6906_vm2, %v7735_v47, %v7720_v30  ;;  %v7814_v37 = vrot.slane %v2323_v55, 4 }
  0x9d   : > { %6398 = vmatprep.mubr.bf16.mxu1 %v6751_v52  ;;  %v2247_v52 = vsel %vm6906_vm2, %v7678_v58, %v7622_v60  ;;  %v2371_v60 = vor.u32 %v2370_v18, %v7770_v57  ;;  %v2379_v58 = vshrl.u32 %v5497_v19, 16  ;;  %v7816_v2 = vrot.slane %v2337_v14, 4  ;;  %v5500_v14 = vld [vmem:[%s6875_s23 + $0x90] sm:$0xf]  ;;  %v7847_v59 = vld [vmem:[%s6875_s23 + $0x94] sm:$0xf] }
  0x9e   : > { %v7826_v63 = vrot.slane %v2347_v24, 4  ;;  %v7828_v28 = vrot.slane %v2350_v49, 5  ;;  %v2388_v30 = vshll.u32 %v7793_v3, 16  ;;  %v2392_v47 = vshrl.u32 %v7793_v3, 16  ;;  %9580 = vst [vmem:[#allocation6_spill] sm:$0xff] %v7847_v59 }
  0x9f   : > { %v2305_v55 = vsel %vm6906_vm2, %v7762_v38, %v7738_v5  ;;  %v7841_v9 = vrot.slane %v2361_v20, 4  ;;  %v7843_v51 = vrot.slane %v2374_v40, 5  ;;  %v2384_v18 = vrot.slane %v2382_v29, 5  ;;  %v6761_v5 = vld [vmem:[%s9520_s1 + $0x168] sm:$0xff]  }
  0xa0   : > { %v2406_v38 = vshll.u32 %v5500_v14, 16  ;;  %v2412_v24 = vshll.u32 %v7847_v59, 16  ;;  %v2416_v49 = vshrl.u32 %v7847_v59, 16  ;;  %v5534_v40 = vcombine.low %v2223_v22, %v2233_v43 }
  0xa1   : > { %6447 = vmatmul.mubr.bf16.vlgmr.msra.gmra.mxu0 %v5532_v4  ;;  %v2295_v4 = vsel %vm6906_vm2, %v7752_v33, %v7697_v7  ;;  %v2398_v7 = vshll.u32 %v7819_v17, 16  ;;  %v2403_v33 = vshrl.u32 %v5500_v14, 16  ;;  %v5535_v20 = vcombine.low %v2247_v52, %v2257_v50 }
  0xa2   : > { %6527 = vmatpush3.bf16.msra.mxu0 %v7549_v15  ;;  %6450 = vmatprep.mubr.bf16.mxu0 %v5533_v54  ;;  %v7849_v15 = vrot.slane %v2371_v60, 4  ;;  %v2381_v54 = vrot.slane %v2379_v58, 4  ;;  %v7858_v19 = vrot.slane %v2388_v30, 5  ;;  %v6756_v60 = vld [vmem:[%s6875_s23 + $0x30] sm:$0xff]   ;;  %v6766_v58 = vld [vmem:[%s9520_s1 + $0x1a0] sm:$0xff]   ;;  %v2408_v14 = vrot.slane %v2406_v38, 5 }
  0xa3   : > { %6528 = vmatprep.subr.bf16.mxu0 %v6758_v12  ;;  %v2405_v29 = vrot.slane %v2403_v33, 4  ;;  %v2418_v22 = vrot.slane %v2416_v49, 4  ;;  %v7866_v43 = vcombine.low %v2271_v6, %v2281_v48  ;;  %v7869_v52 = vcombine.low %v2295_v4, %v2305_v55  ;;  %v5503_v30 = vld [vmem:[%s6875_s23 + $0x9c] sm:$0xf]  ;;  %v7891_v4 = vld [vmem:[%s6875_s23 + $0xa4] sm:$0x1] }
  0xa4   : > { %6399 = vmatmul.mubr.bf16.vlgmr.msra.gmra.mxu1 %v6752_v35  ;;  %v2394_v35 = vrot.slane %v2392_v47, 4  ;;  %v2385_v48 = vor.u32 %v2384_v18, %v2381_v54  ;;  %v7888_v47 = vld [vmem:[%s6875_s23 + $0xa0] sm:$0xf]  ;;  %9583 = vst [vmem:[#allocation9_spill] sm:$0xff] %v7891_v4  ;;  %v2427_v55 = vshrl.u32 %v5503_v30, 16  ;;  %v2430_v33 = vshll.u32 %v5503_v30, 16 }
  0xa5   : > { %6479 = vmatpush3.bf16.msra.mxu1 %v7544_v36  ;;  %6402 = vmatprep.mubr.bf16.mxu1 %v6755_v25  ;;  %v7864_v36 = vrot.slane %v2412_v24, 5  ;;  %v2329_v25 = vsel %vm6906_vm2, %v7814_v37, %v7800_v1  ;;  %9582 = vst [vmem:[#allocation8_spill] sm:$0xff] %v7888_v47  ;;  %v6759_v38 = vld [vmem:[%s6875_s23 + $0x3c] sm:$0xff]   ;;  %v2436_v37 = vshll.u32 %v7888_v47, 16  ;;  %v2440_v24 = vshrl.u32 %v7888_v47, 16 }
  0xa6   : > { %6480 = vmatprep.subr.bf16.mxu1 %v6757_v13  ;;  %6529 = vmatpush3.bf16.msra.mxu0 %v6758_v12  ;;  %v7880_v12 = vld [vmem:[%s6875_s23 + $0x98] sm:$0x1]  ;;  %v2395_v1 = vor.u32 %v2394_v35, %v7858_v19  ;;  %v6765_v54 = vld [vmem:[%s9520_s1 + $0x160] sm:$0xff]   ;;  %v2409_v18 = vor.u32 %v2408_v14, %v2405_v29  ;;  %v2429_v30 = vrot.slane %v2427_v55, 4  ;;  %v2432_v49 = vrot.slane %v2430_v33, 5 }
  0xa7   : > { %6530 = vmatprep.subr.bf16.mxu0 %v7824_v11  ;;  %9581 = vst [vmem:[#allocation7_spill] sm:$0xff] %v7880_v12  ;;  %v2422_v35 = vshll.u32 %v7880_v12, 16  ;;  %v2442_v6 = vrot.slane %v2440_v24, 4  ;;  %v2446_v50 = vshll.u32 %v7891_v4, 16  ;;  %v5506_v47 = vld [vmem:[%s6875_s23 + $0xa8] sm:$0xf] }
  0xa8   : > { %v6769_v29 = vld [vmem:[%s9520_s1 + $0x158] sm:$0xff]   ;;  %v7914_v14 = vrot.slane %v2385_v48, 4  ;;  %v2451_v55 = vshrl.u32 %v5506_v47, 16  ;;  %v2454_v33 = vshll.u32 %v5506_v47, 16  ;;  %v7927_v4 = vld [vmem:[%s6875_s23 + $0xb0] sm:$0x1] }
  0xa9   : > { %6451 = vmatmul.mubr.bf16.gmra.mxu0 %v5534_v40  ;;  %6481 = vmatpush3.bf16.msra.mxu1 %v6757_v13  ;;  %v6770_v13 = vld [vmem:[%s9520_s1 + $0x198] sm:$0xff]   ;;  %v2419_v40 = vor.u32 %v2418_v22, %v7864_v36  ;;  %v7916_v22 = vrot.slane %v2398_v7, 5  ;;  %v6760_v48 = vld [vmem:[%s6875_s23 + $0x48] sm:$0xff]   ;;  %v7930_v7 = vrot.slane %v2395_v1, 4  ;;  %v7932_v12 = vrot.slane %v2409_v18, 4 }
  0xaa   : > { %6454 = vmatprep.mubr.bf16.mxu0 %v5535_v20  ;;  %6482 = vmatprep.subr.bf16.mxu1 %v6761_v5  ;;  %v7907_v20 = vrot.slane %v2436_v37, 5  ;;  %v2433_v37 = vor.u32 %v2432_v49, %v2429_v30  ;;  %v7934_v59 = vrot.slane %v2422_v35, 5  ;;  %v6773_v49 = vld [vmem:[%s9520_s1 + $0x150] sm:$0xff]   ;;  %v7951_v18 = vrot.slane %v2454_v33, 5 }
  0xab   : > { %6531 = vmatpush3.bf16.msra.mxu0 %v7824_v11  ;;  %v7919_v11 = vld [vmem:[%s6875_s23 + $0xac] sm:$0xf]  ;;  %v2470_v35 = vshll.u32 %v7927_v4, 16 }
  0xac   : > { %6403 = vmatmul.mubr.bf16.gmra.mxu1 %v6756_v60  ;;  %6532 = vmatprep.subr.bf16.mxu0 %v6766_v58  ;;  %9584 = vst [vmem:[#allocation10_spill] sm:$0xff] %v7919_v11  ;;  %v2353_v60 = vsel %vm6906_vm2, %v7826_v63, %v7828_v28  ;;  %v2443_v24 = vor.u32 %v2442_v6, %v7907_v20  ;;  %v2460_v47 = vshll.u32 %v7919_v11, 16  ;;  %v6763_v63 = vld [vmem:[%s6875_s23 + $0x54] sm:$0xff]   ;;  %v7941_v28 = vrot.slane %v2419_v40, 4 }
  0xad   : > { %6406 = vmatprep.mubr.bf16.mxu1 %v6759_v38  ;;  %6483 = vmatpush3.bf16.msra.mxu1 %v6761_v5  ;;  %v6774_v5 = vld [vmem:[%s9520_s1 + $0x190] sm:$0xff]   ;;  %v7943_v6 = vrot.slane %v2446_v50, 5  ;;  %v7945_v38 = vrot.slane %v2451_v55, 4  ;;  %v2464_v1 = vshrl.u32 %v7919_v11, 16  ;;  %v7960_v40 = vrot.slane %v2433_v37, 4 }
  0xae   : > { %6484 = vmatprep.subr.bf16.mxu1 %v6765_v54  ;;  %v7962_v30 = vrot.slane %v2443_v24, 4  ;;  %v5509_v55 = vld [vmem:[%s6875_s23 + $0xb4] sm:$0xf]  ;;  %v7966_v11 = vld [vmem:[%s6875_s23 + $0xb8] sm:$0xf]  ;;  %v6777_v24 = vld [vmem:[%s9520_s1 + $0x148] sm:$0xff]  }
  0xaf   : > { %6533 = vmatpush3.bf16.msra.mxu0 %v6766_v58  ;;  %v9585_v58 = vsel %vm6906_vm2, %v7764_v46, %v7742_v21  ;;  %9586 = vst [vmem:[#allocation11_spill] sm:$0xff] %v7966_v11  ;;  %v2367_v21 = vsel %vm6906_vm2, %v7841_v9, %v7770_v57  ;;  %v7978_v46 = vrot.slane %v2460_v47, 5  ;;  %v5512_v37 = vld [vmem:[%s6875_s23 + $0xc0] sm:$0xf]  ;;  %v2377_v57 = vsel %vm6906_vm2, %v7849_v15, %v7843_v51  ;;  %v8005_v47 = vld [vmem:[%s6875_s23 + $0xc4] sm:$0xf] }
  0xb0   : > { %6534 = vmatprep.subr.bf16.mxu0 %v6770_v13  ;;  %v5538_v50 = vcombine.low %v9585_v58, %v2329_v25  ;;  %v2475_v25 = vshrl.u32 %v5509_v55, 16  ;;  %v2391_v9 = vsel %vm6906_vm2, %v7914_v14, %v7858_v19  ;;  %9589 = vst [vmem:[#allocation13_spill] sm:$0xff] %v8005_v47  ;;  %v8008_v51 = vld [vmem:[%s6875_s23 + $0xc8] sm:$0x1]  ;;  %v2508_v58 = vshll.u32 %v8005_v47, 16 }
  0xb1   : > { %6455 = vmatmul.mubr.bf16.gmra.mxu0 %v7866_v43  ;;  %6485 = vmatpush3.bf16.msra.mxu1 %v6765_v54  ;;  %v9587_v43 = vsel %vm6906_vm2, %v7816_v2, %v7754_v53  ;;  %v2466_v54 = vrot.slane %v2464_v1, 4  ;;  %v2478_v53 = vshll.u32 %v5509_v55, 16  ;;  %v2484_v2 = vshll.u32 %v7966_v11, 16 }
  0xb2   : > { %6458 = vmatprep.mubr.bf16.mxu0 %v7869_v52  ;;  %v5539_v33 = vcombine.low %v9587_v43, %v2353_v60  ;;  %6486 = vmatprep.subr.bf16.mxu1 %v6769_v29  ;;  %v6778_v52 = vld [vmem:[%s9520_s1 + $0x188] sm:$0xff]   ;;  %v2488_v60 = vshrl.u32 %v7966_v11, 16  ;;  %v2477_v15 = vrot.slane %v2475_v25, 4  ;;  %v9590_v55 = vrot.slane %v7413_v32, 5 }
  0xb3   : > { %6535 = vmatpush3.bf16.msra.mxu0 %v6770_v13  ;;  %v2401_v13 = vsel %vm6906_vm2, %v7930_v7, %v7916_v22  ;;  %v2480_v19 = vrot.slane %v2478_v53, 5  ;;  %v8010_v14 = vrot.slane %v2484_v2, 5  ;;  %v2499_v22 = vshrl.u32 %v5512_v37, 16  ;;  %v6764_v2 = vld [vmem:[%s6875_s23 + $0x60] sm:$0xff]  }
  0xb4   : > { %6407 = vmatmul.mubr.bf16.gmra.mxu1 %v6760_v48  ;;  %6536 = vmatprep.subr.bf16.mxu0 %v6774_v5  ;;  %v8002_v48 = vld [vmem:[%s6875_s23 + $0xbc] sm:$0x1]  ;;  %v2490_v1 = vrot.slane %v2488_v60, 4  ;;  %v2502_v7 = vshll.u32 %v5512_v37, 16  ;;  %v8015_v43 = vrot.slane %v9590_v55, 4  ;;  %v8020_v25 = vrot.slane %v2470_v35, 5 }
  0xb5   : > { %9588 = vst [vmem:[#allocation12_spill] sm:$0xff] %v8002_v48  ;;  %6410 = vmatprep.mubr.bf16.mxu1 %v6763_v63  ;;  %6487 = vmatpush3.bf16.msra.mxu1 %v6769_v29  ;;  %v2457_v63 = vor.u32 %v7951_v18, %v7945_v38  ;;  %v2467_v29 = vor.u32 %v2466_v54, %v7978_v46  ;;  %v2512_v53 = vshrl.u32 %v8005_v47, 16  ;;  %v2494_v60 = vshll.u32 %v8002_v48, 16  ;;  %v6767_v38 = vld [vmem:[%s6875_s23 + $0x6c] sm:$0xff]   ;;  %v8040_v48 = vld [vmem:[%s6875_s23 + $0x18] sm:$0xe] }
  0xb6   : > { %6488 = vmatprep.subr.bf16.mxu1 %v6773_v49  ;;  %v2501_v37 = vrot.slane %v2499_v22, 4  ;;  %v2504_v11 = vrot.slane %v2502_v7, 5  ;;  %v8025_v55 = vrot.slane %v2508_v58, 5  ;;  %v2481_v18 = vor.u32 %v2480_v19, %v2477_v15  ;;  %v6781_v22 = vld [vmem:[%s9520_s1 + $0x140] sm:$0xff]   ;;  %v8037_v58 = vld [vmem:[%s6875_s23 + $0xc] sm:$0xe] }
  0xb7   : > { %6537 = vmatpush3.bf16.msra.mxu0 %v6774_v5  ;;  %v6782_v5 = vld [vmem:[%s9520_s1 + $0x180] sm:$0xff]   ;;  %v2491_v35 = vor.u32 %v2490_v1, %v8010_v14  ;;  %v2514_v54 = vrot.slane %v2512_v53, 4  ;;  %v2518_v47 = vshll.u32 %v8008_v51, 16  ;;  %v5540_v15 = vcombine.low %v2367_v21, %v2377_v57 }
  0xb8   : > { %6538 = vmatprep.subr.bf16.mxu0 %v6778_v52  ;;  %v2505_v7 = vor.u32 %v2504_v11, %v2501_v37  ;;  %v5541_v19 = vcombine.low %v2391_v9, %v2401_v13  ;;  %v8048_v1 = vrot.slane %v2457_v63, 4  ;;  %v8050_v11 = vrot.slane %v2467_v29, 4  ;;  %v6768_v9 = vld [vmem:[%s6875_s23 + $0x78] sm:$0xff]   ;;  %v6771_v37 = vld [vmem:[%s6875_s23 + $0x84] sm:$0xff]  }
  0xb9   : > { %6459 = vmatmul.mubr.bf16.gmra.mxu0 %v5538_v50  ;;  %6489 = vmatpush3.bf16.msra.mxu1 %v6773_v49  ;;  %v8045_v49 = vld [vmem:[%s9520_s1 + $0x238] sm:$0xff]   ;;  %v2515_v50 = vor.u32 %v2514_v54, %v8025_v55  ;;  %v8059_v53 = vrot.slane %v2491_v35, 4  ;;  %v8061_v21 = vrot.slane %v2494_v60, 5  ;;  %v8067_v63 = vrot.slane %v2518_v47, 5  ;;  %v5558_v60 = vld [vmem:[%s6875_s23 + $0x30] sm:$0xe] }
  0xba   : > { %6462 = vmatprep.mubr.bf16.mxu0 %v5539_v33  ;;  %6490 = vmatprep.subr.bf16.mxu1 %v6777_v24  ;;  %v8055_v33 = vld [vmem:[%s9520_s1 + $0x1f8] sm:$0xff]   ;;  %v8065_v13 = vrot.slane %v2505_v7, 4  ;;  %v2913_v29 = vrot.slane %v7487_v42, 5  ;;  %v9591_v35 = vld [vmem:[#allocation2_spill] sm:$0xff]  ;;  %v5574_v47 = vrot.slane %v5558_v60, 9  ;;  %v9594_v60 = vld [vmem:[#allocation3_spill] sm:$0xff] }
  0xbb   : > { %6539 = vmatpush3.bf16.msra.mxu0 %v6778_v52  ;;  %v8057_v52 = vrot.slane %v2481_v18, 4  ;;  %v9592_v7 = vld [vmem:[#allocation5_spill] sm:$0xff]  ;;  %v2934_v18 = vrot.slane %v7570_v0, 5  ;;  %v2449_v0 = vsel %vm6906_vm2, %v7962_v30, %v7943_v6  ;;  %v2948_v30 = vrot.slane %v7661_v41, 5 }
  0xbc   : > { %6411 = vmatmul.mubr.bf16.gmra.mxu1 %v6764_v2  ;;  %6540 = vmatprep.subr.bf16.mxu0 %v6782_v5  ;;  %v2931_v57 = vrot.slane %v9592_v7, 5  ;;  %v9593_v2 = vld [vmem:[#allocation4_spill] sm:$0xff] }
  0xbd   : > { %6414 = vmatprep.mubr.bf16.mxu1 %v6767_v38  ;;  %6491 = vmatpush3.bf16.msra.mxu1 %v6777_v24  ;;  %v8072_v24 = vrot.slane %v2515_v50, 4  ;;  %v2917_v38 = vrot.slane %v7504_v61, 5  ;;  %v2415_v50 = vsel %vm6906_vm2, %v7932_v12, %v7864_v36  ;;  %v2938_v54 = vrot.slane %v9593_v2, 5  ;;  %v5559_v12 = vld [vmem:[%s6875_s23 + $0x3c] sm:$0xe] }
  0xbe   : > { %6492 = vmatprep.subr.bf16.mxu1 %v6781_v22  ;;  %v8094_v7 = vsel %vm7217_vm5, %v5574_v47, %v2931_v57  ;;  %v2933_v36 = vrot.slane %v2931_v57, 4  ;;  %v5575_v2 = vrot.slane %v5559_v12, 9  ;;  %v6772_v47 = vld [vmem:[%s6875_s23 + $0x90] sm:$0xff]   ;;  %v2955_v12 = vrot.slane %v7681_v34, 5 }
  0xbf   : > { %6541 = vmatpush3.bf16.msra.mxu0 %v6782_v5  ;;  %v2425_v5 = vsel %vm6906_vm2, %v7941_v28, %v7934_v59  ;;  %v2439_v59 = vsel %vm6906_vm2, %v7960_v40, %v7907_v20  ;;  %v2940_v28 = vrot.slane %v2938_v54, 4  ;;  %v2945_v20 = vrot.slane %v7620_v39, 5 }
  0xc0   : > { %6622 = vmatprep.subr.bf16.mxu0 %v8045_v49  ;;  %v8108_v57 = vsel %vm7217_vm5, %v2933_v36, %v2934_v18  ;;  %v5543_v18 = vcombine.low %v2439_v59, %v2449_v0  ;;  %v8123_v39 = vsel %vm7217_vm5, %v5575_v2, %v2938_v54  ;;  %v2463_v36 = vsel %vm6906_vm2, %v8048_v1, %v7978_v46  ;;  %v5561_v54 = vld [vmem:[%s6875_s23 + $0x54] sm:$0xe] }
  0xc1   : > { %6463 = vmatmul.mubr.bf16.gmra.mxu0 %v5540_v15  ;;  %6493 = vmatpush3.bf16.msra.mxu1 %v6781_v22  ;;  %v2927_v15 = vrot.slane %v9594_v60, 5  ;;  %v2941_v22 = vrot.slane %v7599_v45, 5  ;;  %v5606_v40 = vcombine.low %v8094_v7, %v8108_v57  ;;  %v5560_v45 = vld [vmem:[%s6875_s23 + $0x48] sm:$0xe]  ;;  %v2473_v46 = vsel %vm6906_vm2, %v8050_v11, %v8020_v25  ;;  %v6792_v7 = vld [vmem:[%s6875_s23 + $0x54] sm:$0xff]  }
  0xc2   : > { %6466 = vmatprep.mubr.bf16.mxu0 %v5541_v19  ;;  %6574 = vmatprep.subr.bf16.mxu1 %v8055_v33  ;;  %v5542_v19 = vcombine.low %v2415_v50, %v2425_v5  ;;  %v2947_v50 = vrot.slane %v2945_v20, 4  ;;  %v6775_v5 = vld [vmem:[%s6875_s23 + $0x9c] sm:$0xff]   ;;  %v2959_v2 = vrot.slane %v7685_v31, 5  ;;  %v2487_v34 = vsel %vm6906_vm2, %v8057_v52, %v8010_v14 }
  0xc3   : > { %v8115_v6 = vsel %vm7217_vm5, %v2940_v28, %v2941_v22  ;;  %v5577_v28 = vrot.slane %v5561_v54, 9  ;;  %v5562_v22 = vld [vmem:[%s6875_s23 + $0x60] sm:$0xe]  ;;  %v2962_v25 = vrot.slane %v7733_v16, 5  ;;  %v2497_v11 = vsel %vm6906_vm2, %v8059_v53, %v8061_v21 }
  0xc4   : > { %6415 = vmatmul.mubr.bf16.gmra.mxu1 %v6768_v9  ;;  %v2952_v9 = vrot.slane %v7655_v10, 5  ;;  %v5607_v41 = vcombine.low %v8123_v39, %v8115_v6  ;;  %v8138_v59 = vsel %vm7217_vm5, %v2947_v50, %v2948_v30  ;;  %v2966_v14 = vrot.slane %v7725_v8, 5  ;;  %v5788_v6 = vld [vmem:[%s6875_s23 + $0x24] sm:$0xe] }
  0xc5   : > { %6418 = vmatprep.mubr.bf16.mxu1 %v6771_v37  ;;  %v5576_v37 = vrot.slane %v5560_v45, 9  ;;  %v2961_v45 = vrot.slane %v2959_v2, 4  ;;  %v5544_v52 = vcombine.low %v2463_v36, %v2473_v46  ;;  %v2969_v8 = vrot.slane %v7746_v62, 5  ;;  %v5564_v36 = vld [vmem:[%s6875_s23 + $0x78] sm:$0xe] }
  0xc6   : > { %v2954_v0 = vrot.slane %v2952_v9, 4  ;;  %v8165_v31 = vsel %vm7217_vm5, %v5577_v28, %v2952_v9  ;;  %v2968_v9 = vrot.slane %v2966_v14, 4  ;;  %v2973_v54 = vrot.slane %v7750_v44, 5 }
  0xc7   : > { %v8134_v10 = vsel %vm7217_vm5, %v5576_v37, %v2945_v20  ;;  %v5578_v20 = vrot.slane %v5562_v22, 9  ;;  %v8177_v53 = vsel %vm7217_vm5, %v2961_v45, %v2962_v25  ;;  %v5545_v37 = vcombine.low %v2487_v34, %v2497_v11 }
  0xc8   : > { %v8193_v46 = vsel %vm7217_vm5, %v2968_v9, %v2969_v8  ;;  %v5580_v62 = vrot.slane %v5564_v36, 9  ;;  %v2980_v28 = vrot.slane %v7793_v3, 5  ;;  %v2975_v44 = vrot.slane %v2973_v54, 4  ;;  %v6783_v8 = vld [vmem:[%s6875_s23 + $0x18] sm:$0xff]   ;;  %v9599_v36 = vld [vmem:[#allocation8_spill] sm:$0xff] }
  0xc9   : > { %6467 = vmatmul.mubr.bf16.gmra.mxu0 %v5542_v19  ;;  %v8156_v19 = vsel %vm7217_vm5, %v2954_v0, %v2955_v12  ;;  %v8172_v16 = vsel %vm7217_vm5, %v5578_v20, %v2959_v2  ;;  %v2976_v0 = vrot.slane %v7757_v26, 5  ;;  %v2983_v26 = vrot.slane %v7819_v17, 5  ;;  %v5565_v20 = vld [vmem:[%s6875_s23 + $0x84] sm:$0xe] }
  0xca   : > { %6470 = vmatprep.mubr.bf16.mxu0 %v5543_v18  ;;  %v5563_v18 = vld [vmem:[%s6875_s23 + $0x6c] sm:$0xe]  ;;  %v2511_v2 = vsel %vm6906_vm2, %v8065_v13, %v8025_v55  ;;  %v8205_v34 = vsel %vm7217_vm5, %v5580_v62, %v2973_v54  ;;  %v2521_v3 = vsel %vm6906_vm2, %v8072_v24, %v8067_v63  ;;  %v5581_v25 = vrot.slane %v5565_v20, 9  ;;  %v9597_v63 = vld [vmem:[#allocation6_spill] sm:$0xff] }
  0xcb   : > { %v5579_v21 = vrot.slane %v5563_v18, 9  ;;  %v8214_v17 = vsel %vm7217_vm5, %v2975_v44, %v2976_v0  ;;  %v2982_v11 = vrot.slane %v2980_v28, 4  ;;  %v9595_v45 = vrot.slane %v7413_v32, 5  ;;  %v5566_v18 = vld [vmem:[%s6875_s23 + $0x90] sm:$0xe]  ;;  %v6795_v62 = vld [vmem:[%s6875_s23 + $0x60] sm:$0xff]  }
  0xcc   : > { %6419 = vmatmul.mubr.bf16.gmra.mxu1 %v6772_v47  ;;  %v6776_v47 = vld [vmem:[%s6875_s23 + $0xa8] sm:$0xff]   ;;  %v9596_v55 = vrot.slane %v8037_v58, 9  ;;  %v2987_v24 = vrot.slane %v9597_v63, 5  ;;  %v8231_v32 = vsel %vm7217_vm5, %v5581_v25, %v2980_v28  ;;  %v2994_v54 = vrot.slane %v9599_v36, 5 }
  0xcd   : > { %6422 = vmatprep.mubr.bf16.mxu1 %v6775_v5  ;;  %v6779_v5 = vld [vmem:[%s6875_s23 + $0xb4] sm:$0xff]   ;;  %v8189_v12 = vsel %vm7217_vm5, %v5579_v21, %v2966_v14  ;;  %v5557_v14 = vld [vmem:[%s6875_s23 + $0x24] sm:$0xe]  ;;  %v9598_v21 = vld [vmem:[#allocation7_spill] sm:$0xff]  ;;  %v8235_v58 = vsel %vm7217_vm5, %v2982_v11, %v2983_v26  ;;  %v5546_v0 = vcombine.low %v2511_v2, %v2521_v3  ;;  %v2914_v28 = vsel %vm7217_vm5, %v8015_v43, %v2913_v29 }
  0xce   : > { %v2911_v13 = vsel %vm7217_vm5, %v9596_v55, %v9595_v45  ;;  %v2990_v9 = vrot.slane %v9598_v21, 5  ;;  %v2989_v44 = vrot.slane %v2987_v24, 4  ;;  %v6780_v45 = vld [vmem:[%s6875_s23 + $0xc0] sm:$0xff]   ;;  %v2919_v26 = vrot.slane %v2917_v38, 4  ;;  %v5567_v2 = vld [vmem:[%s6875_s23 + $0x9c] sm:$0xe] }
  0xcf   : > { %v2996_v3 = vrot.slane %v2994_v54, 4  ;;  %v5583_v11 = vrot.slane %v5567_v2, 9  ;;  %v9601_v55 = vld [vmem:[#allocation10_spill] sm:$0xff]  ;;  %v5568_v63 = vld [vmem:[%s6875_s23 + $0xa8] sm:$0xe]  ;;  %v5603_v21 = vcombine.low %v2911_v13, %v2914_v28  ;;  %v9605_v28 = vrot.slane %v8040_v48, 9 }
  0xd0   : > { %v8256_v25 = vsel %vm7217_vm5, %v2989_v44, %v2990_v9  ;;  %v3001_v42 = vrot.slane %v9601_v55, 5  ;;  %v8379_v43 = vld [vmem:[%s6875_s23 + $0x34] sm:$0xf] }
  0xd1   : > { %6471 = vmatmul.mubr.bf16.gmra.mxu0 %v5544_v52  ;;  %v8269_v9 = vsel %vm7217_vm5, %v5583_v11, %v2994_v54  ;;  %v5569_v54 = vld [vmem:[%s6875_s23 + $0xb4] sm:$0xe]  ;;  %v3835_v39 = vshll.u32 %v8379_v43, 16 }
  0xd2   : > { %6474 = vmatprep.mubr.bf16.mxu0 %v5545_v37  ;;  %v5582_v37 = vrot.slane %v5566_v18, 9  ;;  %v5573_v18 = vrot.slane %v5557_v14, 9  ;;  %v3003_v36 = vrot.slane %v3001_v42, 4  ;;  %v9602_v14 = vrot.slane %v9591_v35, 5 }
  0xd3   : > { %v5585_v55 = vrot.slane %v5569_v54, 9 }
  0xd4   : > { %6423 = vmatmul.mubr.bf16.gmra.mxu1 %v6776_v47  ;;  %v9600_v47 = vld [vmem:[#allocation9_spill] sm:$0xff]  ;;  %v2926_v44 = vrot.slane %v9602_v14, 4  ;;  %v9607_v61 = vmov %v9602_v14  ;;  %v3018_v14 = vrot.slane %v8008_v51, 5  ;;  %v5705_v51 = vld [vmem:[%s6875_s23 + $0x30] sm:$0xf] }
  0xd5   : > { %6426 = vmatprep.mubr.bf16.mxu1 %v6779_v5  ;;  %v2997_v20 = vrot.slane %v9600_v47, 5  ;;  %v8251_v5 = vsel %vm7217_vm5, %v5582_v37, %v2987_v24  ;;  %v3004_v24 = vrot.slane %v7927_v4, 5  ;;  %v5584_v37 = vrot.slane %v5568_v63, 9 }
  0xd6   : > { %v9606_v63 = vrot.slane %v7518_v23, 5  ;;  %v2925_v48 = vsel %vm7217_vm5, %v5573_v18, %v9607_v61  ;;  %v2928_v23 = vsel %vm7217_vm5, %v2926_v44, %v2927_v15  ;;  %v8349_v61 = vld [vmem:[%s6875_s23 + $0x28] sm:$0xf] }
  0xd7   : > { %v8263_v29 = vsel %vm7217_vm5, %v2996_v3, %v2997_v20  ;;  %v9603_v20 = vld [vmem:[#allocation11_spill] sm:$0xff]  ;;  %v8278_v4 = vsel %vm7217_vm5, %v5584_v37, %v3001_v42  ;;  %v8282_v13 = vsel %vm7217_vm5, %v3003_v36, %v3004_v24  ;;  %v2918_v3 = vsel %vm7217_vm5, %v9605_v28, %v2917_v38  ;;  %v5570_v37 = vld [vmem:[%s6875_s23 + $0xc0] sm:$0xe]  ;;  %v9608_v38 = vld [vmem:[#allocation13_spill] sm:$0xff] }
  0xd8   : > { %v3008_v2 = vrot.slane %v9603_v20, 5  ;;  %v2921_v24 = vsel %vm7217_vm5, %v2919_v26, %v9606_v63  ;;  %v3015_v36 = vrot.slane %v9608_v38, 5  ;;  %v5586_v18 = vrot.slane %v5570_v37, 9  ;;  %v6790_v20 = vld [vmem:[%s9520_s1 + $0x230] sm:$0xff]   ;;  %v5702_v63 = vld [vmem:[%s6875_s23 + $0x24] sm:$0xf] }
  0xd9   : > { %6475 = vmatmul.mubr.bf16.gmra.mxu0 %v5546_v0  ;;  %v5604_v15 = vcombine.low %v2918_v3, %v2921_v24  ;;  %v5605_v54 = vcombine.low %v2925_v48, %v2928_v23  ;;  %v6789_v28 = vld [vmem:[%s9520_s1 + $0x1f0] sm:$0xff]   ;;  %v6788_v48 = vld [vmem:[%s6875_s23 + $0x3c] sm:$0xff]   ;;  %v3802_v37 = vshrl.u32 %v5702_v63, 16  ;;  %v6791_v38 = vld [vmem:[%s6875_s23 + $0x48] sm:$0xff]   ;;  %v3811_v23 = vshll.u32 %v8349_v61, 16 }
  0xda   : > { %6542 = vmatprep.mubr.bf16.mxu0 %v6783_v8  ;;  %v9604_v8 = vld [vmem:[#allocation12_spill] sm:$0xff]  ;;  %v3010_v42 = vrot.slane %v3008_v2, 4  ;;  %v8313_v26 = vsel %vm7217_vm5, %v5585_v55, %v3008_v2  ;;  %v3017_v60 = vrot.slane %v3015_v36, 4  ;;  %v8326_v44 = vsel %vm7217_vm5, %v5586_v18, %v3015_v36  ;;  %v5699_v2 = vld [vmem:[%s6875_s23 + $0x18] sm:$0xf]  ;;  %v6794_v55 = vld [vmem:[%s9520_s1 + $0x228] sm:$0xff]  }
  0xdb   : > { %v3011_v0 = vrot.slane %v9604_v8, 5  ;;  %v3781_v24 = vshll.u32 %v5699_v2, 16  ;;  %v6793_v36 = vld [vmem:[%s9520_s1 + $0x1e8] sm:$0xff]   ;;  %v5701_v18 = vld [vmem:[%s6875_s23 + $0x20] sm:$0x1]  ;;  %v3804_v11 = vrot.slane %v3802_v37, 4 }
  0xdc   : > { %6427 = vmatmul.mubr.bf16.gmra.mxu1 %v6780_v45  ;;  %v6784_v45 = vld [vmem:[%s6875_s23 + $0x24] sm:$0xff]   ;;  %v8331_v8 = vsel %vm7217_vm5, %v3017_v60, %v3018_v14  ;;  %v3805_v14 = vshll.u32 %v5702_v63, 16  ;;  %v8369_v63 = vld [vmem:[%s6875_s23 + $0x2c] sm:$0x1]  ;;  %v3826_v37 = vshrl.u32 %v5705_v51, 16 }
  0xdd   : > { %6494 = vmatprep.mubr.bf16.mxu1 %v5603_v21  ;;  %v6787_v21 = vld [vmem:[%s6875_s23 + $0x30] sm:$0xff]   ;;  %v8317_v35 = vsel %vm7217_vm5, %v3010_v42, %v3011_v0  ;;  %v8334_v0 = vld [vmem:[%s6875_s23 + $0x1c] sm:$0xf]  ;;  %v3778_v42 = vshrl.u32 %v5699_v2, 16 }
  0xde   : > { %v4549_v3 = vrot.slane %v8334_v0, 5  ;;  %v3807_v47 = vrot.slane %v3805_v14, 5 }
  0xdf   : > { %v3780_v60 = vrot.slane %v3778_v42, 4  ;;  %v6797_v42 = vld [vmem:[%s9520_s1 + $0x1e0] sm:$0xff]  }
  0xe1   : > { %6543 = vmatmul.mubr.bf16.vlgmr.msra.gmra.mxu0 %v6784_v45  ;;  %v3791_v45 = vshrl.u32 %v8334_v0, 16 }
  0xe2   : > { %6623 = vmatpush3.bf16.msra.mxu0 %v8045_v49  ;;  %6546 = vmatprep.mubr.bf16.mxu0 %v6787_v21  ;;  %v3787_v49 = vshll.u32 %v8334_v0, 16  ;;  %v3815_v21 = vshrl.u32 %v8349_v61, 16 }
  0xe3   : > { %6624 = vmatprep.subr.bf16.mxu0 %v6790_v20 }
  0xe4   : > { %6495 = vmatmul.mubr.bf16.vlgmr.msra.gmra.mxu1 %v5604_v15  ;;  %v5787_v15 = vld [vmem:[%s6875_s23 + $0x18] sm:$0xe]  ;;  %v8364_v2 = vrot.slane %v3787_v49, 5  ;;  %v3797_v49 = vshll.u32 %v5701_v18, 16  ;;  %v3817_v0 = vrot.slane %v3815_v21, 4 }
  0xe5   : > { %6575 = vmatpush3.bf16.msra.mxu1 %v8055_v33  ;;  %6498 = vmatprep.mubr.bf16.mxu1 %v5605_v54  ;;  %v6798_v33 = vld [vmem:[%s9520_s1 + $0x220] sm:$0xff]   ;;  %v3793_v54 = vrot.slane %v3791_v45, 4  ;;  %v8376_v45 = vrot.slane %v3811_v23, 5  ;;  %v6802_v23 = vld [vmem:[%s9520_s1 + $0x218] sm:$0xff]  }
  0xe6   : > { %6576 = vmatprep.subr.bf16.mxu1 %v6789_v28  ;;  %6625 = vmatpush3.bf16.msra.mxu0 %v6790_v20  ;;  %v3783_v20 = vrot.slane %v3781_v24, 5 }
  0xe7   : > { %6626 = vmatprep.subr.bf16.mxu0 %v6794_v55  ;;  %v3794_v21 = vor.u32 %v3793_v54, %v8364_v2  ;;  %v3818_v54 = vor.u32 %v3817_v0, %v8376_v45 }
  0xe9   : > { %6547 = vmatmul.mubr.bf16.gmra.mxu0 %v6788_v48  ;;  %6577 = vmatpush3.bf16.msra.mxu1 %v6789_v28  ;;  %v5803_v48 = vrot.slane %v5787_v15, 9  ;;  %v4552_v28 = vrot.slane %v5701_v18, 5  ;;  %v4551_v18 = vrot.slane %v4549_v3, 4  ;;  %v3821_v15 = vshll.u32 %v8369_v63, 16 }
  0xea   : > { %6550 = vmatprep.mubr.bf16.mxu0 %v6791_v38  ;;  %6578 = vmatprep.subr.bf16.mxu1 %v6793_v36  ;;  %v3829_v38 = vshll.u32 %v5705_v51, 16  ;;  %v4556_v51 = vrot.slane %v8349_v61, 5  ;;  %v3839_v61 = vshrl.u32 %v8379_v43, 16 }
  0xeb   : > { %6627 = vmatpush3.bf16.msra.mxu0 %v6794_v55  ;;  %v3784_v55 = vor.u32 %v3783_v20, %v3780_v60  ;;  %v6801_v60 = vld [vmem:[%s9520_s1 + $0x1d8] sm:$0xff]   ;;  %v8402_v20 = vrot.slane %v3797_v49, 5  ;;  %v6806_v49 = vld [vmem:[%s9520_s1 + $0x210] sm:$0xff]  }
  0xec   : > { %v8374_v24 = vpop.f32.mrf.mxu0  ;;  %6499 = vmatmul.mubr.bf16.gmra.mxu1 %v5606_v40  ;;  %6628 = vmatprep.subr.bf16.mxu0 %v6798_v33  ;;  %v8384_v14 = vpop.f32.mrf.mxu1  ;;  %v3808_v40 = vor.u32 %v3807_v47, %v3804_v11  ;;  %v3828_v47 = vrot.slane %v3826_v37, 4  ;;  %v3831_v11 = vrot.slane %v3829_v38, 5  ;;  %v8429_v37 = vld [vmem:[%s6875_s23 + $0x40] sm:$0xf]  ;;  %v4558_v50 = vrot.slane %v4556_v51, 4 }
  0xed   : > { %9609 = vst [vmem:[#allocation2_spill] sm:$0xff] %v8384_v14  ;;  %6502 = vmatprep.mubr.bf16.mxu1 %v5607_v41  ;;  %6579 = vmatpush3.bf16.msra.mxu1 %v6793_v36  ;;  %v8409_v41 = vsel %vm7217_vm5, %v5803_v48, %v4549_v3  ;;  %v5708_v36 = vld [vmem:[%s6875_s23 + $0x3c] sm:$0xf]  ;;  %v8418_v0 = vrot.slane %v3784_v55, 4  ;;  %v8424_v3 = vsel %vm7217_vm5, %v4551_v18, %v4552_v28  ;;  %v8426_v48 = vrot.slane %v3821_v15, 5  ;;  %v6805_v55 = vld [vmem:[%s9520_s1 + $0x1d0] sm:$0xff]  }
  0xee   : > { %v8395_v57 = vpop.f32.mrf.mxu0  ;;  %6580 = vmatprep.subr.bf16.mxu1 %v6797_v42  ;;  %v8413_v52 = vpop.f32.mrf.mxu1  ;;  %v8436_v22 = vrot.slane %v3808_v40, 4  ;;  %v4559_v28 = vrot.slane %v8369_v63, 5  ;;  %v3819_v18 = vrot.slane %v3818_v54, 4  ;;  %v8440_v15 = vld [vmem:[%s6875_s23 + $0x38] sm:$0x1]  ;;  %v3853_v30 = vshll.u32 %v5708_v36, 16 }
  0xef   : > { %6629 = vmatpush3.bf16.msra.mxu0 %v6798_v33  ;;  %9610 = vst [vmem:[#allocation5_spill] sm:$0xff] %v8413_v52  ;;  %v8420_v33 = vrot.slane %v3794_v21, 4  ;;  %v5804_v21 = vrot.slane %v5788_v6, 9  ;;  %v3832_v1 = vor.u32 %v3831_v11, %v3828_v47  ;;  %v8444_v52 = vrot.slane %v3839_v61, 4  ;;  %v5789_v40 = vld [vmem:[%s6875_s23 + $0x30] sm:$0xe] }
  0xf0   : > { %6630 = vmatprep.subr.bf16.mxu0 %v6802_v23  ;;  %v8431_v38 = vpop.f32.mrf.mxu0  ;;  %v3859_v6 = vshll.u32 %v8429_v37, 16  ;;  %v3863_v63 = vshrl.u32 %v8429_v37, 16  ;;  %v8452_v54 = vpop.f32.mrf.mxu1  ;;  %v9613_v11 = vcombine.low %v8165_v31, %v8156_v19  ;;  %v6796_v61 = vld [vmem:[%s6875_s23 + $0x6c] sm:$0xff]   ;;  %v8485_v19 = vsel %vm7217_vm5, %v4558_v50, %v4559_v28  ;;  %v8503_v28 = vld [vmem:[%s6875_s23 + $0x44] sm:$0x1] }
  0xf1   : > { %6551 = vmatmul.mubr.bf16.gmra.mxu0 %v6792_v7  ;;  %6581 = vmatpush3.bf16.msra.mxu1 %v6797_v42  ;;  %v8442_v7 = vrot.slane %v3835_v39, 5  ;;  %v3850_v42 = vshrl.u32 %v5708_v36, 16  ;;  %9612 = vst [vmem:[#allocation4_spill] sm:$0xff] %v8452_v54  ;;  %v3790_v39 = vsel %vm6906_vm2, %v8418_v0, %v8364_v2  ;;  %v3800_v47 = vsel %vm6906_vm2, %v8420_v33, %v8402_v20  ;;  %v6799_v36 = vld [vmem:[%s6875_s23 + $0x78] sm:$0xff]   ;;  %v8496_v33 = vld [vmem:[%s6875_s23 + $0x4c] sm:$0xf] }
  0xf2   : > { %6554 = vmatprep.mubr.bf16.mxu0 %v6795_v62  ;;  %6582 = vmatprep.subr.bf16.mxu1 %v6801_v60  ;;  %v9611_v62 = vcombine.low %v8134_v10, %v8138_v59  ;;  %v4563_v59 = vrot.slane %v8379_v43, 5  ;;  %v3814_v2 = vsel %vm6906_vm2, %v8436_v22, %v8376_v45  ;;  %v8481_v20 = vsel %vm7217_vm5, %v5804_v21, %v4556_v51  ;;  %v5711_v43 = vld [vmem:[%s6875_s23 + $0x48] sm:$0xf]  ;;  %v8507_v54 = vpop.f32.mrf.mxu1  ;;  %v5790_v14 = vld [vmem:[%s6875_s23 + $0x3c] sm:$0xe] }
  0xf3   : > { %6631 = vmatpush3.bf16.msra.mxu0 %v6802_v23  ;;  %v6810_v23 = vld [vmem:[%s9520_s1 + $0x208] sm:$0xff]   ;;  %v3845_v31 = vshll.u32 %v8440_v15, 16  ;;  %v3824_v22 = vsel %vm6906_vm2, %v3819_v18, %v8426_v48  ;;  %v5805_v45 = vrot.slane %v5789_v40, 9  ;;  %v3852_v0 = vrot.slane %v3850_v42, 4  ;;  %9615 = vst [vmem:[#allocation6_spill] sm:$0xff] %v8507_v54  ;;  %v6813_v42 = vld [vmem:[%s9520_s1 + $0x1c0] sm:$0xff]  }
  0xf4   : > { %6503 = vmatmul.mubr.bf16.gmra.mxu1 %v9611_v62  ;;  %6632 = vmatprep.subr.bf16.mxu0 %v6806_v49  ;;  %v8473_v62 = vpop.f32.mrf.mxu0  ;;  %v3855_v51 = vrot.slane %v3853_v30, 5  ;;  %v8498_v50 = vrot.slane %v3832_v1, 4  ;;  %v3842_v21 = vor.u32 %v8444_v52, %v8442_v7  ;;  %v3865_v10 = vrot.slane %v3863_v63, 4  ;;  %v6814_v30 = vld [vmem:[%s9520_s1 + $0x200] sm:$0xff]  }
  0xf5   : > { %6506 = vmatprep.mubr.bf16.mxu1 %v9613_v11  ;;  %6583 = vmatpush3.bf16.msra.mxu1 %v6801_v60  ;;  %9614 = vst [vmem:[#allocation3_spill] sm:$0xff] %v8473_v62  ;;  %v6809_v60 = vld [vmem:[%s9520_s1 + $0x1c8] sm:$0xff]   ;;  %v8505_v11 = vrot.slane %v3859_v6, 5  ;;  %v4565_v48 = vrot.slane %v4563_v59, 4  ;;  %v3874_v1 = vshrl.u32 %v5711_v43, 16  ;;  %v3877_v18 = vshll.u32 %v5711_v43, 16 }
  0xf6   : > { %6584 = vmatprep.subr.bf16.mxu1 %v6805_v55  ;;  %v8518_v40 = vcombine.low %v3790_v39, %v3800_v47  ;;  %v3887_v63 = vshrl.u32 %v8496_v33, 16  ;;  %v8526_v43 = vrot.slane %v3845_v31, 5  ;;  %v3869_v54 = vshll.u32 %v8503_v28, 16  ;;  %v5714_v39 = vld [vmem:[%s6875_s23 + $0x54] sm:$0xf]  ;;  %v6800_v6 = vld [vmem:[%s6875_s23 + $0x84] sm:$0xff]  }
  0xf7   : > { %6633 = vmatpush3.bf16.msra.mxu0 %v6806_v49  ;;  %v4566_v49 = vrot.slane %v8440_v15, 5  ;;  %v8513_v52 = vpop.f32.mrf.mxu0  ;;  %v3883_v15 = vshll.u32 %v8496_v33, 16  ;;  %v4570_v31 = vrot.slane %v8429_v37, 5  ;;  %v9619_v37 = vcombine.low %v8189_v12, %v8193_v46  ;;  %v6803_v47 = vld [vmem:[%s6875_s23 + $0x90] sm:$0xff]  }
  0xf8   : > { %6634 = vmatprep.subr.bf16.mxu0 %v6810_v23  ;;  %9616 = vst [vmem:[#allocation7_spill] sm:$0xff] %v8513_v52 }
  0xf9   : > { %6555 = vmatmul.mubr.bf16.gmra.mxu0 %v6796_v61  ;;  %6585 = vmatpush3.bf16.msra.mxu1 %v6805_v55  ;;  %v8524_v61 = vcombine.low %v3814_v2, %v3824_v22  ;;  %v3856_v55 = vor.u32 %v3855_v51, %v3852_v0  ;;  %v3866_v2 = vor.u32 %v3865_v10, %v8505_v11  ;;  %v8542_v22 = vld [vmem:[%s6875_s23 + $0x58] sm:$0xf]  ;;  %v8549_v51 = vrot.slane %v3842_v21, 4 }
  0xfa   : > { %6558 = vmatprep.mubr.bf16.mxu0 %v6799_v36  ;;  %6586 = vmatprep.subr.bf16.mxu1 %v6809_v60  ;;  %v8537_v36 = vsel %vm7217_vm5, %v5805_v45, %v4563_v59  ;;  %v9617_v0 = vcombine.low %v8172_v16, %v8177_v53  ;;  %v8553_v59 = vsel %vm7217_vm5, %v4565_v48, %v4566_v49  ;;  %v3876_v45 = vrot.slane %v3874_v1, 4  ;;  %v8560_v16 = vpop.f32.mrf.mxu0  ;;  %v5713_v1 = vld [vmem:[%s6875_s23 + $0x50] sm:$0x1] }
  0xfb   : > { %6635 = vmatpush3.bf16.msra.mxu0 %v6810_v23  ;;  %v8547_v23 = vpop.f32.mrf.mxu1  ;;  %v3879_v10 = vrot.slane %v3877_v18, 5  ;;  %9620 = vst [vmem:[#allocation9_spill] sm:$0xff] %v8560_v16  ;;  %v5806_v53 = vrot.slane %v5790_v14, 9  ;;  %v3889_v21 = vrot.slane %v3887_v63, 4  ;;  %v3857_v48 = vrot.slane %v3856_v55, 4 }
  0xfc   : > { %6507 = vmatmul.mubr.bf16.gmra.mxu1 %v9617_v0  ;;  %9618 = vst [vmem:[#allocation8_spill] sm:$0xff] %v8547_v23  ;;  %6636 = vmatprep.subr.bf16.mxu0 %v6814_v30  ;;  %v8562_v0 = vrot.slane %v3883_v15, 5  ;;  %v3898_v23 = vshrl.u32 %v5714_v39, 16  ;;  %v3871_v49 = vrot.slane %v3869_v54, 5  ;;  %v3901_v18 = vshll.u32 %v5714_v39, 16  ;;  %v8578_v39 = vpop.f32.mrf.mxu0 }
  0xfd   : > { %6510 = vmatprep.mubr.bf16.mxu1 %v9619_v37  ;;  %6587 = vmatpush3.bf16.msra.mxu1 %v6809_v60  ;;  %v3907_v52 = vshll.u32 %v8542_v22, 16  ;;  %v3867_v12 = vrot.slane %v3866_v2, 4  ;;  %v4572_v46 = vrot.slane %v4570_v31, 4  ;;  %v4573_v37 = vrot.slane %v8503_v28, 5  ;;  %v8568_v60 = vpop.f32.mrf.mxu1  ;;  %v5717_v55 = vld [vmem:[%s6875_s23 + $0x60] sm:$0xf] }
  0xfe   : > { %6588 = vmatprep.subr.bf16.mxu1 %v6813_v42  ;;  %v3911_v14 = vshrl.u32 %v8542_v22, 16  ;;  %9621 = vst [vmem:[#allocation10_spill] sm:$0xff] %v8568_v60  ;;  %v3848_v15 = vsel %vm6906_vm2, %v8549_v51, %v8526_v43  ;;  %v3880_v63 = vor.u32 %v3879_v10, %v3876_v45  ;;  %v3890_v28 = vor.u32 %v3889_v21, %v8562_v0  ;;  %v5791_v60 = vld [vmem:[%s6875_s23 + $0x48] sm:$0xe] }
  0xff   : > { %6637 = vmatpush3.bf16.msra.mxu0 %v6814_v30  ;;  %v4577_v30 = vrot.slane %v8496_v33, 5  ;;  %v3893_v2 = vshll.u32 %v5713_v1, 16  ;;  %v3900_v16 = vrot.slane %v3898_v23, 4  ;;  %v3903_v62 = vrot.slane %v3901_v18, 5  ;;  %v8603_v10 = vpop.f32.mrf.mxu1 }
 0x100   : > { %v3862_v43 = vsel %vm6906_vm2, %v3857_v48, %v8505_v11  ;;  %v8587_v33 = vsel %vm7217_vm5, %v5806_v53, %v4570_v31  ;;  %v3872_v51 = vsel %vm6906_vm2, %v3867_v12, %v3871_v49  ;;  %v8595_v23 = vsel %vm7217_vm5, %v4572_v46, %v4573_v37  ;;  %9623 = vst [vmem:[#allocation11_spill] sm:$0xff] %v8603_v10  ;;  %v8606_v49 = vld [vmem:[%s6875_s23 + $0x64] sm:$0xf]  ;;  %v6804_v12 = vld [vmem:[%s6875_s23 + $0x9c] sm:$0xff]   ;;  %v8612_v46 = vpop.f32.mrf.mxu0 }
 0x101   : > { %6559 = vmatmul.mubr.bf16.gmra.mxu0 %v6800_v6  ;;  %6589 = vmatpush3.bf16.msra.mxu1 %v6813_v42  ;;  %v8589_v6 = vrot.slane %v3907_v52, 5  ;;  %v3913_v42 = vrot.slane %v3911_v14, 4  ;;  %v3922_v45 = vshrl.u32 %v5717_v55, 16  ;;  %v3925_v11 = vshll.u32 %v5717_v55, 16  ;;  %v6807_v55 = vld [vmem:[%s6875_s23 + $0xa8] sm:$0xff]  }
 0x102   : > { %6562 = vmatprep.mubr.bf16.mxu0 %v6803_v47  ;;  %v8598_v47 = vld [vmem:[%s6875_s23 + $0x5c] sm:$0x1]  ;;  %v9622_v31 = vcombine.low %v8205_v34, %v8214_v17  ;;  %v3881_v52 = vrot.slane %v3880_v63, 4  ;;  %v5807_v53 = vrot.slane %v5791_v60, 9  ;;  %v4579_v21 = vrot.slane %v4577_v30, 4 }
 0x103   : > { %v4580_v48 = vrot.slane %v5713_v1, 5  ;;  %v9624_v18 = vcombine.low %v8231_v32, %v8235_v58  ;;  %v3891_v37 = vrot.slane %v3890_v28, 4  ;;  %v3895_v14 = vrot.slane %v3893_v2, 5  ;;  %v5792_v63 = vld [vmem:[%s6875_s23 + $0x54] sm:$0xe]  ;;  %v8630_v28 = vpop.f32.mrf.mxu1 }
 0x104   : > { %6511 = vmatmul.mubr.bf16.gmra.mxu1 %v9622_v31  ;;  %v3904_v34 = vor.u32 %v3903_v62, %v3900_v16  ;;  %v4584_v17 = vrot.slane %v8542_v22, 5  ;;  %v3914_v60 = vor.u32 %v3913_v42, %v8589_v6  ;;  %v3917_v1 = vshll.u32 %v8598_v47, 16  ;;  %9626 = vst [vmem:[#allocation12_spill] sm:$0xff] %v8630_v28  ;;  %v5793_v62 = vld [vmem:[%s6875_s23 + $0x60] sm:$0xe] }
 0x105   : > { %6514 = vmatprep.mubr.bf16.mxu1 %v9624_v18  ;;  %v3924_v31 = vrot.slane %v3922_v45, 4  ;;  %v3927_v54 = vrot.slane %v3925_v11, 5  ;;  %v9625_v32 = vsel %vm6906_vm2, %v8498_v50, %v8442_v7  ;;  %v3931_v22 = vshll.u32 %v8606_v49, 16 }
 0x106   : > { %v8624_v58 = vcombine.low %v9625_v32, %v3848_v15  ;;  %v3935_v16 = vshrl.u32 %v8606_v49, 16  ;;  %v8632_v2 = vcombine.low %v3862_v43, %v3872_v51  ;;  %v3886_v42 = vsel %vm6906_vm2, %v3881_v52, %v8562_v0  ;;  %v5720_v15 = vld [vmem:[%s6875_s23 + $0x6c] sm:$0xf]  ;;  %v8650_v32 = vld [vmem:[%s6875_s23 + $0x70] sm:$0xf] }
 0x107   : > { %v8639_v7 = vsel %vm7217_vm5, %v5807_v53, %v4577_v30  ;;  %v8643_v50 = vsel %vm7217_vm5, %v4579_v21, %v4580_v48  ;;  %v8646_v45 = vpop.f32.mrf.mxu0  ;;  %v3905_v43 = vrot.slane %v3904_v34, 4  ;;  %v5808_v51 = vrot.slane %v5792_v63, 9  ;;  %v5719_v53 = vld [vmem:[%s6875_s23 + $0x68] sm:$0x1] }
 0x108   : > { %9627 = vst [vmem:[#allocation13_spill] sm:$0xff] %v8646_v45  ;;  %v4586_v11 = vrot.slane %v4584_v17, 4  ;;  %v4587_v18 = vrot.slane %v8598_v47, 5  ;;  %v3896_v0 = vsel %vm6906_vm2, %v3891_v37, %v3895_v14  ;;  %v3915_v30 = vrot.slane %v3914_v60, 4  ;;  %v5795_v45 = vld [vmem:[%s6875_s23 + $0x78] sm:$0xe] }
 0x109   : > { %6563 = vmatmul.mubr.bf16.gmra.mxu0 %v6804_v12  ;;  %v3919_v52 = vrot.slane %v3917_v1, 5  ;;  %v3928_v21 = vor.u32 %v3927_v54, %v3924_v31  ;;  %v8655_v48 = vrot.slane %v3931_v22, 5  ;;  %v3937_v12 = vrot.slane %v3935_v16, 4  ;;  %v6808_v31 = vld [vmem:[%s6875_s23 + $0xb4] sm:$0xff]  }
 0x10a   : > { %6566 = vmatprep.mubr.bf16.mxu0 %v6807_v55  ;;  %v3946_v34 = vshrl.u32 %v5720_v15, 16  ;;  %v3949_v63 = vshll.u32 %v5720_v15, 16  ;;  %v9628_v47 = vcombine.low %v8251_v5, %v8256_v25  ;;  %v4591_v14 = vrot.slane %v8606_v49, 5  ;;  %v8672_v5 = vpop.f32.mrf.mxu0 }
 0x10b   : > { %v3955_v54 = vshll.u32 %v8650_v32, 16  ;;  %v3959_v60 = vshrl.u32 %v8650_v32, 16  ;;  %v9630_v1 = vcombine.low %v8269_v9, %v8263_v29  ;;  %9631 = vst [vmem:[#allocation15_spill] sm:$0xff] %v8672_v5  ;;  %v8674_v25 = vcombine.low %v3886_v42, %v3896_v0  ;;  %v5723_v29 = vld [vmem:[%s6875_s23 + $0x78] sm:$0xf]  ;;  %v6811_v9 = vld [vmem:[%s6875_s23 + $0xc0] sm:$0xff]  }
 0x10c   : > { %6515 = vmatmul.mubr.bf16.gmra.mxu1 %v9628_v47  ;;  %v8661_v55 = vpop.f32.mrf.mxu1  ;;  %v3910_v22 = vsel %vm6906_vm2, %v3905_v43, %v8589_v6  ;;  %v8681_v49 = vsel %vm7217_vm5, %v5808_v51, %v4584_v17  ;;  %v8685_v16 = vsel %vm7217_vm5, %v4586_v11, %v4587_v18  ;;  %v3920_v15 = vsel %vm6906_vm2, %v3915_v30, %v3919_v52  ;;  %v8698_v43 = vld [vmem:[%s6875_s23 + $0x74] sm:$0x1]  ;;  %v8755_v5 = vld [vmem:[%s6875_s23 + $0x8c] sm:$0x1] }
 0x10d   : > { %9629 = vst [vmem:[#allocation14_spill] sm:$0xff] %v8661_v55  ;;  %6518 = vmatprep.mubr.bf16.mxu1 %v9630_v1  ;;  %v8691_v47 = vrot.slane %v3928_v21, 4  ;;  %v3941_v42 = vshll.u32 %v5719_v53, 16  ;;  %v5809_v0 = vrot.slane %v5793_v62, 9  ;;  %v8694_v1 = vld [vmem:[%s6875_s23 + $0x7c] sm:$0xf]  ;;  %v3938_v6 = vor.u32 %v3937_v12, %v8655_v48  ;;  %v8704_v21 = vpop.f32.mrf.mxu0 }
 0x10e   : > { %v4594_v17 = vrot.slane %v5719_v53, 5  ;;  %v3948_v51 = vrot.slane %v3946_v34, 4  ;;  %v3951_v11 = vrot.slane %v3949_v63, 5  ;;  %v8700_v18 = vpop.f32.mrf.mxu1  ;;  %v4593_v37 = vrot.slane %v4591_v14, 4  ;;  %9633 = vst [vmem:[#allocation17_spill] sm:$0xff] %v8704_v21 }
 0x10f   : > { %9632 = vst [vmem:[#allocation16_spill] sm:$0xff] %v8700_v18  ;;  %v8702_v55 = vrot.slane %v3955_v54, 5  ;;  %v3961_v30 = vrot.slane %v3959_v60, 4  ;;  %v3970_v52 = vshrl.u32 %v5723_v29, 16  ;;  %v5794_v53 = vld [vmem:[%s6875_s23 + $0x6c] sm:$0xe]  ;;  %v8711_v18 = vcombine.low %v3910_v22, %v3920_v15 }
 0x110   : > { %v3973_v12 = vshll.u32 %v5723_v29, 16  ;;  %v3979_v34 = vshll.u32 %v8694_v1, 16  ;;  %v3983_v63 = vshrl.u32 %v8694_v1, 16  ;;  %v8713_v54 = vrot.slane %v3941_v42, 5  ;;  %v5726_v62 = vld [vmem:[%s6875_s23 + $0x84] sm:$0xf]  ;;  %v8734_v42 = vpop.f32.mrf.mxu1 }
 0x111   : > { %6567 = vmatmul.mubr.bf16.gmra.mxu0 %v6808_v31  ;;  %9634 = vst [vmem:[#allocation18_spill] sm:$0xff] %v8711_v18  ;;  %v8717_v60 = vsel %vm7217_vm5, %v5809_v0, %v4591_v14  ;;  %v3965_v31 = vshll.u32 %v8698_v43, 16  ;;  %v8725_v28 = vrot.slane %v3938_v6, 4  ;;  %v4598_v22 = vrot.slane %v8650_v32, 5  ;;  %v8729_v15 = vld [vmem:[%s6875_s23 + $0x88] sm:$0xf] }
 0x112   : > { %6570 = vmatprep.mubr.bf16.mxu0 %v6811_v9  ;;  %v3952_v9 = vor.u32 %v3951_v11, %v3948_v51  ;;  %v9635_v14 = vcombine.low %v8278_v4, %v8282_v13  ;;  %9636 = vst [vmem:[#allocation19_spill] sm:$0xff] %v8734_v42  ;;  %v6812_v0 = vld [vmem:[%s6875_s23 + $0xcc] sm:$0xff]   ;;  %v8739_v10 = vsel %vm7217_vm5, %v4593_v37, %v4594_v17  ;;  %v5810_v6 = vrot.slane %v5794_v53, 9  ;;  %v8742_v11 = vpop.f32.mrf.mxu0  ;;  %v8748_v4 = vld [vmem:[%s6875_s23 + $0x80] sm:$0x1] }
 0x113   : > { %v3962_v29 = vor.u32 %v3961_v30, %v8702_v55  ;;  %v3972_v51 = vrot.slane %v3970_v52, 4  ;;  %9637 = vst [vmem:[#allocation20_spill] sm:$0xff] %v8742_v11  ;;  %v9638_v32 = vcombine.low %v8313_v26, %v8317_v35  ;;  %v3975_v13 = vrot.slane %v3973_v12, 5 }
 0x114   : > { %6519 = vmatmul.mubr.bf16.gmra.mxu1 %v9635_v14  ;;  %v8750_v14 = vrot.slane %v3979_v34, 5  ;;  %v3985_v42 = vrot.slane %v3983_v63, 4  ;;  %v3994_v21 = vshrl.u32 %v5726_v62, 16  ;;  %v3967_v37 = vrot.slane %v3965_v31, 5 }
 0x115   : > { %6522 = vmatprep.mubr.bf16.mxu1 %v9638_v32  ;;  %v4601_v17 = vrot.slane %v8698_v43, 5  ;;  %v3997_v30 = vshll.u32 %v5726_v62, 16  ;;  %v4003_v52 = vshll.u32 %v8729_v15, 16  ;;  %v3953_v53 = vrot.slane %v3952_v9, 4  ;;  %v8758_v32 = vpop.f32.mrf.mxu1 }
 0x116   : > { %v4600_v11 = vrot.slane %v4598_v22, 4  ;;  %v3996_v26 = vrot.slane %v3994_v21, 4  ;;  %v4007_v35 = vshrl.u32 %v8729_v15, 16  ;;  %v3963_v12 = vrot.slane %v3962_v29, 4 }
 0x117   : > { %v3989_v34 = vshll.u32 %v8748_v4, 16  ;;  %v3999_v63 = vrot.slane %v3997_v30, 5  ;;  %v8761_v31 = vrot.slane %v4003_v52, 5  ;;  %v3976_v62 = vor.u32 %v3975_v13, %v3972_v51  ;;  %v5796_v52 = vld [vmem:[%s6875_s23 + $0x84] sm:$0xe] }
 0x118   : > { %v8763_v43 = vpop.f32.mrf.mxu0  ;;  %v3986_v9 = vor.u32 %v3985_v42, %v8750_v14  ;;  %v4605_v21 = vrot.slane %v8694_v1, 5  ;;  %v4009_v18 = vrot.slane %v4007_v35, 4  ;;  %v9639_v29 = vcombine.low %v8409_v41, %v8424_v3 }
 0x119   : > { %6571 = vmatmul.mubr.bf16.gmra.mxu0 %v6812_v0  ;;  %v3944_v30 = vsel %vm6906_vm2, %v8725_v28, %v8713_v54  ;;  %v8779_v51 = vsel %vm7217_vm5, %v5810_v6, %v4598_v22  ;;  %v4013_v42 = vshll.u32 %v8755_v5, 16  ;;  %v3958_v41 = vsel %vm6906_vm2, %v3953_v53, %v8702_v55  ;;  %v5729_v54 = vld [vmem:[%s6875_s23 + $0x90] sm:$0xf] }
 0x11a   : > { %6638 = vmatprep.mubr.bf16.mxu0 %v9639_v29  ;;  %v8782_v1 = vpop.f32.mrf.mxu0  ;;  %v4000_v3 = vor.u32 %v3999_v63, %v3996_v26  ;;  %v4010_v13 = vor.u32 %v4009_v18, %v8761_v31  ;;  %v4612_v28 = vrot.slane %v8729_v15, 5  ;;  %v9641_v22 = vcombine.low %v8326_v44, %v8331_v8 }
 0x11b   : > { %v3968_v6 = vsel %vm6906_vm2, %v3963_v12, %v3967_v37  ;;  %v8800_v55 = vsel %vm7217_vm5, %v4600_v11, %v4601_v17  ;;  %v3991_v53 = vrot.slane %v3989_v34, 5  ;;  %v5811_v18 = vrot.slane %v5795_v45, 9  ;;  %v8809_v12 = vld [vmem:[%s6875_s23 + $0x94] sm:$0xf] }
 0x11c   : > { %v8791_v35 = vpop.f32.mrf.mxu1  ;;  %6523 = vmatmul.mubr.bf16.gmra.mxu1 %v9641_v22  ;;  %v8802_v26 = vpop.f32.mrf.mxu0  ;;  %v3977_v15 = vrot.slane %v3976_v62, 4  ;;  %v3987_v63 = vrot.slane %v3986_v9, 4  ;;  %v4607_v29 = vrot.slane %v4605_v21, 4  ;;  %v4608_v0 = vrot.slane %v8748_v4, 5 }
 0x11d   : > { %9640 = vst [vmem:[#allocation21_spill] sm:$0xff] %v8791_v35  ;;  %6590 = vmatprep.mubr.bf16.mxu1 %v8518_v40  ;;  %v4015_v8 = vrot.slane %v4013_v42, 5  ;;  %v5812_v37 = vrot.slane %v5796_v52, 9  ;;  %v4018_v11 = vshrl.u32 %v5729_v54, 16  ;;  %v4021_v17 = vshll.u32 %v5729_v54, 16 }
 0x11e   : > { %v8806_v44 = vpop.f32.mrf.mxu1  ;;  %v8811_v34 = vpop.f32.mrf.mxu0  ;;  %v4001_v45 = vrot.slane %v4000_v3, 4  ;;  %v4011_v22 = vrot.slane %v4010_v13, 4  ;;  %v4614_v40 = vrot.slane %v4612_v28, 4  ;;  %v4615_v62 = vrot.slane %v8755_v5, 5  ;;  %v8832_v54 = vld [vmem:[%s6875_s23 + $0x98] sm:$0x1] }
 0x11f   : > { %9642 = vst [vmem:[#allocation22_spill] sm:$0xff] %v8806_v44  ;;  %v9644_v4 = vsel %vm6906_vm2, %v8691_v47, %v8655_v48  ;;  %v8823_v52 = vcombine.low %v3958_v41, %v3968_v6  ;;  %v8829_v13 = vsel %vm7217_vm5, %v5811_v18, %v4605_v21  ;;  %v3982_v48 = vsel %vm6906_vm2, %v3977_v15, %v8750_v14  ;;  %v5732_v41 = vld [vmem:[%s6875_s23 + $0x9c] sm:$0xf]  ;;  %v8849_v6 = vld [vmem:[%s6875_s23 + $0xa0] sm:$0xf] }
 0x120   : > { %v8814_v9 = vpop.f32.mrf.mxu1  ;;  %v8821_v42 = vcombine.low %v9644_v4, %v3944_v30  ;;  %v6352_v5 = vpop.f32.mrf.mxu0  ;;  %v3992_v47 = vsel %vm6906_vm2, %v3987_v63, %v3991_v53  ;;  %v8844_v30 = vsel %vm7217_vm5, %v4607_v29, %v4608_v0  ;;  %v4027_v21 = vshll.u32 %v8809_v12, 16  ;;  %v8936_v35 = vld [vmem:[%s6875_s23 + $0xb0] sm:$0x1] }
 0x121   : > { %9643 = vst [vmem:[#allocation23_spill] sm:$0xff] %v8814_v9  ;;  %v9645_v9 = vcombine.low %v8481_v20, %v8485_v19  ;;  %v9647_v20 = vcombine.low %v8537_v36, %v8553_v59  ;;  %v8858_v19 = vsel %vm7217_vm5, %v5812_v37, %v4612_v28  ;;  %v4020_v14 = vrot.slane %v4018_v11, 4  ;;  %v8873_v37 = vld [vmem:[%s6875_s23 + $0x90] sm:$0xe] }
 0x122   : > { %v8851_v18 = vpop.f32.mrf.mxu1  ;;  %v4023_v53 = vrot.slane %v4021_v17, 5  ;;  %v4031_v0 = vshrl.u32 %v8809_v12, 16  ;;  %v1544_v15 = vpop.f32.mrf.mxu0  ;;  %v4006_v63 = vsel %vm6906_vm2, %v4001_v45, %v8761_v31  ;;  %v4016_v29 = vsel %vm6906_vm2, %v4011_v22, %v4015_v8 }
 0x123   : > { %6639 = vmatmul.mubr.bf16.vlgmr.msra.gmra.mxu0 %v9645_v9  ;;  %9646 = vst [vmem:[#allocation24_spill] sm:$0xff] %v8851_v18  ;;  %v8868_v36 = vsel %vm7217_vm5, %v4614_v40, %v4615_v62  ;;  %v4037_v59 = vshll.u32 %v8832_v54, 16  ;;  %v4042_v11 = vshrl.u32 %v5732_v41, 16  ;;  %v4045_v17 = vshll.u32 %v5732_v41, 16 }
 0x124   : > { %6642 = vmatprep.mubr.bf16.mxu0 %v9647_v20  ;;  %v6304_v28 = vpop.f32.mrf.mxu1  ;;  %6591 = vmatmul.mubr.bf16.vlgmr.msra.gmra.mxu1 %v8524_v61  ;;  %v4051_v9 = vshll.u32 %v8849_v6, 16  ;;  %v4055_v31 = vshrl.u32 %v8849_v6, 16  ;;  %v6353_v45 = vpop.f32.mrf.mxu0  ;;  %v8879_v22 = vcombine.low %v3982_v48, %v3992_v47  ;;  %v8883_v40 = vrot.slane %v4027_v21, 5  ;;  %v8897_v61 = vld [vmem:[%s6875_s23 + $0xa4] sm:$0x1] }
 0x125   : > { %v1100_v8 = vadd.f32 %v6304_v28, %v8374_v24  ;;  %6594 = vmatprep.mubr.bf16.mxu1 %v8624_v58  ;;  %v8885_v4 = vcombine.low %v4006_v63, %v4016_v29  ;;  %v4024_v20 = vor.u32 %v4023_v53, %v4020_v14  ;;  %v4033_v24 = vrot.slane %v4031_v0, 4  ;;  %v5735_v28 = vld [vmem:[%s6875_s23 + $0xa8] sm:$0xf]  ;;  %v8902_v14 = vld [vmem:[%s6875_s23 + $0xac] sm:$0xf] }
 0x126   : > { %v1091_v62 = vpop.f32.mrf.mxu1  ;;  %v1547_v48 = vpop.f32.mrf.mxu0  ;;  %v8893_v47 = vrot.slane %v4037_v59, 5  ;;  %v5813_v21 = vrot.slane %v8873_v37, 9  ;;  %v4044_v29 = vrot.slane %v4042_v11, 4  ;;  %v4047_v18 = vrot.slane %v4045_v17, 5 }
 0x127   : > { %v8890_v3 = vadd.f32 %v6352_v5, %v1100_v8  ;;  %v1092_v58 = vadd.f32 %v1091_v62, %v8395_v57  ;;  %v8899_v44 = vrot.slane %v4051_v9, 5  ;;  %v4057_v41 = vrot.slane %v4055_v31, 4  ;;  %v9653_v62 = vld [vmem:[#allocation3_spill] sm:$0xff] }
 0x128   : > { %v6305_v63 = vpop.f32.mrf.mxu1  ;;  %v6356_v5 = vpop.f32.mrf.mxu0  ;;  %v9650_v0 = vcombine.low %v8587_v33, %v8595_v23  ;;  %v4066_v59 = vshrl.u32 %v5735_v28, 16  ;;  %v4069_v37 = vshll.u32 %v5735_v28, 16  ;;  %v9651_v11 = vcombine.low %v8639_v7, %v8643_v50 }
 0x129   : > { %9648 = vst [vmem:[#allocation25_spill] sm:$0xff] %v8890_v3  ;;  %v8904_v53 = vadd.f32 %v1544_v15, %v1092_v58  ;;  %v1103_v57 = vadd.f32 %v6305_v63, %v8431_v38  ;;  %v8913_v17 = vrot.slane %v4024_v20, 4  ;;  %v4034_v15 = vor.u32 %v4033_v24, %v8883_v40  ;;  %v5798_v58 = vld [vmem:[%s6875_s23 + $0x9c] sm:$0xe] }
 0x12a   : > { %v1094_v8 = vpop.f32.mrf.mxu1  ;;  %v4619_v9 = vrot.slane %v8809_v12, 5  ;;  %v4061_v38 = vshll.u32 %v8897_v61, 16  ;;  %v1560_v23 = vpop.f32.mrf.mxu0  ;;  %v4622_v28 = vrot.slane %v8832_v54, 5  ;;  %v4075_v63 = vshll.u32 %v8902_v14, 16 }
 0x12b   : > { %9649 = vst [vmem:[#allocation26_spill] sm:$0xff] %v8904_v53  ;;  %6643 = vmatmul.mubr.bf16.gmra.mxu0 %v9650_v0  ;;  %v8918_v31 = vadd.f32 %v6353_v45, %v1103_v57  ;;  %v1095_v33 = vadd.f32 %v1094_v8, %v9653_v62  ;;  %v4048_v50 = vor.u32 %v4047_v18, %v4044_v29  ;;  %v4626_v12 = vrot.slane %v8849_v6, 5  ;;  %v9654_v57 = vld [vmem:[#allocation7_spill] sm:$0xff]  ;;  %v9655_v6 = vld [vmem:[#allocation9_spill] sm:$0xff] }
 0x12c   : > { %6646 = vmatprep.mubr.bf16.mxu0 %v9651_v11  ;;  %v6308_v7 = vpop.f32.mrf.mxu1  ;;  %6595 = vmatmul.mubr.bf16.gmra.mxu1 %v8632_v2  ;;  %v4058_v20 = vor.u32 %v4057_v41, %v8899_v44  ;;  %v4079_v45 = vshrl.u32 %v8902_v14, 16  ;;  %v6357_v8 = vpop.f32.mrf.mxu0  ;;  %v4068_v54 = vrot.slane %v4066_v59, 4  ;;  %v4071_v11 = vrot.slane %v4069_v37, 5 }
 0x12d   : > { %9652 = vst [vmem:[#allocation27_spill] sm:$0xff] %v8918_v31  ;;  %v8928_v24 = vadd.f32 %v1547_v48, %v1095_v33  ;;  %v1116_v0 = vadd.f32 %v6308_v7, %v9654_v57  ;;  %6598 = vmatprep.mubr.bf16.mxu1 %v8674_v25  ;;  %v4035_v31 = vrot.slane %v4034_v15, 4  ;;  %v4621_v2 = vrot.slane %v4619_v9, 4 }
 0x12e   : > { %v1107_v62 = vpop.f32.mrf.mxu1  ;;  %v4063_v18 = vrot.slane %v4061_v38, 5  ;;  %v5814_v29 = vrot.slane %v5798_v58, 9  ;;  %v1563_v3 = vpop.f32.mrf.mxu0  ;;  %v8938_v48 = vrot.slane %v4075_v63, 5  ;;  %v4081_v33 = vrot.slane %v4079_v45, 4 }
 0x12f   : > { %v8932_v41 = vadd.f32 %v6356_v5, %v1116_v0  ;;  %v1108_v53 = vadd.f32 %v1107_v62, %v9655_v6  ;;  %v4049_v57 = vrot.slane %v4048_v50, 4  ;;  %v4059_v25 = vrot.slane %v4058_v20, 4 }
 0x130   : > { %v6309_v7 = vpop.f32.mrf.mxu1  ;;  %v4628_v59 = vrot.slane %v4626_v12, 4  ;;  %v4629_v37 = vrot.slane %v8897_v61, 5  ;;  %v6360_v38 = vpop.f32.mrf.mxu0  ;;  %v9656_v58 = vcombine.low %v8681_v49, %v8685_v16  ;;  %v8949_v63 = vsel %vm7217_vm5, %v5813_v21, %v4619_v9  ;;  %v5799_v21 = vld [vmem:[%s6875_s23 + $0xa8] sm:$0xe] }
 0x131   : > { %v8941_v15 = vadd.f32 %v1560_v23, %v1108_v53  ;;  %v1119_v5 = vadd.f32 %v6309_v7, %v8578_v39  ;;  %v4072_v50 = vor.u32 %v4071_v11, %v4068_v54  ;;  %v9657_v20 = vcombine.low %v8717_v60, %v8739_v10 }
 0x132   : > { %v1110_v45 = vpop.f32.mrf.mxu1  ;;  %v4030_v39 = vsel %vm6906_vm2, %v8913_v17, %v8883_v40  ;;  %v4040_v49 = vsel %vm6906_vm2, %v4035_v31, %v8893_v47  ;;  %v8963_v16 = vsel %vm7217_vm5, %v4621_v2, %v4622_v28  ;;  %v4085_v61 = vshll.u32 %v8936_v35, 16  ;;  %v1576_v60 = vpop.f32.mrf.mxu0  ;;  %v5738_v17 = vld [vmem:[%s6875_s23 + $0xb4] sm:$0xf]  ;;  %v9658_v47 = vld [vmem:[#allocation18_spill] sm:$0xff]  ;;  %v8992_v2 = vld [vmem:[%s6875_s23 + $0xb8] sm:$0xf] }
 0x133   : > { %6647 = vmatmul.mubr.bf16.gmra.mxu0 %v9656_v58  ;;  %v8967_v53 = vadd.f32 %v6357_v8, %v1119_v5  ;;  %v1111_v10 = vadd.f32 %v1110_v45, %v8612_v46  ;;  %v4082_v9 = vor.u32 %v4081_v33, %v8938_v48  ;;  %v4633_v40 = vrot.slane %v8902_v14, 5  ;;  %v9659_v8 = vld [vmem:[#allocation13_spill] sm:$0xff] }
 0x134   : > { %6650 = vmatprep.mubr.bf16.mxu0 %v9657_v20  ;;  %v6312_v23 = vpop.f32.mrf.mxu1  ;;  %6599 = vmatmul.mubr.bf16.gmra.mxu1 %v9658_v47  ;;  %v4054_v31 = vsel %vm6906_vm2, %v4049_v57, %v8899_v44  ;;  %v4064_v28 = vsel %vm6906_vm2, %v4059_v25, %v4063_v18  ;;  %v8981_v46 = vsel %vm7217_vm5, %v5814_v29, %v4626_v12  ;;  %v6361_v11 = vpop.f32.mrf.mxu0  ;;  %v4073_v62 = vrot.slane %v4072_v50, 4  ;;  %v9660_v57 = vld [vmem:[#allocation15_spill] sm:$0xff]  ;;  %v9664_v47 = vld [vmem:[#allocation20_spill] sm:$0xff] }
 0x135   : > { %v8985_v0 = vsel %vm7217_vm5, %v4628_v59, %v4629_v37  ;;  %v8987_v14 = vadd.f32 %v1563_v3, %v1111_v10  ;;  %v1132_v54 = vadd.f32 %v6312_v23, %v9659_v8  ;;  %6602 = vmatprep.mubr.bf16.mxu1 %v8821_v42  ;;  %v5815_v44 = vrot.slane %v5799_v21, 9 }
 0x136   : > { %v1123_v18 = vpop.f32.mrf.mxu1  ;;  %v4087_v6 = vrot.slane %v4085_v61, 5  ;;  %v4636_v12 = vrot.slane %v8936_v35, 5  ;;  %v4090_v29 = vshrl.u32 %v5738_v17, 16  ;;  %v4093_v33 = vshll.u32 %v5738_v17, 16  ;;  %v1579_v25 = vpop.f32.mrf.mxu0 }
 0x137   : > { %v8995_v7 = vadd.f32 %v6360_v38, %v1132_v54  ;;  %v1124_v3 = vadd.f32 %v1123_v18, %v9660_v57  ;;  %v4083_v59 = vrot.slane %v4082_v9, 4  ;;  %v4635_v37 = vrot.slane %v4633_v40, 4  ;;  %v9661_v38 = vld [vmem:[#allocation17_spill] sm:$0xff] }
 0x138   : > { %v6313_v42 = vpop.f32.mrf.mxu1  ;;  %v8998_v5 = vcombine.low %v4030_v39, %v4040_v49  ;;  %v5845_v58 = vcombine.low %v8949_v63, %v8963_v16  ;;  %v9002_v50 = vcombine.low %v4054_v31, %v4064_v28  ;;  %v4099_v35 = vshll.u32 %v8992_v2, 16  ;;  %v6364_v61 = vpop.f32.mrf.mxu0  ;;  %v5741_v49 = vld [vmem:[%s6875_s23 + $0xc0] sm:$0xf]  ;;  %v9016_v16 = vld [vmem:[%s6875_s23 + $0xc4] sm:$0xf] }
 0x139   : > { %v9005_v45 = vadd.f32 %v1576_v60, %v1124_v3  ;;  %v1135_v20 = vadd.f32 %v6313_v42, %v9661_v38  ;;  %v9662_v21 = vcombine.low %v8779_v51, %v8800_v55  ;;  %v5846_v39 = vcombine.low %v8981_v46, %v8985_v0  ;;  %v9669_v46 = vld [vmem:[#allocation6_spill] sm:$0xff] }
 0x13a   : > { %v4103_v63 = vshrl.u32 %v8992_v2, 16  ;;  %v1126_v10 = vpop.f32.mrf.mxu1  ;;  %v9663_v60 = vcombine.low %v8829_v13, %v8844_v30  ;;  %v4078_v51 = vsel %vm6906_vm2, %v4073_v62, %v8938_v48  ;;  %v9026_v55 = vsel %vm7217_vm5, %v5815_v44, %v4633_v40  ;;  %v1592_v28 = vpop.f32.mrf.mxu0  ;;  %v9038_v30 = vld [vmem:[%s6875_s23 + $0xbc] sm:$0x1]  ;;  %v5800_v48 = vld [vmem:[%s6875_s23 + $0xb4] sm:$0xe] }
 0x13b   : > { %6651 = vmatmul.mubr.bf16.gmra.mxu0 %v9662_v21  ;;  %v4092_v9 = vrot.slane %v4090_v29, 4  ;;  %v4095_v17 = vrot.slane %v4093_v33, 5  ;;  %v9028_v23 = vadd.f32 %v6361_v11, %v1135_v20  ;;  %v1127_v31 = vadd.f32 %v1126_v10, %v9664_v47  ;;  %v9060_v20 = vld [vmem:[%s6875_s23 + $0xc8] sm:$0x1] }
 0x13c   : > { %6654 = vmatprep.mubr.bf16.mxu0 %v9663_v60  ;;  %v4088_v8 = vsel %vm6906_vm2, %v4083_v59, %v4087_v6  ;;  %v9035_v13 = vsel %vm7217_vm5, %v4635_v37, %v4636_v12  ;;  %v6316_v54 = vpop.f32.mrf.mxu1  ;;  %6603 = vmatmul.mubr.bf16.gmra.mxu1 %v8823_v52  ;;  %v9042_v40 = vrot.slane %v4099_v35, 5  ;;  %v4114_v11 = vshrl.u32 %v5741_v49, 16  ;;  %v6365_v29 = vpop.f32.mrf.mxu0 }
 0x13d   : > { %v4117_v62 = vshll.u32 %v5741_v49, 16  ;;  %v4123_v44 = vshll.u32 %v9016_v16, 16  ;;  %v9045_v18 = vadd.f32 %v1579_v25, %v1127_v31  ;;  %v1148_v6 = vadd.f32 %v6316_v54, %v8763_v43  ;;  %6606 = vmatprep.mubr.bf16.mxu1 %v8879_v22 }
 0x13e   : > { %v4105_v12 = vrot.slane %v4103_v63, 4  ;;  %v4127_v33 = vshrl.u32 %v9016_v16, 16  ;;  %v1139_v57 = vpop.f32.mrf.mxu1  ;;  %v4096_v3 = vor.u32 %v4095_v17, %v4092_v9  ;;  %v4109_v52 = vshll.u32 %v9038_v30, 16  ;;  %v1595_v43 = vpop.f32.mrf.mxu0  ;;  %v5744_v9 = vld [vmem:[%s6875_s23 + $0xcc] sm:$0xf] }
 0x13f   : > { %v5816_v59 = vrot.slane %v5800_v48, 9  ;;  %v4640_v37 = vrot.slane %v8992_v2, 5  ;;  %v9052_v42 = vadd.f32 %v6364_v61, %v1148_v6  ;;  %v1140_v25 = vadd.f32 %v1139_v57, %v8782_v1  ;;  %v5801_v48 = vld [vmem:[%s6875_s23 + $0xc0] sm:$0xe] }
 0x140   : > { %v9055_v35 = vcombine.low %v4078_v51, %v4088_v8  ;;  %v5847_v22 = vcombine.low %v9026_v55, %v9035_v13  ;;  %v6317_v38 = vpop.f32.mrf.mxu1  ;;  %v4116_v21 = vrot.slane %v4114_v11, 4  ;;  %v4119_v63 = vrot.slane %v4117_v62, 5  ;;  %v6368_v10 = vpop.f32.mrf.mxu0  ;;  %v9082_v8 = vld [vmem:[%s6875_s23 + $0xd0] sm:$0xf] }
 0x141   : > { %v9062_v49 = vrot.slane %v4123_v44, 5  ;;  %v4129_v2 = vrot.slane %v4127_v33, 4  ;;  %v9064_v61 = vadd.f32 %v1592_v28, %v1140_v25  ;;  %v1151_v1 = vadd.f32 %v6317_v38, %v8802_v26 }
 0x142   : > { %v9665_v60 = vcombine.low %v8858_v19, %v8868_v36  ;;  %v4106_v51 = vor.u32 %v4105_v12, %v9042_v40  ;;  %v4643_v55 = vrot.slane %v9038_v30, 5  ;;  %v1142_v17 = vpop.f32.mrf.mxu1  ;;  %v9073_v47 = vrot.slane %v4096_v3, 4  ;;  %v1608_v13 = vpop.f32.mrf.mxu0 }
 0x143   : > { %v9075_v31 = vrot.slane %v4109_v52, 5  ;;  %v9079_v26 = vsel %vm7217_vm5, %v5816_v59, %v4640_v37  ;;  %v4642_v28 = vrot.slane %v4640_v37, 4  ;;  %v9084_v19 = vadd.f32 %v6365_v29, %v1151_v1  ;;  %v9666_v29 = vld [vmem:[#allocation2_spill] sm:$0xff] }
 0x144   : > { %6655 = vmatmul.mubr.bf16.gmra.mxu0 %v9665_v60  ;;  %v1143_v36 = vadd.f32 %v1142_v17, %v8811_v34  ;;  %v4133_v30 = vshll.u32 %v9060_v20, 16  ;;  %v6320_v54 = vpop.f32.mrf.mxu1  ;;  %6607 = vmatmul.mubr.bf16.gmra.mxu1 %v8885_v4  ;;  %v4120_v11 = vor.u32 %v4119_v63, %v4116_v21  ;;  %v4130_v62 = vor.u32 %v4129_v2, %v9062_v49  ;;  %v6369_v57 = vpop.f32.mrf.mxu0 }
 0x145   : > { %6658 = vmatprep.mubr.bf16.mxu0 %v5845_v58  ;;  %v4647_v58 = vrot.slane %v9016_v16, 5  ;;  %v4138_v44 = vshrl.u32 %v5744_v9, 16  ;;  %v4141_v6 = vshll.u32 %v5744_v9, 16  ;;  %v1164_v33 = vadd.f32 %v6320_v54, %v9666_v29  ;;  %6610 = vmatprep.mubr.bf16.mxu1 %v8998_v5 }
 0x146   : > { %v9092_v12 = vadd.f32 %v1595_v43, %v1143_v36  ;;  %v4147_v34 = vshll.u32 %v9082_v8, 16  ;;  %v4151_v3 = vshrl.u32 %v9082_v8, 16  ;;  %v1155_v16 = vpop.f32.mrf.mxu1  ;;  %v4107_v52 = vrot.slane %v4106_v51, 4  ;;  %v9667_v43 = vld [vmem:[#allocation5_spill] sm:$0xff]  ;;  %v1611_v21 = vpop.f32.mrf.mxu0  ;;  %v9668_v36 = vld [vmem:[#allocation4_spill] sm:$0xff] }
 0x147   : > { %v4644_v4 = vsel %vm7217_vm5, %v4642_v28, %v4643_v55  ;;  %v5817_v59 = vrot.slane %v5801_v48, 9  ;;  %v4650_v37 = vrot.slane %v9060_v20, 5  ;;  %v9101_v25 = vadd.f32 %v6368_v10, %v1164_v33  ;;  %v5746_v20 = vld [vmem:[%s6875_s23 + $0xd4] sm:$0x1] }
 0x148   : > { %v1156_v38 = vadd.f32 %v1155_v16, %v9667_v43  ;;  %v4135_v63 = vrot.slane %v4133_v30, 5  ;;  %v4649_v5 = vrot.slane %v4647_v58, 4  ;;  %v6321_v2 = vpop.f32.mrf.mxu1  ;;  %v4121_v1 = vrot.slane %v4120_v11, 4 }
 0x149   : > { %v4131_v60 = vrot.slane %v4130_v62, 4  ;;  %v4140_v9 = vrot.slane %v4138_v44, 4  ;;  %v4143_v17 = vrot.slane %v4141_v6, 5  ;;  %v1167_v55 = vadd.f32 %v6321_v2, %v9668_v36  ;;  %v6372_v28 = vpop.f32.mrf.mxu0  ;;  %v5802_v6 = vld [vmem:[%s6875_s23 + $0xcc] sm:$0xe] }
 0x14a   : > { %v9104_v51 = vadd.f32 %v1608_v13, %v1156_v38  ;;  %v9111_v10 = vrot.slane %v4147_v34, 5  ;;  %v4153_v30 = vrot.slane %v4151_v3, 4  ;;  %v1158_v48 = vpop.f32.mrf.mxu1  ;;  %v4102_v13 = vsel %vm6906_vm2, %v9073_v47, %v9042_v40 }
 0x14b   : > { %v4112_v54 = vsel %vm6906_vm2, %v4107_v52, %v9075_v31  ;;  %v4654_v11 = vrot.slane %v9082_v8, 5  ;;  %v9121_v62 = vadd.f32 %v6369_v57, %v1167_v55  ;;  %v1159_v0 = vadd.f32 %v1158_v48, %v9669_v46  ;;  %v9670_v57 = vld [vmem:[#allocation8_spill] sm:$0xff] }
 0x14c   : > { %6659 = vmatmul.mubr.bf16.gmra.mxu0 %v5846_v39  ;;  %v1624_v39 = vpop.f32.mrf.mxu0  ;;  %v4648_v44 = vsel %vm7217_vm5, %v5817_v59, %v4647_v58  ;;  %v6324_v29 = vpop.f32.mrf.mxu1  ;;  %6611 = vmatmul.mubr.bf16.gmra.mxu1 %v9002_v50  ;;  %v5848_v40 = vcombine.low %v9079_v26, %v4644_v4  ;;  %v4126_v47 = vsel %vm6906_vm2, %v4121_v1, %v9062_v49  ;;  %v4157_v8 = vshll.u32 %v5746_v20, 16  ;;  %v9673_v48 = vld [vmem:[#allocation12_spill] sm:$0xff] }
 0x14d   : > { %6662 = vmatprep.mubr.bf16.mxu0 %v5847_v22  ;;  %v4651_v22 = vsel %vm7217_vm5, %v4649_v5, %v4650_v37  ;;  %v4144_v31 = vor.u32 %v4143_v17, %v4140_v9  ;;  %v9134_v33 = vadd.f32 %v1611_v21, %v1159_v0  ;;  %v1180_v34 = vadd.f32 %v6324_v29, %v9670_v57  ;;  %v9671_v37 = vld [vmem:[#allocation10_spill] sm:$0xff]  ;;  %v9672_v9 = vld [vmem:[#allocation11_spill] sm:$0xff] }
 0x14e   : > { %v6373_v58 = vpop.f32.mrf.mxu0  ;;  %6614 = vmatprep.mubr.bf16.mxu1 %v9055_v35  ;;  %v4136_v3 = vsel %vm6906_vm2, %v4131_v60, %v4135_v63  ;;  %v4154_v50 = vor.u32 %v4153_v30, %v9111_v10  ;;  %v1171_v16 = vpop.f32.mrf.mxu1  ;;  %v5849_v26 = vcombine.low %v4648_v44, %v4651_v22  ;;  %v5818_v52 = vrot.slane %v5802_v6, 9  ;;  %v9674_v44 = vld [vmem:[#allocation14_spill] sm:$0xff] }
 0x14f   : > { %v4656_v4 = vrot.slane %v4654_v11, 4  ;;  %v4657_v59 = vrot.slane %v5746_v20, 5  ;;  %v9141_v49 = vadd.f32 %v6372_v28, %v1180_v34  ;;  %v1172_v43 = vadd.f32 %v1171_v16, %v9671_v37  ;;  %v9677_v37 = vld [vmem:[#allocation21_spill] sm:$0xff] }
 0x150   : > { %v1627_v38 = vpop.f32.mrf.mxu0  ;;  %v6325_v21 = vpop.f32.mrf.mxu1  ;;  %v5776_v5 = vcombine.low %v4102_v13, %v4112_v54  ;;  %v5777_v2 = vcombine.low %v4126_v47, %v4136_v3  ;;  %v4145_v1 = vrot.slane %v4144_v31, 4  ;;  %v4155_v17 = vrot.slane %v4154_v50, 4  ;;  %v9675_v47 = vld [vmem:[#allocation16_spill] sm:$0xff] }
 0x151   : > { %v9144_v35 = vadd.f32 %v1624_v39, %v1172_v43  ;;  %v1183_v63 = vadd.f32 %v6325_v21, %v9672_v9  ;;  %v4159_v36 = vrot.slane %v4157_v8, 5  ;;  %v4655_v28 = vsel %vm7217_vm5, %v5818_v52, %v4654_v11 }
 0x152   : > { %v6376_v60 = vpop.f32.mrf.mxu0  ;;  %v1174_v55 = vpop.f32.mrf.mxu1  ;;  %v4658_v20 = vsel %vm7217_vm5, %v4656_v4, %v4657_v59  ;;  %v4150_v0 = vsel %vm6906_vm2, %v4145_v1, %v9111_v10  ;;  %v9676_v10 = vld [vmem:[#allocation19_spill] sm:$0xff] }
 0x153   : > { %v9151_v30 = vadd.f32 %v6373_v58, %v1183_v63  ;;  %v1175_v13 = vadd.f32 %v1174_v55, %v9673_v48  ;;  %v4160_v56 = vsel %vm6906_vm2, %v4155_v17, %v4159_v36  ;;  %v5850_v11 = vcombine.low %v4655_v28, %v4658_v20  ;;  %v9679_v17 = vld [vmem:[#allocation23_spill] sm:$0xff]  ;;  %v9680_v20 = vld [vmem:[#allocation24_spill] sm:$0xff] }
 0x154   : > { %6663 = vmatmul.mubr.bf16.gmra.mxu0 %v5848_v40  ;;  %v1640_v54 = vpop.f32.mrf.mxu0  ;;  %v6328_v46 = vpop.f32.mrf.mxu1  ;;  %6615 = vmatmul.mubr.bf16.gmra.mxu1 %v5776_v5  ;;  %v5778_v34 = vcombine.low %v4150_v0, %v4160_v56  ;;  %v9681_v0 = vld [vmem:[#allocation25_spill] sm:$0xff] }
 0x155   : > { %6666 = vmatprep.mubr.bf16.mxu0 %v5849_v26  ;;  %v9157_v39 = vadd.f32 %v1627_v38, %v1175_v13  ;;  %v1196_v22 = vadd.f32 %v6328_v46, %v9674_v44  ;;  %6618 = vmatprep.mubr.bf16.mxu1 %v5777_v2  ;;  %v9678_v2 = vld [vmem:[#allocation22_spill] sm:$0xff] }
 0x156   : > { %v6377_v6 = vpop.f32.mrf.mxu0  ;;  %v1187_v29 = vpop.f32.mrf.mxu1 }
 0x157   : > { %v9162_v40 = vadd.f32 %v6376_v60, %v1196_v22  ;;  %v1188_v31 = vadd.f32 %v1187_v29, %v9675_v47 }
 0x158   : > { %v1643_v8 = vpop.f32.mrf.mxu0  ;;  %v6329_v57 = vpop.f32.mrf.mxu1 }
 0x159   : > { %v9165_v58 = vadd.f32 %v1640_v54, %v1188_v31  ;;  %v1199_v3 = vadd.f32 %v6329_v57, %v9676_v10  ;;  %v9683_v57 = vld [vmem:[#allocation27_spill] sm:$0xff] }
 0x15a   : > { %v6380_v50 = vpop.f32.mrf.mxu0  ;;  %v1190_v16 = vpop.f32.mrf.mxu1 }
 0x15b   : > { %v9168_v26 = vadd.f32 %v6377_v6, %v1199_v3  ;;  %v1191_v27 = vadd.f32 %v1190_v16, %v8758_v32 }
 0x15c   : > { %6667 = vmatmul.mubr.bf16.gmra.mxu0 %v5850_v11  ;;  %v1656_v52 = vpop.f32.mrf.mxu0  ;;  %v6332_v4 = vpop.f32.mrf.mxu1  ;;  %6619 = vmatmul.mubr.bf16.gmra.mxu1 %v5778_v34  ;;  %v9682_v11 = vld [vmem:[#allocation26_spill] sm:$0xff] }
 0x15d   : > { %v9171_v59 = vadd.f32 %v1643_v8, %v1191_v27  ;;  %v1212_v43 = vadd.f32 %v6332_v4, %v9677_v37 }
 0x15e   : > { %v6381_v38 = vpop.f32.mrf.mxu0  ;;  %v1203_v21 = vpop.f32.mrf.mxu1 }
 0x15f   : > { %v9174_v5 = vadd.f32 %v6380_v50, %v1212_v43  ;;  %v1204_v1 = vadd.f32 %v1203_v21, %v9678_v2 }
 0x160   : > { %v1659_v9 = vpop.f32.mrf.mxu0  ;;  %v6333_v63 = vpop.f32.mrf.mxu1 }
 0x161   : > { %v9177_v60 = vadd.f32 %v1656_v52, %v1204_v1  ;;  %v1215_v36 = vadd.f32 %v6333_v63, %v9679_v17 }
 0x162   : > { %v6448_v32 = vpop.f32.mrf.mxu0  ;;  %v1206_v55 = vpop.f32.mrf.mxu1 }
 0x163   : > { %v9180_v28 = vadd.f32 %v6381_v38, %v1215_v36  ;;  %v1207_v48 = vadd.f32 %v1206_v55, %v9680_v20 }
 0x164   : > { %v2685_v13 = vpop.f32.mrf.mxu0  ;;  %v6400_v54 = vpop.f32.mrf.mxu1 }
 0x165   : > { %v9183_v46 = vadd.f32 %v1659_v9, %v1207_v48  ;;  %v2060_v44 = vadd.f32 %v6400_v54, %v9681_v0 }
 0x166   : > { %v6449_v22 = vpop.f32.mrf.mxu0  ;;  %v1931_v6 = vpop.f32.mrf.mxu1 }
 0x167   : > { %v9186_v56 = vadd.f32 %v6448_v32, %v2060_v44  ;;  %v2058_v29 = vadd.f32 %v1931_v6, %v9682_v11 }
 0x168   : > { %v2688_v47 = vpop.f32.mrf.mxu0  ;;  %v6401_v31 = vpop.f32.mrf.mxu1 }
 0x169   : > { %v9189_v8 = vadd.f32 %v2685_v13, %v2058_v29  ;;  %v2061_v34 = vadd.f32 %v6401_v31, %v9683_v57 }
 0x16a   : > { %v6452_v10 = vpop.f32.mrf.mxu0  ;;  %v1934_v3 = vpop.f32.mrf.mxu1 }
 0x16b   : > { %v9192_v50 = vadd.f32 %v6449_v22, %v2061_v34  ;;  %v2059_v16 = vadd.f32 %v1934_v3, %v8928_v24 }
 0x16c   : > { %v2701_v27 = vpop.f32.mrf.mxu0  ;;  %v6404_v52 = vpop.f32.mrf.mxu1 }
 0x16d   : > { %v9195_v4 = vadd.f32 %v2688_v47, %v2059_v16  ;;  %v2064_v37 = vadd.f32 %v6404_v52, %v8932_v41 }
 0x16e   : > { %v6453_v43 = vpop.f32.mrf.mxu0  ;;  %v1947_v38 = vpop.f32.mrf.mxu1 }
 0x16f   : > { %v9198_v21 = vadd.f32 %v6452_v10, %v2064_v37  ;;  %v2062_v2 = vadd.f32 %v1947_v38, %v8941_v15 }
 0x170   : > { %v2704_v1 = vpop.f32.mrf.mxu0  ;;  %v6405_v9 = vpop.f32.mrf.mxu1 }
 0x171   : > { %v9201_v63 = vadd.f32 %v2701_v27, %v2062_v2  ;;  %v2065_v17 = vadd.f32 %v6405_v9, %v8967_v53 }
 0x172   : > { %v6456_v36 = vpop.f32.mrf.mxu0  ;;  %v1950_v24 = vpop.f32.mrf.mxu1 }
 0x173   : > { %v9204_v32 = vadd.f32 %v6453_v43, %v2065_v17  ;;  %v2063_v55 = vadd.f32 %v1950_v24, %v8987_v14 }
 0x174   : > { %v2717_v20 = vpop.f32.mrf.mxu0  ;;  %v6408_v41 = vpop.f32.mrf.mxu1 }
 0x175   : > { %v9207_v48 = vadd.f32 %v2704_v1, %v2063_v55  ;;  %v2068_v13 = vadd.f32 %v6408_v41, %v8995_v7 }
 0x176   : > { %v6457_v54 = vpop.f32.mrf.mxu0  ;;  %v1963_v15 = vpop.f32.mrf.mxu1 }
 0x177   : > { %v9210_v0 = vadd.f32 %v6456_v36, %v2068_v13  ;;  %v2066_v44 = vadd.f32 %v1963_v15, %v9005_v45 }
 0x178   : > { %v2720_v22 = vpop.f32.mrf.mxu0  ;;  %v6409_v53 = vpop.f32.mrf.mxu1 }
 0x179   : > { %v9213_v6 = vadd.f32 %v2717_v20, %v2066_v44  ;;  %v2069_v11 = vadd.f32 %v6409_v53, %v9028_v23 }
 0x17a   : > { %v6460_v29 = vpop.f32.mrf.mxu0  ;;  %v1966_v14 = vpop.f32.mrf.mxu1 }
 0x17b   : > { %v9216_v47 = vadd.f32 %v6457_v54, %v2069_v11  ;;  %v2067_v31 = vadd.f32 %v1966_v14, %v9045_v18 }
 0x17c   : > { %v2733_v57 = vpop.f32.mrf.mxu0  ;;  %v6412_v7 = vpop.f32.mrf.mxu1 }
 0x17d   : > { %v9219_v34 = vadd.f32 %v2720_v22, %v2067_v31  ;;  %v2072_v10 = vadd.f32 %v6412_v7, %v9052_v42 }
 0x17e   : > { %v6461_v3 = vpop.f32.mrf.mxu0  ;;  %v1979_v45 = vpop.f32.mrf.mxu1 }
 0x17f   : > { %v9222_v16 = vadd.f32 %v6460_v29, %v2072_v10  ;;  %v2070_v27 = vadd.f32 %v1979_v45, %v9064_v61 }
 0x180   : > { %v2736_v52 = vpop.f32.mrf.mxu0  ;;  %v6413_v23 = vpop.f32.mrf.mxu1 }
 0x181   : > { %v9225_v37 = vadd.f32 %v2733_v57, %v2070_v27  ;;  %v2073_v43 = vadd.f32 %v6413_v23, %v9084_v19 }
 0x182   : > { %v6464_v38 = vpop.f32.mrf.mxu0  ;;  %v1982_v18 = vpop.f32.mrf.mxu1 }
 0x183   : > { %v9228_v2 = vadd.f32 %v6461_v3, %v2073_v43  ;;  %v2071_v1 = vadd.f32 %v1982_v18, %v9092_v12 }
 0x184   : > { %v2749_v9 = vpop.f32.mrf.mxu0  ;;  %v6416_v42 = vpop.f32.mrf.mxu1 }
 0x185   : > { %v9231_v17 = vadd.f32 %v2736_v52, %v2071_v1  ;;  %v2076_v36 = vadd.f32 %v6416_v42, %v9101_v25 }
 0x186   : > { %v6465_v24 = vpop.f32.mrf.mxu0  ;;  %v1995_v61 = vpop.f32.mrf.mxu1 }
 0x187   : > { %v9234_v55 = vadd.f32 %v6464_v38, %v2076_v36  ;;  %v2074_v20 = vadd.f32 %v1995_v61, %v9104_v51 }
 0x188   : > { %v2752_v41 = vpop.f32.mrf.mxu0  ;;  %v6417_v19 = vpop.f32.mrf.mxu1 }
 0x189   : > { %v9237_v13 = vadd.f32 %v2749_v9, %v2074_v20  ;;  %v2077_v54 = vadd.f32 %v6417_v19, %v9121_v62 }
 0x18a   : > { %v6468_v15 = vpop.f32.mrf.mxu0  ;;  %v1998_v12 = vpop.f32.mrf.mxu1 }
 0x18b   : > { %v9240_v44 = vadd.f32 %v6465_v24, %v2077_v54  ;;  %v2075_v22 = vadd.f32 %v1998_v12, %v9134_v33 }
 0x18c   : > { %v2765_v53 = vpop.f32.mrf.mxu0  ;;  %v6420_v25 = vpop.f32.mrf.mxu1 }
 0x18d   : > { %v9243_v11 = vadd.f32 %v2752_v41, %v2075_v22  ;;  %v2080_v29 = vadd.f32 %v6420_v25, %v9141_v49 }
 0x18e   : > { %v6469_v14 = vpop.f32.mrf.mxu0  ;;  %v2011_v51 = vpop.f32.mrf.mxu1 }
 0x18f   : > { %v9246_v31 = vadd.f32 %v6468_v15, %v2080_v29  ;;  %v2078_v57 = vadd.f32 %v2011_v51, %v9144_v35 }
 0x190   : > { %v2768_v7 = vpop.f32.mrf.mxu0  ;;  %v6421_v62 = vpop.f32.mrf.mxu1 }
 0x191   : > { %v9249_v10 = vadd.f32 %v2765_v53, %v2078_v57  ;;  %v2081_v3 = vadd.f32 %v6421_v62, %v9151_v30 }
 0x192   : > { %v6472_v45 = vpop.f32.mrf.mxu0  ;;  %v2014_v33 = vpop.f32.mrf.mxu1 }
 0x193   : > { %v9252_v27 = vadd.f32 %v6469_v14, %v2081_v3  ;;  %v2079_v52 = vadd.f32 %v2014_v33, %v9157_v39 }
 0x194   : > { %v2781_v23 = vpop.f32.mrf.mxu0  ;;  %v6424_v49 = vpop.f32.mrf.mxu1 }
 0x195   : > { %v9255_v43 = vadd.f32 %v2768_v7, %v2079_v52  ;;  %v2084_v38 = vadd.f32 %v6424_v49, %v9162_v40 }
 0x196   : > { %v6473_v18 = vpop.f32.mrf.mxu0  ;;  %v2027_v35 = vpop.f32.mrf.mxu1 }
 0x197   : > { %v9258_v1 = vadd.f32 %v6472_v45, %v2084_v38  ;;  %v2082_v9 = vadd.f32 %v2027_v35, %v9165_v58 }
 0x198   : > { %v2784_v42 = vpop.f32.mrf.mxu0  ;;  %v6425_v30 = vpop.f32.mrf.mxu1 }
 0x199   : > { %v9261_v36 = vadd.f32 %v2781_v23, %v2082_v9  ;;  %v2085_v24 = vadd.f32 %v6425_v30, %v9168_v26 }
 0x19a   : > { %v6476_v61 = vpop.f32.mrf.mxu0  ;;  %v2030_v39 = vpop.f32.mrf.mxu1 }
 0x19b   : > { %v9264_v20 = vadd.f32 %v6473_v18, %v2085_v24  ;;  %v2083_v41 = vadd.f32 %v2030_v39, %v9171_v59 }
 0x19c   : > { %v2797_v19 = vpop.f32.mrf.mxu0  ;;  %v6428_v40 = vpop.f32.mrf.mxu1 }
 0x19d   : > { %9684 = vst [vmem:[#allocation3_spill] sm:$0xff] %v9264_v20  ;;  %v9267_v54 = vadd.f32 %v2784_v42, %v2083_v41  ;;  %v2088_v15 = vadd.f32 %v6428_v40, %v9174_v5 }
 0x19e   : > { %v6477_v12 = vpop.f32.mrf.mxu0  ;;  %v2043_v58 = vpop.f32.mrf.mxu1 }
 0x19f   : > { %9685 = vst [vmem:[#allocation7_spill] sm:$0xff] %v9267_v54  ;;  %v9270_v22 = vadd.f32 %v6476_v61, %v2088_v15  ;;  %v2086_v53 = vadd.f32 %v2043_v58, %v9177_v60 }
 0x1a0   : > { %v2800_v25 = vpop.f32.mrf.mxu0  ;;  %v6429_v26 = vpop.f32.mrf.mxu1 }
 0x1a1   : > { %v9273_v29 = vadd.f32 %v2797_v19, %v2086_v53  ;;  %v2089_v14 = vadd.f32 %v6429_v26, %v9180_v28 }
 0x1a2   : > { %v6544_v51 = vpop.f32.mrf.mxu0  ;;  %v2046_v59 = vpop.f32.mrf.mxu1 }
 0x1a3   : > { %v9276_v57 = vadd.f32 %v6477_v12, %v2089_v14  ;;  %v2087_v7 = vadd.f32 %v2046_v59, %v9183_v46 }
 0x1a4   : > { %v3570_v62 = vpop.f32.mrf.mxu0  ;;  %v6496_v5 = vpop.f32.mrf.mxu1 }
 0x1a5   : > { %9686 = vst [vmem:[#allocation9_spill] sm:$0xff] %v9276_v57  ;;  %v9279_v3 = vadd.f32 %v2800_v25, %v2087_v7  ;;  %v3312_v45 = vadd.f32 %v6496_v5, %v9186_v56 }
 0x1a6   : > { %v9282_v33 = vpop.f32.mrf.mxu0  ;;  %v3183_v60 = vpop.f32.mrf.mxu1 }
 0x1a7   : > { %9687 = vst [vmem:[#allocation18_spill] sm:$0xff] %v9279_v3  ;;  %v9284_v52 = vadd.f32 %v6544_v51, %v3312_v45  ;;  %v3310_v23 = vadd.f32 %v3183_v60, %v9189_v8 }
 0x1a8   : > { %v9287_v28 = vpop.f32.mrf.mxu0  ;;  %v9289_v49 = vpop.f32.mrf.mxu1 }
 0x1a9   : > { %v9291_v38 = vadd.f32 %v3570_v62, %v3310_v23 }
 0x1aa   : > { %v6548_v46 = vpop.f32.mrf.mxu0  ;;  %v9293_v18 = vpop.f32.mrf.mxu1 }
 0x1ac   : > { %v3586_v35 = vpop.f32.mrf.mxu0  ;;  %v6500_v9 = vpop.f32.mrf.mxu1 }
 0x1ad   : > { %v3316_v56 = vadd.f32 %v6500_v9, %v9198_v21 }
 0x1ae   : > { %v9296_v42 = vpop.f32.mrf.mxu0  ;;  %v3199_v30 = vpop.f32.mrf.mxu1 }
 0x1af   : > { %v9298_v24 = vadd.f32 %v6548_v46, %v3316_v56  ;;  %v3314_v8 = vadd.f32 %v3199_v30, %v9201_v63 }
 0x1b0   : > { %v9301_v61 = vpop.f32.mrf.mxu0  ;;  %v9303_v39 = vpop.f32.mrf.mxu1 }
 0x1b1   : > { %v9305_v41 = vadd.f32 %v3586_v35, %v3314_v8 }
 0x1b2   : > { %v6552_v19 = vpop.f32.mrf.mxu0  ;;  %v9307_v40 = vpop.f32.mrf.mxu1 }
 0x1b4   : > { %v3602_v15 = vpop.f32.mrf.mxu0  ;;  %v6504_v12 = vpop.f32.mrf.mxu1 }
 0x1b5   : > { %v3320_v21 = vadd.f32 %v6504_v12, %v9210_v0 }
 0x1b6   : > { %v9310_v58 = vpop.f32.mrf.mxu0  ;;  %v3215_v53 = vpop.f32.mrf.mxu1 }
 0x1b7   : > { %v9312_v25 = vadd.f32 %v6552_v19, %v3320_v21  ;;  %v3318_v63 = vadd.f32 %v3215_v53, %v9213_v6 }
 0x1b8   : > { %v9315_v26 = vpop.f32.mrf.mxu0  ;;  %v9317_v14 = vpop.f32.mrf.mxu1 }
 0x1b9   : > { %v9319_v51 = vadd.f32 %v3602_v15, %v3318_v63 }
 0x1ba   : > { %v6556_v59 = vpop.f32.mrf.mxu0  ;;  %v9321_v7 = vpop.f32.mrf.mxu1 }
 0x1bc   : > { %v3618_v62 = vpop.f32.mrf.mxu0  ;;  %v6508_v5 = vpop.f32.mrf.mxu1 }
 0x1bd   : > { %v3324_v0 = vadd.f32 %v6508_v5, %v9222_v16 }
 0x1be   : > { %v9324_v45 = vpop.f32.mrf.mxu0  ;;  %v3231_v60 = vpop.f32.mrf.mxu1 }
 0x1bf   : > { %v9326_v23 = vadd.f32 %v6556_v59, %v3324_v0  ;;  %v3322_v6 = vadd.f32 %v3231_v60, %v9225_v37 }
 0x1c0   : > { %v9329_v46 = vpop.f32.mrf.mxu0  ;;  %v9331_v35 = vpop.f32.mrf.mxu1 }
 0x1c1   : > { %v9333_v9 = vadd.f32 %v3618_v62, %v3322_v6 }
 0x1c2   : > { %v6560_v56 = vpop.f32.mrf.mxu0  ;;  %v9335_v30 = vpop.f32.mrf.mxu1 }
 0x1c4   : > { %v3634_v8 = vpop.f32.mrf.mxu0  ;;  %v6512_v19 = vpop.f32.mrf.mxu1 }
 0x1c5   : > { %v3328_v16 = vadd.f32 %v6512_v19, %v9234_v55 }
 0x1c6   : > { %v9338_v15 = vpop.f32.mrf.mxu0  ;;  %v3247_v12 = vpop.f32.mrf.mxu1 }
 0x1c7   : > { %v9340_v21 = vadd.f32 %v6560_v56, %v3328_v16  ;;  %v3326_v37 = vadd.f32 %v3247_v12, %v9237_v13 }
 0x1c8   : > { %v9343_v53 = vpop.f32.mrf.mxu0  ;;  %v9345_v63 = vpop.f32.mrf.mxu1 }
 0x1c9   : > { %v9347_v59 = vadd.f32 %v3634_v8, %v3326_v37 }
 0x1ca   : > { %v6564_v62 = vpop.f32.mrf.mxu0  ;;  %v9349_v5 = vpop.f32.mrf.mxu1 }
 0x1cc   : > { %v3650_v0 = vpop.f32.mrf.mxu0  ;;  %v6516_v60 = vpop.f32.mrf.mxu1 }
 0x1cd   : > { %v3332_v55 = vadd.f32 %v6516_v60, %v9246_v31 }
 0x1ce   : > { %v9352_v6 = vpop.f32.mrf.mxu0  ;;  %v3263_v19 = vpop.f32.mrf.mxu1 }
 0x1cf   : > { %9688 = vst [vmem:[#allocation13_spill] sm:$0xff] %v9352_v6  ;;  %v9354_v56 = vadd.f32 %v6564_v62, %v3332_v55  ;;  %v3330_v13 = vadd.f32 %v3263_v19, %v9249_v10 }
 0x1d0   : > { %v9357_v16 = vpop.f32.mrf.mxu0  ;;  %v9359_v12 = vpop.f32.mrf.mxu1 }
 0x1d1   : > { %9689 = vst [vmem:[#allocation15_spill] sm:$0xff] %v9357_v16  ;;  %v9361_v8 = vadd.f32 %v3650_v0, %v3330_v13 }
 0x1d2   : > { %v6568_v37 = vpop.f32.mrf.mxu0  ;;  %v9363_v3 = vpop.f32.mrf.mxu1 }
 0x1d3   : > { %9690 = vst [vmem:[#allocation17_spill] sm:$0xff] %v9361_v8 }
 0x1d4   : > { %v3666_v57 = vpop.f32.mrf.mxu0  ;;  %v6520_v54 = vpop.f32.mrf.mxu1 }
 0x1d5   : > { %v3336_v31 = vadd.f32 %v6520_v54, %v9258_v1 }
 0x1d6   : > { %v9366_v60 = vpop.f32.mrf.mxu0  ;;  %v3279_v20 = vpop.f32.mrf.mxu1 }
 0x1d7   : > { %9691 = vst [vmem:[#allocation20_spill] sm:$0xff] %v9366_v60  ;;  %v9368_v62 = vadd.f32 %v6568_v37, %v3336_v31  ;;  %v3334_v10 = vadd.f32 %v3279_v20, %v9261_v36 }
 0x1d8   : > { %v9371_v55 = vpop.f32.mrf.mxu0  ;;  %v9373_v19 = vpop.f32.mrf.mxu1 }
 0x1d9   : > { %9692 = vst [vmem:[#allocation2_spill] sm:$0xff] %v9371_v55  ;;  %v9375_v0 = vadd.f32 %v3666_v57, %v3334_v10 }
 0x1da   : > { %v6572_v13 = vpop.f32.mrf.mxu0  ;;  %v9377_v16 = vpop.f32.mrf.mxu1 }
 0x1db   : > { %9693 = vst [vmem:[#allocation5_spill] sm:$0xff] %v9375_v0  ;;  %v3313_v0 = vadd.f32 %v9289_v49, %v9192_v50  ;;  %v9403_v50 = vld [vmem:[%s9521_s2] ss:$0 sm:$0xff] }
 0x1dc   : > { %v3682_v8 = vpop.f32.mrf.mxu0  ;;  %v6524_v6 = vpop.f32.mrf.mxu1 }
 0x1dd   : > { %v3340_v1 = vadd.f32 %v6524_v6, %v9270_v22 }
 0x1de   : > { %v9380_v54 = vpop.f32.mrf.mxu0  ;;  %v3295_v60 = vpop.f32.mrf.mxu1 }
 0x1df   : > { %9694 = vst [vmem:[#allocation4_spill] sm:$0xff] %v9380_v54  ;;  %v9382_v37 = vadd.f32 %v6572_v13, %v3340_v1  ;;  %v3338_v36 = vadd.f32 %v3295_v60, %v9273_v29  ;;  %v3311_v13 = vadd.f32 %v9293_v18, %v9195_v4 }
 0x1e0   : > { %v9385_v20 = vpop.f32.mrf.mxu0  ;;  %v9387_v31 = vpop.f32.mrf.mxu1 }
 0x1e1   : > { %9695 = vst [vmem:[#allocation6_spill] sm:$0xff] %v9382_v37  ;;  %9696 = vst [vmem:[#allocation8_spill] sm:$0xff] %v9385_v20  ;;  %v9389_v57 = vadd.f32 %v3682_v8, %v3338_v36  ;;  %v3700_v20 = vadd.f32 %v9282_v33, %v3313_v0 }
 0x1e2   : > { %v9391_v55 = vpop.f32.mrf.mxu1 }
 0x1e3   : > { %9697 = vst [vmem:[#allocation10_spill] sm:$0xff] %v9389_v57  ;;  %v6640_v10 = vpop.f32.mrf.mxu0  ;;  %9698 = vst [vmem:[#allocation11_spill] sm:$0xff] %v9391_v55  ;;  %v3698_v57 = vadd.f32 %v9287_v28, %v3311_v13 }
 0x1e4   : > { %v6592_v6 = vpop.f32.mrf.mxu1 }
 0x1e5   : > { %v4822_v22 = vpop.f32.mrf.mxu0  ;;  %v4453_v1 = vadd.f32 %v6592_v6, %v9284_v52 }
 0x1e6   : > { %v4324_v60 = vpop.f32.mrf.mxu1 }
 0x1e7   : > { %v6641_v29 = vpop.f32.mrf.mxu0  ;;  %v4951_v54 = vadd.f32 %v6640_v10, %v4453_v1  ;;  %v4451_v8 = vadd.f32 %v4324_v60, %v9291_v38  ;;  %v3317_v38 = vadd.f32 %v9303_v39, %v9204_v32  ;;  %v3315_v1 = vadd.f32 %v9307_v40, %v9207_v48 }
 0x1e8   : > { %v6593_v49 = vpop.f32.mrf.mxu1 }
 0x1e9   : > { %v4825_v36 = vpop.f32.mrf.mxu0  ;;  %v4949_v4 = vadd.f32 %v4822_v22, %v4451_v8  ;;  %v4454_v18 = vadd.f32 %v6593_v49, %v3700_v20  ;;  %v4990_v37 = vadd.f32 %v9403_v50, %v4951_v54  ;;  %v3704_v48 = vadd.f32 %v9296_v42, %v3317_v38 }
 0x1ea   : > { %v4327_v6 = vpop.f32.mrf.mxu1  ;;  %v3702_v40 = vadd.f32 %v9301_v61, %v3315_v1  ;;  %v3321_v42 = vadd.f32 %v9317_v14, %v9216_v47 }
 0x1eb   : > { %v6644_v52 = vpop.f32.mrf.mxu0  ;;  %v4952_v33 = vadd.f32 %v6641_v29, %v4454_v18  ;;  %v4452_v0 = vadd.f32 %v4327_v6, %v3698_v57  ;;  %v4988_v55 = vadd.f32 %v9403_v50, %v4949_v4  ;;  %v5022_v29 = vmax.f32 %v4990_v37, 0.0 }
 0x1ec   : > { %v6596_v60 = vpop.f32.mrf.mxu1 }
 0x1ed   : > { %v4838_v10 = vpop.f32.mrf.mxu0  ;;  %v4991_v28 = vadd.f32 %v9403_v50, %v4952_v33  ;;  %v4950_v20 = vadd.f32 %v4825_v36, %v4452_v0  ;;  %v4457_v22 = vadd.f32 %v6596_v60, %v9298_v24  ;;  %v5020_v37 = vmax.f32 %v4988_v55, 0.0 }
 0x1ee   : > { %v4340_v54 = vpop.f32.mrf.mxu1 }
 0x1ef   : > { %v6645_v13 = vpop.f32.mrf.mxu0  ;;  %v5023_v57 = vmax.f32 %v4991_v28, 0.0  ;;  %v4989_v8 = vadd.f32 %v9403_v50, %v4950_v20  ;;  %v4455_v32 = vadd.f32 %v4340_v54, %v9305_v41  ;;  %v4955_v24 = vadd.f32 %v6644_v52, %v4457_v22 }
 0x1f0   : > { %v6597_v36 = vpop.f32.mrf.mxu1  ;;  %v3319_v22 = vadd.f32 %v9321_v7, %v9219_v34  ;;  %v3708_v54 = vadd.f32 %v9310_v58, %v3321_v42  ;;  %v3325_v58 = vadd.f32 %v9331_v35, %v9228_v2  ;;  %v3323_v42 = vadd.f32 %v9335_v30, %v9231_v17 }
 0x1f1   : > { %v4841_v39 = vpop.f32.mrf.mxu0  ;;  %v5935_v49 = vpack.c.bf16 %v5023_v57, %v5022_v29  ;;  %v5021_v4 = vmax.f32 %v4989_v8, 0.0  ;;  %v4953_v18 = vadd.f32 %v4838_v10, %v4455_v32  ;;  %v4458_v41 = vadd.f32 %v6597_v36, %v3704_v48 }
 0x1f2   : > { %v4343_v33 = vpop.f32.mrf.mxu1  ;;  %v4994_v1 = vadd.f32 %v9403_v50, %v4955_v24  ;;  %v3706_v7 = vadd.f32 %v9315_v26, %v3319_v22  ;;  %v3712_v35 = vadd.f32 %v9324_v45, %v3325_v58 }
 0x1f3   : > { %v6648_v6 = vpop.f32.mrf.mxu0  ;;  %6007 = vst [vmem:[%s9422_s20 + $0x8] sm:$0xff] %v5935_v49   ;;  %v5930_v61 = vpack.c.bf16 %v5021_v4, %v5020_v37  ;;  %v4456_v0 = vadd.f32 %v4343_v33, %v3702_v40  ;;  %v4956_v60 = vadd.f32 %v6645_v13, %v4458_v41  ;;  %v4992_v55 = vadd.f32 %v9403_v50, %v4953_v18 }
 0x1f4   : > { %v6600_v52 = vpop.f32.mrf.mxu1  ;;  %v5026_v32 = vmax.f32 %v4994_v1, 0.0 }
 0x1f5   : > { %v4854_v38 = vpop.f32.mrf.mxu0  ;;  %5931 = vst [vmem:[%s9422_s20] sm:$0xff] %v5930_v61   ;;  %v4954_v28 = vadd.f32 %v4841_v39, %v4456_v0  ;;  %v4461_v10 = vadd.f32 %v6600_v52, %v9312_v25  ;;  %v4995_v47 = vadd.f32 %v9403_v50, %v4956_v60  ;;  %v5024_v25 = vmax.f32 %v4992_v55, 0.0 }
 0x1f6   : > { %v4356_v14 = vpop.f32.mrf.mxu1 }
 0x1f7   : > { %v6649_v20 = vpop.f32.mrf.mxu0  ;;  %v4993_v29 = vadd.f32 %v9403_v50, %v4954_v28  ;;  %v4959_v57 = vadd.f32 %v6648_v6, %v4461_v10  ;;  %v4459_v13 = vadd.f32 %v4356_v14, %v9319_v51  ;;  %v5027_v39 = vmax.f32 %v4995_v47, 0.0 }
 0x1f8   : > { %v6601_v48 = vpop.f32.mrf.mxu1 }
 0x1f9   : > { %v4857_v8 = vpop.f32.mrf.mxu0  ;;  %v5025_v40 = vmax.f32 %v4993_v29, 0.0  ;;  %v4462_v24 = vadd.f32 %v6601_v48, %v3708_v54  ;;  %v5945_v36 = vpack.c.bf16 %v5027_v39, %v5026_v32  ;;  %v4957_v37 = vadd.f32 %v4854_v38, %v4459_v13 }
 0x1fa   : > { %v4359_v49 = vpop.f32.mrf.mxu1  ;;  %v4998_v51 = vadd.f32 %v9403_v50, %v4959_v57  ;;  %v3329_v32 = vadd.f32 %v9345_v63, %v9240_v44 }
 0x1fb   : > { %v6652_v34 = vpop.f32.mrf.mxu0  ;;  %v5940_v4 = vpack.c.bf16 %v5025_v40, %v5024_v25  ;;  %v4960_v18 = vadd.f32 %v6649_v20, %v4462_v24  ;;  %6009 = vst [vmem:[%s9422_s20 + $0x18] sm:$0xff] %v5945_v36   ;;  %v4460_v41 = vadd.f32 %v4359_v49, %v3706_v7  ;;  %v4996_v0 = vadd.f32 %v9403_v50, %v4957_v37 }
 0x1fc   : > { %v6604_v33 = vpop.f32.mrf.mxu1  ;;  %v5030_v60 = vmax.f32 %v4998_v51, 0.0  ;;  %v3710_v20 = vadd.f32 %v9329_v46, %v3323_v42  ;;  %v3327_v46 = vadd.f32 %v9349_v5, %v9243_v11  ;;  %v3716_v5 = vadd.f32 %v9338_v15, %v3329_v32 }
 0x1fd   : > { %v4870_v6 = vpop.f32.mrf.mxu0  ;;  %6008 = vst [vmem:[%s9422_s20 + $0x10] sm:$0xff] %v5940_v4   ;;  %v4999_v26 = vadd.f32 %v9403_v50, %v4960_v18  ;;  %v4465_v61 = vadd.f32 %v6604_v33, %v9326_v23  ;;  %v4958_v38 = vadd.f32 %v4857_v8, %v4460_v41  ;;  %v5028_v14 = vmax.f32 %v4996_v0, 0.0 }
 0x1fe   : > { %v4372_v1 = vpop.f32.mrf.mxu1  ;;  %v3714_v49 = vadd.f32 %v9343_v53, %v3327_v46 }
 0x1ff   : > { %v6653_v2 = vpop.f32.mrf.mxu0  ;;  %v5031_v52 = vmax.f32 %v4999_v26, 0.0  ;;  %v4963_v55 = vadd.f32 %v6652_v34, %v4465_v61  ;;  %v4463_v28 = vadd.f32 %v4372_v1, %v9333_v9  ;;  %v4997_v17 = vadd.f32 %v9403_v50, %v4958_v38 }
 0x200   : > { %v6605_v30 = vpop.f32.mrf.mxu1  ;;  %v3333_v61 = vadd.f32 %v9359_v12, %v9252_v27 }
 0x201   : > { %v4873_v10 = vpop.f32.mrf.mxu0  ;;  %v5955_v23 = vpack.c.bf16 %v5031_v52, %v5030_v60  ;;  %v4961_v22 = vadd.f32 %v4870_v6, %v4463_v28  ;;  %v4466_v47 = vadd.f32 %v6605_v30, %v3712_v35  ;;  %v5029_v54 = vmax.f32 %v4997_v17, 0.0  ;;  %v9699_v28 = vld [vmem:[#allocation13_spill] sm:$0xff] }
 0x202   : > { %v4375_v29 = vpop.f32.mrf.mxu1  ;;  %v5002_v57 = vadd.f32 %v9403_v50, %v4963_v55  ;;  %v3331_v55 = vadd.f32 %v9363_v3, %v9255_v43  ;;  %v9701_v3 = vld [vmem:[#allocation15_spill] sm:$0xff] }
 0x203   : > { %6011 = vst [vmem:[%s9422_s20 + $0x28] sm:$0xff] %v5955_v23   ;;  %v4964_v13 = vadd.f32 %v6653_v2, %v4466_v47  ;;  %v4464_v8 = vadd.f32 %v4375_v29, %v3710_v20  ;;  %v5950_v39 = vpack.c.bf16 %v5029_v54, %v5028_v14  ;;  %v5000_v25 = vadd.f32 %v9403_v50, %v4961_v22  ;;  %v9700_v20 = vld [vmem:[#allocation17_spill] sm:$0xff] }
 0x204   : > { %v6656_v45 = vpop.f32.mrf.mxu0  ;;  %v6608_v48 = vpop.f32.mrf.mxu1  ;;  %v5034_v36 = vmax.f32 %v5002_v57, 0.0  ;;  %v3718_v57 = vadd.f32 %v9701_v3, %v3331_v55  ;;  %v9708_v55 = vld [vmem:[#allocation18_spill] sm:$0xff] }
 0x205   : > { %v5003_v40 = vadd.f32 %v9403_v50, %v4964_v13  ;;  %v4962_v24 = vadd.f32 %v4873_v10, %v4464_v8  ;;  %v4469_v34 = vadd.f32 %v6608_v48, %v9340_v21  ;;  %6010 = vst [vmem:[%s9422_s20 + $0x20] sm:$0xff] %v5950_v39   ;;  %v5032_v18 = vmax.f32 %v5000_v25, 0.0  ;;  %v9702_v13 = vld [vmem:[#allocation3_spill] sm:$0xff] }
 0x206   : > { %v4886_v9 = vpop.f32.mrf.mxu0  ;;  %v4388_v58 = vpop.f32.mrf.mxu1  ;;  %v3720_v10 = vadd.f32 %v9699_v28, %v3333_v61  ;;  %v3337_v8 = vadd.f32 %v9373_v19, %v9702_v13 }
 0x207   : > { %v5035_v37 = vmax.f32 %v5003_v40, 0.0  ;;  %v5001_v44 = vadd.f32 %v9403_v50, %v4962_v24  ;;  %v4467_v63 = vadd.f32 %v4388_v58, %v9347_v59  ;;  %v4967_v4 = vadd.f32 %v6656_v45, %v4469_v34 }
 0x208   : > { %v6657_v7 = vpop.f32.mrf.mxu0  ;;  %v6609_v51 = vpop.f32.mrf.mxu1 }
 0x209   : > { %v5965_v21 = vpack.c.bf16 %v5035_v37, %v5034_v36  ;;  %v5033_v6 = vmax.f32 %v5001_v44, 0.0  ;;  %v4965_v41 = vadd.f32 %v4886_v9, %v4467_v63  ;;  %v4470_v42 = vadd.f32 %v6609_v51, %v3716_v5  ;;  %v9704_v44 = vld [vmem:[#allocation20_spill] sm:$0xff] }
 0x20a   : > { %v4889_v11 = vpop.f32.mrf.mxu0  ;;  %v4391_v26 = vpop.f32.mrf.mxu1  ;;  %v5006_v15 = vadd.f32 %v9403_v50, %v4967_v4  ;;  %v3724_v63 = vadd.f32 %v9704_v44, %v3337_v8 }
 0x20b   : > { %6013 = vst [vmem:[%s9422_s20 + $0x38] sm:$0xff] %v5965_v21   ;;  %v5960_v59 = vpack.c.bf16 %v5033_v6, %v5032_v18  ;;  %v4468_v2 = vadd.f32 %v4391_v26, %v3714_v49  ;;  %v4968_v53 = vadd.f32 %v6657_v7, %v4470_v42  ;;  %v5004_v38 = vadd.f32 %v9403_v50, %v4965_v41  ;;  %v9703_v7 = vld [vmem:[#allocation7_spill] sm:$0xff]  ;;  %v9705_v21 = vld [vmem:[#allocation5_spill] sm:$0xff]  ;;  %v9706_v42 = vld [vmem:[#allocation2_spill] sm:$0xff] }
 0x20c   : > { %v6660_v33 = vpop.f32.mrf.mxu0  ;;  %v6612_v0 = vpop.f32.mrf.mxu1  ;;  %v5038_v47 = vmax.f32 %v5006_v15, 0.0  ;;  %v3335_v58 = vadd.f32 %v9377_v16, %v9703_v7 }
 0x20d   : > { %6012 = vst [vmem:[%s9422_s20 + $0x30] sm:$0xff] %v5960_v59   ;;  %v4966_v1 = vadd.f32 %v4889_v11, %v4468_v2  ;;  %v4473_v60 = vadd.f32 %v6612_v0, %v9354_v56  ;;  %v5007_v27 = vadd.f32 %v9403_v50, %v4968_v53  ;;  %v5036_v56 = vmax.f32 %v5004_v38, 0.0 }
 0x20e   : > { %v4902_v35 = vpop.f32.mrf.mxu0  ;;  %v4404_v12 = vpop.f32.mrf.mxu1  ;;  %v3722_v26 = vadd.f32 %v9706_v42, %v3335_v58 }
 0x20f   : > { %v5005_v17 = vadd.f32 %v9403_v50, %v4966_v1  ;;  %v4971_v30 = vadd.f32 %v6660_v33, %v4473_v60  ;;  %v4471_v23 = vadd.f32 %v4404_v12, %v9700_v20  ;;  %v5039_v45 = vmax.f32 %v5007_v27, 0.0  ;;  %v9707_v60 = vld [vmem:[#allocation9_spill] sm:$0xff]  ;;  %v9709_v27 = vld [vmem:[#allocation11_spill] sm:$0xff] }
 0x210   : > { %v6661_v52 = vpop.f32.mrf.mxu0  ;;  %v6613_v14 = vpop.f32.mrf.mxu1  ;;  %v3339_v12 = vadd.f32 %v9709_v27, %v9708_v55 }
 0x211   : > { %v5037_v54 = vmax.f32 %v5005_v17, 0.0  ;;  %v4474_v29 = vadd.f32 %v6613_v14, %v3720_v10  ;;  %v5975_v9 = vpack.c.bf16 %v5039_v45, %v5038_v47  ;;  %v4969_v32 = vadd.f32 %v4902_v35, %v4471_v23 }
 0x212   : > { %v4905_v22 = vpop.f32.mrf.mxu0  ;;  %v4407_v46 = vpop.f32.mrf.mxu1  ;;  %v5010_v48 = vadd.f32 %v9403_v50, %v4971_v30 }
 0x213   : > { %v5970_v39 = vpack.c.bf16 %v5037_v54, %v5036_v56  ;;  %v4972_v25 = vadd.f32 %v6661_v52, %v4474_v29  ;;  %6015 = vst [vmem:[%s9422_s20 + $0x48] sm:$0xff] %v5975_v9   ;;  %v4472_v24 = vadd.f32 %v4407_v46, %v3718_v57  ;;  %v5008_v11 = vadd.f32 %v9403_v50, %v4969_v32  ;;  %v9711_v54 = vld [vmem:[#allocation10_spill] sm:$0xff]  ;;  %v9713_v57 = vld [vmem:[#allocation8_spill] sm:$0xff] }
 0x214   : > { %v6664_v43 = vpop.f32.mrf.mxu0  ;;  %v6616_v34 = vpop.f32.mrf.mxu1  ;;  %v5042_v4 = vmax.f32 %v5010_v48, 0.0  ;;  %v3341_v52 = vadd.f32 %v9387_v31, %v9707_v60  ;;  %v3726_v13 = vadd.f32 %v9713_v57, %v3339_v12 }
 0x215   : > { %6014 = vst [vmem:[%s9422_s20 + $0x40] sm:$0xff] %v5970_v39   ;;  %v5011_v36 = vadd.f32 %v9403_v50, %v4972_v25  ;;  %v4477_v37 = vadd.f32 %v6616_v34, %v9368_v62  ;;  %v4970_v5 = vadd.f32 %v4905_v22, %v4472_v24  ;;  %v5040_v35 = vmax.f32 %v5008_v11, 0.0  ;;  %v9710_v22 = vld [vmem:[#allocation6_spill] sm:$0xff] }
 0x216   : > { %v4918_v40 = vpop.f32.mrf.mxu0  ;;  %v4420_v49 = vpop.f32.mrf.mxu1 }
 0x217   : > { %v5043_v51 = vmax.f32 %v5011_v36, 0.0  ;;  %v4975_v18 = vadd.f32 %v6664_v43, %v4477_v37  ;;  %v4475_v6 = vadd.f32 %v4420_v49, %v9705_v21  ;;  %v5009_v16 = vadd.f32 %v9403_v50, %v4970_v5  ;;  %v9712_v43 = vld [vmem:[#allocation4_spill] sm:$0xff] }
 0x218   : > { %v6665_v19 = vpop.f32.mrf.mxu0  ;;  %v6617_v33 = vpop.f32.mrf.mxu1  ;;  %v3728_v3 = vadd.f32 %v9712_v43, %v3341_v52 }
 0x219   : > { %v5985_v62 = vpack.c.bf16 %v5043_v51, %v5042_v4  ;;  %v4973_v61 = vadd.f32 %v4918_v40, %v4475_v6  ;;  %v4478_v59 = vadd.f32 %v6617_v33, %v3724_v63  ;;  %v5041_v15 = vmax.f32 %v5009_v16, 0.0 }
 0x21a   : > { %v4921_v41 = vpop.f32.mrf.mxu0  ;;  %v4423_v53 = vpop.f32.mrf.mxu1  ;;  %v5014_v0 = vadd.f32 %v9403_v50, %v4975_v18 }
 0x21b   : > { %6017 = vst [vmem:[%s9422_s20 + $0x58] sm:$0xff] %v5985_v62   ;;  %v4976_v38 = vadd.f32 %v6665_v19, %v4478_v59  ;;  %v4476_v1 = vadd.f32 %v4423_v53, %v3722_v26  ;;  %v5980_v28 = vpack.c.bf16 %v5041_v15, %v5040_v35  ;;  %v5012_v30 = vadd.f32 %v9403_v50, %v4973_v61 }
 0x21c   : > { %v6668_v2 = vpop.f32.mrf.mxu0  ;;  %v6620_v10 = vpop.f32.mrf.mxu1  ;;  %v5046_v14 = vmax.f32 %v5014_v0, 0.0 }
 0x21d   : > { %v5015_v20 = vadd.f32 %v9403_v50, %v4976_v38  ;;  %v4974_v23 = vadd.f32 %v4921_v41, %v4476_v1  ;;  %v4481_v47 = vadd.f32 %v6620_v10, %v9710_v22  ;;  %6016 = vst [vmem:[%s9422_s20 + $0x50] sm:$0xff] %v5980_v28   ;;  %v5044_v46 = vmax.f32 %v5012_v30, 0.0 }
 0x21e   : > { %v4934_v17 = vpop.f32.mrf.mxu0  ;;  %v4436_v45 = vpop.f32.mrf.mxu1 }
 0x21f   : > { %v5047_v56 = vmax.f32 %v5015_v20, 0.0  ;;  %v5013_v31 = vadd.f32 %v9403_v50, %v4974_v23  ;;  %v4479_v29 = vadd.f32 %v4436_v45, %v9711_v54  ;;  %v4979_v8 = vadd.f32 %v6668_v2, %v4481_v47 }
 0x220   : > { %v6621_v9 = vpop.f32.mrf.mxu1  ;;  %v6669_v32 = vpop.f32.mrf.mxu0 }
 0x221   : > { %v5995_v39 = vpack.c.bf16 %v5047_v56, %v5046_v14  ;;  %v5045_v48 = vmax.f32 %v5013_v31, 0.0  ;;  %v4977_v25 = vadd.f32 %v4934_v17, %v4479_v29  ;;  %v4482_v40 = vadd.f32 %v6621_v9, %v3728_v3 }
 0x222   : > { %v4439_v24 = vpop.f32.mrf.mxu1  ;;  %v5018_v58 = vadd.f32 %v9403_v50, %v4979_v8  ;;  %v4937_v37 = vpop.f32.mrf.mxu0 }
 0x223   : > { %6019 = vst [vmem:[%s9422_s20 + $0x68] sm:$0xff] %v5995_v39   ;;  %v5990_v34 = vpack.c.bf16 %v5045_v48, %v5044_v46  ;;  %v4480_v7 = vadd.f32 %v4439_v24, %v3726_v13  ;;  %v4980_v36 = vadd.f32 %v6669_v32, %v4482_v40  ;;  %v5016_v19 = vadd.f32 %v9403_v50, %v4977_v25 }
 0x224   : > { %v5050_v5 = vmax.f32 %v5018_v58, 0.0 }
 0x225   : > { %6018 = vst [vmem:[%s9422_s20 + $0x60] sm:$0xff] %v5990_v34   ;;  %v4978_v44 = vadd.f32 %v4937_v37, %v4480_v7  ;;  %v5019_v63 = vadd.f32 %v9403_v50, %v4980_v36  ;;  %v5048_v4 = vmax.f32 %v5016_v19, 0.0 }
 0x227   : > { %v5017_v11 = vadd.f32 %v9403_v50, %v4978_v44  ;;  %v5051_v49 = vmax.f32 %v5019_v63, 0.0 }
 0x229   : > { %v5049_v51 = vmax.f32 %v5017_v11, 0.0  ;;  %v6005_v18 = vpack.c.bf16 %v5051_v49, %v5050_v5 }
 0x22b   : > { %v6000_v21 = vpack.c.bf16 %v5049_v51, %v5048_v4  ;;  %6021 = vst [vmem:[%s9422_s20 + $0x78] sm:$0xff] %v6005_v18  }
 0x22d   : > { %6020 = vst [vmem:[%s9422_s20 + $0x70] sm:$0xff] %v6000_v21  }
 0x22e PF: > { %s13_s12 = sadd.s32 1, %s6830_s12  }
 0x22f   : > { %p10_p4 = scmp.ge.s32.totalorder %s13_s12, 6  }
 0x231   :  { %12 = sbr.rel (!%p10_p4) target bundleno = 1 (0x1), region = 72 }

// kernel: _lambda_.15
= control target key start
LH: loop header
LB: loop body
LE: loop exit
PB: predicated region body
PF: predicated region fallthrough
CT: control target
= control target key end

     0   :  { %s373_s9 = smov 0   ;;  %s400_s0 = inlined_call_operand.vmem [shape: bf16[4,64,128], index: 0, kind: input, shape index: {}, may-alias: {0,1}]   ;;  %s401_s1 = inlined_call_operand.vmem [shape: bf16[4,64,128], index: 1, kind: input, shape index: {}, may-alias: {0,1}]   ;;  %s402_s2 = inlined_call_operand.vmem [shape: f32[2,8,128], index: 2, kind: output, shape index: {}]  }
   0x1 LB: > { %s379_s10 = sadd.s32 4294967295, %s356_s9   ;;  %p294_p0 = scmp.ge.s32.totalorder %s356_s9, 1  ;;  %s356_s9 = sphi %s373_s9, %s12_s9  }
   0x2   : > { %p126_p1 = scmp.lt.s32.totalorder %s356_s9, 3 }
   0x4   : > { %p127_p2 = pnand %p294_p0, %p126_p1 }
   0x5   : > { %p153_p3 = scmp.lt.s32.totalorder (!%p127_p2), %s379_s10, 3  ;;  %s158_s11 = sadd.s32 (!%p127_p2), 2, %s379_s10 }
   0x6   : > { %130 = sbr.rel (%p127_p2) target bundleno = 38 (0x26), region = 28  ;;  %p159_p4 = scmp.lt.s32.totalorder (!%p127_p2), %s158_s11, 3 }
   0x7   : > { %p165_p5 = scmp.lt.s32.totalorder (!%p127_p2), %s379_s10, 1 }
   0xb   : > { %s154_s12 = scalar_select %p153_p3, %s379_s10, 3 }
   0xc   : > { %s404_s11 = smov (!%p159_p4, %s158_s11), 3  ;;  %s406_s10 = smov (!%p165_p5, %s379_s10), 1 }
   0xd   : > { %s302_s13 = sshll.u32 %s154_s12, 5  ;;  %s303_s17 = sshll.u32 %s404_s11, 5 }
   0xe   : > { %s157_s16 = scalar_lea.vmem %s400_s0, %s302_s13  ;;  %s163_s20 = scalar_lea.vmem %s401_s1, %s303_s17 }
   0xf   : > { %v305_v0 = vld [vmem:[%s157_s16] sm:$0xff]   ;;  %v336_v1 = vld [vmem:[%s157_s16 + $0x8] sm:$0xff]   ;;  %v337_v2 = vld [vmem:[%s157_s16 + $0x10] sm:$0xff]   ;;  %s299_s21 = sshll.u32 %s406_s10, 3 }
  0x10   : > { %v306_v3 = vunpack.c.l.bf16 %v305_v0  ;;  %v307_v4 = vunpack.c.h.bf16 %v305_v0  ;;  %v310_v5 = vunpack.c.l.bf16 %v336_v1  ;;  %v311_v6 = vunpack.c.h.bf16 %v336_v1  ;;  %v321_v7 = vld [vmem:[%s163_s20] sm:$0xff]   ;;  %v339_v8 = vld [vmem:[%s163_s20 + $0x8] sm:$0xff]   ;;  %v340_v10 = vld [vmem:[%s163_s20 + $0x10] sm:$0xff]   ;;  %s168_s24 = scalar_lea.vmem %s402_s2, %s299_s21 }
  0x11   : > { %v314_v9 = vunpack.c.l.bf16 %v337_v2  ;;  %v338_v11 = vld [vmem:[%s157_s16 + $0x18] sm:$0xff]   ;;  %v322_v12 = vunpack.c.l.bf16 %v321_v7  ;;  %v323_v13 = vunpack.c.h.bf16 %v321_v7  ;;  %v326_v14 = vunpack.c.l.bf16 %v339_v8 }
  0x12   : > { %v327_v15 = vunpack.c.h.bf16 %v339_v8  ;;  %v341_v16 = vld [vmem:[%s163_s20 + $0x18] sm:$0xff]   ;;  %v315_v17 = vunpack.c.h.bf16 %v337_v2  ;;  %v330_v18 = vunpack.c.l.bf16 %v340_v10  ;;  %v331_v19 = vunpack.c.h.bf16 %v340_v10 }
  0x13   : > { %v201_v20 = vsub.f32 %v306_v3, %v322_v12  ;;  %v202_v21 = vsub.f32 %v307_v4, %v323_v13  ;;  %v203_v22 = vsub.f32 %v310_v5, %v326_v14  ;;  %v318_v24 = vunpack.c.l.bf16 %v338_v11 }
  0x14   : > { %v204_v23 = vsub.f32 %v311_v6, %v327_v15  ;;  %v334_v25 = vunpack.c.l.bf16 %v341_v16  ;;  %v205_v26 = vsub.f32 %v314_v9, %v330_v18  ;;  %v319_v30 = vunpack.c.h.bf16 %v338_v11 }
  0x15   : > { %v209_v27 = vmul.f32 %v201_v20, %v201_v20  ;;  %v210_v28 = vmul.f32 %v202_v21, %v202_v21  ;;  %v211_v29 = vmul.f32 %v203_v22, %v203_v22  ;;  %v335_v31 = vunpack.c.h.bf16 %v341_v16 }
  0x16   : > { %v206_v32 = vsub.f32 %v315_v17, %v331_v19  ;;  %v212_v33 = vmul.f32 %v204_v23, %v204_v23  ;;  %v207_v35 = vsub.f32 %v318_v24, %v334_v25  ;;  %v213_v36 = vmul.f32 %v205_v26, %v205_v26 }
  0x17   : > { %v217_v34 = vadd.f32 %v210_v28, %v209_v27  ;;  %v208_v38 = vsub.f32 %v319_v30, %v335_v31 }
  0x18   : > { %v214_v39 = vmul.f32 %v206_v32, %v206_v32  ;;  %v215_v41 = vmul.f32 %v207_v35, %v207_v35 }
  0x19   : > { %v218_v37 = vadd.f32 %v217_v34, %v211_v29  ;;  %v216_v43 = vmul.f32 %v208_v38, %v208_v38 }
  0x1b   : > { %v219_v40 = vadd.f32 %v218_v37, %v212_v33 }
  0x1d   : > { %v220_v42 = vadd.f32 %v219_v40, %v213_v36 }
  0x1f   : > { %v221_v44 = vadd.f32 %v220_v42, %v214_v39 }
  0x21   : > { %v222_v45 = vadd.f32 %v221_v44, %v215_v41 }
  0x23   : > { %v223_v46 = vadd.f32 %v222_v45, %v216_v43 }
  0x25   : > { %224 = vst [vmem:[%s168_s24] sm:$0xff] %v223_v46 }
  0x26 PF: > { %s12_s9 = sadd.s32 1, %s356_s9  }
  0x27   : > { %p9_p6 = scmp.ge.s32.totalorder %s12_s9, 4  }
  0x29   :  { %11 = sbr.rel (!%p9_p6) target bundleno = 1 (0x1), region = 61 }

// kernel: _lambda_.11
= control target key start
LH: loop header
LB: loop body
LE: loop exit
PB: predicated region body
PF: predicated region fallthrough
CT: control target
= control target key end

     0   :  { %s2979_s12 = smov 0   ;;  %s3359_s0 = inlined_call_operand.vmem [shape: bf16[4,4,9,9,128], index: 0, kind: input, shape index: {}]   ;;  %s3360_s1 = inlined_call_operand.vmem [shape: bf16[9,128,128], index: 1, kind: input, shape index: {}]   ;;  %s3361_s2 = inlined_call_operand.vmem [shape: f32[1,128], index: 2, kind: input, shape index: {}]   ;;  %s3362_s3 = inlined_call_operand.vmem [shape: bf16[4,64,128], index: 3, kind: output, shape index: {}]  }
   0x1 LB: > { %s2147_s13 = sadd.s32 4294967295, %s2957_s12   ;;  %p2151_p0 = scmp.ge.s32.totalorder %s2957_s12, 1  ;;  %s2957_s12 = sphi %s2979_s12, %s13_s12  }
   0x2   : > { %p137_p1 = scmp.lt.s32.totalorder %s2957_s12, 5 }
   0x4   : > { %p138_p2 = pnand %p2151_p0, %p137_p1 }
   0x6   : > { %141 = sbr.rel (%p138_p2) target bundleno = 381 (0x17d), region = 32 }
   0xb   : > { %v2855_v0 = vld [vmem:[%s3360_s1 + $0x78] sm:$0xff]   ;;  %p161_p3 = scmp.lt.s32.totalorder %s2147_s13, 3  ;;  %v2857_v2 = vld [vmem:[%s3360_s1 + $0x70] sm:$0xff]   ;;  %v2859_v4 = vld [vmem:[%s3360_s1 + $0x68] sm:$0xff]   ;;  %vm512_vm0 = vsmask.f32 3328 }
   0xc   : > { %v2856_v1 = vld [vmem:[%s3360_s1 + $0x38] sm:$0xff]   ;;  %2614 = vmatprep.subr.bf16.mxu0 %v2855_v0  ;;  %v2858_v3 = vld [vmem:[%s3360_s1 + $0x30] sm:$0xff]   ;;  %v2860_v5 = vld [vmem:[%s3360_s1 + $0x28] sm:$0xff]   ;;  %vm513_vm1 = vsmask.f32 7440 }
   0xd   : > { %2638 = vmatprep.subr.bf16.mxu1 %v2856_v1  ;;  %2615 = vmatpush3.bf16.msra.mxu0 %v2855_v0  ;;  %s3372_s13 = smov (!%p161_p3, %s2147_s13), 3  ;;  %v2861_v6 = vld [vmem:[%s3360_s1 + $0x60] sm:$0xff]   ;;  %v2863_v8 = vld [vmem:[%s3360_s1 + $0x58] sm:$0xff]   ;;  %v2865_v10 = vld [vmem:[%s3360_s1 + $0x50] sm:$0xff]  }
   0xe   : > { %2639 = vmatpush3.bf16.msra.mxu1 %v2856_v1  ;;  %2616 = vmatprep.subr.bf16.mxu0 %v2857_v2  ;;  %v2862_v7 = vld [vmem:[%s3360_s1 + $0x20] sm:$0xff]   ;;  %s2846_s30 = smul.u32 288, %s3372_s13  ;;  %v2864_v9 = vld [vmem:[%s3360_s1 + $0x18] sm:$0xff]   ;;  %v2866_v11 = vld [vmem:[%s3360_s1 + $0x10] sm:$0xff]   ;;  %s2474_s18 = sshll.u32 %s3372_s13, 5 }
   0xf   : > { %2640 = vmatprep.subr.bf16.mxu1 %v2858_v3  ;;  %v2867_v14 = vld [vmem:[%s3360_s1 + $0x48] sm:$0xff]   ;;  %v2869_v16 = vld [vmem:[%s3360_s1 + $0x40] sm:$0xff]   ;;  %v2875_v19 = vld [vmem:[%s3360_s1 + $0xb8] sm:$0xff]   ;;  %s170_s21 = scalar_lea.vmem %s3362_s3, %s2474_s18 }
  0x10   : > { %s3023_s10 = scalar_lea.vmem %s3359_s0, %s2846_s30  ;;  %v2868_v15 = vld [vmem:[%s3360_s1 + $0x8] sm:$0xff]   ;;  %v2870_v17 = vld [vmem:[%s3360_s1] sm:$0xff]   ;;  %v2876_v20 = vld [vmem:[%s3360_s1 + $0xf8] sm:$0xff]  }
  0x11   : > { %2617 = vmatpush3.bf16.msra.mxu0 %v2857_v2  ;;  %v2871_v12 = vld [vmem:[%s3023_s10 + $0x48] ss:$8 sps:$4 sm:$0xff]   ;;  %v2873_v18 = vld [vmem:[%s3023_s10 + $0x58] ss:$8 sps:$4 sm:$0xff]   ;;  %v497_v33 = vld [vmem:[%s3023_s10 + $0x4] sm:$0x1] }
  0x12   : > { %2641 = vmatpush3.bf16.msra.mxu1 %v2858_v3  ;;  %2618 = vmatprep.subr.bf16.mxu0 %v2859_v4  ;;  %v2872_v13 = vld [vmem:[%s3023_s10] ss:$8 sps:$4 sm:$0xff]   ;;  %v2874_v21 = vld [vmem:[%s3023_s10 + $0x10] ss:$8 sps:$4 sm:$0xff]   ;;  %v499_v35 = vld [vmem:[%s3023_s10 + $0xc] sm:$0x1] }
  0x13   : > { %2642 = vmatprep.subr.bf16.mxu1 %v2860_v5  ;;  %2630 = vmatprep.mubr.bf16.mxu0 %v2871_v12  ;;  %v2877_v22 = vld [vmem:[%s3360_s1 + $0xb0] sm:$0xff]   ;;  %v2886_v25 = vld [vmem:[%s3023_s10 + $0x20] ss:$8 sps:$4 sm:$0xff]   ;;  %v2883_v36 = vld [vmem:[%s3360_s1 + $0x98] sm:$0xff]   ;;  %v525_v39 = vshll.u32 %v497_v33, 16  ;;  %v539_v42 = vshll.u32 %v499_v35, 16 }
  0x14   : > { %2654 = vmatprep.mubr.bf16.mxu1 %v2872_v13  ;;  %v2878_v23 = vld [vmem:[%s3360_s1 + $0xf0] sm:$0xff]   ;;  %v2879_v26 = vld [vmem:[%s3360_s1 + $0xa8] sm:$0xff]   ;;  %v2881_v28 = vld [vmem:[%s3360_s1 + $0xa0] sm:$0xff]  }
  0x15   : > { %2619 = vmatpush3.bf16.msra.mxu0 %v2859_v4  ;;  %v2885_v24 = vld [vmem:[%s3023_s10 + $0x68] ss:$8 sps:$4 sm:$0xff]   ;;  %v2887_v29 = vld [vmem:[%s3023_s10 + $0x78] ss:$8 sps:$4 sm:$0xff]   ;;  %v527_v49 = vrot.slane %v525_v39, 5  ;;  %vm3095_vm2 = vmor %vm512_vm0, %vm513_vm1  ;;  %v541_v61 = vrot.slane %v539_v42, 5 }
  0x16   : > { %2643 = vmatpush3.bf16.msra.mxu1 %v2860_v5  ;;  %2620 = vmatprep.subr.bf16.mxu0 %v2861_v6  ;;  %v2880_v27 = vld [vmem:[%s3360_s1 + $0xe8] sm:$0xff]   ;;  %v2882_v30 = vld [vmem:[%s3360_s1 + $0xe0] sm:$0xff]   ;;  %v2888_v31 = vld [vmem:[%s3023_s10 + $0x30] ss:$8 sps:$4 sm:$0xff]  }
  0x17   : > { %2644 = vmatprep.subr.bf16.mxu1 %v2862_v7  ;;  %v496_v32 = vld [vmem:[%s3023_s10] sm:$0xf]  ;;  %v498_v34 = vld [vmem:[%s3023_s10 + $0x8] sm:$0xf]  ;;  %v2895_v43 = vld [vmem:[%s3023_s10 + $0x90] ss:$8 sps:$4 sm:$0xff]  }
  0x18   : > { %v516_v37 = vshrl.u32 %v496_v32, 16  ;;  %v519_v38 = vshll.u32 %v496_v32, 16  ;;  %v530_v40 = vshrl.u32 %v498_v34, 16  ;;  %v533_v41 = vshll.u32 %v498_v34, 16  ;;  %v2884_v44 = vld [vmem:[%s3360_s1 + $0xd8] sm:$0xff]   ;;  %v2889_v58 = vld [vmem:[%s3360_s1 + $0x90] sm:$0xff]  }
  0x19   : > { %2621 = vmatpush3.bf16.msra.mxu0 %v2861_v6  ;;  %v500_v48 = vld [vmem:[%s3023_s10 + $0x10] sm:$0xf]  ;;  %v501_v51 = vld [vmem:[%s3023_s10 + $0x14] sm:$0x1]  ;;  %v502_v52 = vld [vmem:[%s3023_s10 + $0x18] sm:$0xf] }
  0x1a   : > { %2645 = vmatpush3.bf16.msra.mxu1 %v2862_v7  ;;  %2622 = vmatprep.subr.bf16.mxu0 %v2863_v8  ;;  %v518_v45 = vrot.slane %v516_v37, 4  ;;  %v521_v46 = vrot.slane %v519_v38, 5  ;;  %v532_v47 = vrot.slane %v530_v40, 4  ;;  %v535_v50 = vrot.slane %v533_v41, 5  ;;  %v503_v54 = vld [vmem:[%s3023_s10 + $0x1c] sm:$0x1] }
  0x1b   : > { %2646 = vmatprep.subr.bf16.mxu1 %v2864_v9  ;;  %v544_v55 = vshrl.u32 %v500_v48, 16  ;;  %v547_v56 = vshll.u32 %v500_v48, 16  ;;  %v553_v57 = vshll.u32 %v501_v51, 16  ;;  %v558_v62 = vshrl.u32 %v502_v52, 16  ;;  %v2890_v4 = vld [vmem:[%s3360_s1 + $0xd0] sm:$0xff]   ;;  %v2897_v51 = vld [vmem:[%s3360_s1 + $0x138] sm:$0xff]  }
  0x1c   : > { %v522_v53 = vor.u32 %v521_v46, %v518_v45  ;;  %v536_v60 = vor.u32 %v535_v50, %v532_v47  ;;  %v561_v63 = vshll.u32 %v502_v52, 16  ;;  %v567_v3 = vshll.u32 %v503_v54, 16  ;;  %v510_v40 = vld [vmem:[%s3023_s10 + $0x38] sm:$0xf] }
  0x1d   : > { %2623 = vmatpush3.bf16.msra.mxu0 %v2863_v8  ;;  %v546_v1 = vrot.slane %v544_v55, 4  ;;  %v549_v2 = vrot.slane %v547_v56, 5  ;;  %v3102_v6 = vrot.slane %v553_v57, 5  ;;  %v560_v7 = vrot.slane %v558_v62, 4  ;;  %v2898_v55 = vld [vmem:[%s3360_s1 + $0x178] sm:$0xff]  }
  0x1e   : > { %2647 = vmatpush3.bf16.msra.mxu1 %v2864_v9  ;;  %2624 = vmatprep.subr.bf16.mxu0 %v2865_v10  ;;  %v523_v0 = vrot.slane %v522_v53, 4  ;;  %v537_v5 = vrot.slane %v536_v60, 4  ;;  %v563_v8 = vrot.slane %v561_v63, 5  ;;  %v2891_v9 = vld [vmem:[%s3360_s1 + $0x88] sm:$0xff]   ;;  %v617_v50 = vshll.u32 %v510_v40, 16 }
  0x1f   : > { %2648 = vmatprep.subr.bf16.mxu1 %v2866_v11 }
  0x20   : > { %v542_v12 = vsel %vm3095_vm2, %v537_v5, %v541_v61  ;;  %v564_v13 = vor.u32 %v563_v8, %v560_v7  ;;  %v2896_v61 = vld [vmem:[%s3023_s10 + $0xa0] ss:$8 sps:$4 sm:$0xff]   ;;  %v2900_v7 = vld [vmem:[%s3360_s1 + $0x170] sm:$0xff]  }
  0x21   : > { %2625 = vmatpush3.bf16.msra.mxu0 %v2865_v10  ;;  %v528_v10 = vsel %vm3095_vm2, %v523_v0, %v527_v49  ;;  %v614_v49 = vshrl.u32 %v510_v40, 16  ;;  %v2308_v40 = vld [vmem:[%s3023_s10 + $0xa4] sm:$0x1] }
  0x22   : > { %2649 = vmatpush3.bf16.msra.mxu1 %v2866_v11  ;;  %2626 = vmatprep.subr.bf16.mxu0 %v2867_v14  ;;  %v550_v11 = vor.u32 %v549_v2, %v546_v1 }
  0x23   : > { %2650 = vmatprep.subr.bf16.mxu1 %v2868_v15  ;;  %v616_v57 = vrot.slane %v614_v49, 4 }
  0x25   : > { %2627 = vmatpush3.bf16.msra.mxu0 %v2867_v14  ;;  %v2219_v14 = vcombine.low %v528_v10, %v542_v12  ;;  %v2901_v10 = vld [vmem:[%s3360_s1 + $0x128] sm:$0xff]  }
  0x26   : > { %2651 = vmatpush3.bf16.msra.mxu1 %v2868_v15  ;;  %2628 = vmatprep.subr.bf16.mxu0 %v2869_v16  ;;  %v551_v15 = vrot.slane %v550_v11, 4 }
  0x27   : > { %2652 = vmatprep.subr.bf16.mxu1 %v2870_v17 }
  0x29   : > { %2629 = vmatpush3.bf16.msra.mxu0 %v2869_v16  ;;  %v569_v16 = vrot.slane %v567_v3, 5 }
  0x2a   : > { %2653 = vmatpush3.bf16.msra.mxu1 %v2870_v17  ;;  %2662 = vmatprep.subr.bf16.mxu0 %v2875_v19  ;;  %v2892_v17 = vld [vmem:[%s3360_s1 + $0xc8] sm:$0xff]  }
  0x2b   : > { %2686 = vmatprep.subr.bf16.mxu1 %v2876_v20 }
  0x2c   : > { %2631 = vmatmul.mubr.bf16.vlgmr.msra.gmra.mxu0 %v2873_v18  ;;  %v565_v18 = vrot.slane %v564_v13, 4  ;;  %v2902_v13 = vld [vmem:[%s3360_s1 + $0x168] sm:$0xff]  }
  0x2d   : > { %2655 = vmatmul.mubr.bf16.vlgmr.msra.gmra.mxu1 %v2874_v21  ;;  %2663 = vmatpush3.bf16.msra.mxu0 %v2875_v19  ;;  %v504_v19 = vld [vmem:[%s3023_s10 + $0x20] sm:$0xf]  ;;  %v506_v21 = vld [vmem:[%s3023_s10 + $0x28] sm:$0xf] }
  0x2e   : > { %2687 = vmatpush3.bf16.msra.mxu1 %v2876_v20  ;;  %2664 = vmatprep.subr.bf16.mxu0 %v2877_v22  ;;  %v505_v20 = vld [vmem:[%s3023_s10 + $0x24] sm:$0x1]  ;;  %v570_v32 = vsel %vm3095_vm2, %v565_v18, %v569_v16  ;;  %v2907_v18 = vld [vmem:[%s3360_s1 + $0x118] sm:$0xff]  }
  0x2f   : > { %2688 = vmatprep.subr.bf16.mxu1 %v2878_v23  ;;  %2634 = vmatprep.mubr.bf16.mxu0 %v2885_v24  ;;  %v575_v24 = vshll.u32 %v504_v19, 16  ;;  %v2905_v16 = vld [vmem:[%s3360_s1 + $0x120] sm:$0xff]  }
  0x30   : > { %2658 = vmatprep.mubr.bf16.mxu1 %v2886_v25  ;;  %v2893_v25 = vld [vmem:[%s3360_s1 + $0x80] sm:$0xff]  }
  0x31   : > { %2665 = vmatpush3.bf16.msra.mxu0 %v2877_v22  ;;  %v507_v22 = vld [vmem:[%s3023_s10 + $0x2c] sm:$0x1]  ;;  %v577_v34 = vrot.slane %v575_v24, 5 }
  0x32   : > { %2689 = vmatpush3.bf16.msra.mxu1 %v2878_v23  ;;  %2666 = vmatprep.subr.bf16.mxu0 %v2879_v26  ;;  %v572_v23 = vshrl.u32 %v504_v19, 16  ;;  %v595_v35 = vshll.u32 %v507_v22, 16  ;;  %v2915_v19 = vld [vmem:[%s3023_s10 + $0xd8] ss:$8 sps:$4 sm:$0xff]  }
  0x33   : > { %2690 = vmatprep.subr.bf16.mxu1 %v2880_v27  ;;  %v2305_v22 = vld [vmem:[%s3023_s10 + $0x98] sm:$0xf] }
  0x34   : > { %2635 = vmatmul.mubr.bf16.gmra.mxu0 %v2887_v29  ;;  %v589_v29 = vshll.u32 %v506_v21, 16  ;;  %v574_v33 = vrot.slane %v572_v23, 4  ;;  %v2306_v23 = vld [vmem:[%s3023_s10 + $0x9c] sm:$0x1] }
  0x35   : > { %2667 = vmatpush3.bf16.msra.mxu0 %v2879_v26  ;;  %2659 = vmatmul.mubr.bf16.gmra.mxu1 %v2888_v31  ;;  %v556_v26 = vsel %vm3095_vm2, %v551_v15, %v3102_v6  ;;  %v2894_v31 = vld [vmem:[%s3360_s1 + $0xc0] sm:$0xff]   ;;  %v2903_v6 = vld [vmem:[%s3023_s10 + $0xb0] ss:$8 sps:$4 sm:$0xff]  }
  0x36   : > { %2691 = vmatpush3.bf16.msra.mxu1 %v2880_v27  ;;  %2668 = vmatprep.subr.bf16.mxu0 %v2881_v28  ;;  %v581_v27 = vshll.u32 %v505_v20, 16  ;;  %v591_v39 = vrot.slane %v589_v29, 5  ;;  %v578_v42 = vor.u32 %v577_v34, %v574_v33  ;;  %v2220_v60 = vcombine.low %v556_v26, %v570_v32  ;;  %v2904_v15 = vld [vmem:[%s3023_s10 + $0xc0] ss:$8 sps:$4 sm:$0xff]   ;;  %v2303_v20 = vld [vmem:[%s3023_s10 + $0x90] sm:$0xf] }
  0x37   : > { %2692 = vmatprep.subr.bf16.mxu1 %v2882_v30  ;;  %2702 = vmatprep.mubr.bf16.mxu1 %v2895_v43  ;;  %v597_v43 = vrot.slane %v595_v35, 5  ;;  %v1140_v24 = vshrl.u32 %v2303_v20, 16  ;;  %v1163_v29 = vshll.u32 %v2306_v23, 16  ;;  %v2909_v33 = vld [vmem:[%s3360_s1 + $0x110] sm:$0xff]   ;;  %v2315_v23 = vld [vmem:[%s3023_s10 + $0xc0] sm:$0xf] }
  0x38   : > { %2678 = vmatprep.mubr.bf16.mxu0 %v2219_v14  ;;  %v583_v37 = vrot.slane %v581_v27, 5  ;;  %v579_v52 = vrot.slane %v578_v42, 4  ;;  %v1154_v27 = vshrl.u32 %v2305_v22, 16  ;;  %v2310_v42 = vld [vmem:[%s3023_s10 + $0xac] sm:$0x1] }
  0x39   : > { %2669 = vmatpush3.bf16.msra.mxu0 %v2881_v28  ;;  %v586_v28 = vshrl.u32 %v506_v21, 16  ;;  %v2304_v21 = vld [vmem:[%s3023_s10 + $0x94] sm:$0x1] }
  0x3a   : > { %2693 = vmatpush3.bf16.msra.mxu1 %v2882_v30  ;;  %2670 = vmatprep.subr.bf16.mxu0 %v2883_v36  ;;  %v508_v30 = vld [vmem:[%s3023_s10 + $0x30] sm:$0xf]  ;;  %v584_v62 = vsel %vm3095_vm2, %v579_v52, %v583_v37  ;;  %v1149_v26 = vshll.u32 %v2304_v21, 16  ;;  %v1156_v35 = vrot.slane %v1154_v27, 4  ;;  %v1165_v37 = vrot.slane %v1163_v29, 5 }
  0x3b   : > { %2694 = vmatprep.subr.bf16.mxu1 %v2884_v44  ;;  %v588_v38 = vrot.slane %v586_v28, 4  ;;  %v600_v41 = vshrl.u32 %v508_v30, 16  ;;  %v603_v45 = vshll.u32 %v508_v30, 16  ;;  %v1157_v28 = vshll.u32 %v2305_v22, 16  ;;  %v2908_v30 = vld [vmem:[%s3360_s1 + $0x158] sm:$0xff]  }
  0x3c   : > { %v1151_v34 = vrot.slane %v1149_v26, 5  ;;  %v2317_v29 = vld [vmem:[%s3023_s10 + $0xc8] sm:$0xf] }
  0x3d   : > { %2671 = vmatpush3.bf16.msra.mxu0 %v2883_v36  ;;  %v509_v36 = vld [vmem:[%s3023_s10 + $0x34] sm:$0x1]  ;;  %v592_v47 = vor.u32 %v591_v39, %v588_v38  ;;  %v602_v48 = vrot.slane %v600_v41, 4  ;;  %v605_v53 = vrot.slane %v603_v45, 5  ;;  %v2307_v38 = vld [vmem:[%s3023_s10 + $0xa0] sm:$0xf] }
  0x3e   : > { %2695 = vmatpush3.bf16.msra.mxu1 %v2884_v44  ;;  %2672 = vmatprep.subr.bf16.mxu0 %v2889_v58  ;;  %v511_v44 = vld [vmem:[%s3023_s10 + $0x3c] sm:$0x1]  ;;  %v609_v46 = vshll.u32 %v509_v36, 16  ;;  %v1159_v36 = vrot.slane %v1157_v28, 5  ;;  %v2309_v41 = vld [vmem:[%s3023_s10 + $0xa8] sm:$0xf] }
  0x3f   : > { %2696 = vmatprep.subr.bf16.mxu1 %v2890_v4  ;;  %v623_v54 = vshll.u32 %v511_v44, 16  ;;  %v593_v56 = vrot.slane %v592_v47, 4  ;;  %v606_v63 = vor.u32 %v605_v53, %v602_v48  ;;  %v1168_v45 = vshrl.u32 %v2307_v38, 16 }
  0x40   : > { %v611_v1 = vrot.slane %v609_v46, 5  ;;  %v1160_v44 = vor.u32 %v1159_v36, %v1156_v35  ;;  %v1171_v46 = vshll.u32 %v2307_v38, 16  ;;  %v1177_v47 = vshll.u32 %v2308_v40, 16  ;;  %v2921_v35 = vld [vmem:[%s3023_s10 + $0xf8] ss:$8 sps:$4 sm:$0xff]   ;;  %v2919_v40 = vld [vmem:[%s3360_s1 + $0x1b0] sm:$0xff]  }
  0x41   : > { %2673 = vmatpush3.bf16.msra.mxu0 %v2889_v58  ;;  %v619_v58 = vrot.slane %v617_v50, 5  ;;  %v598_v0 = vsel %vm3095_vm2, %v593_v56, %v597_v43  ;;  %v625_v3 = vrot.slane %v623_v54, 5  ;;  %v607_v5 = vrot.slane %v606_v63, 4  ;;  %v2910_v43 = vld [vmem:[%s3360_s1 + $0x150] sm:$0xff]  }
  0x42   : > { %2697 = vmatpush3.bf16.msra.mxu1 %v2890_v4  ;;  %2674 = vmatprep.subr.bf16.mxu0 %v2891_v9  ;;  %v2899_v4 = vld [vmem:[%s3360_s1 + $0x130] sm:$0xff]   ;;  %v2221_v8 = vcombine.low %v584_v62, %v598_v0  ;;  %v1182_v49 = vshrl.u32 %v2309_v41, 16  ;;  %v1185_v50 = vshll.u32 %v2309_v41, 16  ;;  %v1161_v52 = vrot.slane %v1160_v44, 4 }
  0x43   : > { %2698 = vmatprep.subr.bf16.mxu1 %v2892_v17  ;;  %v620_v2 = vor.u32 %v619_v58, %v616_v57  ;;  %v612_v11 = vsel %vm3095_vm2, %v607_v5, %v611_v1  ;;  %v1170_v53 = vrot.slane %v1168_v45, 4  ;;  %v1173_v54 = vrot.slane %v1171_v46, 5  ;;  %v2920_v45 = vld [vmem:[%s3360_s1 + $0x1f0] sm:$0xff]  }
  0x44   : > { %v1184_v57 = vrot.slane %v1182_v49, 4  ;;  %v1187_v58 = vrot.slane %v1185_v50, 5  ;;  %v1179_v0 = vrot.slane %v1177_v47, 5  ;;  %v1238_v38 = vshrl.u32 %v2317_v29, 16 }
  0x45   : > { %2675 = vmatpush3.bf16.msra.mxu0 %v2891_v9  ;;  %v621_v9 = vrot.slane %v620_v2, 4  ;;  %v1174_v62 = vor.u32 %v1173_v54, %v1170_v53 }
  0x46   : > { %2699 = vmatpush3.bf16.msra.mxu1 %v2892_v17  ;;  %2676 = vmatprep.subr.bf16.mxu0 %v2893_v25  ;;  %v2906_v17 = vld [vmem:[%s3360_s1 + $0x160] sm:$0xff]   ;;  %v1188_v1 = vor.u32 %v1187_v58, %v1184_v57  ;;  %v1240_v47 = vrot.slane %v1238_v38, 4  ;;  %v2924_v58 = vld [vmem:[%s3360_s1 + $0x1e8] sm:$0xff]   ;;  %v2940_v38 = vld [vmem:[%s3360_s1 + $0x230] sm:$0xff]  }
  0x47   : > { %2700 = vmatprep.subr.bf16.mxu1 %v2894_v31  ;;  %v626_v12 = vsel %vm3095_vm2, %v621_v9, %v625_v3  ;;  %v1175_v3 = vrot.slane %v1174_v62, 4  ;;  %v2917_v9 = vld [vmem:[%s3360_s1 + $0x1b8] sm:$0xff]   ;;  %v2922_v62 = vld [vmem:[%s3023_s10 + $0x108] ss:$8 sps:$4 sm:$0xff]  }
  0x48   : > { %v2222_v14 = vcombine.low %v612_v11, %v626_v12  ;;  %v1189_v5 = vrot.slane %v1188_v1, 4  ;;  %v2312_v11 = vld [vmem:[%s3023_s10 + $0xb4] sm:$0x1]  ;;  %v2313_v12 = vld [vmem:[%s3023_s10 + $0xb8] sm:$0xf] }
  0x49   : > { %2677 = vmatpush3.bf16.msra.mxu0 %v2893_v25  ;;  %v1143_v25 = vshll.u32 %v2303_v20, 16  ;;  %v1213_v21 = vshll.u32 %v2313_v12, 16 }
  0x4a   : > { %2701 = vmatpush3.bf16.msra.mxu1 %v2894_v31  ;;  %2710 = vmatprep.subr.bf16.mxu0 %v2897_v51  ;;  %v1142_v31 = vrot.slane %v1140_v24, 4  ;;  %v2316_v24 = vld [vmem:[%s3023_s10 + $0xc4] sm:$0x1] }
  0x4b   : > { %2734 = vmatprep.subr.bf16.mxu1 %v2898_v55  ;;  %v1145_v32 = vrot.slane %v1143_v25, 5 }
  0x4c   : > { %2679 = vmatmul.mubr.bf16.vlgmr.msra.gmra.mxu0 %v2220_v60  ;;  %v2912_v60 = vld [vmem:[%s3360_s1 + $0x148] sm:$0xff]  }
  0x4d   : > { %2703 = vmatmul.mubr.bf16.vlgmr.msra.gmra.mxu1 %v2896_v61  ;;  %2711 = vmatpush3.bf16.msra.mxu0 %v2897_v51  ;;  %v1146_v39 = vor.u32 %v1145_v32, %v1142_v31  ;;  %v1191_v51 = vshll.u32 %v2310_v42, 16  ;;  %v1166_v61 = vsel %vm3095_vm2, %v1161_v52, %v1165_v37  ;;  %v2318_v32 = vld [vmem:[%s3023_s10 + $0xcc] sm:$0x1]  ;;  %v1233_v37 = vshll.u32 %v2316_v24, 16  ;;  %v2427_v24 = vld [vmem:[%s3023_s10 + $0x28] sm:$0xf] }
  0x4e   : > { %2735 = vmatpush3.bf16.msra.mxu1 %v2898_v55  ;;  %2712 = vmatprep.subr.bf16.mxu0 %v2899_v4  ;;  %v2911_v55 = vld [vmem:[%s3360_s1 + $0x108] sm:$0xff]   ;;  %v1247_v44 = vshll.u32 %v2318_v32, 16  ;;  %v2430_v32 = vld [vmem:[%s3023_s10 + $0x34] sm:$0x1] }
  0x4f   : > { %2736 = vmatprep.subr.bf16.mxu1 %v2900_v7  ;;  %2682 = vmatprep.mubr.bf16.mxu0 %v2221_v8  ;;  %v1147_v48 = vrot.slane %v1146_v39, 4  ;;  %v1193_v2 = vrot.slane %v1191_v51, 5  ;;  %v1241_v39 = vshll.u32 %v2317_v29, 16  ;;  %v1235_v51 = vrot.slane %v1233_v37, 5 }
  0x50   : > { %2706 = vmatprep.mubr.bf16.mxu1 %v2903_v6  ;;  %v2914_v6 = vld [vmem:[%s3360_s1 + $0x140] sm:$0xff]   ;;  %v1249_v54 = vrot.slane %v1247_v44, 5  ;;  %v1823_v37 = vshll.u32 %v2427_v24, 16 }
  0x51   : > { %2713 = vmatpush3.bf16.msra.mxu0 %v2899_v4  ;;  %v1152_v56 = vsel %vm3095_vm2, %v1147_v48, %v1151_v34  ;;  %v2913_v4 = vld [vmem:[%s3360_s1 + $0x100] sm:$0xff]   ;;  %v1194_v8 = vsel %vm3095_vm2, %v1189_v5, %v1193_v2  ;;  %v1227_v34 = vshll.u32 %v2315_v23, 16  ;;  %v1243_v48 = vrot.slane %v1241_v39, 5  ;;  %v2935_v5 = vld [vmem:[%s3023_s10 + $0x8] ss:$8 sps:$4 sm:$0xff]  }
  0x52   : > { %2737 = vmatpush3.bf16.msra.mxu1 %v2900_v7  ;;  %2714 = vmatprep.subr.bf16.mxu0 %v2901_v10  ;;  %v2335_v63 = vcombine.low %v1152_v56, %v1166_v61  ;;  %v1180_v7 = vsel %vm3095_vm2, %v1175_v3, %v1179_v0  ;;  %v2925_v2 = vld [vmem:[%s3360_s1 + $0x1a0] sm:$0xff]  }
  0x53   : > { %2738 = vmatprep.subr.bf16.mxu1 %v2902_v13  ;;  %v2336_v20 = vcombine.low %v1180_v7, %v1194_v8  ;;  %v1244_v53 = vor.u32 %v1243_v48, %v1240_v47  ;;  %v2926_v3 = vld [vmem:[%s3360_s1 + $0x1e0] sm:$0xff]   ;;  %v2928_v7 = vld [vmem:[%s3360_s1 + $0x1d8] sm:$0xff]   ;;  %v2929_v8 = vld [vmem:[%s3360_s1 + $0x190] sm:$0xff]   ;;  %v1843_v47 = vshll.u32 %v2430_v32, 16 }
  0x54   : > { %2683 = vmatmul.mubr.bf16.gmra.mxu0 %v2222_v14  ;;  %v2314_v14 = vld [vmem:[%s3023_s10 + $0xbc] sm:$0x1]  ;;  %v2944_v48 = vld [vmem:[%s3023_s10 + $0x70] ss:$8 sps:$4 sm:$0xff]   ;;  %v2434_v32 = vld [vmem:[%s3023_s10 + $0x44] sm:$0x1] }
  0x55   : > { %2715 = vmatpush3.bf16.msra.mxu0 %v2901_v10  ;;  %2707 = vmatmul.mubr.bf16.gmra.mxu1 %v2904_v15  ;;  %v2311_v10 = vld [vmem:[%s3023_s10 + $0xb0] sm:$0xf]  ;;  %v1219_v22 = vshll.u32 %v2314_v14, 16  ;;  %v1245_v61 = vrot.slane %v1244_v53, 4  ;;  %v2939_v14 = vld [vmem:[%s3360_s1 + $0x238] sm:$0xff]  }
  0x56   : > { %2739 = vmatpush3.bf16.msra.mxu1 %v2902_v13  ;;  %2716 = vmatprep.subr.bf16.mxu0 %v2905_v16  ;;  %v2918_v13 = vld [vmem:[%s3360_s1 + $0x1f8] sm:$0xff]   ;;  %v1196_v15 = vshrl.u32 %v2311_v10, 16 }
  0x57   : > { %2740 = vmatprep.subr.bf16.mxu1 %v2906_v17  ;;  %2726 = vmatprep.mubr.bf16.mxu0 %v2915_v19  ;;  %v2916_v19 = vld [vmem:[%s3023_s10 + $0xe8] ss:$8 sps:$4 sm:$0xff]   ;;  %v1221_v31 = vrot.slane %v1219_v22, 5  ;;  %v1250_v0 = vsel %vm3095_vm2, %v1245_v61, %v1249_v54  ;;  %v2942_v61 = vld [vmem:[%s3023_s10 + $0x38] ss:$8 sps:$4 sm:$0xff]  }
  0x58   : > { %2750 = vmatprep.mubr.bf16.mxu1 %v2335_v63  ;;  %v1198_v25 = vrot.slane %v1196_v15, 4  ;;  %v2419_v15 = vld [vmem:[%s3023_s10 + $0x8] sm:$0xf] }
  0x59   : > { %2717 = vmatpush3.bf16.msra.mxu0 %v2905_v16  ;;  %v1199_v16 = vshll.u32 %v2311_v10, 16  ;;  %v2931_v10 = vld [vmem:[%s3360_s1 + $0x188] sm:$0xff]  }
  0x5a   : > { %2741 = vmatpush3.bf16.msra.mxu1 %v2906_v17  ;;  %2718 = vmatprep.subr.bf16.mxu0 %v2907_v18  ;;  %v1205_v17 = vshll.u32 %v2312_v11, 16  ;;  %v2932_v11 = vld [vmem:[%s3360_s1 + $0x1c8] sm:$0xff]  }
  0x5b   : > { %2742 = vmatprep.subr.bf16.mxu1 %v2908_v30  ;;  %v1201_v26 = vrot.slane %v1199_v16, 5  ;;  %v2420_v16 = vld [vmem:[%s3023_s10 + $0xc] sm:$0x1] }
  0x5c   : > { %v1207_v27 = vrot.slane %v1205_v17, 5  ;;  %v2421_v17 = vld [vmem:[%s3023_s10 + $0x10] sm:$0xf]  ;;  %v1773_v22 = vshll.u32 %v2420_v16, 16 }
  0x5d   : > { %2719 = vmatpush3.bf16.msra.mxu0 %v2907_v18  ;;  %v1210_v18 = vshrl.u32 %v2313_v12, 16  ;;  %v1202_v36 = vor.u32 %v1201_v26, %v1198_v25  ;;  %v2933_v12 = vld [vmem:[%s3360_s1 + $0x180] sm:$0xff]   ;;  %v1781_v25 = vshll.u32 %v2421_v17, 16  ;;  %v2428_v26 = vld [vmem:[%s3023_s10 + $0x2c] sm:$0x1] }
  0x5e   : > { %2743 = vmatpush3.bf16.msra.mxu1 %v2908_v30  ;;  %2720 = vmatprep.subr.bf16.mxu0 %v2909_v33  ;;  %v1215_v30 = vrot.slane %v1213_v21, 5  ;;  %v1767_v21 = vshll.u32 %v2419_v15, 16 }
  0x5f   : > { %2744 = vmatprep.subr.bf16.mxu1 %v2910_v43  ;;  %v1212_v28 = vrot.slane %v1210_v18, 4  ;;  %v1203_v46 = vrot.slane %v1202_v36, 4  ;;  %v2422_v18 = vld [vmem:[%s3023_s10 + $0x14] sm:$0x1]  ;;  %v1820_v36 = vshrl.u32 %v2427_v24, 16 }
  0x60   : > { %v1769_v29 = vrot.slane %v1767_v21, 5  ;;  %v2424_v21 = vld [vmem:[%s3023_s10 + $0x1c] sm:$0x1] }
  0x61   : > { %2721 = vmatpush3.bf16.msra.mxu0 %v2909_v33  ;;  %v1224_v33 = vshrl.u32 %v2315_v23, 16  ;;  %v1216_v41 = vor.u32 %v1215_v30, %v1212_v28  ;;  %v1208_v52 = vsel %vm3095_vm2, %v1203_v46, %v1207_v27  ;;  %v1778_v23 = vshrl.u32 %v2421_v17, 16  ;;  %v2429_v27 = vld [vmem:[%s3023_s10 + $0x30] sm:$0xf] }
  0x62   : > { %2745 = vmatpush3.bf16.msra.mxu1 %v2910_v43  ;;  %2722 = vmatprep.subr.bf16.mxu0 %v2911_v55  ;;  %v1229_v43 = vrot.slane %v1227_v34, 5  ;;  %v1775_v34 = vrot.slane %v1773_v22, 5  ;;  %v1825_v46 = vrot.slane %v1823_v37, 5  ;;  %v2949_v37 = vld [vmem:[%s3360_s1 + $0x208] sm:$0xff]  }
  0x63   : > { %2746 = vmatprep.subr.bf16.mxu1 %v2912_v60  ;;  %v1226_v42 = vrot.slane %v1224_v33, 4  ;;  %v1217_v49 = vrot.slane %v1216_v41, 4  ;;  %v1780_v30 = vrot.slane %v1778_v23, 4  ;;  %v2938_v33 = vld [vmem:[%s3023_s10 + $0x60] ss:$8 sps:$4 sm:$0xff]   ;;  %v1834_v41 = vshrl.u32 %v2429_v27, 16 }
  0x65   : > { %2723 = vmatpush3.bf16.msra.mxu0 %v2911_v55  ;;  %v1230_v50 = vor.u32 %v1229_v43, %v1226_v42  ;;  %v2923_v55 = vld [vmem:[%s3360_s1 + $0x1a8] sm:$0xff]   ;;  %v1222_v56 = vsel %vm3095_vm2, %v1217_v49, %v1221_v31  ;;  %v1787_v31 = vshll.u32 %v2422_v18, 16  ;;  %v1837_v42 = vshll.u32 %v2429_v27, 16 }
  0x66   : > { %2747 = vmatpush3.bf16.msra.mxu1 %v2912_v60  ;;  %2724 = vmatprep.subr.bf16.mxu0 %v2913_v4  ;;  %v2337_v60 = vcombine.low %v1208_v52, %v1222_v56  ;;  %v2941_v43 = vld [vmem:[%s3023_s10 + $0x28] ss:$8 sps:$4 sm:$0xff]  }
  0x67   : > { %2748 = vmatprep.subr.bf16.mxu1 %v2914_v6  ;;  %v1231_v57 = vrot.slane %v1230_v50, 4  ;;  %v1789_v50 = vrot.slane %v1787_v31, 5  ;;  %v1839_v52 = vrot.slane %v1837_v42, 5  ;;  %v2943_v56 = vld [vmem:[%s3360_s1 + $0x228] sm:$0xff]   ;;  %v2432_v31 = vld [vmem:[%s3023_s10 + $0x3c] sm:$0x1] }
  0x69   : > { %2725 = vmatpush3.bf16.msra.mxu0 %v2913_v4  ;;  %v1236_v63 = vsel %vm3095_vm2, %v1231_v57, %v1235_v51  ;;  %v2927_v4 = vld [vmem:[%s3360_s1 + $0x198] sm:$0xff]   ;;  %v1836_v51 = vrot.slane %v1834_v41, 4  ;;  %v1871_v41 = vshll.u32 %v2434_v32, 16 }
  0x6a   : > { %2749 = vmatpush3.bf16.msra.mxu1 %v2914_v6  ;;  %2758 = vmatprep.subr.bf16.mxu0 %v2917_v9  ;;  %v2338_v1 = vcombine.low %v1236_v63, %v1250_v0  ;;  %v2936_v6 = vld [vmem:[%s3023_s10 + $0x50] ss:$8 sps:$4 sm:$0xff]  }
  0x6b   : > { %2782 = vmatprep.subr.bf16.mxu1 %v2918_v13  ;;  %v1840_v57 = vor.u32 %v1839_v52, %v1836_v51 }
  0x6c   : > { %2727 = vmatmul.mubr.bf16.vlgmr.msra.gmra.mxu0 %v2916_v19  ;;  %v2937_v19 = vld [vmem:[%s3023_s10 + $0x18] ss:$8 sps:$4 sm:$0xff]  }
  0x6d   : > { %2751 = vmatmul.mubr.bf16.vlgmr.msra.gmra.mxu1 %v2336_v20  ;;  %2759 = vmatpush3.bf16.msra.mxu0 %v2917_v9  ;;  %v2930_v9 = vld [vmem:[%s3360_s1 + $0x1d0] sm:$0xff]   ;;  %v1764_v20 = vshrl.u32 %v2419_v15, 16  ;;  %v1841_v0 = vrot.slane %v1840_v57, 4  ;;  %v2947_v15 = vld [vmem:[%s3360_s1 + $0x218] sm:$0xff]  }
  0x6e   : > { %2783 = vmatpush3.bf16.msra.mxu1 %v2918_v13  ;;  %2760 = vmatprep.subr.bf16.mxu0 %v2919_v40  ;;  %v2934_v13 = vld [vmem:[%s3360_s1 + $0x1c0] sm:$0xff]  }
  0x6f   : > { %2784 = vmatprep.subr.bf16.mxu1 %v2920_v45  ;;  %2730 = vmatprep.mubr.bf16.mxu0 %v2921_v35  ;;  %v1766_v28 = vrot.slane %v1764_v20, 4  ;;  %v1783_v35 = vrot.slane %v1781_v25, 5  ;;  %v2948_v20 = vld [vmem:[%s3360_s1 + $0x210] sm:$0xff]  }
  0x70   : > { %2754 = vmatprep.mubr.bf16.mxu1 %v2337_v60 }
  0x71   : > { %2761 = vmatpush3.bf16.msra.mxu0 %v2919_v40  ;;  %v1770_v39 = vor.u32 %v1769_v29, %v1766_v28  ;;  %v1829_v40 = vshll.u32 %v2428_v26, 16  ;;  %v1784_v44 = vor.u32 %v1783_v35, %v1780_v30  ;;  %v2426_v26 = vld [vmem:[%s3023_s10 + $0x24] sm:$0x1] }
  0x72   : > { %2785 = vmatpush3.bf16.msra.mxu1 %v2920_v45  ;;  %2762 = vmatprep.subr.bf16.mxu0 %v2923_v55  ;;  %v1822_v45 = vrot.slane %v1820_v36, 4  ;;  %v1815_v36 = vshll.u32 %v2426_v26, 16 }
  0x73   : > { %2786 = vmatprep.subr.bf16.mxu1 %v2924_v58  ;;  %v1771_v49 = vrot.slane %v1770_v39, 4  ;;  %v1785_v53 = vrot.slane %v1784_v44, 4  ;;  %v1857_v39 = vshll.u32 %v2432_v31, 16 }
  0x74   : > { %2731 = vmatmul.mubr.bf16.gmra.mxu0 %v2922_v62  ;;  %v1826_v54 = vor.u32 %v1825_v46, %v1822_v45  ;;  %v1817_v45 = vrot.slane %v1815_v36, 5  ;;  %v2950_v46 = vld [vmem:[%s3360_s1 + $0x200] sm:$0xff]  }
  0x75   : > { %2763 = vmatpush3.bf16.msra.mxu0 %v2923_v55  ;;  %2755 = vmatmul.mubr.bf16.gmra.mxu1 %v2338_v1  ;;  %v1831_v55 = vrot.slane %v1829_v40, 5  ;;  %v1776_v62 = vsel %vm3095_vm2, %v1771_v49, %v1775_v34  ;;  %v1790_v63 = vsel %vm3095_vm2, %v1785_v53, %v1789_v50  ;;  %v2945_v1 = vld [vmem:[%s3023_s10 + $0x80] ss:$8 sps:$4 sm:$0xff]   ;;  %v1801_v34 = vshll.u32 %v2424_v21, 16 }
  0x76   : > { %2787 = vmatpush3.bf16.msra.mxu1 %v2924_v58  ;;  %2764 = vmatprep.subr.bf16.mxu0 %v2925_v2  ;;  %v1845_v58 = vrot.slane %v1843_v47, 5  ;;  %v1827_v60 = vrot.slane %v1826_v54, 4  ;;  %v1873_v50 = vrot.slane %v1871_v41, 5 }
  0x77   : > { %2788 = vmatprep.subr.bf16.mxu1 %v2926_v3  ;;  %2774 = vmatprep.mubr.bf16.mxu0 %v2935_v5  ;;  %v2423_v5 = vld [vmem:[%s3023_s10 + $0x18] sm:$0xf] }
  0x78   : > { %2798 = vmatprep.mubr.bf16.mxu1 %v2936_v6  ;;  %v2425_v6 = vld [vmem:[%s3023_s10 + $0x20] sm:$0xf] }
  0x79   : > { %2765 = vmatpush3.bf16.msra.mxu0 %v2925_v2  ;;  %v1832_v2 = vsel %vm3095_vm2, %v1827_v60, %v1831_v55 }
  0x7a   : > { %2789 = vmatpush3.bf16.msra.mxu1 %v2926_v3  ;;  %2766 = vmatprep.subr.bf16.mxu0 %v2927_v4  ;;  %v2946_v3 = vld [vmem:[%s3360_s1 + $0x220] sm:$0xff]  }
  0x7b   : > { %2790 = vmatprep.subr.bf16.mxu1 %v2928_v7 }
  0x7d   : > { %2767 = vmatpush3.bf16.msra.mxu0 %v2927_v4  ;;  %v1846_v4 = vsel %vm3095_vm2, %v1841_v0, %v1845_v58 }
  0x7e   : > { %2791 = vmatpush3.bf16.msra.mxu1 %v2928_v7  ;;  %2768 = vmatprep.subr.bf16.mxu0 %v2929_v8  ;;  %v2451_v7 = vcombine.low %v1776_v62, %v1790_v63 }
  0x7f   : > { %2792 = vmatprep.subr.bf16.mxu1 %v2930_v9 }
  0x81   : > { %2769 = vmatpush3.bf16.msra.mxu0 %v2929_v8  ;;  %v2431_v8 = vld [vmem:[%s3023_s10 + $0x38] sm:$0xf] }
  0x82   : > { %2793 = vmatpush3.bf16.msra.mxu1 %v2930_v9  ;;  %2770 = vmatprep.subr.bf16.mxu0 %v2931_v10  ;;  %v2433_v9 = vld [vmem:[%s3023_s10 + $0x40] sm:$0xf]  ;;  %v1848_v16 = vshrl.u32 %v2431_v8, 16  ;;  %v1851_v17 = vshll.u32 %v2431_v8, 16 }
  0x83   : > { %2794 = vmatprep.subr.bf16.mxu1 %v2932_v11  ;;  %v1862_v18 = vshrl.u32 %v2433_v9, 16 }
  0x84   : > { %v1850_v27 = vrot.slane %v1848_v16, 4  ;;  %v1853_v28 = vrot.slane %v1851_v17, 5 }
  0x85   : > { %2771 = vmatpush3.bf16.msra.mxu0 %v2931_v10  ;;  %v2453_v10 = vcombine.low %v1832_v2, %v1846_v4  ;;  %v1864_v29 = vrot.slane %v1862_v18, 4 }
  0x86   : > { %2795 = vmatpush3.bf16.msra.mxu1 %v2932_v11  ;;  %2772 = vmatprep.subr.bf16.mxu0 %v2933_v12  ;;  %v1792_v11 = vshrl.u32 %v2423_v5, 16 }
  0x87   : > { %2796 = vmatprep.subr.bf16.mxu1 %v2934_v13 }
  0x88   : > { %v1794_v22 = vrot.slane %v1792_v11, 4 }
  0x89   : > { %2773 = vmatpush3.bf16.msra.mxu0 %v2933_v12  ;;  %v1795_v12 = vshll.u32 %v2423_v5, 16 }
  0x8a   : > { %2797 = vmatpush3.bf16.msra.mxu1 %v2934_v13  ;;  %2806 = vmatprep.subr.bf16.mxu0 %v2939_v14  ;;  %v1806_v13 = vshrl.u32 %v2425_v6, 16 }
  0x8b   : > { %2830 = vmatprep.subr.bf16.mxu1 %v2939_v14  ;;  %v1797_v23 = vrot.slane %v1795_v12, 5 }
  0x8c   : > { %2775 = vmatmul.mubr.bf16.vlgmr.msra.gmra.mxu0 %v2937_v19  ;;  %v1865_v19 = vshll.u32 %v2433_v9, 16  ;;  %v1808_v24 = vrot.slane %v1806_v13, 4 }
  0x8d   : > { %2799 = vmatmul.mubr.bf16.vlgmr.msra.gmra.mxu1 %v2938_v33  ;;  %2807 = vmatpush3.bf16.msra.mxu0 %v2939_v14  ;;  %v1798_v33 = vor.u32 %v1797_v23, %v1794_v22 }
  0x8e   : > { %2838 = vmatpush3.bf16.msra.mxu1 %v2939_v14  ;;  %2808 = vmatprep.subr.bf16.mxu0 %v2940_v38  ;;  %v1809_v14 = vshll.u32 %v2425_v6, 16  ;;  %v1867_v30 = vrot.slane %v1865_v19, 5 }
  0x8f   : > { %2831 = vmatprep.subr.bf16.mxu1 %v2940_v38  ;;  %2778 = vmatprep.mubr.bf16.mxu0 %v2941_v43  ;;  %v1799_v42 = vrot.slane %v1798_v33, 4  ;;  %v1803_v43 = vrot.slane %v1801_v34, 5 }
  0x90   : > { %2802 = vmatprep.mubr.bf16.mxu1 %v2944_v48  ;;  %v1811_v25 = vrot.slane %v1809_v14, 5  ;;  %v1868_v40 = vor.u32 %v1867_v30, %v1864_v29  ;;  %v1859_v48 = vrot.slane %v1857_v39, 5 }
  0x91   : > { %2809 = vmatpush3.bf16.msra.mxu0 %v2940_v38  ;;  %v1804_v51 = vsel %vm3095_vm2, %v1799_v42, %v1803_v43 }
  0x92   : > { %2839 = vmatpush3.bf16.msra.mxu1 %v2940_v38  ;;  %2810 = vmatprep.subr.bf16.mxu0 %v2943_v56  ;;  %v1812_v35 = vor.u32 %v1811_v25, %v1808_v24  ;;  %v1854_v38 = vor.u32 %v1853_v28, %v1850_v27  ;;  %v1869_v49 = vrot.slane %v1868_v40, 4 }
  0x93   : > { %2832 = vmatprep.subr.bf16.mxu1 %v2943_v56 }
  0x94   : > { %2779 = vmatmul.mubr.bf16.gmra.mxu0 %v2942_v61  ;;  %v1813_v44 = vrot.slane %v1812_v35, 4  ;;  %v1855_v47 = vrot.slane %v1854_v38, 4  ;;  %v1874_v54 = vsel %vm3095_vm2, %v1869_v49, %v1873_v50 }
  0x95   : > { %2811 = vmatpush3.bf16.msra.mxu0 %v2943_v56  ;;  %2803 = vmatmul.mubr.bf16.gmra.mxu1 %v2945_v1 }
  0x96   : > { %2840 = vmatpush3.bf16.msra.mxu1 %v2943_v56  ;;  %2812 = vmatprep.subr.bf16.mxu0 %v2946_v3  ;;  %v1818_v52 = vsel %vm3095_vm2, %v1813_v44, %v1817_v45  ;;  %v1860_v53 = vsel %vm3095_vm2, %v1855_v47, %v1859_v48 }
  0x97   : > { %2833 = vmatprep.subr.bf16.mxu1 %v2946_v3  ;;  %2822 = vmatprep.mubr.bf16.mxu0 %v2451_v7  ;;  %v2452_v55 = vcombine.low %v1804_v51, %v1818_v52  ;;  %v2454_v56 = vcombine.low %v1860_v53, %v1874_v54 }
  0x98   : > { %2826 = vmatprep.mubr.bf16.mxu1 %v2453_v10 }
  0x99   : > { %2813 = vmatpush3.bf16.msra.mxu0 %v2946_v3 }
  0x9a   : > { %2841 = vmatpush3.bf16.msra.mxu1 %v2946_v3  ;;  %2814 = vmatprep.subr.bf16.mxu0 %v2947_v15 }
  0x9b   : > { %2834 = vmatprep.subr.bf16.mxu1 %v2947_v15 }
  0x9d   : > { %2815 = vmatpush3.bf16.msra.mxu0 %v2947_v15 }
  0x9e   : > { %2842 = vmatpush3.bf16.msra.mxu1 %v2947_v15  ;;  %2816 = vmatprep.subr.bf16.mxu0 %v2948_v20 }
  0x9f   : > { %2835 = vmatprep.subr.bf16.mxu1 %v2948_v20 }
  0xa1   : > { %2817 = vmatpush3.bf16.msra.mxu0 %v2948_v20 }
  0xa2   : > { %2843 = vmatpush3.bf16.msra.mxu1 %v2948_v20  ;;  %2818 = vmatprep.subr.bf16.mxu0 %v2949_v37 }
  0xa3   : > { %2836 = vmatprep.subr.bf16.mxu1 %v2949_v37 }
  0xa5   : > { %2819 = vmatpush3.bf16.msra.mxu0 %v2949_v37 }
  0xa6   : > { %2844 = vmatpush3.bf16.msra.mxu1 %v2949_v37  ;;  %2820 = vmatprep.subr.bf16.mxu0 %v2950_v46 }
  0xa7   : > { %2837 = vmatprep.subr.bf16.mxu1 %v2950_v46 }
  0xa9   : > { %2821 = vmatpush3.bf16.msra.mxu0 %v2950_v46 }
  0xaa   : > { %2845 = vmatpush3.bf16.msra.mxu1 %v2950_v46 }
  0xac   : > { %2823 = vmatmul.mubr.bf16.vlgmr.msra.gmra.mxu0 %v2452_v55 }
  0xad   : > { %2827 = vmatmul.mubr.bf16.vlgmr.msra.gmra.mxu1 %v2454_v56 }
  0xec   : > { %v2632_v57 = vpop.f32.mrf.mxu0 }
  0xed   : > { %v2656_v60 = vpop.f32.mrf.mxu1 }
  0xee   : > { %v328_v58 = vpop.f32.mrf.mxu0  ;;  %v474_v46 = vadd.f32 %v2656_v60, %v2632_v57 }
  0xef   : > { %v465_v62 = vpop.f32.mrf.mxu1 }
  0xf0   : > { %v2633_v61 = vpop.f32.mrf.mxu0  ;;  %v466_v50 = vadd.f32 %v465_v62, %v328_v58 }
  0xf1   : > { %v2657_v1 = vpop.f32.mrf.mxu1 }
  0xf2   : > { %v331_v63 = vpop.f32.mrf.mxu0  ;;  %v477_v54 = vadd.f32 %v2657_v1, %v2633_v61 }
  0xf3   : > { %v468_v3 = vpop.f32.mrf.mxu1 }
  0xf4   : > { %v2636_v0 = vpop.f32.mrf.mxu0 }
  0xf5   : > { %v2660_v4 = vpop.f32.mrf.mxu1 }
  0xf6   : > { %v344_v2 = vpop.f32.mrf.mxu0  ;;  %v490_v48 = vadd.f32 %v2660_v4, %v2636_v0 }
  0xf7   : > { %v481_v5 = vpop.f32.mrf.mxu1 }
  0xf8   : > { %v2637_v59 = vpop.f32.mrf.mxu0  ;;  %v482_v52 = vadd.f32 %v481_v5, %v344_v2 }
  0xf9   : > { %v2661_v8 = vpop.f32.mrf.mxu1 }
  0xfa   : > { %v347_v6 = vpop.f32.mrf.mxu0 }
  0xfb   : > { %v484_v10 = vpop.f32.mrf.mxu1 }
  0xfc   : > { %v485_v62 = vadd.f32 %v484_v10, %v347_v6 }
 0x10c   : > { %v2680_v7 = vpop.f32.mrf.mxu0 }
 0x10d   : > { %v2704_v11 = vpop.f32.mrf.mxu1  ;;  %v775_v51 = vadd.f32 %v2680_v7, %v474_v46 }
 0x10e   : > { %v742_v9 = vpop.f32.mrf.mxu0 }
 0x10f   : > { %v913_v13 = vpop.f32.mrf.mxu1  ;;  %v773_v55 = vadd.f32 %v742_v9, %v466_v50  ;;  %v946_v0 = vadd.f32 %v2704_v11, %v775_v51 }
 0x110   : > { %v2681_v12 = vpop.f32.mrf.mxu0 }
 0x111   : > { %v2705_v15 = vpop.f32.mrf.mxu1  ;;  %v776_v4 = vadd.f32 %v2681_v12, %v477_v54  ;;  %v944_v2 = vadd.f32 %v913_v13, %v773_v55 }
 0x112   : > { %v745_v14 = vpop.f32.mrf.mxu0 }
 0x113   : > { %v916_v17 = vpop.f32.mrf.mxu1  ;;  %v947_v50 = vadd.f32 %v2705_v15, %v776_v4 }
 0x114   : > { %v2684_v16 = vpop.f32.mrf.mxu0 }
 0x115   : > { %v2708_v19 = vpop.f32.mrf.mxu1  ;;  %v779_v53 = vadd.f32 %v2684_v16, %v490_v48 }
 0x116   : > { %v758_v18 = vpop.f32.mrf.mxu0 }
 0x117   : > { %v929_v21 = vpop.f32.mrf.mxu1  ;;  %v777_v57 = vadd.f32 %v758_v18, %v482_v52  ;;  %v950_v7 = vadd.f32 %v2708_v19, %v779_v53 }
 0x118   : > { %v2685_v20 = vpop.f32.mrf.mxu0 }
 0x119   : > { %v2709_v23 = vpop.f32.mrf.mxu1  ;;  %v948_v48 = vadd.f32 %v929_v21, %v777_v57 }
 0x11a   : > { %v761_v22 = vpop.f32.mrf.mxu0 }
 0x11b   : > { %v932_v25 = vpop.f32.mrf.mxu1  ;;  %v778_v1 = vadd.f32 %v761_v22, %v485_v62 }
 0x11d   : > { %v949_v11 = vadd.f32 %v932_v25, %v778_v1 }
 0x12c   : > { %v2728_v24 = vpop.f32.mrf.mxu0 }
 0x12d   : > { %v2752_v27 = vpop.f32.mrf.mxu1  ;;  %v1117_v16 = vadd.f32 %v2728_v24, %v946_v0 }
 0x12e   : > { %v1084_v26 = vpop.f32.mrf.mxu0 }
 0x12f   : > { %v1366_v29 = vpop.f32.mrf.mxu1 }
 0x130   : > { %v2729_v28 = vpop.f32.mrf.mxu0 }
 0x131   : > { %v2753_v31 = vpop.f32.mrf.mxu1 }
 0x132   : > { %v1087_v30 = vpop.f32.mrf.mxu0 }
 0x133   : > { %v3340_v33 = vpop.f32.mrf.mxu1 }
 0x134   : > { %v2732_v32 = vpop.f32.mrf.mxu0  ;;  %3365 = vst [vmem:[#allocation2_spill] sm:$0xff] %v3340_v33  ;;  %v493_v33 = vadd.f32 %v2661_v8, %v2637_v59 }
 0x135   : > { %v2756_v34 = vpop.f32.mrf.mxu1  ;;  %v1121_v61 = vadd.f32 %v2732_v32, %v950_v7 }
 0x136   : > { %v1100_v35 = vpop.f32.mrf.mxu0  ;;  %v780_v46 = vadd.f32 %v2685_v20, %v493_v33 }
 0x137   : > { %v1382_v36 = vpop.f32.mrf.mxu1  ;;  %v1119_v18 = vadd.f32 %v1100_v35, %v948_v48  ;;  %v1403_v12 = vadd.f32 %v2756_v34, %v1121_v61 }
 0x138   : > { %v2733_v37 = vpop.f32.mrf.mxu0  ;;  %v951_v59 = vadd.f32 %v2709_v23, %v780_v46 }
 0x139   : > { %v2757_v38 = vpop.f32.mrf.mxu1  ;;  %v1401_v21 = vadd.f32 %v1382_v36, %v1119_v18 }
 0x13a   : > { %v1103_v39 = vpop.f32.mrf.mxu0  ;;  %v1122_v6 = vadd.f32 %v2733_v37, %v951_v59 }
 0x13b   : > { %v1385_v41 = vpop.f32.mrf.mxu1  ;;  %v1120_v22 = vadd.f32 %v1103_v39, %v949_v11  ;;  %v3368_v35 = vld [vmem:[#allocation2_spill] sm:$0xff] }
 0x13d   : > { %v1402_v34 = vadd.f32 %v1385_v41, %v1120_v22 }
 0x14c   : > { %v2776_v40 = vpop.f32.mrf.mxu0 }
 0x14d   : > { %v2800_v42 = vpop.f32.mrf.mxu1 }
 0x14e   : > { %v1537_v43 = vpop.f32.mrf.mxu0 }
 0x14f   : > { %v1708_v44 = vpop.f32.mrf.mxu1 }
 0x150   : > { %v2777_v45 = vpop.f32.mrf.mxu0 }
 0x151   : > { %v3342_v47 = vpop.f32.mrf.mxu1 }
 0x152   : > { %3366 = vst [vmem:[#allocation3_spill] sm:$0xff] %v3342_v47  ;;  %v1540_v49 = vpop.f32.mrf.mxu0  ;;  %v469_v47 = vadd.f32 %v468_v3, %v331_v63  ;;  %v1399_v63 = vadd.f32 %v2752_v27, %v1117_v16  ;;  %v1118_v3 = vadd.f32 %v2729_v28, %v947_v50 }
 0x153   : > { %v3344_v56 = vpop.f32.mrf.mxu1 }
 0x154   : > { %3367 = vst [vmem:[#allocation4_spill] sm:$0xff] %v3344_v56  ;;  %v2780_v60 = vpop.f32.mrf.mxu0  ;;  %v774_v5 = vadd.f32 %v745_v14, %v469_v47  ;;  %v1115_v56 = vadd.f32 %v1084_v26, %v944_v2  ;;  %v1570_v14 = vadd.f32 %v2776_v40, %v1399_v63  ;;  %v1400_v32 = vadd.f32 %v2753_v31, %v1118_v3  ;;  %v2463_v31 = vld [vmem:[%s3361_s2] ss:$0 sm:$0xff] }
 0x155   : > { %v2804_v58 = vpop.f32.mrf.mxu1  ;;  %v1574_v24 = vadd.f32 %v2780_v60, %v1403_v12  ;;  %v1404_v26 = vadd.f32 %v2757_v38, %v1122_v6 }
 0x156   : > { %v1553_v9 = vpop.f32.mrf.mxu0  ;;  %v945_v52 = vadd.f32 %v916_v17, %v774_v5  ;;  %v1397_v19 = vadd.f32 %v1366_v29, %v1115_v56  ;;  %v1741_v27 = vadd.f32 %v2800_v42, %v1570_v14  ;;  %v1571_v28 = vadd.f32 %v2777_v45, %v1400_v32 }
 0x157   : > { %v1724_v8 = vpop.f32.mrf.mxu1  ;;  %v1572_v33 = vadd.f32 %v1553_v9, %v1401_v21  ;;  %v1745_v37 = vadd.f32 %v2804_v58, %v1574_v24 }
 0x158   : > { %v2781_v10 = vpop.f32.mrf.mxu0  ;;  %v1116_v13 = vadd.f32 %v1087_v30, %v945_v52  ;;  %v1568_v15 = vadd.f32 %v1537_v43, %v1397_v19 }
 0x159   : > { %v2805_v20 = vpop.f32.mrf.mxu1  ;;  %v1575_v47 = vadd.f32 %v2781_v10, %v1404_v26  ;;  %v1743_v39 = vadd.f32 %v1724_v8, %v1572_v33  ;;  %v3369_v54 = vld [vmem:[#allocation3_spill] sm:$0xff] }
 0x15a   : > { %v1556_v23 = vpop.f32.mrf.mxu0  ;;  %v1398_v17 = vadd.f32 %v3368_v35, %v1116_v13  ;;  %v1739_v30 = vadd.f32 %v1708_v44, %v1568_v15  ;;  %v1742_v42 = vadd.f32 %v3369_v54, %v1571_v28 }
 0x15b   : > { %v1727_v25 = vpop.f32.mrf.mxu1  ;;  %v1573_v53 = vadd.f32 %v1556_v23, %v1402_v34  ;;  %v1746_v55 = vadd.f32 %v2805_v20, %v1575_v47  ;;  %v3370_v44 = vld [vmem:[#allocation4_spill] sm:$0xff] }
 0x15c   : > { %v1569_v40 = vadd.f32 %v1540_v49, %v1398_v17 }
 0x15d   : > { %v1744_v58 = vadd.f32 %v1727_v25, %v1573_v53 }
 0x15e   : > { %v1740_v49 = vadd.f32 %v3370_v44, %v1569_v40 }
 0x16c   : > { %v2824_v29 = vpop.f32.mrf.mxu0 }
 0x16d   : > { %v2023_v51 = vadd.f32 %v2824_v29, %v1741_v27  ;;  %v2828_v36 = vpop.f32.mrf.mxu1 }
 0x16e   : > { %v2027_v38 = vadd.f32 %v2828_v36, %v1745_v37  ;;  %v1990_v43 = vpop.f32.mrf.mxu0 }
 0x16f   : > { %v2021_v45 = vadd.f32 %v1990_v43, %v1739_v30  ;;  %v2006_v41 = vpop.f32.mrf.mxu1  ;;  %v2038_v60 = vadd.f32 %v2463_v31, %v2023_v51 }
 0x170   : > { %v2025_v56 = vadd.f32 %v2006_v41, %v1743_v39  ;;  %v2825_v57 = vpop.f32.mrf.mxu0  ;;  %v2042_v62 = vadd.f32 %v2463_v31, %v2027_v38 }
 0x171   : > { %v2024_v0 = vadd.f32 %v2825_v57, %v1742_v42  ;;  %v2829_v4 = vpop.f32.mrf.mxu1  ;;  %v2036_v2 = vadd.f32 %v2463_v31, %v2021_v45  ;;  %v2046_v50 = vmax.f32 %v2038_v60, 0.0 }
 0x172   : > { %v2028_v7 = vadd.f32 %v2829_v4, %v1746_v55  ;;  %v1993_v46 = vpop.f32.mrf.mxu0  ;;  %v2040_v1 = vadd.f32 %v2463_v31, %v2025_v56  ;;  %v2050_v18 = vmax.f32 %v2042_v62, 0.0 }
 0x173   : > { %v2039_v5 = vadd.f32 %v2463_v31, %v2024_v0  ;;  %v2022_v16 = vadd.f32 %v1993_v46, %v1740_v49  ;;  %v2009_v48 = vpop.f32.mrf.mxu1  ;;  %v2044_v3 = vmax.f32 %v2036_v2, 0.0 }
 0x174   : > { %v2043_v61 = vadd.f32 %v2463_v31, %v2028_v7  ;;  %v2026_v9 = vadd.f32 %v2009_v48, %v1744_v58  ;;  %v2048_v6 = vmax.f32 %v2040_v1, 0.0 }
 0x175   : > { %v2047_v8 = vmax.f32 %v2039_v5, 0.0  ;;  %v2037_v59 = vadd.f32 %v2463_v31, %v2022_v16 }
 0x176   : > { %v2051_v52 = vmax.f32 %v2043_v61, 0.0  ;;  %v2041_v63 = vadd.f32 %v2463_v31, %v2026_v9 }
 0x177   : > { %v2491_v11 = vpack.c.bf16 %v2047_v8, %v2046_v50  ;;  %v2045_v12 = vmax.f32 %v2037_v59, 0.0 }
 0x178   : > { %v2501_v10 = vpack.c.bf16 %v2051_v52, %v2050_v18  ;;  %v2049_v19 = vmax.f32 %v2041_v63, 0.0 }
 0x179   : > { %2503 = vst [vmem:[%s170_s21 + $0x8] sm:$0xff] %v2491_v11   ;;  %v2486_v13 = vpack.c.bf16 %v2045_v12, %v2044_v3 }
 0x17a   : > { %2505 = vst [vmem:[%s170_s21 + $0x18] sm:$0xff] %v2501_v10   ;;  %v2496_v14 = vpack.c.bf16 %v2049_v19, %v2048_v6 }
 0x17b   : > { %2487 = vst [vmem:[%s170_s21] sm:$0xff] %v2486_v13  }
 0x17c   : > { %2504 = vst [vmem:[%s170_s21 + $0x10] sm:$0xff] %v2496_v14  }
 0x17d PF: > { %s13_s12 = sadd.s32 1, %s2957_s12  }
 0x17e   : > { %p10_p4 = scmp.ge.s32.totalorder %s13_s12, 6  }
 0x180   :  { %12 = sbr.rel (!%p10_p4) target bundleno = 1 (0x1), region = 75 }

// kernel: _lambda_.12
= control target key start
LH: loop header
LB: loop body
LE: loop exit
PB: predicated region body
PF: predicated region fallthrough
CT: control target
= control target key end

     0   :  { %s2975_s12 = smov 0   ;;  %s3440_s0 = inlined_call_operand.vmem [shape: bf16[4,1,12,12,128], index: 0, kind: input, shape index: {}]   ;;  %s3441_s1 = inlined_call_operand.vmem [shape: bf16[9,128,128], index: 1, kind: input, shape index: {}]   ;;  %s3442_s2 = inlined_call_operand.vmem [shape: f32[1,128], index: 2, kind: input, shape index: {}]   ;;  %s3443_s3 = inlined_call_operand.vmem [shape: bf16[4,64,128], index: 3, kind: output, shape index: {}]  }
   0x1 LB: > { %s2099_s13 = sadd.s32 4294967295, %s2953_s12   ;;  %p2103_p0 = scmp.ge.s32.totalorder %s2953_s12, 1  ;;  %s2953_s12 = sphi %s2975_s12, %s13_s12  }
   0x2   : > { %p137_p1 = scmp.lt.s32.totalorder %s2953_s12, 5 }
   0x4   : > { %p138_p2 = pnand %p2103_p0, %p137_p1 }
   0x6   : > { %141 = sbr.rel (%p138_p2) target bundleno = 381 (0x17d), region = 32 }
   0xb   : > { %v2863_v0 = vld [vmem:[%s3441_s1 + $0x78] sm:$0xff]   ;;  %p161_p3 = scmp.lt.s32.totalorder %s2099_s13, 3  ;;  %v2865_v2 = vld [vmem:[%s3441_s1 + $0x70] sm:$0xff]   ;;  %v2867_v4 = vld [vmem:[%s3441_s1 + $0x68] sm:$0xff]   ;;  %vm228_vm0 = vcmask 1042432   ;;  %vm229_vm1 = vcmask 1046532  }
   0xc   : > { %v2864_v1 = vld [vmem:[%s3441_s1 + $0x38] sm:$0xff]   ;;  %2622 = vmatprep.subr.bf16.mxu0 %v2863_v0  ;;  %v2866_v3 = vld [vmem:[%s3441_s1 + $0x30] sm:$0xff]   ;;  %v2868_v5 = vld [vmem:[%s3441_s1 + $0x28] sm:$0xff]   ;;  %vm578_vm3 = vcmask 1041408   ;;  %vm579_vm4 = vcmask 1045508  }
   0xd   : > { %2646 = vmatprep.subr.bf16.mxu1 %v2864_v1  ;;  %2623 = vmatpush3.bf16.msra.mxu0 %v2863_v0  ;;  %s3455_s13 = smov (!%p161_p3, %s2099_s13), 3  ;;  %v2869_v6 = vld [vmem:[%s3441_s1 + $0x60] sm:$0xff]   ;;  %v2871_v8 = vld [vmem:[%s3441_s1 + $0x58] sm:$0xff]   ;;  %v2873_v10 = vld [vmem:[%s3441_s1 + $0x50] sm:$0xff]  }
   0xe   : > { %2647 = vmatpush3.bf16.msra.mxu1 %v2864_v1  ;;  %2624 = vmatprep.subr.bf16.mxu0 %v2865_v2  ;;  %v2870_v7 = vld [vmem:[%s3441_s1 + $0x20] sm:$0xff]   ;;  %s2854_s30 = smul.u32 96, %s3455_s13  ;;  %v2872_v9 = vld [vmem:[%s3441_s1 + $0x18] sm:$0xff]   ;;  %v2874_v14 = vld [vmem:[%s3441_s1 + $0x10] sm:$0xff]   ;;  %s2482_s18 = sshll.u32 %s3455_s13, 5 }
   0xf   : > { %2648 = vmatprep.subr.bf16.mxu1 %v2866_v3  ;;  %vm3031_vm2 = vmor %vm228_vm0, %vm229_vm1  ;;  %v2875_v20 = vld [vmem:[%s3441_s1 + $0x48] sm:$0xff]   ;;  %v2877_v35 = vld [vmem:[%s3441_s1 + $0x40] sm:$0xff]   ;;  %s170_s21 = scalar_lea.vmem %s3443_s3, %s2482_s18 }
  0x10   : > { %s3019_s10 = scalar_lea.vmem %s3440_s0, %s2854_s30  ;;  %v2876_v26 = vld [vmem:[%s3441_s1 + $0x8] sm:$0xff]   ;;  %v2878_v36 = vld [vmem:[%s3441_s1] sm:$0xff]   ;;  %v2881_v39 = vld [vmem:[%s3441_s1 + $0xb8] sm:$0xff]  }
  0x11   : > { %2625 = vmatpush3.bf16.msra.mxu0 %v2865_v2  ;;  %v196_v11 = vld [vmem:[%s3019_s10] sm:$0xe]  ;;  %v197_v12 = vld [vmem:[%s3019_s10 + $0x4] sm:$0x1]  ;;  %v198_v13 = vld [vmem:[%s3019_s10 + $0x8] sm:$0xe] }
  0x12   : > { %2649 = vmatpush3.bf16.msra.mxu1 %v2866_v3  ;;  %2626 = vmatprep.subr.bf16.mxu0 %v2867_v4  ;;  %v199_v15 = vld [vmem:[%s3019_s10 + $0xc] sm:$0x1]  ;;  %v2107_v17 = vrot.slane %v196_v11, 9  ;;  %v233_v18 = vrot.slane %v197_v12, 5  ;;  %v2108_v19 = vrot.slane %v198_v13, 9  ;;  %v2882_v40 = vld [vmem:[%s3441_s1 + $0xf8] sm:$0xff]   ;;  %vm3091_vm5 = vmor %vm578_vm3, %vm579_vm4 }
  0x13   : > { %2650 = vmatprep.subr.bf16.mxu1 %v2868_v5  ;;  %v237_v21 = vrot.slane %v199_v15, 5  ;;  %v2879_v23 = vld [vmem:[%s3019_s10] ss:$8 sps:$4 sm:$0xff]   ;;  %v200_v24 = vld [vmem:[%s3019_s10 + $0x10] sm:$0xe]  ;;  %v2890_v11 = vld [vmem:[%s3441_s1 + $0xd8] sm:$0xff]  }
  0x14   : > { %v234_v22 = vsel %vm3031_vm2, %v2107_v17, %v233_v18  ;;  %v201_v25 = vld [vmem:[%s3019_s10 + $0x14] sm:$0x1]  ;;  %v202_v28 = vld [vmem:[%s3019_s10 + $0x18] sm:$0xe]  ;;  %v203_v29 = vld [vmem:[%s3019_s10 + $0x1c] sm:$0x1]  ;;  %2662 = vmatprep.mubr.bf16.mxu1 %v2879_v23 }
  0x15   : > { %2627 = vmatpush3.bf16.msra.mxu0 %v2867_v4  ;;  %v238_v27 = vsel %vm3031_vm2, %v2108_v19, %v237_v21  ;;  %v2109_v31 = vrot.slane %v200_v24, 9  ;;  %v241_v32 = vrot.slane %v201_v25, 5  ;;  %v2110_v33 = vrot.slane %v202_v28, 9  ;;  %v2880_v41 = vld [vmem:[%s3019_s10 + $0x10] ss:$8 sps:$4 sm:$0xff]   ;;  %v2885_v60 = vld [vmem:[%s3441_s1 + $0xa8] sm:$0xff]  }
  0x16   : > { %2651 = vmatpush3.bf16.msra.mxu1 %v2868_v5  ;;  %2628 = vmatprep.subr.bf16.mxu0 %v2869_v6  ;;  %v2131_v30 = vcombine.low %v234_v22, %v238_v27  ;;  %v245_v34 = vrot.slane %v203_v29, 5  ;;  %v2883_v43 = vld [vmem:[%s3441_s1 + $0xb0] sm:$0xff]   ;;  %v204_v45 = vld [vmem:[%s3019_s10 + $0x20] sm:$0xe]  ;;  %v205_v46 = vld [vmem:[%s3019_s10 + $0x24] sm:$0x1] }
  0x17   : > { %2652 = vmatprep.subr.bf16.mxu1 %v2870_v7  ;;  %v242_v37 = vsel %vm3031_vm2, %v2109_v31, %v241_v32  ;;  %v2884_v44 = vld [vmem:[%s3441_s1 + $0xf0] sm:$0xff]   ;;  %v206_v47 = vld [vmem:[%s3019_s10 + $0x28] sm:$0xe]  ;;  %v207_v48 = vld [vmem:[%s3019_s10 + $0x2c] sm:$0x1]  ;;  %v2111_v49 = vrot.slane %v204_v45, 9 }
  0x18   : > { %2638 = vmatprep.mubr.bf16.mxu0 %v2131_v30  ;;  %v246_v38 = vsel %vm3031_vm2, %v2110_v33, %v245_v34  ;;  %v249_v50 = vrot.slane %v205_v46, 5  ;;  %v2112_v51 = vrot.slane %v206_v47, 9  ;;  %v253_v52 = vrot.slane %v207_v48, 5  ;;  %v2891_v53 = vld [vmem:[%s3019_s10 + $0x20] ss:$8 sps:$4 sm:$0xff]   ;;  %v2893_v23 = vld [vmem:[%s3441_s1 + $0x90] sm:$0xff]  }
  0x19   : > { %2629 = vmatpush3.bf16.msra.mxu0 %v2869_v6  ;;  %v2132_v42 = vcombine.low %v242_v37, %v246_v38  ;;  %v208_v54 = vld [vmem:[%s3019_s10 + $0x30] sm:$0xe]  ;;  %v209_v57 = vld [vmem:[%s3019_s10 + $0x34] sm:$0x1]  ;;  %v210_v58 = vld [vmem:[%s3019_s10 + $0x38] sm:$0xe] }
  0x1a   : > { %2653 = vmatpush3.bf16.msra.mxu1 %v2870_v7  ;;  %2630 = vmatprep.subr.bf16.mxu0 %v2871_v8  ;;  %v250_v55 = vsel %vm3031_vm2, %v2111_v49, %v249_v50  ;;  %v254_v56 = vsel %vm3031_vm2, %v2112_v51, %v253_v52  ;;  %v211_v59 = vld [vmem:[%s3019_s10 + $0x3c] sm:$0x1]  ;;  %v2113_v62 = vrot.slane %v208_v54, 9  ;;  %v257_v63 = vrot.slane %v209_v57, 5  ;;  %v2886_v2 = vld [vmem:[%s3441_s1 + $0xe8] sm:$0xff]   ;;  %v2887_v7 = vld [vmem:[%s3441_s1 + $0xa0] sm:$0xff]  }
  0x1b   : > { %2654 = vmatprep.subr.bf16.mxu1 %v2872_v9  ;;  %v2133_v61 = vcombine.low %v250_v55, %v254_v56  ;;  %v2114_v0 = vrot.slane %v210_v58, 9  ;;  %v261_v3 = vrot.slane %v211_v59, 5  ;;  %v2892_v4 = vld [vmem:[%s3019_s10 + $0x30] ss:$8 sps:$4 sm:$0xff]   ;;  %v546_v12 = vld [vmem:[%s3019_s10] sm:$0xc] }
  0x1c   : > { %v258_v5 = vsel %vm3031_vm2, %v2113_v62, %v257_v63  ;;  %v547_v13 = vld [vmem:[%s3019_s10 + $0x4] sm:$0x3]  ;;  %v549_v15 = vld [vmem:[%s3019_s10 + $0xc] sm:$0x3]  ;;  %v2155_v17 = vrot.slane %v546_v12, 10  ;;  %v2894_v24 = vld [vmem:[%s3441_s1 + $0xd0] sm:$0xff]  }
  0x1d   : > { %2631 = vmatpush3.bf16.msra.mxu0 %v2871_v8  ;;  %v262_v6 = vsel %vm3031_vm2, %v2114_v0, %v261_v3  ;;  %v583_v18 = vrot.slane %v547_v13, 6  ;;  %v2899_v22 = vld [vmem:[%s3019_s10 + $0x10] ss:$8 sps:$4 sm:$0xff]   ;;  %v551_v28 = vld [vmem:[%s3019_s10 + $0x14] sm:$0x3]  ;;  %v2895_v29 = vld [vmem:[%s3441_s1 + $0x88] sm:$0xff]  }
  0x1e   : > { %2655 = vmatpush3.bf16.msra.mxu1 %v2872_v9  ;;  %2632 = vmatprep.subr.bf16.mxu0 %v2873_v10  ;;  %v2134_v8 = vcombine.low %v258_v5, %v262_v6  ;;  %v2888_v9 = vld [vmem:[%s3441_s1 + $0xe0] sm:$0xff]   ;;  %v550_v27 = vld [vmem:[%s3019_s10 + $0x10] sm:$0xc]  ;;  %v552_v30 = vld [vmem:[%s3019_s10 + $0x18] sm:$0xc]  ;;  %v591_v34 = vrot.slane %v551_v28, 6 }
  0x1f   : > { %2656 = vmatprep.subr.bf16.mxu1 %v2874_v14  ;;  %v584_v21 = vsel %vm3091_vm5, %v2155_v17, %v583_v18  ;;  %v553_v31 = vld [vmem:[%s3019_s10 + $0x1c] sm:$0x3]  ;;  %v2896_v32 = vld [vmem:[%s3441_s1 + $0xc8] sm:$0xff]   ;;  %v2157_v33 = vrot.slane %v550_v27, 10  ;;  %v2158_v37 = vrot.slane %v552_v30, 10  ;;  %v2903_v63 = vld [vmem:[%s3441_s1 + $0x130] sm:$0xff]  }
  0x20   : > { %v595_v38 = vrot.slane %v553_v31, 6  ;;  %v558_v47 = vld [vmem:[%s3019_s10 + $0x30] sm:$0xc]  ;;  %v2901_v50 = vld [vmem:[%s3441_s1 + $0x138] sm:$0xff]   ;;  %v559_v51 = vld [vmem:[%s3019_s10 + $0x34] sm:$0x3] }
  0x21   : > { %2633 = vmatpush3.bf16.msra.mxu0 %v2873_v10  ;;  %v2889_v10 = vld [vmem:[%s3441_s1 + $0x98] sm:$0xff]   ;;  %v592_v48 = vsel %vm3091_vm5, %v2157_v33, %v591_v34  ;;  %v2900_v55 = vld [vmem:[%s3019_s10 + $0x20] ss:$8 sps:$4 sm:$0xff]   ;;  %v2161_v59 = vrot.slane %v558_v47, 10  ;;  %v2904_v0 = vld [vmem:[%s3441_s1 + $0x170] sm:$0xff]  }
  0x22   : > { %2657 = vmatpush3.bf16.msra.mxu1 %v2874_v14  ;;  %2634 = vmatprep.subr.bf16.mxu0 %v2875_v20  ;;  %v548_v14 = vld [vmem:[%s3019_s10 + $0x8] sm:$0xc]  ;;  %v596_v49 = vsel %vm3091_vm5, %v2158_v37, %v595_v38  ;;  %v560_v52 = vld [vmem:[%s3019_s10 + $0x38] sm:$0xc]  ;;  %v2227_v12 = vld [vmem:[%s3019_s10 + $0x10] sm:$0xe] }
  0x23   : > { %2658 = vmatprep.subr.bf16.mxu1 %v2876_v26  ;;  %v2156_v19 = vrot.slane %v548_v14, 10  ;;  %v2180_v54 = vcombine.low %v592_v48, %v596_v49  ;;  %v2902_v56 = vld [vmem:[%s3441_s1 + $0x178] sm:$0xff]   ;;  %v2905_v6 = vld [vmem:[%s3441_s1 + $0x128] sm:$0xff]   ;;  %v2228_v13 = vld [vmem:[%s3019_s10 + $0x14] sm:$0x1]  ;;  %v2243_v17 = vrot.slane %v2227_v12, 9 }
  0x24   : > { %v2907_v3 = vld [vmem:[%s3019_s10 + $0x30] ss:$8 sps:$4 sm:$0xff]   ;;  %v972_v18 = vrot.slane %v2228_v13, 5  ;;  %v2236_v48 = vld [vmem:[%s3019_s10 + $0x34] sm:$0x1]  ;;  %v2915_v49 = vld [vmem:[%s3441_s1 + $0x108] sm:$0xff]  }
  0x25   : > { %2635 = vmatpush3.bf16.msra.mxu0 %v2875_v20  ;;  %v587_v20 = vrot.slane %v549_v15, 6  ;;  %v2229_v14 = vld [vmem:[%s3019_s10 + $0x18] sm:$0xe]  ;;  %v2230_v15 = vld [vmem:[%s3019_s10 + $0x1c] sm:$0x1]  ;;  %v2914_v38 = vld [vmem:[%s3441_s1 + $0x150] sm:$0xff]  }
  0x26   : > { %2659 = vmatpush3.bf16.msra.mxu1 %v2876_v26  ;;  %2636 = vmatprep.subr.bf16.mxu0 %v2877_v35  ;;  %v2911_v31 = vld [vmem:[%s3441_s1 + $0x118] sm:$0xff]   ;;  %v2235_v47 = vld [vmem:[%s3019_s10 + $0x30] sm:$0xe]  ;;  %v2942_v16 = vld [vmem:[%s3441_s1 + $0x220] sm:$0xff]  }
  0x27   : > { %2660 = vmatprep.subr.bf16.mxu1 %v2878_v36  ;;  %v588_v25 = vsel %vm3091_vm5, %v2156_v19, %v587_v20  ;;  %v2244_v19 = vrot.slane %v2229_v14, 9  ;;  %v976_v20 = vrot.slane %v2230_v15, 5  ;;  %v2912_v34 = vld [vmem:[%s3441_s1 + $0x158] sm:$0xff]  }
  0x28   : > { %v2179_v26 = vcombine.low %v584_v21, %v588_v25  ;;  %v2279_v21 = vld [vmem:[%s3019_s10 + $0x10] sm:$0xc]  ;;  %v2282_v25 = vld [vmem:[%s3019_s10 + $0x1c] sm:$0x3] }
  0x29   : > { %2637 = vmatpush3.bf16.msra.mxu0 %v2877_v35  ;;  %v554_v35 = vld [vmem:[%s3019_s10 + $0x20] sm:$0xc]  ;;  %v977_v28 = vsel %vm3031_vm2, %v2244_v19, %v976_v20  ;;  %v1194_v30 = vrot.slane %v2282_v25, 6  ;;  %v2919_v13 = vld [vmem:[%s3441_s1 + $0x1b8] sm:$0xff]   ;;  %v2242_v20 = vld [vmem:[%s3019_s10 + $0x4c] sm:$0x1] }
  0x2a   : > { %2661 = vmatpush3.bf16.msra.mxu1 %v2878_v36  ;;  %2670 = vmatprep.subr.bf16.mxu0 %v2881_v39  ;;  %v555_v36 = vld [vmem:[%s3019_s10 + $0x24] sm:$0x3]  ;;  %v2920_v19 = vld [vmem:[%s3441_s1 + $0x1f8] sm:$0xff]   ;;  %v2291_v25 = vld [vmem:[%s3019_s10 + $0x40] sm:$0xc] }
  0x2b   : > { %2694 = vmatprep.subr.bf16.mxu1 %v2882_v40 }
  0x2c   : > { %2639 = vmatmul.mubr.bf16.vlgmr.msra.gmra.mxu0 %v2132_v42  ;;  %v2898_v42 = vld [vmem:[%s3441_s1 + $0xc0] sm:$0xff]  }
  0x2d   : > { %2663 = vmatmul.mubr.bf16.vlgmr.msra.gmra.mxu1 %v2880_v41  ;;  %2671 = vmatpush3.bf16.msra.mxu0 %v2881_v39  ;;  %v556_v39 = vld [vmem:[%s3019_s10 + $0x28] sm:$0xc]  ;;  %v2897_v41 = vld [vmem:[%s3441_s1 + $0x80] sm:$0xff]  }
  0x2e   : > { %2695 = vmatpush3.bf16.msra.mxu1 %v2882_v40  ;;  %2672 = vmatprep.subr.bf16.mxu0 %v2883_v43  ;;  %v557_v40 = vld [vmem:[%s3019_s10 + $0x2c] sm:$0x3]  ;;  %v2160_v45 = vrot.slane %v556_v39, 10  ;;  %v2231_v39 = vld [vmem:[%s3019_s10 + $0x20] sm:$0xe] }
  0x2f   : > { %2696 = vmatprep.subr.bf16.mxu1 %v2884_v44  ;;  %2666 = vmatprep.mubr.bf16.mxu1 %v2891_v53  ;;  %v603_v46 = vrot.slane %v557_v40, 6  ;;  %v561_v53 = vld [vmem:[%s3019_s10 + $0x3c] sm:$0x3]  ;;  %v2232_v40 = vld [vmem:[%s3019_s10 + $0x24] sm:$0x1] }
  0x30   : > { %2642 = vmatprep.mubr.bf16.mxu0 %v2133_v61  ;;  %v2162_v61 = vrot.slane %v560_v52, 10  ;;  %v611_v62 = vrot.slane %v561_v53, 6  ;;  %v980_v52 = vrot.slane %v2232_v40, 5 }
  0x31   : > { %2673 = vmatpush3.bf16.msra.mxu0 %v2883_v43  ;;  %v2159_v43 = vrot.slane %v554_v35, 10  ;;  %v604_v58 = vsel %vm3091_vm5, %v2160_v45, %v603_v46  ;;  %v2285_v45 = vld [vmem:[%s3019_s10 + $0x28] sm:$0xc]  ;;  %v2286_v46 = vld [vmem:[%s3019_s10 + $0x2c] sm:$0x3] }
  0x32   : > { %2697 = vmatpush3.bf16.msra.mxu1 %v2884_v44  ;;  %2674 = vmatprep.subr.bf16.mxu0 %v2885_v60  ;;  %v599_v44 = vrot.slane %v555_v36, 6  ;;  %v612_v5 = vsel %vm3091_vm5, %v2162_v61, %v611_v62  ;;  %v2913_v36 = vld [vmem:[%s3441_s1 + $0x110] sm:$0xff]   ;;  %v1202_v61 = vrot.slane %v2286_v46, 6  ;;  %v2247_v62 = vrot.slane %v2235_v47, 9  ;;  %v2923_v47 = vld [vmem:[%s3441_s1 + $0x1a8] sm:$0xff]  }
  0x33   : > { %2698 = vmatprep.subr.bf16.mxu1 %v2886_v2 }
  0x34   : > { %2643 = vmatmul.mubr.bf16.gmra.mxu0 %v2134_v8  ;;  %v600_v57 = vsel %vm3091_vm5, %v2159_v43, %v599_v44  ;;  %v2908_v8 = vld [vmem:[%s3019_s10 + $0x40] ss:$8 sps:$4 sm:$0xff]   ;;  %v2284_v44 = vld [vmem:[%s3019_s10 + $0x24] sm:$0x3] }
  0x35   : > { %2675 = vmatpush3.bf16.msra.mxu0 %v2885_v60  ;;  %2667 = vmatmul.mubr.bf16.gmra.mxu1 %v2892_v4  ;;  %v607_v60 = vrot.slane %v559_v51, 6  ;;  %v2283_v43 = vld [vmem:[%s3019_s10 + $0x20] sm:$0xc]  ;;  %v2245_v51 = vrot.slane %v2231_v39, 9 }
  0x36   : > { %2699 = vmatpush3.bf16.msra.mxu1 %v2886_v2  ;;  %2676 = vmatprep.subr.bf16.mxu0 %v2887_v7  ;;  %v2181_v2 = vcombine.low %v600_v57, %v604_v58  ;;  %v2237_v57 = vld [vmem:[%s3019_s10 + $0x38] sm:$0xe]  ;;  %v2238_v58 = vld [vmem:[%s3019_s10 + $0x3c] sm:$0x1] }
  0x37   : > { %2700 = vmatprep.subr.bf16.mxu1 %v2888_v9  ;;  %2710 = vmatprep.mubr.bf16.mxu1 %v2899_v22  ;;  %v608_v4 = vsel %vm3091_vm5, %v2161_v59, %v607_v60  ;;  %v2280_v22 = vld [vmem:[%s3019_s10 + $0x14] sm:$0x3]  ;;  %v2917_v59 = vld [vmem:[%s3441_s1 + $0x100] sm:$0xff]   ;;  %v2298_v60 = vrot.slane %v2285_v45, 10 }
  0x38   : > { %2686 = vmatprep.mubr.bf16.mxu0 %v2179_v26  ;;  %v2295_v26 = vrot.slane %v2279_v21, 10  ;;  %v1190_v27 = vrot.slane %v2280_v22, 6 }
  0x39   : > { %2677 = vmatpush3.bf16.msra.mxu0 %v2887_v7  ;;  %v2906_v7 = vld [vmem:[%s3441_s1 + $0x168] sm:$0xff]   ;;  %v1203_v12 = vsel %vm3091_vm5, %v2298_v60, %v1202_v61 }
  0x3a   : > { %2701 = vmatpush3.bf16.msra.mxu1 %v2888_v9  ;;  %2678 = vmatprep.subr.bf16.mxu0 %v2889_v10  ;;  %v2182_v9 = vcombine.low %v608_v4, %v612_v5  ;;  %v1191_v33 = vsel %vm3091_vm5, %v2295_v26, %v1190_v27  ;;  %v2248_v4 = vrot.slane %v2237_v57, 9  ;;  %v992_v5 = vrot.slane %v2238_v58, 5  ;;  %v2292_v26 = vld [vmem:[%s3019_s10 + $0x44] sm:$0x3]  ;;  %v2293_v27 = vld [vmem:[%s3019_s10 + $0x48] sm:$0xc] }
  0x3b   : > { %2702 = vmatprep.subr.bf16.mxu1 %v2890_v11  ;;  %v1214_v39 = vrot.slane %v2292_v26, 6  ;;  %v2302_v40 = vrot.slane %v2293_v27, 10  ;;  %v2368_v57 = vld [vmem:[%s3019_s10 + $0x24] sm:$0x1]  ;;  %v2369_v58 = vld [vmem:[%s3019_s10 + $0x28] sm:$0xe] }
  0x3c   : > { %v1579_v61 = vrot.slane %v2368_v57, 5 }
  0x3d   : > { %2679 = vmatpush3.bf16.msra.mxu0 %v2889_v10  ;;  %v2909_v10 = vld [vmem:[%s3441_s1 + $0x120] sm:$0xff]  }
  0x3e   : > { %2703 = vmatpush3.bf16.msra.mxu1 %v2890_v11  ;;  %2680 = vmatprep.subr.bf16.mxu0 %v2893_v23  ;;  %v2910_v11 = vld [vmem:[%s3441_s1 + $0x160] sm:$0xff]  }
  0x3f   : > { %2704 = vmatprep.subr.bf16.mxu1 %v2894_v24 }
  0x41   : > { %2681 = vmatpush3.bf16.msra.mxu0 %v2893_v23  ;;  %v973_v23 = vsel %vm3031_vm2, %v2243_v17, %v972_v18  ;;  %v2289_v17 = vld [vmem:[%s3019_s10 + $0x38] sm:$0xc]  ;;  %v2290_v18 = vld [vmem:[%s3019_s10 + $0x3c] sm:$0x3] }
  0x42   : > { %2705 = vmatpush3.bf16.msra.mxu1 %v2894_v24  ;;  %2682 = vmatprep.subr.bf16.mxu0 %v2895_v29  ;;  %v2281_v24 = vld [vmem:[%s3019_s10 + $0x18] sm:$0xc] }
  0x43   : > { %2706 = vmatprep.subr.bf16.mxu1 %v2896_v32 }
  0x45   : > { %2683 = vmatpush3.bf16.msra.mxu0 %v2895_v29  ;;  %v2296_v29 = vrot.slane %v2281_v24, 10  ;;  %v1210_v24 = vrot.slane %v2290_v18, 6 }
  0x46   : > { %2707 = vmatpush3.bf16.msra.mxu1 %v2896_v32  ;;  %2684 = vmatprep.subr.bf16.mxu0 %v2897_v41  ;;  %v2267_v32 = vcombine.low %v973_v23, %v977_v28  ;;  %v2300_v23 = vrot.slane %v2289_v17, 10 }
  0x47   : > { %2708 = vmatprep.subr.bf16.mxu1 %v2898_v42  ;;  %v1195_v35 = vsel %vm3091_vm5, %v2296_v29, %v1194_v30  ;;  %v2294_v30 = vld [vmem:[%s3019_s10 + $0x4c] sm:$0x3] }
  0x48   : > { %v2319_v37 = vcombine.low %v1191_v33, %v1195_v35  ;;  %v993_v33 = vsel %vm3031_vm2, %v2248_v4, %v992_v5  ;;  %v1000_v35 = vrot.slane %v2242_v20, 5  ;;  %v2928_v4 = vld [vmem:[%s3441_s1 + $0x1d8] sm:$0xff]   ;;  %v2378_v20 = vld [vmem:[%s3019_s10 + $0x4c] sm:$0x1] }
  0x49   : > { %2685 = vmatpush3.bf16.msra.mxu0 %v2897_v41  ;;  %v2233_v41 = vld [vmem:[%s3019_s10 + $0x28] sm:$0xe] }
  0x4a   : > { %2709 = vmatpush3.bf16.msra.mxu1 %v2898_v42  ;;  %2718 = vmatprep.subr.bf16.mxu0 %v2901_v50  ;;  %v2234_v42 = vld [vmem:[%s3019_s10 + $0x2c] sm:$0x1]  ;;  %v2246_v53 = vrot.slane %v2233_v41, 9  ;;  %v1218_v41 = vrot.slane %v2294_v30, 6  ;;  %v2380_v30 = vld [vmem:[%s3019_s10 + $0x54] sm:$0x1] }
  0x4b   : > { %2742 = vmatprep.subr.bf16.mxu1 %v2902_v56 }
  0x4c   : > { %2687 = vmatmul.mubr.bf16.vlgmr.msra.gmra.mxu0 %v2180_v54  ;;  %v984_v54 = vrot.slane %v2234_v42, 5  ;;  %v2922_v42 = vld [vmem:[%s3441_s1 + $0x1f0] sm:$0xff]  }
  0x4d   : > { %2711 = vmatmul.mubr.bf16.vlgmr.msra.gmra.mxu1 %v2900_v55  ;;  %2719 = vmatpush3.bf16.msra.mxu0 %v2901_v50  ;;  %v2916_v50 = vld [vmem:[%s3441_s1 + $0x148] sm:$0xff]   ;;  %v2297_v55 = vrot.slane %v2283_v43, 10 }
  0x4e   : > { %2743 = vmatpush3.bf16.msra.mxu1 %v2902_v56  ;;  %2720 = vmatprep.subr.bf16.mxu0 %v2903_v63  ;;  %v1198_v56 = vrot.slane %v2284_v44, 6 }
  0x4f   : > { %2744 = vmatprep.subr.bf16.mxu1 %v2904_v0  ;;  %2690 = vmatprep.mubr.bf16.mxu0 %v2181_v2  ;;  %v2918_v2 = vld [vmem:[%s3441_s1 + $0x140] sm:$0xff]  }
  0x50   : > { %2714 = vmatprep.mubr.bf16.mxu1 %v2907_v3  ;;  %v2240_v3 = vld [vmem:[%s3019_s10 + $0x44] sm:$0x1] }
  0x51   : > { %2721 = vmatpush3.bf16.msra.mxu0 %v2903_v63  ;;  %v988_v63 = vrot.slane %v2236_v48, 5  ;;  %v996_v15 = vrot.slane %v2240_v3, 5 }
  0x52   : > { %2745 = vmatpush3.bf16.msra.mxu1 %v2904_v0  ;;  %2722 = vmatprep.subr.bf16.mxu0 %v2905_v6  ;;  %v2239_v0 = vld [vmem:[%s3019_s10 + $0x40] sm:$0xe] }
  0x53   : > { %2746 = vmatprep.subr.bf16.mxu1 %v2906_v7  ;;  %v2249_v14 = vrot.slane %v2239_v0, 9 }
  0x54   : > { %2691 = vmatmul.mubr.bf16.gmra.mxu0 %v2182_v9  ;;  %v2287_v9 = vld [vmem:[%s3019_s10 + $0x30] sm:$0xc] }
  0x55   : > { %2723 = vmatpush3.bf16.msra.mxu0 %v2905_v6  ;;  %2715 = vmatmul.mubr.bf16.gmra.mxu1 %v2908_v8  ;;  %v981_v6 = vsel %vm3031_vm2, %v2245_v51, %v980_v52  ;;  %v2241_v8 = vld [vmem:[%s3019_s10 + $0x48] sm:$0xe]  ;;  %v2299_v21 = vrot.slane %v2287_v9, 10  ;;  %v997_v45 = vsel %vm3031_vm2, %v2249_v14, %v996_v15  ;;  %v2925_v52 = vld [vmem:[%s3441_s1 + $0x1a0] sm:$0xff]   ;;  %v2372_v9 = vld [vmem:[%s3019_s10 + $0x34] sm:$0x1] }
  0x56   : > { %2747 = vmatpush3.bf16.msra.mxu1 %v2906_v7  ;;  %2724 = vmatprep.subr.bf16.mxu0 %v2909_v10  ;;  %v985_v7 = vsel %vm3031_vm2, %v2246_v53, %v984_v54  ;;  %v2926_v54 = vld [vmem:[%s3441_s1 + $0x1e0] sm:$0xff]   ;;  %v1587_v18 = vrot.slane %v2372_v9, 5 }
  0x57   : > { %2748 = vmatprep.subr.bf16.mxu1 %v2910_v11  ;;  %2734 = vmatprep.mubr.bf16.mxu0 %v2267_v32  ;;  %v2268_v28 = vcombine.low %v981_v6, %v985_v7  ;;  %v989_v32 = vsel %vm3031_vm2, %v2247_v62, %v988_v63  ;;  %v2384_v62 = vrot.slane %v2369_v58, 9  ;;  %v2929_v6 = vld [vmem:[%s3441_s1 + $0x190] sm:$0xff]   ;;  %v2375_v14 = vld [vmem:[%s3019_s10 + $0x40] sm:$0xe]  ;;  %v2376_v15 = vld [vmem:[%s3019_s10 + $0x44] sm:$0x1] }
  0x58   : > { %2758 = vmatprep.mubr.bf16.mxu1 %v2319_v37  ;;  %v1211_v37 = vsel %vm3091_vm5, %v2300_v23, %v1210_v24  ;;  %v2269_v43 = vcombine.low %v989_v32, %v993_v33  ;;  %v2930_v7 = vld [vmem:[%s3441_s1 + $0x1d0] sm:$0xff]   ;;  %v2934_v24 = vld [vmem:[%s3441_s1 + $0x1c0] sm:$0xff]   ;;  %v1595_v26 = vrot.slane %v2376_v15, 5  ;;  %v2382_v32 = vld [vmem:[%s3019_s10 + $0x5c] sm:$0x1] }
  0x59   : > { %2725 = vmatpush3.bf16.msra.mxu0 %v2909_v10  ;;  %v2288_v10 = vld [vmem:[%s3019_s10 + $0x34] sm:$0x3] }
  0x5a   : > { %2749 = vmatpush3.bf16.msra.mxu1 %v2910_v11  ;;  %2726 = vmatprep.subr.bf16.mxu0 %v2911_v31  ;;  %v1199_v11 = vsel %vm3091_vm5, %v2297_v55, %v1198_v56  ;;  %v1206_v22 = vrot.slane %v2288_v10, 6  ;;  %v2935_v55 = vld [vmem:[%s3019_s10 + $0x20] ss:$8 sps:$4 sm:$0xff]   ;;  %v2424_v15 = vld [vmem:[%s3019_s10 + $0x34] sm:$0x3] }
  0x5b   : > { %2750 = vmatprep.subr.bf16.mxu1 %v2912_v34  ;;  %v2320_v29 = vcombine.low %v1199_v11, %v1203_v12  ;;  %v2367_v56 = vld [vmem:[%s3019_s10 + $0x20] sm:$0xe]  ;;  %v2931_v10 = vld [vmem:[%s3441_s1 + $0x188] sm:$0xff]   ;;  %v2373_v11 = vld [vmem:[%s3019_s10 + $0x38] sm:$0xe] }
  0x5c   : > { %v2383_v60 = vrot.slane %v2367_v56, 9  ;;  %v2374_v12 = vld [vmem:[%s3019_s10 + $0x3c] sm:$0x1] }
  0x5d   : > { %2727 = vmatpush3.bf16.msra.mxu0 %v2911_v31  ;;  %v2921_v31 = vld [vmem:[%s3441_s1 + $0x1b0] sm:$0xff]   ;;  %v1591_v23 = vrot.slane %v2374_v12, 5 }
  0x5e   : > { %2751 = vmatpush3.bf16.msra.mxu1 %v2912_v34  ;;  %2728 = vmatprep.subr.bf16.mxu0 %v2913_v36  ;;  %v2250_v34 = vrot.slane %v2241_v8, 9  ;;  %v1580_v0 = vsel %vm3031_vm2, %v2383_v60, %v1579_v61  ;;  %v2371_v8 = vld [vmem:[%s3019_s10 + $0x30] sm:$0xe] }
  0x5f   : > { %2752 = vmatprep.subr.bf16.mxu1 %v2914_v38  ;;  %v2385_v17 = vrot.slane %v2371_v8, 9  ;;  %v2944_v12 = vld [vmem:[%s3441_s1 + $0x210] sm:$0xff]  }
  0x60   : > { %v1001_v46 = vsel %vm3031_vm2, %v2250_v34, %v1000_v35  ;;  %v2937_v35 = vld [vmem:[%s3441_s1 + $0x238] sm:$0xff]  }
  0x61   : > { %2729 = vmatpush3.bf16.msra.mxu0 %v2913_v36  ;;  %v1207_v36 = vsel %vm3091_vm5, %v2299_v21, %v1206_v22  ;;  %v2270_v51 = vcombine.low %v997_v45, %v1001_v46  ;;  %v2933_v21 = vld [vmem:[%s3441_s1 + $0x180] sm:$0xff]   ;;  %v2386_v22 = vrot.slane %v2373_v11, 9  ;;  %v1588_v33 = vsel %vm3031_vm2, %v2385_v17, %v1587_v18  ;;  %v2943_v11 = vld [vmem:[%s3441_s1 + $0x218] sm:$0xff]  }
  0x62   : > { %2753 = vmatpush3.bf16.msra.mxu1 %v2914_v38  ;;  %2730 = vmatprep.subr.bf16.mxu0 %v2915_v49  ;;  %v2301_v38 = vrot.slane %v2291_v25, 10  ;;  %v2321_v44 = vcombine.low %v1207_v36, %v1211_v37  ;;  %v2387_v25 = vrot.slane %v2375_v14, 9  ;;  %v2936_v36 = vld [vmem:[%s3019_s10 + $0x30] ss:$8 sps:$4 sm:$0xff]   ;;  %v2420_v45 = vld [vmem:[%s3019_s10 + $0x24] sm:$0x3] }
  0x63   : > { %2754 = vmatprep.subr.bf16.mxu1 %v2916_v50  ;;  %v1592_v34 = vsel %vm3031_vm2, %v2386_v22, %v1591_v23  ;;  %v1797_v56 = vrot.slane %v2420_v45, 6  ;;  %v2423_v14 = vld [vmem:[%s3019_s10 + $0x30] sm:$0xc]  ;;  %v2425_v17 = vld [vmem:[%s3019_s10 + $0x38] sm:$0xc] }
  0x64   : > { %v1215_v48 = vsel %vm3091_vm5, %v2301_v38, %v1214_v39  ;;  %v1603_v38 = vrot.slane %v2380_v30, 5  ;;  %v2938_v39 = vld [vmem:[%s3441_s1 + $0x230] sm:$0xff]   ;;  %v2408_v46 = vcombine.low %v1588_v33, %v1592_v34  ;;  %v2426_v18 = vld [vmem:[%s3019_s10 + $0x3c] sm:$0x3]  ;;  %v2437_v23 = vrot.slane %v2423_v14, 10 }
  0x65   : > { %2731 = vmatpush3.bf16.msra.mxu0 %v2915_v49  ;;  %v1219_v49 = vsel %vm3091_vm5, %v2302_v40, %v1218_v41  ;;  %v1596_v40 = vsel %vm3031_vm2, %v2387_v25, %v1595_v26  ;;  %v2434_v22 = vld [vmem:[%s3019_s10 + $0x5c] sm:$0x3]  ;;  %v2438_v25 = vrot.slane %v2425_v17, 10  ;;  %v1809_v26 = vrot.slane %v2426_v18, 6 }
  0x66   : > { %2755 = vmatpush3.bf16.msra.mxu1 %v2916_v50  ;;  %2732 = vmatprep.subr.bf16.mxu0 %v2917_v59  ;;  %v2924_v50 = vld [vmem:[%s3441_s1 + $0x1e8] sm:$0xff]   ;;  %v2322_v53 = vcombine.low %v1215_v48, %v1219_v49  ;;  %v2427_v49 = vld [vmem:[%s3019_s10 + $0x40] sm:$0xc] }
  0x67   : > { %2756 = vmatprep.subr.bf16.mxu1 %v2918_v2  ;;  %v2422_v48 = vld [vmem:[%s3019_s10 + $0x2c] sm:$0x3]  ;;  %v1810_v33 = vsel %vm3091_vm5, %v2438_v25, %v1809_v26 }
  0x68   : > { %v1801_v58 = vrot.slane %v2422_v48, 6 }
  0x69   : > { %2733 = vmatpush3.bf16.msra.mxu0 %v2917_v59  ;;  %v2370_v59 = vld [vmem:[%s3019_s10 + $0x2c] sm:$0x1] }
  0x6a   : > { %2757 = vmatpush3.bf16.msra.mxu1 %v2918_v2  ;;  %2766 = vmatprep.subr.bf16.mxu0 %v2919_v13  ;;  %v1583_v63 = vrot.slane %v2370_v59, 5  ;;  %v2927_v2 = vld [vmem:[%s3441_s1 + $0x198] sm:$0xff]   ;;  %v2439_v59 = vrot.slane %v2427_v49, 10 }
  0x6b   : > { %2790 = vmatprep.subr.bf16.mxu1 %v2920_v19 }
  0x6c   : > { %2735 = vmatmul.mubr.bf16.vlgmr.msra.gmra.mxu0 %v2268_v28  ;;  %v1584_v3 = vsel %vm3031_vm2, %v2384_v62, %v1583_v63  ;;  %v1599_v28 = vrot.slane %v2378_v20, 5  ;;  %v2941_v63 = vld [vmem:[%s3441_s1 + $0x228] sm:$0xff]   ;;  %v2432_v20 = vld [vmem:[%s3019_s10 + $0x54] sm:$0x3] }
  0x6d   : > { %2759 = vmatmul.mubr.bf16.vlgmr.msra.gmra.mxu1 %v2320_v29  ;;  %2767 = vmatpush3.bf16.msra.mxu0 %v2919_v13  ;;  %v2407_v5 = vcombine.low %v1580_v0, %v1584_v3  ;;  %v2932_v13 = vld [vmem:[%s3441_s1 + $0x1c8] sm:$0xff]   ;;  %v2379_v29 = vld [vmem:[%s3019_s10 + $0x50] sm:$0xe] }
  0x6e   : > { %2791 = vmatpush3.bf16.msra.mxu1 %v2920_v19  ;;  %2768 = vmatprep.subr.bf16.mxu0 %v2921_v31  ;;  %v2377_v19 = vld [vmem:[%s3019_s10 + $0x48] sm:$0xe]  ;;  %v2389_v37 = vrot.slane %v2379_v29, 9  ;;  %v2940_v3 = vld [vmem:[%s3019_s10 + $0x50] ss:$8 sps:$4 sm:$0xff]   ;;  %v1821_v29 = vrot.slane %v2432_v20, 6 }
  0x6f   : > { %2792 = vmatprep.subr.bf16.mxu1 %v2922_v42  ;;  %2738 = vmatprep.mubr.bf16.mxu0 %v2269_v43  ;;  %v2388_v27 = vrot.slane %v2377_v19, 9  ;;  %v1607_v43 = vrot.slane %v2382_v32, 5  ;;  %v2431_v19 = vld [vmem:[%s3019_s10 + $0x50] sm:$0xc] }
  0x70   : > { %2762 = vmatprep.mubr.bf16.mxu1 %v2321_v44  ;;  %v2419_v44 = vld [vmem:[%s3019_s10 + $0x20] sm:$0xc]  ;;  %v1604_v0 = vsel %vm3031_vm2, %v2389_v37, %v1603_v38 }
  0x71   : > { %2769 = vmatpush3.bf16.msra.mxu0 %v2921_v31  ;;  %v2381_v31 = vld [vmem:[%s3019_s10 + $0x58] sm:$0xe]  ;;  %v1600_v41 = vsel %vm3031_vm2, %v2388_v27, %v1599_v28  ;;  %v2946_v27 = vld [vmem:[%s3441_s1 + $0x200] sm:$0xff]   ;;  %v2441_v28 = vrot.slane %v2431_v19, 10 }
  0x72   : > { %2793 = vmatpush3.bf16.msra.mxu1 %v2922_v42  ;;  %2770 = vmatprep.subr.bf16.mxu0 %v2923_v47  ;;  %v2390_v42 = vrot.slane %v2381_v31, 9  ;;  %v1825_v31 = vrot.slane %v2434_v22, 6 }
  0x73   : > { %2794 = vmatprep.subr.bf16.mxu1 %v2924_v50  ;;  %v1822_v34 = vsel %vm3091_vm5, %v2441_v28, %v1821_v29 }
  0x74   : > { %2739 = vmatmul.mubr.bf16.gmra.mxu0 %v2270_v51  ;;  %v2429_v51 = vld [vmem:[%s3019_s10 + $0x48] sm:$0xc] }
  0x75   : > { %2771 = vmatpush3.bf16.msra.mxu0 %v2923_v47  ;;  %2763 = vmatmul.mubr.bf16.gmra.mxu1 %v2322_v53  ;;  %v2421_v47 = vld [vmem:[%s3019_s10 + $0x28] sm:$0xc]  ;;  %v2440_v61 = vrot.slane %v2429_v51, 10 }
  0x76   : > { %2795 = vmatpush3.bf16.msra.mxu1 %v2924_v50  ;;  %2772 = vmatprep.subr.bf16.mxu0 %v2925_v52  ;;  %v2428_v50 = vld [vmem:[%s3019_s10 + $0x44] sm:$0x3]  ;;  %v2939_v53 = vld [vmem:[%s3019_s10 + $0x40] ss:$8 sps:$4 sm:$0xff]   ;;  %v2436_v57 = vrot.slane %v2421_v47, 10 }
  0x77   : > { %2796 = vmatprep.subr.bf16.mxu1 %v2926_v54  ;;  %2782 = vmatprep.mubr.bf16.mxu0 %v2935_v55  ;;  %v2435_v55 = vrot.slane %v2419_v44, 10  ;;  %v1813_v60 = vrot.slane %v2428_v50, 6 }
  0x78   : > { %2806 = vmatprep.mubr.bf16.mxu1 %v2407_v5  ;;  %v1802_v5 = vsel %vm3091_vm5, %v2436_v57, %v1801_v58 }
  0x79   : > { %2773 = vmatpush3.bf16.msra.mxu0 %v2925_v52  ;;  %v2430_v52 = vld [vmem:[%s3019_s10 + $0x4c] sm:$0x3] }
  0x7a   : > { %2797 = vmatpush3.bf16.msra.mxu1 %v2926_v54  ;;  %2774 = vmatprep.subr.bf16.mxu0 %v2927_v2  ;;  %v2409_v54 = vcombine.low %v1596_v40, %v1600_v41  ;;  %v1817_v62 = vrot.slane %v2430_v52, 6 }
  0x7b   : > { %2798 = vmatprep.subr.bf16.mxu1 %v2928_v4 }
  0x7c   : > { %v1818_v8 = vsel %vm3091_vm5, %v2440_v61, %v1817_v62 }
  0x7d   : > { %2775 = vmatpush3.bf16.msra.mxu0 %v2927_v2  ;;  %v1608_v2 = vsel %vm3031_vm2, %v2390_v42, %v1607_v43 }
  0x7e   : > { %2799 = vmatpush3.bf16.msra.mxu1 %v2928_v4  ;;  %2776 = vmatprep.subr.bf16.mxu0 %v2929_v6  ;;  %v1798_v4 = vsel %vm3091_vm5, %v2435_v55, %v1797_v56 }
  0x7f   : > { %2800 = vmatprep.subr.bf16.mxu1 %v2930_v7  ;;  %v2459_v9 = vcombine.low %v1798_v4, %v1802_v5 }
  0x81   : > { %2777 = vmatpush3.bf16.msra.mxu0 %v2929_v6  ;;  %v2410_v6 = vcombine.low %v1604_v0, %v1608_v2 }
  0x82   : > { %2801 = vmatpush3.bf16.msra.mxu1 %v2930_v7  ;;  %2778 = vmatprep.subr.bf16.mxu0 %v2931_v10  ;;  %v1814_v7 = vsel %vm3091_vm5, %v2439_v59, %v1813_v60 }
  0x83   : > { %2802 = vmatprep.subr.bf16.mxu1 %v2932_v13 }
  0x85   : > { %2779 = vmatpush3.bf16.msra.mxu0 %v2931_v10  ;;  %v2461_v10 = vcombine.low %v1814_v7, %v1818_v8 }
  0x86   : > { %2803 = vmatpush3.bf16.msra.mxu1 %v2932_v13  ;;  %2780 = vmatprep.subr.bf16.mxu0 %v2933_v21  ;;  %v2945_v13 = vld [vmem:[%s3441_s1 + $0x208] sm:$0xff]  }
  0x87   : > { %2804 = vmatprep.subr.bf16.mxu1 %v2934_v24 }
  0x89   : > { %2781 = vmatpush3.bf16.msra.mxu0 %v2933_v21  ;;  %v2433_v21 = vld [vmem:[%s3019_s10 + $0x58] sm:$0xc] }
  0x8a   : > { %2805 = vmatpush3.bf16.msra.mxu1 %v2934_v24  ;;  %2814 = vmatprep.subr.bf16.mxu0 %v2937_v35  ;;  %v1805_v24 = vrot.slane %v2424_v15, 6  ;;  %v2442_v30 = vrot.slane %v2433_v21, 10 }
  0x8b   : > { %2838 = vmatprep.subr.bf16.mxu1 %v2937_v35 }
  0x8c   : > { %2783 = vmatmul.mubr.bf16.vlgmr.msra.gmra.mxu0 %v2936_v36  ;;  %v1806_v32 = vsel %vm3091_vm5, %v2437_v23, %v1805_v24 }
  0x8d   : > { %2807 = vmatmul.mubr.bf16.vlgmr.msra.gmra.mxu1 %v2408_v46  ;;  %2815 = vmatpush3.bf16.msra.mxu0 %v2937_v35  ;;  %v2460_v36 = vcombine.low %v1806_v32, %v1810_v33 }
  0x8e   : > { %2846 = vmatpush3.bf16.msra.mxu1 %v2937_v35  ;;  %2816 = vmatprep.subr.bf16.mxu0 %v2938_v39  ;;  %v1826_v35 = vsel %vm3091_vm5, %v2442_v30, %v1825_v31 }
  0x8f   : > { %2839 = vmatprep.subr.bf16.mxu1 %v2938_v39  ;;  %2786 = vmatprep.mubr.bf16.mxu0 %v2939_v53  ;;  %v2462_v37 = vcombine.low %v1822_v34, %v1826_v35 }
  0x90   : > { %2810 = vmatprep.mubr.bf16.mxu1 %v2409_v54 }
  0x91   : > { %2817 = vmatpush3.bf16.msra.mxu0 %v2938_v39 }
  0x92   : > { %2847 = vmatpush3.bf16.msra.mxu1 %v2938_v39  ;;  %2818 = vmatprep.subr.bf16.mxu0 %v2941_v63 }
  0x93   : > { %2840 = vmatprep.subr.bf16.mxu1 %v2941_v63 }
  0x94   : > { %2787 = vmatmul.mubr.bf16.gmra.mxu0 %v2940_v3 }
  0x95   : > { %2819 = vmatpush3.bf16.msra.mxu0 %v2941_v63  ;;  %2811 = vmatmul.mubr.bf16.gmra.mxu1 %v2410_v6 }
  0x96   : > { %2848 = vmatpush3.bf16.msra.mxu1 %v2941_v63  ;;  %2820 = vmatprep.subr.bf16.mxu0 %v2942_v16 }
  0x97   : > { %2841 = vmatprep.subr.bf16.mxu1 %v2942_v16  ;;  %2830 = vmatprep.mubr.bf16.mxu0 %v2459_v9 }
  0x98   : > { %2834 = vmatprep.mubr.bf16.mxu1 %v2461_v10 }
  0x99   : > { %2821 = vmatpush3.bf16.msra.mxu0 %v2942_v16 }
  0x9a   : > { %2849 = vmatpush3.bf16.msra.mxu1 %v2942_v16  ;;  %2822 = vmatprep.subr.bf16.mxu0 %v2943_v11 }
  0x9b   : > { %2842 = vmatprep.subr.bf16.mxu1 %v2943_v11 }
  0x9d   : > { %2823 = vmatpush3.bf16.msra.mxu0 %v2943_v11 }
  0x9e   : > { %2850 = vmatpush3.bf16.msra.mxu1 %v2943_v11  ;;  %2824 = vmatprep.subr.bf16.mxu0 %v2944_v12 }
  0x9f   : > { %2843 = vmatprep.subr.bf16.mxu1 %v2944_v12 }
  0xa1   : > { %2825 = vmatpush3.bf16.msra.mxu0 %v2944_v12 }
  0xa2   : > { %2851 = vmatpush3.bf16.msra.mxu1 %v2944_v12  ;;  %2826 = vmatprep.subr.bf16.mxu0 %v2945_v13 }
  0xa3   : > { %2844 = vmatprep.subr.bf16.mxu1 %v2945_v13 }
  0xa5   : > { %2827 = vmatpush3.bf16.msra.mxu0 %v2945_v13 }
  0xa6   : > { %2852 = vmatpush3.bf16.msra.mxu1 %v2945_v13  ;;  %2828 = vmatprep.subr.bf16.mxu0 %v2946_v27 }
  0xa7   : > { %2845 = vmatprep.subr.bf16.mxu1 %v2946_v27 }
  0xa9   : > { %2829 = vmatpush3.bf16.msra.mxu0 %v2946_v27 }
  0xaa   : > { %2853 = vmatpush3.bf16.msra.mxu1 %v2946_v27 }
  0xac   : > { %2831 = vmatmul.mubr.bf16.vlgmr.msra.gmra.mxu0 %v2460_v36 }
  0xad   : > { %2835 = vmatmul.mubr.bf16.vlgmr.msra.gmra.mxu1 %v2462_v37 }
  0xec   : > { %v2640_v38 = vpop.f32.mrf.mxu0 }
  0xed   : > { %v2664_v40 = vpop.f32.mrf.mxu1 }
  0xee   : > { %v378_v39 = vpop.f32.mrf.mxu0  ;;  %v524_v27 = vadd.f32 %v2664_v40, %v2640_v38 }
  0xef   : > { %v515_v42 = vpop.f32.mrf.mxu1 }
  0xf0   : > { %v2641_v41 = vpop.f32.mrf.mxu0  ;;  %v516_v31 = vadd.f32 %v515_v42, %v378_v39 }
  0xf1   : > { %v2665_v45 = vpop.f32.mrf.mxu1 }
  0xf2   : > { %v381_v43 = vpop.f32.mrf.mxu0  ;;  %v527_v35 = vadd.f32 %v2665_v45, %v2641_v41 }
  0xf3   : > { %v518_v47 = vpop.f32.mrf.mxu1 }
  0xf4   : > { %v2644_v44 = vpop.f32.mrf.mxu0 }
  0xf5   : > { %v2668_v48 = vpop.f32.mrf.mxu1 }
  0xf6   : > { %v394_v46 = vpop.f32.mrf.mxu0  ;;  %v540_v29 = vadd.f32 %v2668_v48, %v2644_v44 }
  0xf7   : > { %v531_v49 = vpop.f32.mrf.mxu1 }
  0xf8   : > { %v2645_v1 = vpop.f32.mrf.mxu0  ;;  %v532_v33 = vadd.f32 %v531_v49, %v394_v46 }
  0xf9   : > { %v2669_v52 = vpop.f32.mrf.mxu1 }
  0xfa   : > { %v397_v50 = vpop.f32.mrf.mxu0 }
  0xfb   : > { %v534_v54 = vpop.f32.mrf.mxu1 }
  0xfc   : > { %v535_v42 = vadd.f32 %v534_v54, %v397_v50 }
 0x10c   : > { %v2688_v51 = vpop.f32.mrf.mxu0 }
 0x10d   : > { %v2712_v55 = vpop.f32.mrf.mxu1  ;;  %v761_v32 = vadd.f32 %v2688_v51, %v524_v27 }
 0x10e   : > { %v728_v53 = vpop.f32.mrf.mxu0 }
 0x10f   : > { %v899_v57 = vpop.f32.mrf.mxu1  ;;  %v759_v36 = vadd.f32 %v728_v53, %v516_v31  ;;  %v932_v44 = vadd.f32 %v2712_v55, %v761_v32 }
 0x110   : > { %v2689_v56 = vpop.f32.mrf.mxu0 }
 0x111   : > { %v2713_v59 = vpop.f32.mrf.mxu1  ;;  %v762_v48 = vadd.f32 %v2689_v56, %v527_v35  ;;  %v930_v46 = vadd.f32 %v899_v57, %v759_v36 }
 0x112   : > { %v731_v58 = vpop.f32.mrf.mxu0 }
 0x113   : > { %v902_v61 = vpop.f32.mrf.mxu1  ;;  %v933_v53 = vadd.f32 %v2713_v59, %v762_v48 }
 0x114   : > { %v2692_v60 = vpop.f32.mrf.mxu0 }
 0x115   : > { %v2716_v63 = vpop.f32.mrf.mxu1  ;;  %v765_v34 = vadd.f32 %v2692_v60, %v540_v29 }
 0x116   : > { %v744_v62 = vpop.f32.mrf.mxu0 }
 0x117   : > { %v915_v2 = vpop.f32.mrf.mxu1  ;;  %v763_v38 = vadd.f32 %v744_v62, %v532_v33  ;;  %v936_v27 = vadd.f32 %v2716_v63, %v765_v34 }
 0x118   : > { %v2693_v0 = vpop.f32.mrf.mxu0 }
 0x119   : > { %v2717_v4 = vpop.f32.mrf.mxu1  ;;  %v934_v60 = vadd.f32 %v915_v2, %v763_v38 }
 0x11a   : > { %v747_v3 = vpop.f32.mrf.mxu0 }
 0x11b   : > { %v918_v6 = vpop.f32.mrf.mxu1  ;;  %v764_v41 = vadd.f32 %v747_v3, %v535_v42 }
 0x11d   : > { %v935_v55 = vadd.f32 %v918_v6, %v764_v41 }
 0x12c   : > { %v2736_v5 = vpop.f32.mrf.mxu0 }
 0x12d   : > { %v2760_v8 = vpop.f32.mrf.mxu1  ;;  %v1150_v29 = vadd.f32 %v2736_v5, %v932_v44 }
 0x12e   : > { %v1117_v7 = vpop.f32.mrf.mxu0 }
 0x12f   : > { %v1335_v9 = vpop.f32.mrf.mxu1 }
 0x130   : > { %v2737_v16 = vpop.f32.mrf.mxu0 }
 0x131   : > { %v2761_v11 = vpop.f32.mrf.mxu1 }
 0x132   : > { %v1120_v10 = vpop.f32.mrf.mxu0 }
 0x133   : > { %v3421_v13 = vpop.f32.mrf.mxu1 }
 0x134   : > { %v2740_v12 = vpop.f32.mrf.mxu0  ;;  %3448 = vst [vmem:[#allocation2_spill] sm:$0xff] %v3421_v13  ;;  %v543_v13 = vadd.f32 %v2669_v52, %v2645_v1 }
 0x135   : > { %v2764_v14 = vpop.f32.mrf.mxu1  ;;  %v1154_v45 = vadd.f32 %v2740_v12, %v936_v27 }
 0x136   : > { %v1133_v15 = vpop.f32.mrf.mxu0  ;;  %v766_v51 = vadd.f32 %v2693_v0, %v543_v13 }
 0x137   : > { %v1351_v17 = vpop.f32.mrf.mxu1  ;;  %v1152_v62 = vadd.f32 %v1133_v15, %v934_v60  ;;  %v1372_v56 = vadd.f32 %v2764_v14, %v1154_v45 }
 0x138   : > { %v2741_v18 = vpop.f32.mrf.mxu0  ;;  %v937_v52 = vadd.f32 %v2717_v4, %v766_v51 }
 0x139   : > { %v2765_v19 = vpop.f32.mrf.mxu1  ;;  %v1370_v2 = vadd.f32 %v1351_v17, %v1152_v62 }
 0x13a   : > { %v1136_v20 = vpop.f32.mrf.mxu0  ;;  %v1155_v50 = vadd.f32 %v2741_v18, %v937_v52 }
 0x13b   : > { %v1354_v22 = vpop.f32.mrf.mxu1  ;;  %v1153_v3 = vadd.f32 %v1136_v20, %v935_v55  ;;  %v3451_v15 = vld [vmem:[#allocation2_spill] sm:$0xff] }
 0x13d   : > { %v1371_v14 = vadd.f32 %v1354_v22, %v1153_v3 }
 0x14c   : > { %v2784_v21 = vpop.f32.mrf.mxu0 }
 0x14d   : > { %v2808_v23 = vpop.f32.mrf.mxu1 }
 0x14e   : > { %v1506_v24 = vpop.f32.mrf.mxu0 }
 0x14f   : > { %v1724_v25 = vpop.f32.mrf.mxu1 }
 0x150   : > { %v2785_v26 = vpop.f32.mrf.mxu0 }
 0x151   : > { %v3423_v28 = vpop.f32.mrf.mxu1 }
 0x152   : > { %3449 = vst [vmem:[#allocation3_spill] sm:$0xff] %v3423_v28  ;;  %v1509_v30 = vpop.f32.mrf.mxu0  ;;  %v519_v28 = vadd.f32 %v518_v47, %v381_v43  ;;  %v1368_v43 = vadd.f32 %v2760_v8, %v1150_v29  ;;  %v1151_v47 = vadd.f32 %v2737_v16, %v933_v53 }
 0x153   : > { %v3425_v37 = vpop.f32.mrf.mxu1 }
 0x154   : > { %3450 = vst [vmem:[#allocation4_spill] sm:$0xff] %v3425_v37  ;;  %v2788_v40 = vpop.f32.mrf.mxu0  ;;  %v760_v49 = vadd.f32 %v731_v58, %v519_v28  ;;  %v1148_v37 = vadd.f32 %v1117_v7, %v930_v46  ;;  %v1539_v58 = vadd.f32 %v2784_v21, %v1368_v43  ;;  %v1369_v12 = vadd.f32 %v2761_v11, %v1151_v47  ;;  %v2471_v11 = vld [vmem:[%s3442_s2] ss:$0 sm:$0xff] }
 0x155   : > { %v2812_v39 = vpop.f32.mrf.mxu1  ;;  %v1543_v5 = vadd.f32 %v2788_v40, %v1372_v56  ;;  %v1373_v7 = vadd.f32 %v2765_v19, %v1155_v50 }
 0x156   : > { %v1522_v31 = vpop.f32.mrf.mxu0  ;;  %v931_v33 = vadd.f32 %v902_v61, %v760_v49  ;;  %v1366_v63 = vadd.f32 %v1335_v9, %v1148_v37  ;;  %v1757_v8 = vadd.f32 %v2808_v23, %v1539_v58  ;;  %v1540_v16 = vadd.f32 %v2785_v26, %v1369_v12 }
 0x157   : > { %v1740_v1 = vpop.f32.mrf.mxu1  ;;  %v1541_v13 = vadd.f32 %v1522_v31, %v1370_v2  ;;  %v1761_v18 = vadd.f32 %v2812_v39, %v1543_v5 }
 0x158   : > { %v2789_v54 = vpop.f32.mrf.mxu0  ;;  %v1149_v57 = vadd.f32 %v1120_v10, %v931_v33  ;;  %v1537_v59 = vadd.f32 %v1506_v24, %v1366_v63 }
 0x159   : > { %v2813_v0 = vpop.f32.mrf.mxu1  ;;  %v1544_v28 = vadd.f32 %v2789_v54, %v1373_v7  ;;  %v1759_v20 = vadd.f32 %v1740_v1, %v1541_v13  ;;  %v3452_v35 = vld [vmem:[#allocation3_spill] sm:$0xff] }
 0x15a   : > { %v1525_v4 = vpop.f32.mrf.mxu0  ;;  %v1367_v61 = vadd.f32 %v3451_v15, %v1149_v57  ;;  %v1755_v10 = vadd.f32 %v1724_v25, %v1537_v59  ;;  %v1758_v23 = vadd.f32 %v3452_v35, %v1540_v16 }
 0x15b   : > { %v1743_v6 = vpop.f32.mrf.mxu1  ;;  %v1542_v34 = vadd.f32 %v1525_v4, %v1371_v14  ;;  %v1762_v36 = vadd.f32 %v2813_v0, %v1544_v28  ;;  %v3453_v25 = vld [vmem:[#allocation4_spill] sm:$0xff] }
 0x15c   : > { %v1538_v21 = vadd.f32 %v1509_v30, %v1367_v61 }
 0x15d   : > { %v1760_v39 = vadd.f32 %v1743_v6, %v1542_v34 }
 0x15e   : > { %v1756_v30 = vadd.f32 %v3453_v25, %v1538_v21 }
 0x16c   : > { %v2832_v9 = vpop.f32.mrf.mxu0 }
 0x16d   : > { %v1975_v32 = vadd.f32 %v2832_v9, %v1757_v8  ;;  %v2836_v17 = vpop.f32.mrf.mxu1 }
 0x16e   : > { %v1979_v19 = vadd.f32 %v2836_v17, %v1761_v18  ;;  %v1942_v24 = vpop.f32.mrf.mxu0 }
 0x16f   : > { %v1973_v26 = vadd.f32 %v1942_v24, %v1755_v10  ;;  %v1958_v22 = vpop.f32.mrf.mxu1  ;;  %v1990_v40 = vadd.f32 %v2471_v11, %v1975_v32 }
 0x170   : > { %v1977_v37 = vadd.f32 %v1958_v22, %v1759_v20  ;;  %v2833_v38 = vpop.f32.mrf.mxu0  ;;  %v1994_v42 = vadd.f32 %v2471_v11, %v1979_v19 }
 0x171   : > { %v1976_v44 = vadd.f32 %v2833_v38, %v1758_v23  ;;  %v2837_v48 = vpop.f32.mrf.mxu1  ;;  %v1988_v46 = vadd.f32 %v2471_v11, %v1973_v26  ;;  %v1998_v53 = vmax.f32 %v1990_v40, 0.0 }
 0x172   : > { %v1980_v27 = vadd.f32 %v2837_v48, %v1762_v36  ;;  %v1945_v51 = vpop.f32.mrf.mxu0  ;;  %v1992_v41 = vadd.f32 %v2471_v11, %v1977_v37  ;;  %v2002_v62 = vmax.f32 %v1994_v42, 0.0 }
 0x173   : > { %v1991_v49 = vadd.f32 %v2471_v11, %v1976_v44  ;;  %v1974_v29 = vadd.f32 %v1945_v51, %v1756_v30  ;;  %v1961_v60 = vpop.f32.mrf.mxu1  ;;  %v1996_v47 = vmax.f32 %v1988_v46, 0.0 }
 0x174   : > { %v1995_v45 = vadd.f32 %v2471_v11, %v1980_v27  ;;  %v1978_v31 = vadd.f32 %v1961_v60, %v1760_v39  ;;  %v2000_v50 = vmax.f32 %v1992_v41, 0.0 }
 0x175   : > { %v1999_v1 = vmax.f32 %v1991_v49, 0.0  ;;  %v1989_v52 = vadd.f32 %v2471_v11, %v1974_v29 }
 0x176   : > { %v2003_v33 = vmax.f32 %v1995_v45, 0.0  ;;  %v1993_v43 = vadd.f32 %v2471_v11, %v1978_v31 }
 0x177   : > { %v2499_v55 = vpack.c.bf16 %v1999_v1, %v1998_v53  ;;  %v1997_v56 = vmax.f32 %v1989_v52, 0.0 }
 0x178   : > { %v2509_v54 = vpack.c.bf16 %v2003_v33, %v2002_v62  ;;  %v2001_v63 = vmax.f32 %v1993_v43, 0.0 }
 0x179   : > { %2511 = vst [vmem:[%s170_s21 + $0x8] sm:$0xff] %v2499_v55   ;;  %v2494_v57 = vpack.c.bf16 %v1997_v56, %v1996_v47 }
 0x17a   : > { %2513 = vst [vmem:[%s170_s21 + $0x18] sm:$0xff] %v2509_v54   ;;  %v2504_v58 = vpack.c.bf16 %v2001_v63, %v2000_v50 }
 0x17b   : > { %2495 = vst [vmem:[%s170_s21] sm:$0xff] %v2494_v57  }
 0x17c   : > { %2512 = vst [vmem:[%s170_s21 + $0x10] sm:$0xff] %v2504_v58  }
 0x17d PF: > { %s13_s12 = sadd.s32 1, %s2953_s12  }
 0x17e   : > { %p10_p4 = scmp.ge.s32.totalorder %s13_s12, 6  }
 0x180   :  { %12 = sbr.rel (!%p10_p4) target bundleno = 1 (0x1), region = 72 }

// kernel: _lambda_.13
= control target key start
LH: loop header
LB: loop body
LE: loop exit
PB: predicated region body
PF: predicated region fallthrough
CT: control target
= control target key end

     0   :  { %s2801_s12 = smov 0   ;;  %s3176_s0 = inlined_call_operand.vmem [shape: bf16[4,1,16,16,128], index: 0, kind: input, shape index: {}]   ;;  %s3177_s1 = inlined_call_operand.vmem [shape: bf16[9,128,128], index: 1, kind: input, shape index: {}]   ;;  %s3178_s2 = inlined_call_operand.vmem [shape: f32[1,128], index: 2, kind: input, shape index: {}]   ;;  %s3179_s3 = inlined_call_operand.vmem [shape: bf16[4,64,128], index: 3, kind: output, shape index: {}]  }
   0x1 LB: > { %s1952_s13 = sadd.s32 4294967295, %s2779_s12   ;;  %p1956_p0 = scmp.ge.s32.totalorder %s2779_s12, 1  ;;  %s2779_s12 = sphi %s2801_s12, %s13_s12  }
   0x2   : > { %p137_p1 = scmp.lt.s32.totalorder %s2779_s12, 5 }
   0x4   : > { %p138_p2 = pnand %p1956_p0, %p137_p1 }
   0x6   : > { %141 = sbr.rel (%p138_p2) target bundleno = 381 (0x17d), region = 32 }
   0xb   : > { %v2677_v0 = vld [vmem:[%s3177_s1 + $0x78] sm:$0xff]   ;;  %v2679_v2 = vld [vmem:[%s3177_s1 + $0x70] sm:$0xff]   ;;  %p161_p3 = scmp.lt.s32.totalorder %s1952_s13, 3  ;;  %v2681_v4 = vld [vmem:[%s3177_s1 + $0x68] sm:$0xff]   ;;  %vm228_vm0 = vcmask 1041408   ;;  %vm229_vm1 = vcmask 1045508  }
   0xc   : > { %v2678_v1 = vld [vmem:[%s3177_s1 + $0x38] sm:$0xff]   ;;  %2437 = vmatprep.subr.bf16.mxu0 %v2677_v0  ;;  %v2680_v3 = vld [vmem:[%s3177_s1 + $0x30] sm:$0xff]   ;;  %v2682_v5 = vld [vmem:[%s3177_s1 + $0x28] sm:$0xff]  }
   0xd   : > { %2461 = vmatprep.subr.bf16.mxu1 %v2678_v1  ;;  %2438 = vmatpush3.bf16.msra.mxu0 %v2677_v0  ;;  %s3189_s13 = smov (!%p161_p3, %s1952_s13), 3  ;;  %v2683_v6 = vld [vmem:[%s3177_s1 + $0x60] sm:$0xff]   ;;  %v2685_v8 = vld [vmem:[%s3177_s1 + $0x58] sm:$0xff]   ;;  %v2687_v10 = vld [vmem:[%s3177_s1 + $0x50] sm:$0xff]  }
   0xe   : > { %2462 = vmatpush3.bf16.msra.mxu1 %v2678_v1  ;;  %2439 = vmatprep.subr.bf16.mxu0 %v2679_v2  ;;  %v2684_v7 = vld [vmem:[%s3177_s1 + $0x20] sm:$0xff]   ;;  %s2296_s30 = sshll.u32 %s3189_s13, 7  ;;  %v2686_v9 = vld [vmem:[%s3177_s1 + $0x18] sm:$0xff]   ;;  %v2688_v14 = vld [vmem:[%s3177_s1 + $0x10] sm:$0xff]   ;;  %s2297_s18 = sshll.u32 %s3189_s13, 5 }
   0xf   : > { %2463 = vmatprep.subr.bf16.mxu1 %v2680_v3  ;;  %s2845_s10 = scalar_lea.vmem %s3176_s0, %s2296_s30  ;;  %vm2857_vm2 = vmor %vm228_vm0, %vm229_vm1  ;;  %v2689_v20 = vld [vmem:[%s3177_s1 + $0x48] sm:$0xff]   ;;  %v2691_v35 = vld [vmem:[%s3177_s1 + $0x40] sm:$0xff]   ;;  %s170_s21 = scalar_lea.vmem %s3179_s3, %s2297_s18 }
  0x10   : > { %v196_v11 = vld [vmem:[%s2845_s10] sm:$0xc]  ;;  %v197_v12 = vld [vmem:[%s2845_s10 + $0x4] sm:$0x3]  ;;  %v198_v13 = vld [vmem:[%s2845_s10 + $0x8] sm:$0xc] }
  0x11   : > { %2440 = vmatpush3.bf16.msra.mxu0 %v2679_v2  ;;  %v199_v15 = vld [vmem:[%s2845_s10 + $0xc] sm:$0x3]  ;;  %v1961_v17 = vrot.slane %v196_v11, 10  ;;  %v233_v18 = vrot.slane %v197_v12, 6  ;;  %v1962_v19 = vrot.slane %v198_v13, 10  ;;  %v2692_v36 = vld [vmem:[%s3177_s1] sm:$0xff]  }
  0x12   : > { %2464 = vmatpush3.bf16.msra.mxu1 %v2680_v3  ;;  %2441 = vmatprep.subr.bf16.mxu0 %v2681_v4  ;;  %v237_v21 = vrot.slane %v199_v15, 6  ;;  %v2693_v23 = vld [vmem:[%s2845_s10] ss:$8 sps:$4 sm:$0xff]   ;;  %v200_v24 = vld [vmem:[%s2845_s10 + $0x10] sm:$0xc]  ;;  %v2695_v39 = vld [vmem:[%s3177_s1 + $0xb8] sm:$0xff]  }
  0x13   : > { %2465 = vmatprep.subr.bf16.mxu1 %v2682_v5  ;;  %v234_v22 = vsel %vm2857_vm2, %v1961_v17, %v233_v18  ;;  %v201_v25 = vld [vmem:[%s2845_s10 + $0x14] sm:$0x3]  ;;  %v2690_v26 = vld [vmem:[%s3177_s1 + $0x8] sm:$0xff]   ;;  %v202_v28 = vld [vmem:[%s2845_s10 + $0x18] sm:$0xc]  ;;  %2477 = vmatprep.mubr.bf16.mxu1 %v2693_v23  ;;  %v1963_v31 = vrot.slane %v200_v24, 10 }
  0x14   : > { %v238_v27 = vsel %vm2857_vm2, %v1962_v19, %v237_v21  ;;  %v203_v29 = vld [vmem:[%s2845_s10 + $0x1c] sm:$0x3]  ;;  %v241_v32 = vrot.slane %v201_v25, 6  ;;  %v1964_v33 = vrot.slane %v202_v28, 10  ;;  %v2694_v41 = vld [vmem:[%s2845_s10 + $0x10] ss:$8 sps:$4 sm:$0xff]  }
  0x15   : > { %2442 = vmatpush3.bf16.msra.mxu0 %v2681_v4  ;;  %v1985_v30 = vcombine.low %v234_v22, %v238_v27  ;;  %v245_v34 = vrot.slane %v203_v29, 6  ;;  %v2696_v40 = vld [vmem:[%s3177_s1 + $0xf8] sm:$0xff]   ;;  %v2697_v43 = vld [vmem:[%s3177_s1 + $0xb0] sm:$0xff]   ;;  %v204_v45 = vld [vmem:[%s2845_s10 + $0x20] sm:$0xc] }
  0x16   : > { %2466 = vmatpush3.bf16.msra.mxu1 %v2682_v5  ;;  %2443 = vmatprep.subr.bf16.mxu0 %v2683_v6  ;;  %v242_v37 = vsel %vm2857_vm2, %v1963_v31, %v241_v32  ;;  %v2698_v44 = vld [vmem:[%s3177_s1 + $0xf0] sm:$0xff]   ;;  %v205_v46 = vld [vmem:[%s2845_s10 + $0x24] sm:$0x3]  ;;  %v206_v47 = vld [vmem:[%s2845_s10 + $0x28] sm:$0xc]  ;;  %v1965_v49 = vrot.slane %v204_v45, 10 }
  0x17   : > { %2467 = vmatprep.subr.bf16.mxu1 %v2684_v7  ;;  %2453 = vmatprep.mubr.bf16.mxu0 %v1985_v30  ;;  %v246_v38 = vsel %vm2857_vm2, %v1964_v33, %v245_v34  ;;  %v207_v48 = vld [vmem:[%s2845_s10 + $0x2c] sm:$0x3]  ;;  %v249_v50 = vrot.slane %v205_v46, 6  ;;  %v1966_v51 = vrot.slane %v206_v47, 10  ;;  %v2705_v53 = vld [vmem:[%s2845_s10 + $0x20] ss:$8 sps:$4 sm:$0xff]  }
  0x18   : > { %v1986_v42 = vcombine.low %v242_v37, %v246_v38  ;;  %v253_v52 = vrot.slane %v207_v48, 6  ;;  %v208_v54 = vld [vmem:[%s2845_s10 + $0x30] sm:$0xc]  ;;  %v209_v57 = vld [vmem:[%s2845_s10 + $0x34] sm:$0x3]  ;;  %v2699_v60 = vld [vmem:[%s3177_s1 + $0xa8] sm:$0xff]  }
  0x19   : > { %2444 = vmatpush3.bf16.msra.mxu0 %v2683_v6  ;;  %v250_v55 = vsel %vm2857_vm2, %v1965_v49, %v249_v50  ;;  %v210_v58 = vld [vmem:[%s2845_s10 + $0x38] sm:$0xc]  ;;  %v211_v59 = vld [vmem:[%s2845_s10 + $0x3c] sm:$0x3]  ;;  %v1967_v62 = vrot.slane %v208_v54, 10  ;;  %v257_v63 = vrot.slane %v209_v57, 6 }
  0x1a   : > { %2468 = vmatpush3.bf16.msra.mxu1 %v2684_v7  ;;  %2445 = vmatprep.subr.bf16.mxu0 %v2685_v8  ;;  %v254_v56 = vsel %vm2857_vm2, %v1966_v51, %v253_v52  ;;  %v1968_v0 = vrot.slane %v210_v58, 10  ;;  %v2700_v1 = vld [vmem:[%s3177_s1 + $0xe8] sm:$0xff]   ;;  %v261_v2 = vrot.slane %v211_v59, 6  ;;  %v2706_v3 = vld [vmem:[%s2845_s10 + $0x30] ss:$8 sps:$4 sm:$0xff]   ;;  %v2701_v6 = vld [vmem:[%s3177_s1 + $0xa0] sm:$0xff]  }
  0x1b   : > { %2469 = vmatprep.subr.bf16.mxu1 %v2686_v9  ;;  %v1987_v61 = vcombine.low %v250_v55, %v254_v56  ;;  %v258_v4 = vsel %vm2857_vm2, %v1967_v62, %v257_v63  ;;  %v2713_v11 = vld [vmem:[%s2845_s10 + $0x4] ss:$8 sps:$4 sm:$0xff]   ;;  %v2714_v12 = vld [vmem:[%s2845_s10 + $0x20] ss:$8 sps:$4 sm:$0xff]   ;;  %v2707_v13 = vld [vmem:[%s3177_s1 + $0x90] sm:$0xff]  }
  0x1c   : > { %v262_v5 = vsel %vm2857_vm2, %v1968_v0, %v261_v2  ;;  %v2709_v15 = vld [vmem:[%s3177_s1 + $0x88] sm:$0xff]   ;;  %v2711_v18 = vld [vmem:[%s3177_s1 + $0x80] sm:$0xff]   ;;  %v2717_v21 = vld [vmem:[%s3177_s1 + $0x138] sm:$0xff]  }
  0x1d   : > { %2446 = vmatpush3.bf16.msra.mxu0 %v2685_v8  ;;  %v1988_v7 = vcombine.low %v258_v4, %v262_v5  ;;  %v2702_v8 = vld [vmem:[%s3177_s1 + $0xe0] sm:$0xff]   ;;  %v2710_v17 = vld [vmem:[%s3177_s1 + $0xc8] sm:$0xff]   ;;  %v2718_v22 = vld [vmem:[%s3177_s1 + $0x178] sm:$0xff]  }
  0x1e   : > { %2470 = vmatpush3.bf16.msra.mxu1 %v2686_v9  ;;  %2447 = vmatprep.subr.bf16.mxu0 %v2687_v10  ;;  %v2703_v9 = vld [vmem:[%s3177_s1 + $0x98] sm:$0xff]   ;;  %v2712_v19 = vld [vmem:[%s3177_s1 + $0xc0] sm:$0xff]   ;;  %v2719_v24 = vld [vmem:[%s3177_s1 + $0x130] sm:$0xff]  }
  0x1f   : > { %2471 = vmatprep.subr.bf16.mxu1 %v2688_v14  ;;  %v2716_v23 = vld [vmem:[%s2845_s10 + $0x30] ss:$8 sps:$4 sm:$0xff]   ;;  %v2723_v27 = vld [vmem:[%s3177_s1 + $0x128] sm:$0xff]   ;;  %v2073_v30 = vld [vmem:[%s2845_s10 + $0x20] sm:$0xc] }
  0x20   : > { %v2720_v25 = vld [vmem:[%s3177_s1 + $0x170] sm:$0xff]   ;;  %v2725_v28 = vld [vmem:[%s2845_s10 + $0x40] ss:$8 sps:$4 sm:$0xff]   ;;  %v2074_v31 = vld [vmem:[%s2845_s10 + $0x24] sm:$0x3]  ;;  %v2089_v34 = vrot.slane %v2073_v30, 10 }
  0x21   : > { %2448 = vmatpush3.bf16.msra.mxu0 %v2687_v10  ;;  %v2704_v10 = vld [vmem:[%s3177_s1 + $0xd8] sm:$0xff]   ;;  %v2724_v29 = vld [vmem:[%s3177_s1 + $0x168] sm:$0xff]   ;;  %v2077_v48 = vld [vmem:[%s2845_s10 + $0x30] sm:$0xc] }
  0x22   : > { %2472 = vmatpush3.bf16.msra.mxu1 %v2688_v14  ;;  %2449 = vmatprep.subr.bf16.mxu0 %v2689_v20  ;;  %v2708_v14 = vld [vmem:[%s3177_s1 + $0xd0] sm:$0xff]   ;;  %v2075_v32 = vld [vmem:[%s2845_s10 + $0x28] sm:$0xc]  ;;  %v2076_v33 = vld [vmem:[%s2845_s10 + $0x2c] sm:$0x3]  ;;  %v2091_v54 = vrot.slane %v2077_v48, 10 }
  0x23   : > { %2473 = vmatprep.subr.bf16.mxu1 %v2690_v26  ;;  %v925_v37 = vrot.slane %v2076_v33, 6  ;;  %v2722_v38 = vld [vmem:[%s2845_s10 + $0x34] ss:$8 sps:$4 sm:$0xff]   ;;  %v2737_v45 = vld [vmem:[%s2845_s10 + $0x24] ss:$8 sps:$4 sm:$0xff]  }
  0x24   : > { %v2729_v46 = vld [vmem:[%s3177_s1 + $0x118] sm:$0xff]   ;;  %v2078_v49 = vld [vmem:[%s2845_s10 + $0x34] sm:$0x3]  ;;  %v2081_v56 = vld [vmem:[%s2845_s10 + $0x40] sm:$0xc] }
  0x25   : > { %2450 = vmatpush3.bf16.msra.mxu0 %v2689_v20  ;;  %v2715_v20 = vld [vmem:[%s2845_s10 + $0x14] ss:$8 sps:$4 sm:$0xff]   ;;  %v2079_v52 = vld [vmem:[%s2845_s10 + $0x38] sm:$0xc]  ;;  %v929_v55 = vrot.slane %v2078_v49, 6  ;;  %v2733_v57 = vld [vmem:[%s3177_s1 + $0x108] sm:$0xff]  }
  0x26   : > { %2474 = vmatpush3.bf16.msra.mxu1 %v2690_v26  ;;  %2451 = vmatprep.subr.bf16.mxu0 %v2691_v35  ;;  %v2721_v26 = vld [vmem:[%s2845_s10 + $0x24] ss:$8 sps:$4 sm:$0xff]   ;;  %v2730_v47 = vld [vmem:[%s3177_s1 + $0x158] sm:$0xff]   ;;  %v2731_v50 = vld [vmem:[%s3177_s1 + $0x110] sm:$0xff]   ;;  %v2092_v62 = vrot.slane %v2079_v52, 10 }
  0x27   : > { %2475 = vmatprep.subr.bf16.mxu1 %v2692_v36  ;;  %v2732_v51 = vld [vmem:[%s3177_s1 + $0x150] sm:$0xff]   ;;  %v2082_v58 = vld [vmem:[%s2845_s10 + $0x44] sm:$0x3]  ;;  %v2734_v59 = vld [vmem:[%s3177_s1 + $0x148] sm:$0xff]  }
  0x28   : > { %v2735_v0 = vld [vmem:[%s3177_s1 + $0x100] sm:$0xff]   ;;  %v937_v2 = vrot.slane %v2082_v58, 6  ;;  %v2750_v48 = vld [vmem:[%s3177_s1 + $0x1d8] sm:$0xff]   ;;  %v2751_v49 = vld [vmem:[%s3177_s1 + $0x190] sm:$0xff]  }
  0x29   : > { %2452 = vmatpush3.bf16.msra.mxu0 %v2691_v35  ;;  %v921_v35 = vrot.slane %v2074_v31, 6  ;;  %v2201_v52 = vld [vmem:[%s2845_s10 + $0x50] sm:$0xc]  ;;  %v2765_v16 = vld [vmem:[%s3177_s1 + $0x218] sm:$0xff]  }
  0x2a   : > { %2476 = vmatpush3.bf16.msra.mxu1 %v2692_v36  ;;  %2485 = vmatprep.subr.bf16.mxu0 %v2695_v39  ;;  %v2090_v36 = vrot.slane %v2075_v32, 10  ;;  %v2745_v32 = vld [vmem:[%s2845_s10 + $0x44] ss:$8 sps:$4 sm:$0xff]   ;;  %v2215_v58 = vrot.slane %v2201_v52, 10 }
  0x2b   : > { %2509 = vmatprep.subr.bf16.mxu1 %v2696_v40 }
  0x2c   : > { %2454 = vmatmul.mubr.bf16.vlgmr.msra.gmra.mxu0 %v1986_v42  ;;  %v2727_v42 = vld [vmem:[%s3177_s1 + $0x120] sm:$0xff]  }
  0x2d   : > { %2478 = vmatmul.mubr.bf16.vlgmr.msra.gmra.mxu1 %v2694_v41  ;;  %2486 = vmatpush3.bf16.msra.mxu0 %v2695_v39  ;;  %v922_v39 = vsel %vm2857_vm2, %v2089_v34, %v921_v35  ;;  %v926_v41 = vsel %vm2857_vm2, %v2090_v36, %v925_v37  ;;  %v2743_v37 = vld [vmem:[%s3177_s1 + $0x1a8] sm:$0xff]  }
  0x2e   : > { %2510 = vmatpush3.bf16.msra.mxu1 %v2696_v40  ;;  %2487 = vmatprep.subr.bf16.mxu0 %v2697_v43  ;;  %v2726_v40 = vld [vmem:[%s2845_s10 + $0x50] ss:$8 sps:$4 sm:$0xff]  }
  0x2f   : > { %2511 = vmatprep.subr.bf16.mxu1 %v2698_v44  ;;  %2481 = vmatprep.mubr.bf16.mxu1 %v2705_v53  ;;  %v2080_v53 = vld [vmem:[%s2845_s10 + $0x3c] sm:$0x3] }
  0x30   : > { %2457 = vmatprep.mubr.bf16.mxu0 %v1987_v61  ;;  %v2084_v61 = vld [vmem:[%s2845_s10 + $0x4c] sm:$0x3]  ;;  %v933_v63 = vrot.slane %v2080_v53, 6  ;;  %v2202_v53 = vld [vmem:[%s2845_s10 + $0x54] sm:$0x3] }
  0x31   : > { %2488 = vmatpush3.bf16.msra.mxu0 %v2697_v43  ;;  %v2728_v43 = vld [vmem:[%s3177_s1 + $0x160] sm:$0xff]   ;;  %v941_v5 = vrot.slane %v2084_v61, 6 }
  0x32   : > { %2512 = vmatpush3.bf16.msra.mxu1 %v2698_v44  ;;  %2489 = vmatprep.subr.bf16.mxu0 %v2699_v60  ;;  %v2113_v44 = vcombine.low %v922_v39, %v926_v41  ;;  %v2747_v41 = vld [vmem:[%s3177_s1 + $0x1a0] sm:$0xff]  }
  0x33   : > { %2513 = vmatprep.subr.bf16.mxu1 %v2700_v1 }
  0x34   : > { %2458 = vmatmul.mubr.bf16.gmra.mxu0 %v1988_v7  ;;  %v2086_v7 = vld [vmem:[%s2845_s10 + $0x54] sm:$0x3] }
  0x35   : > { %2490 = vmatpush3.bf16.msra.mxu0 %v2699_v60  ;;  %2482 = vmatmul.mubr.bf16.gmra.mxu1 %v2706_v3  ;;  %v2083_v60 = vld [vmem:[%s2845_s10 + $0x48] sm:$0xc]  ;;  %v2736_v3 = vld [vmem:[%s3177_s1 + $0x140] sm:$0xff]  }
  0x36   : > { %2514 = vmatpush3.bf16.msra.mxu1 %v2700_v1  ;;  %2491 = vmatprep.subr.bf16.mxu0 %v2701_v6  ;;  %v2093_v1 = vrot.slane %v2081_v56, 10  ;;  %v2094_v4 = vrot.slane %v2083_v60, 10  ;;  %v2754_v56 = vld [vmem:[%s3177_s1 + $0x1c8] sm:$0xff]  }
  0x37   : > { %2515 = vmatprep.subr.bf16.mxu1 %v2702_v8  ;;  %2501 = vmatprep.mubr.bf16.mxu0 %v2713_v11  ;;  %v2087_v11 = vld [vmem:[%s2845_s10 + $0x58] sm:$0xc] }
  0x38   : > { %2525 = vmatprep.mubr.bf16.mxu1 %v2714_v12  ;;  %v2088_v12 = vld [vmem:[%s2845_s10 + $0x5c] sm:$0x3] }
  0x39   : > { %2492 = vmatpush3.bf16.msra.mxu0 %v2701_v6  ;;  %v2085_v6 = vld [vmem:[%s2845_s10 + $0x50] sm:$0xc] }
  0x3a   : > { %2516 = vmatpush3.bf16.msra.mxu1 %v2702_v8  ;;  %2493 = vmatprep.subr.bf16.mxu0 %v2703_v9  ;;  %v930_v8 = vsel %vm2857_vm2, %v2091_v54, %v929_v55  ;;  %v2203_v54 = vld [vmem:[%s2845_s10 + $0x58] sm:$0xc]  ;;  %v2204_v55 = vld [vmem:[%s2845_s10 + $0x5c] sm:$0x3] }
  0x3b   : > { %2517 = vmatprep.subr.bf16.mxu1 %v2704_v10  ;;  %v2216_v60 = vrot.slane %v2203_v54, 10  ;;  %v1492_v61 = vrot.slane %v2204_v55, 6 }
  0x3d   : > { %2494 = vmatpush3.bf16.msra.mxu0 %v2703_v9  ;;  %v934_v9 = vsel %vm2857_vm2, %v2092_v62, %v933_v63  ;;  %v2205_v62 = vld [vmem:[%s2845_s10 + $0x60] sm:$0xc]  ;;  %v2206_v63 = vld [vmem:[%s2845_s10 + $0x64] sm:$0x3] }
  0x3e   : > { %2518 = vmatpush3.bf16.msra.mxu1 %v2704_v10  ;;  %2495 = vmatprep.subr.bf16.mxu0 %v2707_v13  ;;  %v2739_v10 = vld [vmem:[%s3177_s1 + $0x1b8] sm:$0xff]  }
  0x3f   : > { %2519 = vmatprep.subr.bf16.mxu1 %v2708_v14 }
  0x41   : > { %2496 = vmatpush3.bf16.msra.mxu0 %v2707_v13  ;;  %v2740_v13 = vld [vmem:[%s3177_s1 + $0x1f8] sm:$0xff]  }
  0x42   : > { %2520 = vmatpush3.bf16.msra.mxu1 %v2708_v14  ;;  %2497 = vmatprep.subr.bf16.mxu0 %v2709_v15  ;;  %v2114_v14 = vcombine.low %v930_v8, %v934_v9  ;;  %v1493_v8 = vsel %vm2857_vm2, %v2216_v60, %v1492_v61  ;;  %v2759_v9 = vld [vmem:[%s3177_s1 + $0x238] sm:$0xff]  }
  0x43   : > { %2521 = vmatprep.subr.bf16.mxu1 %v2710_v17 }
  0x45   : > { %2498 = vmatpush3.bf16.msra.mxu0 %v2709_v15  ;;  %v2095_v15 = vrot.slane %v2085_v6, 10 }
  0x46   : > { %2522 = vmatpush3.bf16.msra.mxu1 %v2710_v17  ;;  %2499 = vmatprep.subr.bf16.mxu0 %v2711_v18  ;;  %v945_v17 = vrot.slane %v2086_v7, 6 }
  0x47   : > { %2523 = vmatprep.subr.bf16.mxu1 %v2712_v19 }
  0x48   : > { %v946_v30 = vsel %vm2857_vm2, %v2095_v15, %v945_v17 }
  0x49   : > { %2500 = vmatpush3.bf16.msra.mxu0 %v2711_v18  ;;  %v938_v18 = vsel %vm2857_vm2, %v2093_v1, %v937_v2  ;;  %v2208_v1 = vld [vmem:[%s2845_s10 + $0x6c] sm:$0x3]  ;;  %v2756_v2 = vld [vmem:[%s3177_s1 + $0x1c0] sm:$0xff]  }
  0x4a   : > { %2524 = vmatpush3.bf16.msra.mxu1 %v2712_v19  ;;  %2533 = vmatprep.subr.bf16.mxu0 %v2717_v21  ;;  %v942_v19 = vsel %vm2857_vm2, %v2094_v4, %v941_v5  ;;  %v1496_v4 = vrot.slane %v2206_v63, 6  ;;  %v1500_v6 = vrot.slane %v2208_v1, 6 }
  0x4b   : > { %2557 = vmatprep.subr.bf16.mxu1 %v2718_v22 }
  0x4c   : > { %2502 = vmatmul.mubr.bf16.vlgmr.msra.gmra.mxu0 %v2715_v20  ;;  %v2096_v20 = vrot.slane %v2087_v11, 10  ;;  %v2210_v11 = vld [vmem:[%s2845_s10 + $0x74] sm:$0x3] }
  0x4d   : > { %2526 = vmatmul.mubr.bf16.vlgmr.msra.gmra.mxu1 %v2716_v23  ;;  %2534 = vmatpush3.bf16.msra.mxu0 %v2717_v21  ;;  %v949_v21 = vrot.slane %v2088_v12, 6  ;;  %v2741_v23 = vld [vmem:[%s3177_s1 + $0x1b0] sm:$0xff]   ;;  %v2211_v12 = vld [vmem:[%s2845_s10 + $0x78] sm:$0xc] }
  0x4e   : > { %2558 = vmatpush3.bf16.msra.mxu1 %v2718_v22  ;;  %2535 = vmatprep.subr.bf16.mxu0 %v2719_v24  ;;  %v2738_v22 = vld [vmem:[%s2845_s10 + $0x34] ss:$8 sps:$4 sm:$0xff]  }
  0x4f   : > { %2559 = vmatprep.subr.bf16.mxu1 %v2720_v25  ;;  %2505 = vmatprep.mubr.bf16.mxu0 %v2721_v26  ;;  %v2742_v26 = vld [vmem:[%s3177_s1 + $0x1f0] sm:$0xff]   ;;  %v950_v31 = vsel %vm2857_vm2, %v2096_v20, %v949_v21  ;;  %v1504_v21 = vrot.slane %v2210_v11, 6 }
  0x50   : > { %2529 = vmatprep.mubr.bf16.mxu1 %v2725_v28  ;;  %v2199_v28 = vld [vmem:[%s2845_s10 + $0x48] sm:$0xc]  ;;  %v2116_v39 = vcombine.low %v946_v30, %v950_v31  ;;  %v2764_v31 = vld [vmem:[%s3177_s1 + $0x220] sm:$0xff]  }
  0x51   : > { %2536 = vmatpush3.bf16.msra.mxu0 %v2719_v24  ;;  %v2197_v24 = vld [vmem:[%s2845_s10 + $0x40] sm:$0xc]  ;;  %v2214_v35 = vrot.slane %v2199_v28, 10 }
  0x52   : > { %2560 = vmatpush3.bf16.msra.mxu1 %v2720_v25  ;;  %2537 = vmatprep.subr.bf16.mxu0 %v2723_v27  ;;  %v2198_v25 = vld [vmem:[%s2845_s10 + $0x44] sm:$0x3]  ;;  %v2213_v33 = vrot.slane %v2197_v24, 10  ;;  %v2761_v24 = vld [vmem:[%s2845_s10 + $0x60] ss:$8 sps:$4 sm:$0xff]  }
  0x53   : > { %2561 = vmatprep.subr.bf16.mxu1 %v2724_v29  ;;  %v1480_v34 = vrot.slane %v2198_v25, 6 }
  0x54   : > { %2506 = vmatmul.mubr.bf16.gmra.mxu0 %v2722_v38  ;;  %v2744_v38 = vld [vmem:[%s3177_s1 + $0x1e8] sm:$0xff]  }
  0x55   : > { %2538 = vmatpush3.bf16.msra.mxu0 %v2723_v27  ;;  %2530 = vmatmul.mubr.bf16.gmra.mxu1 %v2726_v40  ;;  %v2115_v27 = vcombine.low %v938_v18, %v942_v19  ;;  %v2746_v40 = vld [vmem:[%s2845_s10 + $0x54] ss:$8 sps:$4 sm:$0xff]  }
  0x56   : > { %2562 = vmatpush3.bf16.msra.mxu1 %v2724_v29  ;;  %2539 = vmatprep.subr.bf16.mxu0 %v2727_v42  ;;  %v2200_v29 = vld [vmem:[%s2845_s10 + $0x4c] sm:$0x3]  ;;  %v2760_v19 = vld [vmem:[%s3177_s1 + $0x230] sm:$0xff]  }
  0x57   : > { %2563 = vmatprep.subr.bf16.mxu1 %v2728_v43  ;;  %2549 = vmatprep.mubr.bf16.mxu0 %v2113_v44  ;;  %v1484_v36 = vrot.slane %v2200_v29, 6  ;;  %v2748_v44 = vld [vmem:[%s3177_s1 + $0x1e0] sm:$0xff]   ;;  %v2762_v29 = vld [vmem:[%s2845_s10 + $0x70] ss:$8 sps:$4 sm:$0xff]  }
  0x58   : > { %2573 = vmatprep.mubr.bf16.mxu1 %v2737_v45  ;;  %v2757_v45 = vld [vmem:[%s2845_s10 + $0x40] ss:$8 sps:$4 sm:$0xff]  }
  0x59   : > { %2540 = vmatpush3.bf16.msra.mxu0 %v2727_v42  ;;  %v1481_v42 = vsel %vm2857_vm2, %v2213_v33, %v1480_v34  ;;  %v2770_v33 = vld [vmem:[%s2845_s10 + $0x64] ss:$8 sps:$4 sm:$0xff]   ;;  %v2766_v34 = vld [vmem:[%s3177_s1 + $0x210] sm:$0xff]  }
  0x5a   : > { %2564 = vmatpush3.bf16.msra.mxu1 %v2728_v43  ;;  %2541 = vmatprep.subr.bf16.mxu0 %v2729_v46  ;;  %v1485_v43 = vsel %vm2857_vm2, %v2214_v35, %v1484_v36  ;;  %v2767_v35 = vld [vmem:[%s3177_s1 + $0x208] sm:$0xff]   ;;  %v2768_v36 = vld [vmem:[%s3177_s1 + $0x200] sm:$0xff]  }
  0x5b   : > { %2565 = vmatprep.subr.bf16.mxu1 %v2730_v47 }
  0x5d   : > { %2542 = vmatpush3.bf16.msra.mxu0 %v2729_v46  ;;  %v2237_v46 = vcombine.low %v1481_v42, %v1485_v43 }
  0x5e   : > { %2566 = vmatpush3.bf16.msra.mxu1 %v2730_v47  ;;  %2543 = vmatprep.subr.bf16.mxu0 %v2731_v50  ;;  %v2749_v47 = vld [vmem:[%s3177_s1 + $0x198] sm:$0xff]  }
  0x5f   : > { %2567 = vmatprep.subr.bf16.mxu1 %v2732_v51 }
  0x61   : > { %2544 = vmatpush3.bf16.msra.mxu0 %v2731_v50  ;;  %v2752_v50 = vld [vmem:[%s3177_s1 + $0x1d0] sm:$0xff]  }
  0x62   : > { %2568 = vmatpush3.bf16.msra.mxu1 %v2732_v51  ;;  %2545 = vmatprep.subr.bf16.mxu0 %v2733_v57  ;;  %v2753_v51 = vld [vmem:[%s3177_s1 + $0x188] sm:$0xff]  }
  0x63   : > { %2569 = vmatprep.subr.bf16.mxu1 %v2734_v59 }
  0x65   : > { %2546 = vmatpush3.bf16.msra.mxu0 %v2733_v57  ;;  %v2755_v57 = vld [vmem:[%s3177_s1 + $0x180] sm:$0xff]  }
  0x66   : > { %2570 = vmatpush3.bf16.msra.mxu1 %v2734_v59  ;;  %2547 = vmatprep.subr.bf16.mxu0 %v2735_v0  ;;  %v1488_v59 = vrot.slane %v2202_v53, 6 }
  0x67   : > { %2571 = vmatprep.subr.bf16.mxu1 %v2736_v3 }
  0x68   : > { %v1489_v7 = vsel %vm2857_vm2, %v2215_v58, %v1488_v59 }
  0x69   : > { %2548 = vmatpush3.bf16.msra.mxu0 %v2735_v0  ;;  %v2207_v0 = vld [vmem:[%s2845_s10 + $0x68] sm:$0xc]  ;;  %v2238_v15 = vcombine.low %v1489_v7, %v1493_v8 }
  0x6a   : > { %2572 = vmatpush3.bf16.msra.mxu1 %v2736_v3  ;;  %2581 = vmatprep.subr.bf16.mxu0 %v2739_v10  ;;  %v2217_v3 = vrot.slane %v2205_v62, 10  ;;  %v2218_v5 = vrot.slane %v2207_v0, 10 }
  0x6b   : > { %2605 = vmatprep.subr.bf16.mxu1 %v2740_v13 }
  0x6c   : > { %2550 = vmatmul.mubr.bf16.vlgmr.msra.gmra.mxu0 %v2114_v14  ;;  %v2758_v14 = vld [vmem:[%s2845_s10 + $0x50] ss:$8 sps:$4 sm:$0xff]   ;;  %v1497_v17 = vsel %vm2857_vm2, %v2217_v3, %v1496_v4  ;;  %v1501_v18 = vsel %vm2857_vm2, %v2218_v5, %v1500_v6 }
  0x6d   : > { %2574 = vmatmul.mubr.bf16.vlgmr.msra.gmra.mxu1 %v2738_v22  ;;  %2582 = vmatpush3.bf16.msra.mxu0 %v2739_v10  ;;  %v2209_v10 = vld [vmem:[%s2845_s10 + $0x70] sm:$0xc]  ;;  %v2220_v22 = vrot.slane %v2211_v12, 10  ;;  %v2239_v25 = vcombine.low %v1497_v17, %v1501_v18 }
  0x6e   : > { %2606 = vmatpush3.bf16.msra.mxu1 %v2740_v13  ;;  %2583 = vmatprep.subr.bf16.mxu0 %v2741_v23  ;;  %v2212_v13 = vld [vmem:[%s2845_s10 + $0x7c] sm:$0x3]  ;;  %v2219_v20 = vrot.slane %v2209_v10, 10 }
  0x6f   : > { %2607 = vmatprep.subr.bf16.mxu1 %v2742_v26  ;;  %2553 = vmatprep.mubr.bf16.mxu0 %v2115_v27 }
  0x70   : > { %2577 = vmatprep.mubr.bf16.mxu1 %v2745_v32  ;;  %v1505_v27 = vsel %vm2857_vm2, %v2219_v20, %v1504_v21  ;;  %v2769_v32 = vld [vmem:[%s2845_s10 + $0x44] ss:$8 sps:$4 sm:$0xff]  }
  0x71   : > { %2584 = vmatpush3.bf16.msra.mxu0 %v2741_v23  ;;  %v1508_v23 = vrot.slane %v2212_v13, 6 }
  0x72   : > { %2608 = vmatpush3.bf16.msra.mxu1 %v2742_v26  ;;  %2585 = vmatprep.subr.bf16.mxu0 %v2743_v37  ;;  %v2763_v26 = vld [vmem:[%s3177_s1 + $0x228] sm:$0xff]  }
  0x73   : > { %2609 = vmatprep.subr.bf16.mxu1 %v2744_v38  ;;  %v1509_v28 = vsel %vm2857_vm2, %v2220_v22, %v1508_v23 }
  0x74   : > { %2554 = vmatmul.mubr.bf16.gmra.mxu0 %v2116_v39  ;;  %v2240_v30 = vcombine.low %v1505_v27, %v1509_v28 }
  0x75   : > { %2586 = vmatpush3.bf16.msra.mxu0 %v2743_v37  ;;  %2578 = vmatmul.mubr.bf16.gmra.mxu1 %v2746_v40  ;;  %v2771_v37 = vld [vmem:[%s2845_s10 + $0x54] ss:$8 sps:$4 sm:$0xff]  }
  0x76   : > { %2610 = vmatpush3.bf16.msra.mxu1 %v2744_v38  ;;  %2587 = vmatprep.subr.bf16.mxu0 %v2747_v41  ;;  %v2772_v38 = vld [vmem:[%s2845_s10 + $0x74] ss:$8 sps:$4 sm:$0xff]  }
  0x77   : > { %2611 = vmatprep.subr.bf16.mxu1 %v2748_v44  ;;  %2597 = vmatprep.mubr.bf16.mxu0 %v2757_v45 }
  0x78   : > { %2621 = vmatprep.mubr.bf16.mxu1 %v2237_v46 }
  0x79   : > { %2588 = vmatpush3.bf16.msra.mxu0 %v2747_v41 }
  0x7a   : > { %2612 = vmatpush3.bf16.msra.mxu1 %v2748_v44  ;;  %2589 = vmatprep.subr.bf16.mxu0 %v2749_v47 }
  0x7b   : > { %2613 = vmatprep.subr.bf16.mxu1 %v2750_v48 }
  0x7d   : > { %2590 = vmatpush3.bf16.msra.mxu0 %v2749_v47 }
  0x7e   : > { %2614 = vmatpush3.bf16.msra.mxu1 %v2750_v48  ;;  %2591 = vmatprep.subr.bf16.mxu0 %v2751_v49 }
  0x7f   : > { %2615 = vmatprep.subr.bf16.mxu1 %v2752_v50 }
  0x81   : > { %2592 = vmatpush3.bf16.msra.mxu0 %v2751_v49 }
  0x82   : > { %2616 = vmatpush3.bf16.msra.mxu1 %v2752_v50  ;;  %2593 = vmatprep.subr.bf16.mxu0 %v2753_v51 }
  0x83   : > { %2617 = vmatprep.subr.bf16.mxu1 %v2754_v56 }
  0x85   : > { %2594 = vmatpush3.bf16.msra.mxu0 %v2753_v51 }
  0x86   : > { %2618 = vmatpush3.bf16.msra.mxu1 %v2754_v56  ;;  %2595 = vmatprep.subr.bf16.mxu0 %v2755_v57 }
  0x87   : > { %2619 = vmatprep.subr.bf16.mxu1 %v2756_v2 }
  0x89   : > { %2596 = vmatpush3.bf16.msra.mxu0 %v2755_v57 }
  0x8a   : > { %2620 = vmatpush3.bf16.msra.mxu1 %v2756_v2  ;;  %2629 = vmatprep.subr.bf16.mxu0 %v2759_v9 }
  0x8b   : > { %2653 = vmatprep.subr.bf16.mxu1 %v2759_v9 }
  0x8c   : > { %2598 = vmatmul.mubr.bf16.vlgmr.msra.gmra.mxu0 %v2758_v14 }
  0x8d   : > { %2622 = vmatmul.mubr.bf16.vlgmr.msra.gmra.mxu1 %v2238_v15  ;;  %2630 = vmatpush3.bf16.msra.mxu0 %v2759_v9 }
  0x8e   : > { %2661 = vmatpush3.bf16.msra.mxu1 %v2759_v9  ;;  %2631 = vmatprep.subr.bf16.mxu0 %v2760_v19 }
  0x8f   : > { %2654 = vmatprep.subr.bf16.mxu1 %v2760_v19  ;;  %2601 = vmatprep.mubr.bf16.mxu0 %v2761_v24 }
  0x90   : > { %2625 = vmatprep.mubr.bf16.mxu1 %v2239_v25 }
  0x91   : > { %2632 = vmatpush3.bf16.msra.mxu0 %v2760_v19 }
  0x92   : > { %2662 = vmatpush3.bf16.msra.mxu1 %v2760_v19  ;;  %2633 = vmatprep.subr.bf16.mxu0 %v2763_v26 }
  0x93   : > { %2655 = vmatprep.subr.bf16.mxu1 %v2763_v26 }
  0x94   : > { %2602 = vmatmul.mubr.bf16.gmra.mxu0 %v2762_v29 }
  0x95   : > { %2634 = vmatpush3.bf16.msra.mxu0 %v2763_v26  ;;  %2626 = vmatmul.mubr.bf16.gmra.mxu1 %v2240_v30 }
  0x96   : > { %2663 = vmatpush3.bf16.msra.mxu1 %v2763_v26  ;;  %2635 = vmatprep.subr.bf16.mxu0 %v2764_v31 }
  0x97   : > { %2656 = vmatprep.subr.bf16.mxu1 %v2764_v31  ;;  %2645 = vmatprep.mubr.bf16.mxu0 %v2769_v32 }
  0x98   : > { %2649 = vmatprep.mubr.bf16.mxu1 %v2770_v33 }
  0x99   : > { %2636 = vmatpush3.bf16.msra.mxu0 %v2764_v31 }
  0x9a   : > { %2664 = vmatpush3.bf16.msra.mxu1 %v2764_v31  ;;  %2637 = vmatprep.subr.bf16.mxu0 %v2765_v16 }
  0x9b   : > { %2657 = vmatprep.subr.bf16.mxu1 %v2765_v16 }
  0x9d   : > { %2638 = vmatpush3.bf16.msra.mxu0 %v2765_v16 }
  0x9e   : > { %2665 = vmatpush3.bf16.msra.mxu1 %v2765_v16  ;;  %2639 = vmatprep.subr.bf16.mxu0 %v2766_v34 }
  0x9f   : > { %2658 = vmatprep.subr.bf16.mxu1 %v2766_v34 }
  0xa1   : > { %2640 = vmatpush3.bf16.msra.mxu0 %v2766_v34 }
  0xa2   : > { %2666 = vmatpush3.bf16.msra.mxu1 %v2766_v34  ;;  %2641 = vmatprep.subr.bf16.mxu0 %v2767_v35 }
  0xa3   : > { %2659 = vmatprep.subr.bf16.mxu1 %v2767_v35 }
  0xa5   : > { %2642 = vmatpush3.bf16.msra.mxu0 %v2767_v35 }
  0xa6   : > { %2667 = vmatpush3.bf16.msra.mxu1 %v2767_v35  ;;  %2643 = vmatprep.subr.bf16.mxu0 %v2768_v36 }
  0xa7   : > { %2660 = vmatprep.subr.bf16.mxu1 %v2768_v36 }
  0xa9   : > { %2644 = vmatpush3.bf16.msra.mxu0 %v2768_v36 }
  0xaa   : > { %2668 = vmatpush3.bf16.msra.mxu1 %v2768_v36 }
  0xac   : > { %2646 = vmatmul.mubr.bf16.vlgmr.msra.gmra.mxu0 %v2771_v37 }
  0xad   : > { %2650 = vmatmul.mubr.bf16.vlgmr.msra.gmra.mxu1 %v2772_v38 }
  0xec   : > { %v2455_v39 = vpop.f32.mrf.mxu0 }
  0xed   : > { %v2479_v41 = vpop.f32.mrf.mxu1 }
  0xee   : > { %v378_v40 = vpop.f32.mrf.mxu0  ;;  %v524_v29 = vadd.f32 %v2479_v41, %v2455_v39 }
  0xef   : > { %v515_v43 = vpop.f32.mrf.mxu1 }
  0xf0   : > { %v2456_v42 = vpop.f32.mrf.mxu0  ;;  %v516_v33 = vadd.f32 %v515_v43, %v378_v40 }
  0xf1   : > { %v2480_v46 = vpop.f32.mrf.mxu1 }
  0xf2   : > { %v381_v44 = vpop.f32.mrf.mxu0  ;;  %v527_v36 = vadd.f32 %v2480_v46, %v2456_v42 }
  0xf3   : > { %v518_v48 = vpop.f32.mrf.mxu1 }
  0xf4   : > { %v2459_v45 = vpop.f32.mrf.mxu0 }
  0xf5   : > { %v2483_v49 = vpop.f32.mrf.mxu1 }
  0xf6   : > { %v394_v47 = vpop.f32.mrf.mxu0  ;;  %v540_v31 = vadd.f32 %v2483_v49, %v2459_v45 }
  0xf7   : > { %v531_v51 = vpop.f32.mrf.mxu1 }
  0xf8   : > { %v2460_v50 = vpop.f32.mrf.mxu0  ;;  %v532_v34 = vadd.f32 %v531_v51, %v394_v47 }
  0xf9   : > { %v2484_v54 = vpop.f32.mrf.mxu1 }
  0xfa   : > { %v397_v52 = vpop.f32.mrf.mxu0 }
  0xfb   : > { %v534_v56 = vpop.f32.mrf.mxu1 }
  0xfc   : > { %v535_v43 = vadd.f32 %v534_v56, %v397_v52 }
 0x10c   : > { %v2503_v53 = vpop.f32.mrf.mxu0 }
 0x10d   : > { %v2527_v57 = vpop.f32.mrf.mxu1  ;;  %v710_v16 = vadd.f32 %v2503_v53, %v524_v29 }
 0x10e   : > { %v677_v55 = vpop.f32.mrf.mxu0 }
 0x10f   : > { %v848_v59 = vpop.f32.mrf.mxu1  ;;  %v708_v37 = vadd.f32 %v677_v55, %v516_v33  ;;  %v881_v45 = vadd.f32 %v2527_v57, %v710_v16 }
 0x110   : > { %v2504_v58 = vpop.f32.mrf.mxu0 }
 0x111   : > { %v2528_v61 = vpop.f32.mrf.mxu1  ;;  %v711_v49 = vadd.f32 %v2504_v58, %v527_v36  ;;  %v879_v47 = vadd.f32 %v848_v59, %v708_v37 }
 0x112   : > { %v680_v60 = vpop.f32.mrf.mxu0 }
 0x113   : > { %v851_v63 = vpop.f32.mrf.mxu1  ;;  %v882_v55 = vadd.f32 %v2528_v61, %v711_v49 }
 0x114   : > { %v2507_v62 = vpop.f32.mrf.mxu0 }
 0x115   : > { %v2531_v1 = vpop.f32.mrf.mxu1  ;;  %v714_v35 = vadd.f32 %v2507_v62, %v540_v31 }
 0x116   : > { %v693_v0 = vpop.f32.mrf.mxu0 }
 0x117   : > { %v864_v3 = vpop.f32.mrf.mxu1  ;;  %v712_v39 = vadd.f32 %v693_v0, %v532_v34  ;;  %v885_v29 = vadd.f32 %v2531_v1, %v714_v35 }
 0x118   : > { %v2508_v2 = vpop.f32.mrf.mxu0 }
 0x119   : > { %v2532_v5 = vpop.f32.mrf.mxu1  ;;  %v883_v62 = vadd.f32 %v864_v3, %v712_v39 }
 0x11a   : > { %v696_v4 = vpop.f32.mrf.mxu0 }
 0x11b   : > { %v867_v7 = vpop.f32.mrf.mxu1  ;;  %v713_v42 = vadd.f32 %v696_v4, %v535_v43 }
 0x11d   : > { %v884_v57 = vadd.f32 %v867_v7, %v713_v42 }
 0x12c   : > { %v2551_v6 = vpop.f32.mrf.mxu0 }
 0x12d   : > { %v2575_v9 = vpop.f32.mrf.mxu1  ;;  %v1099_v31 = vadd.f32 %v2551_v6, %v881_v45 }
 0x12e   : > { %v1066_v8 = vpop.f32.mrf.mxu0 }
 0x12f   : > { %v1236_v11 = vpop.f32.mrf.mxu1 }
 0x130   : > { %v2552_v10 = vpop.f32.mrf.mxu0 }
 0x131   : > { %v2576_v13 = vpop.f32.mrf.mxu1 }
 0x132   : > { %v1069_v12 = vpop.f32.mrf.mxu0 }
 0x133   : > { %v3157_v15 = vpop.f32.mrf.mxu1 }
 0x134   : > { %v2555_v14 = vpop.f32.mrf.mxu0  ;;  %3182 = vst [vmem:[#allocation2_spill] sm:$0xff] %v3157_v15  ;;  %v543_v15 = vadd.f32 %v2484_v54, %v2460_v50 }
 0x135   : > { %v2579_v17 = vpop.f32.mrf.mxu1  ;;  %v1103_v46 = vadd.f32 %v2555_v14, %v885_v29 }
 0x136   : > { %v1082_v18 = vpop.f32.mrf.mxu0  ;;  %v715_v53 = vadd.f32 %v2508_v2, %v543_v15 }
 0x137   : > { %v1252_v19 = vpop.f32.mrf.mxu1  ;;  %v1101_v0 = vadd.f32 %v1082_v18, %v883_v62  ;;  %v1273_v58 = vadd.f32 %v2579_v17, %v1103_v46 }
 0x138   : > { %v2556_v20 = vpop.f32.mrf.mxu0  ;;  %v886_v54 = vadd.f32 %v2532_v5, %v715_v53 }
 0x139   : > { %v2580_v21 = vpop.f32.mrf.mxu1  ;;  %v1271_v3 = vadd.f32 %v1252_v19, %v1101_v0 }
 0x13a   : > { %v1085_v22 = vpop.f32.mrf.mxu0  ;;  %v1104_v52 = vadd.f32 %v2556_v20, %v886_v54 }
 0x13b   : > { %v1255_v24 = vpop.f32.mrf.mxu1  ;;  %v1102_v4 = vadd.f32 %v1085_v22, %v884_v57  ;;  %v3185_v18 = vld [vmem:[#allocation2_spill] sm:$0xff] }
 0x13d   : > { %v1272_v17 = vadd.f32 %v1255_v24, %v1102_v4 }
 0x14c   : > { %v2599_v23 = vpop.f32.mrf.mxu0 }
 0x14d   : > { %v2623_v25 = vpop.f32.mrf.mxu1 }
 0x14e   : > { %v1407_v26 = vpop.f32.mrf.mxu0 }
 0x14f   : > { %v1625_v27 = vpop.f32.mrf.mxu1 }
 0x150   : > { %v2600_v28 = vpop.f32.mrf.mxu0 }
 0x151   : > { %v3159_v30 = vpop.f32.mrf.mxu1 }
 0x152   : > { %3183 = vst [vmem:[#allocation3_spill] sm:$0xff] %v3159_v30  ;;  %v1410_v32 = vpop.f32.mrf.mxu0  ;;  %v519_v30 = vadd.f32 %v518_v48, %v381_v44  ;;  %v1269_v44 = vadd.f32 %v2575_v9, %v1099_v31  ;;  %v1100_v48 = vadd.f32 %v2552_v10, %v882_v55 }
 0x153   : > { %v3161_v38 = vpop.f32.mrf.mxu1 }
 0x154   : > { %3184 = vst [vmem:[#allocation4_spill] sm:$0xff] %v3161_v38  ;;  %v2603_v41 = vpop.f32.mrf.mxu0  ;;  %v709_v51 = vadd.f32 %v680_v60, %v519_v30  ;;  %v1097_v38 = vadd.f32 %v1066_v8, %v879_v47  ;;  %v1440_v60 = vadd.f32 %v2599_v23, %v1269_v44  ;;  %v1270_v14 = vadd.f32 %v2576_v13, %v1100_v48  ;;  %v2285_v13 = vld [vmem:[%s3178_s2] ss:$0 sm:$0xff] }
 0x155   : > { %v2627_v40 = vpop.f32.mrf.mxu1  ;;  %v1444_v6 = vadd.f32 %v2603_v41, %v1273_v58  ;;  %v1274_v8 = vadd.f32 %v2580_v21, %v1104_v52 }
 0x156   : > { %v1423_v33 = vpop.f32.mrf.mxu0  ;;  %v880_v34 = vadd.f32 %v851_v63, %v709_v51  ;;  %v1267_v1 = vadd.f32 %v1236_v11, %v1097_v38  ;;  %v1658_v9 = vadd.f32 %v2623_v25, %v1440_v60  ;;  %v1441_v10 = vadd.f32 %v2600_v28, %v1270_v14 }
 0x157   : > { %v1641_v50 = vpop.f32.mrf.mxu1  ;;  %v1442_v15 = vadd.f32 %v1423_v33, %v1271_v3  ;;  %v1662_v20 = vadd.f32 %v2627_v40, %v1444_v6 }
 0x158   : > { %v2604_v56 = vpop.f32.mrf.mxu0  ;;  %v1098_v59 = vadd.f32 %v1069_v12, %v880_v34  ;;  %v1438_v61 = vadd.f32 %v1407_v26, %v1267_v1 }
 0x159   : > { %v2628_v2 = vpop.f32.mrf.mxu1  ;;  %v1445_v30 = vadd.f32 %v2604_v56, %v1274_v8  ;;  %v1660_v22 = vadd.f32 %v1641_v50, %v1442_v15  ;;  %v3186_v36 = vld [vmem:[#allocation3_spill] sm:$0xff] }
 0x15a   : > { %v1426_v5 = vpop.f32.mrf.mxu0  ;;  %v1268_v63 = vadd.f32 %v3185_v18, %v1098_v59  ;;  %v1656_v12 = vadd.f32 %v1625_v27, %v1438_v61  ;;  %v1659_v25 = vadd.f32 %v3186_v36, %v1441_v10 }
 0x15b   : > { %v1644_v7 = vpop.f32.mrf.mxu1  ;;  %v1443_v35 = vadd.f32 %v1426_v5, %v1272_v17  ;;  %v1663_v37 = vadd.f32 %v2628_v2, %v1445_v30  ;;  %v3187_v27 = vld [vmem:[#allocation4_spill] sm:$0xff] }
 0x15c   : > { %v1439_v23 = vadd.f32 %v1410_v32, %v1268_v63 }
 0x15d   : > { %v1661_v40 = vadd.f32 %v1644_v7, %v1443_v35 }
 0x15e   : > { %v1657_v32 = vadd.f32 %v3187_v27, %v1439_v23 }
 0x16c   : > { %v2647_v11 = vpop.f32.mrf.mxu0 }
 0x16d   : > { %v1828_v16 = vadd.f32 %v2647_v11, %v1658_v9  ;;  %v2651_v19 = vpop.f32.mrf.mxu1 }
 0x16e   : > { %v1832_v21 = vadd.f32 %v2651_v19, %v1662_v20  ;;  %v1795_v26 = vpop.f32.mrf.mxu0 }
 0x16f   : > { %v1826_v28 = vadd.f32 %v1795_v26, %v1656_v12  ;;  %v1811_v24 = vpop.f32.mrf.mxu1  ;;  %v1843_v41 = vadd.f32 %v2285_v13, %v1828_v16 }
 0x170   : > { %v1830_v38 = vadd.f32 %v1811_v24, %v1660_v22  ;;  %v2648_v39 = vpop.f32.mrf.mxu0  ;;  %v1847_v43 = vadd.f32 %v2285_v13, %v1832_v21 }
 0x171   : > { %v1829_v45 = vadd.f32 %v2648_v39, %v1659_v25  ;;  %v2652_v49 = vpop.f32.mrf.mxu1  ;;  %v1841_v47 = vadd.f32 %v2285_v13, %v1826_v28  ;;  %v1851_v55 = vmax.f32 %v1843_v41, 0.0 }
 0x172   : > { %v1833_v29 = vadd.f32 %v2652_v49, %v1663_v37  ;;  %v1798_v53 = vpop.f32.mrf.mxu0  ;;  %v1845_v42 = vadd.f32 %v2285_v13, %v1830_v38  ;;  %v1855_v0 = vmax.f32 %v1847_v43, 0.0 }
 0x173   : > { %v1844_v51 = vadd.f32 %v2285_v13, %v1829_v45  ;;  %v1827_v31 = vadd.f32 %v1798_v53, %v1657_v32  ;;  %v1814_v62 = vpop.f32.mrf.mxu1  ;;  %v1849_v48 = vmax.f32 %v1841_v47, 0.0 }
 0x174   : > { %v1848_v46 = vadd.f32 %v2285_v13, %v1833_v29  ;;  %v1831_v33 = vadd.f32 %v1814_v62, %v1661_v40  ;;  %v1853_v52 = vmax.f32 %v1845_v42, 0.0 }
 0x175   : > { %v1852_v50 = vmax.f32 %v1844_v51, 0.0  ;;  %v1842_v54 = vadd.f32 %v2285_v13, %v1827_v31 }
 0x176   : > { %v1856_v34 = vmax.f32 %v1848_v46, 0.0  ;;  %v1846_v44 = vadd.f32 %v2285_v13, %v1831_v33 }
 0x177   : > { %v2314_v57 = vpack.c.bf16 %v1852_v50, %v1851_v55  ;;  %v1850_v58 = vmax.f32 %v1842_v54, 0.0 }
 0x178   : > { %v2324_v56 = vpack.c.bf16 %v1856_v34, %v1855_v0  ;;  %v1854_v1 = vmax.f32 %v1846_v44, 0.0 }
 0x179   : > { %2326 = vst [vmem:[%s170_s21 + $0x8] sm:$0xff] %v2314_v57   ;;  %v2309_v59 = vpack.c.bf16 %v1850_v58, %v1849_v48 }
 0x17a   : > { %2328 = vst [vmem:[%s170_s21 + $0x18] sm:$0xff] %v2324_v56   ;;  %v2319_v60 = vpack.c.bf16 %v1854_v1, %v1853_v52 }
 0x17b   : > { %2310 = vst [vmem:[%s170_s21] sm:$0xff] %v2309_v59  }
 0x17c   : > { %2327 = vst [vmem:[%s170_s21 + $0x10] sm:$0xff] %v2319_v60  }
 0x17d PF: > { %s13_s12 = sadd.s32 1, %s2779_s12  }
 0x17e   : > { %p10_p4 = scmp.ge.s32.totalorder %s13_s12, 6  }
 0x180   :  { %12 = sbr.rel (!%p10_p4) target bundleno = 1 (0x1), region = 72 }

</bundles_post_ra>
